<compile_context>
chip_gen: v7x
topology: tpu7x:2x2x1
jax: 0.10.0
libtpu: 0.0.40
codegen_flags: <defaults>
</compile_context>

<pallas_src>
import functools

import jax
import jax.numpy as jnp
from jax import lax
from jax.experimental import pallas as pl
from jax.experimental.pallas import tpu as pltpu

_LANES = 128
_BLOCK_ROWS = 1024          # (1024, 128) f32 block = 512 KiB; ~4.3 MiB total VMEM
_NUM_SPLITS = 2             # leading "parallel" grid axis (both TCs on v7x)


def _ddp_mt_loss_kernel(nrows_ref, x_ref, t_ref, m_ref,
                        loss_out_ref, cnt_out_ref, *, bps):
    """One streaming step: accumulate masked squared error + mask count.

    loss_out_ref / cnt_out_ref are (BLOCK_ROWS, 128) f32 blocks indexed only by
    the parallel split index `c`, so they stay VMEM-resident across the whole
    "arbitrary" axis (standard accumulator pattern).  Steady state is pure
    DMA + VPU elementwise work; no cross-lane reduce, no SMEM scalar RMW.
    """
    c = pl.program_id(0)        # parallel split index
    i = pl.program_id(1)        # streaming (reduction) index

    @pl.when(i == 0)
    def _():
        loss_out_ref[...] = jnp.zeros_like(loss_out_ref)
        cnt_out_ref[...] = jnp.zeros_like(cnt_out_ref)

    # Native-dtype loads, f32 compute (v5e has no bf16 VPU datapath).
    x = x_ref[...].astype(jnp.float32)
    t = t_ref[...].astype(jnp.float32)
    m = m_ref[...].astype(jnp.float32)

    # torch.nan_to_num(target, posinf=0.0, neginf=0.0): nan/+inf/-inf -> 0
    t = jnp.where(jnp.isfinite(t), t, 0.0)
    err = x - t
    loss = err * err * m        # MSE(reduction='none') * mult_mask

    # Global (unclamped) row offset of this step.  Blocks that are entirely
    # inside the valid row range take the cheap path; the ragged last block
    # and any overflow steps (whose block index was clamped in the index_map,
    # so their loaded data is a duplicate / unspecified) are masked explicitly.
    row0 = (c * bps + i) * _BLOCK_ROWS
    nrows = nrows_ref[0]
    full = (row0 + _BLOCK_ROWS) <= nrows

    @pl.when(full)
    def _():
        loss_out_ref[...] += loss
        cnt_out_ref[...] += m

    @pl.when(jnp.logical_not(full))
    def _():
        rid = lax.broadcasted_iota(jnp.int32, (_BLOCK_ROWS, _LANES), 0) + row0
        valid = rid < nrows
        loss_out_ref[...] += jnp.where(valid, loss, 0.0)
        cnt_out_ref[...] += jnp.where(valid, m, 0.0)


def ddp_mt_loss(inp, target, mult_mask, natoms, *, reduction="mean",
                coefficient=1.0, world_size=1):
    """Forward pass of DDPMTLoss(MSELoss(reduction='none')), single replica."""
    assert inp.shape[0] == target.shape[0] == mult_mask.shape[0], (
        f"Mismatched shapes: {inp.shape}, {target.shape}, {mult_mask.shape}")
    target = target.reshape(inp.shape)

    # mult_mask is boolean (torch uses it for boolean indexing).  If it is
    # per-atom ([N] vs input [N, D]) broadcast it over the trailing dims so
    # num_samples matches torch's loss[mult_mask].numel() semantics.
    if mult_mask.size == inp.size:
        mult_mask = mult_mask.reshape(inp.shape)
    else:
        mult_mask = jnp.broadcast_to(
            mult_mask.reshape(mult_mask.shape + (1,) * (inp.ndim - mult_mask.ndim)),
            inp.shape)

    x = inp.reshape(-1)                               # native dtype, no astype pass
    t = target.reshape(-1)
    m = mult_mask.astype(jnp.int8).reshape(-1)        # 1 B/elt mask stream

    n = x.shape[0]
    if n == 0:
        return jnp.asarray(coefficient * 0.0, dtype=jnp.float32)

    # Reshape flat streams to (rows, 128).  Only pad when 128 does not divide
    # the flat length (minimal pad; the ragged row-block tail is handled
    # in-kernel, so no padding up to a full tile is ever needed).
    rem = n % _LANES
    if rem:
        pad = _LANES - rem
        x = jnp.pad(x, (0, pad))
        t = jnp.pad(t, (0, pad))
        m = jnp.pad(m, (0, pad))
    rows = x.shape[0] // _LANES
    x = x.reshape(rows, _LANES)
    t = t.reshape(rows, _LANES)
    m = m.reshape(rows, _LANES)

    nblocks = pl.cdiv(rows, _BLOCK_ROWS)
    bps = pl.cdiv(nblocks, _NUM_SPLITS)               # row-blocks per parallel split
    nrows = jnp.array([rows], dtype=jnp.int32)        # scalar-prefetch (SMEM)

    def in_map(c, i, nrows_ref):
        # Clamp so overflow steps never index past the array; their
        # contribution is zeroed in-kernel via the global-row validity mask.
        return (jnp.minimum(c * bps + i, nblocks - 1), 0)

    def out_map(c, i, nrows_ref):
        return (c, 0)

    in_spec = pl.BlockSpec((_BLOCK_ROWS, _LANES), in_map)
    out_spec = pl.BlockSpec((_BLOCK_ROWS, _LANES), out_map)

    loss_part, cnt_part = pl.pallas_call(
        functools.partial(_ddp_mt_loss_kernel, bps=bps),
        out_shape=(
            jax.ShapeDtypeStruct((_NUM_SPLITS * _BLOCK_ROWS, _LANES), jnp.float32),
            jax.ShapeDtypeStruct((_NUM_SPLITS * _BLOCK_ROWS, _LANES), jnp.float32),
        ),
        grid_spec=pltpu.PrefetchScalarGridSpec(
            num_scalar_prefetch=1,
            grid=(_NUM_SPLITS, bps),
            in_specs=[in_spec, in_spec, in_spec],
            out_specs=(out_spec, out_spec),
        ),
        compiler_params=pltpu.CompilerParams(
            dimension_semantics=("parallel", "arbitrary")),
    )(nrows, x, t, m)

    # Tiny final reduce over the per-split partials (a few KiB-MiB), fused by XLA.
    loss_sum = jnp.sum(loss_part)
    num_samples = jnp.sum(cnt_part)

    if reduction == "sum":
        loss = loss_sum
    elif reduction == "mean":
        # Single replica: all_reduce(num_samples) == num_samples, world_size == 1.
        global_samples = jnp.maximum(num_samples, 1.0)
        loss = loss_sum * world_size / global_samples
    else:
        # TODO(synk): 'per_structure' reduction needs a scatter_reduce by
        # structure index (repeat_interleave + bincount) — not implemented here.
        raise NotImplementedError(reduction)

    # torch: if not all(isfinite(loss)): loss = torch.nan_to_num(loss, nan=0.0)
    # (identity when finite; like torch, +/-inf map to the largest finite float)
    loss = jnp.nan_to_num(loss, nan=0.0)
    return coefficient * loss


if __name__ == "__main__":
    key = jax.random.PRNGKey(0)
    k1, k2, k3, k4, k5, k6 = jax.random.split(key, 6)

    # Case 1: forces [N, 3], full-size boolean mask, mean reduction.
    # 3*N = 1032 is not a multiple of 128 -> exercises pad + ragged-tail masking.
    N, D = 344, 3
    natoms = jnp.array([200, 144], dtype=jnp.int32)   # unused for 'mean'
    coefficient = 2.0
    inp = jax.random.normal(k1, (N, D), dtype=jnp.float32)
    target = jax.random.normal(k2, (N, D), dtype=jnp.float32)
    # sprinkle non-finite targets to exercise nan_to_num handling
    target = target.at[0, 0].set(jnp.nan).at[5, 1].set(jnp.inf).at[7, 2].set(-jnp.inf)
    mult_mask = jax.random.bernoulli(k3, 0.8, (N, D))

    out = ddp_mt_loss(inp, target, mult_mask, natoms,
                      reduction="mean", coefficient=coefficient)
    out = jax.block_until_ready(out)

    t_clean = jnp.where(jnp.isfinite(target), target, 0.0)
    m_f = mult_mask.astype(jnp.float32)
    loss_el = (inp - t_clean) ** 2 * m_f
    ref = coefficient * jnp.sum(loss_el) / jnp.maximum(jnp.sum(m_f), 1.0)
    assert jnp.allclose(out, ref, rtol=1e-5, atol=1e-5), (float(out), float(ref))

    # Case 2: per-atom mask [N], sum reduction, 3*N multiple of 128 (no pad path).
    N2 = 256
    inp2 = jax.random.normal(k4, (N2, D), dtype=jnp.float32)
    target2 = jax.random.normal(k5, (N2, D), dtype=jnp.float32)
    mask2 = jax.random.bernoulli(k6, 0.5, (N2,))
    natoms2 = jnp.array([N2], dtype=jnp.int32)

    out2 = ddp_mt_loss(inp2, target2, mask2, natoms2,
                       reduction="sum", coefficient=1.0)
    out2 = jax.block_until_ready(out2)

    ref2 = jnp.sum((inp2 - target2) ** 2 * mask2.astype(jnp.float32)[:, None])
    assert jnp.allclose(out2, ref2, rtol=1e-5, atol=1e-5), (float(out2), float(ref2))

    print("KERNEL_OK")
</pallas_src>

<mosaic_0001>
module attributes {stable_mosaic.version = 11 : i64} {
  func.func @_ddp_mt_loss_kernel(%arg0: i32, %arg1: i32, %arg2: memref<1xi32, #tpu.memory_space<smem>>, %arg3: memref<1024x128xf32, #tpu.memory_space<vmem>>, %arg4: memref<1024x128xf32, #tpu.memory_space<vmem>>, %arg5: memref<1024x128xi8, #tpu.memory_space<vmem>>, %arg6: memref<1024x128xf32, #tpu.memory_space<vmem>>, %arg7: memref<1024x128xf32, #tpu.memory_space<vmem>>) attributes {dimension_semantics = [#tpu.dimension_semantics<parallel>, #tpu.dimension_semantics<arbitrary>], iteration_bounds = array<i64: 2, 1>, scalar_prefetch = 1 : i64, scratch_operands = 0 : i64, tpu.core_type = #tpu.core_type<tc>, window_params = [{transform_indices = @transform_0, window_bounds = array<i64: 1024, 128>}, {transform_indices = @transform_1, window_bounds = array<i64: 1024, 128>}, {transform_indices = @transform_2, window_bounds = array<i64: 1024, 128>}, {transform_indices = @transform_3, window_bounds = array<i64: 1024, 128>}, {transform_indices = @transform_4, window_bounds = array<i64: 1024, 128>}]} {
    %c0_i32 = arith.constant 0 : i32
    %0 = arith.cmpi eq, %arg1, %c0_i32 : i32
    %1 = arith.extui %0 : i1 to i32
    %c0_i32_0 = arith.constant 0 : i32
    %2 = arith.cmpi ne, %1, %c0_i32_0 : i32
    scf.if %2 {
      %cst_11 = arith.constant 0.000000e+00 : f32
      %25 = vector.broadcast %cst_11 : f32 to vector<1024x128xf32>
      %c0_12 = arith.constant 0 : index
      %c0_13 = arith.constant 0 : index
      %26 = vector.load %arg6[%c0_12, %c0_13] : memref<1024x128xf32, #tpu.memory_space<vmem>>, vector<1024x128xf32>
      tpu.vector_store %arg6[%c0_12, %c0_13], %25 {strides = array<i32>} : memref<1024x128xf32, #tpu.memory_space<vmem>>, vector<1024x128xf32>,
      %cst_14 = arith.constant 0.000000e+00 : f32
      %27 = vector.broadcast %cst_14 : f32 to vector<1024x128xf32>
      %c0_15 = arith.constant 0 : index
      %c0_16 = arith.constant 0 : index
      %28 = vector.load %arg7[%c0_15, %c0_16] : memref<1024x128xf32, #tpu.memory_space<vmem>>, vector<1024x128xf32>
      tpu.vector_store %arg7[%c0_15, %c0_16], %27 {strides = array<i32>} : memref<1024x128xf32, #tpu.memory_space<vmem>>, vector<1024x128xf32>,
    } else {
    }
    %c0 = arith.constant 0 : index
    %c0_1 = arith.constant 0 : index
    %3 = vector.load %arg3[%c0, %c0_1] : memref<1024x128xf32, #tpu.memory_space<vmem>>, vector<1024x128xf32>
    %c0_2 = arith.constant 0 : index
    %c0_3 = arith.constant 0 : index
    %4 = vector.load %arg4[%c0_2, %c0_3] : memref<1024x128xf32, #tpu.memory_space<vmem>>, vector<1024x128xf32>
    %c0_4 = arith.constant 0 : index
    %c0_5 = arith.constant 0 : index
    %5 = vector.load %arg5[%c0_4, %c0_5] : memref<1024x128xi8, #tpu.memory_space<vmem>>, vector<1024x128xi8>
    %6 = arith.sitofp %5 : vector<1024x128xi8> to vector<1024x128xf32>
    %7 = tpu.weird %4 : vector<1024x128xf32> -> vector<1024x128xi1>
    %cst = arith.constant dense<true> : vector<1024x128xi1>
    %8 = arith.xori %7, %cst : vector<1024x128xi1>
    %cst_6 = arith.constant 0.000000e+00 : f32
    %9 = vector.broadcast %cst_6 : f32 to vector<1024x128xf32>
    %10 = arith.select %8, %4, %9 : vector<1024x128xi1>, vector<1024x128xf32>
    %11 = arith.subf %3, %10 : vector<1024x128xf32>
    %12 = arith.mulf %11, %11 : vector<1024x128xf32>
    %13 = arith.mulf %12, %6 : vector<1024x128xf32>
    %c1_i32 = arith.constant 1 : i32
    %14 = arith.muli %arg0, %c1_i32 : i32
    %15 = arith.addi %14, %arg1 : i32
    %c1024_i32 = arith.constant 1024 : i32
    %16 = arith.muli %15, %c1024_i32 : i32
    %c0_7 = arith.constant 0 : index
    %17 = memref.load %arg2[%c0_7] : memref<1xi32, #tpu.memory_space<smem>>
    %c1024_i32_8 = arith.constant 1024 : i32
    %18 = arith.addi %16, %c1024_i32_8 : i32
    %19 = arith.cmpi sle, %18, %17 : i32
    %20 = arith.extui %19 : i1 to i32
    %c0_i32_9 = arith.constant 0 : i32
    %21 = arith.cmpi ne, %20, %c0_i32_9 : i32
    scf.if %21 {
      %c0_11 = arith.constant 0 : index
      %c0_12 = arith.constant 0 : index
      %25 = vector.load %arg6[%c0_11, %c0_12] : memref<1024x128xf32, #tpu.memory_space<vmem>>, vector<1024x128xf32>
      %26 = arith.addf %25, %13 : vector<1024x128xf32>
      %c0_13 = arith.constant 0 : index
      %c0_14 = arith.constant 0 : index
      %27 = vector.load %arg6[%c0_13, %c0_14] : memref<1024x128xf32, #tpu.memory_space<vmem>>, vector<1024x128xf32>
      tpu.vector_store %arg6[%c0_13, %c0_14], %26 {strides = array<i32>} : memref<1024x128xf32, #tpu.memory_space<vmem>>, vector<1024x128xf32>,
      %c0_15 = arith.constant 0 : index
      %c0_16 = arith.constant 0 : index
      %28 = vector.load %arg7[%c0_15, %c0_16] : memref<1024x128xf32, #tpu.memory_space<vmem>>, vector<1024x128xf32>
      %29 = arith.addf %28, %6 : vector<1024x128xf32>
      %c0_17 = arith.constant 0 : index
      %c0_18 = arith.constant 0 : index
      %30 = vector.load %arg7[%c0_17, %c0_18] : memref<1024x128xf32, #tpu.memory_space<vmem>>, vector<1024x128xf32>
      tpu.vector_store %arg7[%c0_17, %c0_18], %29 {strides = array<i32>} : memref<1024x128xf32, #tpu.memory_space<vmem>>, vector<1024x128xf32>,
    } else {
    }
    %true = arith.constant true
    %22 = arith.xori %19, %true : i1
    %23 = arith.extui %22 : i1 to i32
    %c0_i32_10 = arith.constant 0 : i32
    %24 = arith.cmpi ne, %23, %c0_i32_10 : i32
    scf.if %24 {
      %25 = tpu.iota {dimensions = array<i32: 0>} : vector<1024x128xi32>
      %26 = vector.broadcast %16 : i32 to vector<1024x128xi32>
      %27 = arith.addi %25, %26 : vector<1024x128xi32>
      %28 = vector.broadcast %17 : i32 to vector<1024x128xi32>
      %29 = arith.cmpi slt, %27, %28 : vector<1024x128xi32>
      %c0_11 = arith.constant 0 : index
      %c0_12 = arith.constant 0 : index
      %30 = vector.load %arg6[%c0_11, %c0_12] : memref<1024x128xf32, #tpu.memory_space<vmem>>, vector<1024x128xf32>
      %cst_13 = arith.constant 0.000000e+00 : f32
      %31 = vector.broadcast %cst_13 : f32 to vector<1024x128xf32>
      %32 = arith.select %29, %13, %31 : vector<1024x128xi1>, vector<1024x128xf32>
      %33 = arith.addf %30, %32 : vector<1024x128xf32>
      %c0_14 = arith.constant 0 : index
      %c0_15 = arith.constant 0 : index
      %34 = vector.load %arg6[%c0_14, %c0_15] : memref<1024x128xf32, #tpu.memory_space<vmem>>, vector<1024x128xf32>
      tpu.vector_store %arg6[%c0_14, %c0_15], %33 {strides = array<i32>} : memref<1024x128xf32, #tpu.memory_space<vmem>>, vector<1024x128xf32>,
      %c0_16 = arith.constant 0 : index
      %c0_17 = arith.constant 0 : index
      %35 = vector.load %arg7[%c0_16, %c0_17] : memref<1024x128xf32, #tpu.memory_space<vmem>>, vector<1024x128xf32>
      %cst_18 = arith.constant 0.000000e+00 : f32
      %36 = vector.broadcast %cst_18 : f32 to vector<1024x128xf32>
      %37 = arith.select %29, %6, %36 : vector<1024x128xi1>, vector<1024x128xf32>
      %38 = arith.addf %35, %37 : vector<1024x128xf32>
      %c0_19 = arith.constant 0 : index
      %c0_20 = arith.constant 0 : index
      %39 = vector.load %arg7[%c0_19, %c0_20] : memref<1024x128xf32, #tpu.memory_space<vmem>>, vector<1024x128xf32>
      tpu.vector_store %arg7[%c0_19, %c0_20], %38 {strides = array<i32>} : memref<1024x128xf32, #tpu.memory_space<vmem>>, vector<1024x128xf32>,
    } else {
    }
    return
  }
  func.func @transform_0(%arg0: i32, %arg1: i32, %arg2: memref<1xi32, #tpu.memory_space<smem>>) -> (i32, i32) {
    %c1_i32 = arith.constant 1 : i32
    %0 = arith.muli %arg0, %c1_i32 : i32
    %1 = arith.addi %0, %arg1 : i32
    %c0_i32 = arith.constant 0 : i32
    %2 = arith.minsi %1, %c0_i32 : i32
    %c0_i32_0 = arith.constant 0 : i32
    %c0_i32_1 = arith.constant 0 : i32
    return %2, %c0_i32_0 : i32, i32
  }
  func.func @transform_1(%arg0: i32, %arg1: i32, %arg2: memref<1xi32, #tpu.memory_space<smem>>) -> (i32, i32) {
    %c1_i32 = arith.constant 1 : i32
    %0 = arith.muli %arg0, %c1_i32 : i32
    %1 = arith.addi %0, %arg1 : i32
    %c0_i32 = arith.constant 0 : i32
    %2 = arith.minsi %1, %c0_i32 : i32
    %c0_i32_0 = arith.constant 0 : i32
    %c0_i32_1 = arith.constant 0 : i32
    return %2, %c0_i32_0 : i32, i32
  }
  func.func @transform_2(%arg0: i32, %arg1: i32, %arg2: memref<1xi32, #tpu.memory_space<smem>>) -> (i32, i32) {
    %c1_i32 = arith.constant 1 : i32
    %0 = arith.muli %arg0, %c1_i32 : i32
    %1 = arith.addi %0, %arg1 : i32
    %c0_i32 = arith.constant 0 : i32
    %2 = arith.minsi %1, %c0_i32 : i32
    %c0_i32_0 = arith.constant 0 : i32
    %c0_i32_1 = arith.constant 0 : i32
    return %2, %c0_i32_0 : i32, i32
  }
  func.func @transform_3(%arg0: i32, %arg1: i32, %arg2: memref<1xi32, #tpu.memory_space<smem>>) -> (i32, i32) {
    %c0_i32 = arith.constant 0 : i32
    %c0_i32_0 = arith.constant 0 : i32
    return %arg0, %c0_i32 : i32, i32
  }
  func.func @transform_4(%arg0: i32, %arg1: i32, %arg2: memref<1xi32, #tpu.memory_space<smem>>) -> (i32, i32) {
    %c0_i32 = arith.constant 0 : i32
    %c0_i32_0 = arith.constant 0 : i32
    return %arg0, %c0_i32 : i32, i32
  }
}

</mosaic_0001>

<bundles_post_ra>
// kernel: tpu_custom_call.1
= control target key start
LH: loop header
LB: loop body
LE: loop exit
PB: predicated region body
PF: predicated region fallthrough
CT: control target
= control target key end

     0   :  { %s13205_s0 = inlined_call_operand.<no memory space> [shape: s32[1], index: 0, kind: input, shape index: {}]   ;;  %s13206_s1 = inlined_call_operand.hbm [shape: f32[9,128], index: 1, kind: input, shape index: {}]   ;;  %s13207_s2 = inlined_call_operand.hbm [shape: f32[9,128], index: 2, kind: input, shape index: {}]   ;;  %s13208_s3 = inlined_call_operand.vmem [shape: s8[9,128], index: 3, kind: input, shape index: {}]   ;;  %s13209_s4 = inlined_call_operand.hbm [shape: f32[2048,128], index: 4, kind: output, shape index: {0}]   ;;  %s13210_s5 = inlined_call_operand.hbm [shape: f32[2048,128], index: 5, kind: output, shape index: {1}]  }
   0x1   :  { %11 = sst [smem:[#allocation3]] %s13205_s0 }
   0x2   :  { %12 = vsyncpa [#allocation5], 0 }
   0x3   :  { %14 = vsyncpa [#allocation5 + $0x1], 0 }
   0x4   :  { %15 = vsyncpa [#allocation8], 0 }
   0x5   :  { %17 = vsyncpa [#allocation8 + $0x1], 0 }
   0x6   :  { %18 = vsyncpa [#allocation6], 0 }
   0x7   :  { %20 = vsyncpa [#allocation6 + $0x1], 0 }
   0x8   :  { %21 = vsyncpa [#allocation11], 0 }
   0x9   :  { %23 = vsyncpa [#allocation11 + $0x1], 0  ;;  %s5115_s20 = smov 0   ;;  %s5117_s21 = smov 0  }
   0xa   :  { %s5119_s22 = smov 0   ;;  %s5121_s23 = smov 0  }
   0xb   :  { %s5123_s24 = smov 0   ;;  %s5125_s25 = smov 0  }
   0xc   :  { %s5127_s0 = smov 0   ;;  %s5129_s26 = smov 0  }
   0xd LB: > { %s4416_s27 = sadd.s32 4294967295, %s5068_s26   ;;  %s4417_s28 = sadd.s32 4294967294, %s5068_s26   ;;  %s5068_s26 = sphi %s5129_s26, %s29_s26   ;;  %s5064_s0 = sphi %s5127_s0, %s16222_s0   ;;  %s5060_s25 = sphi %s5125_s25, %s16221_s25   ;;  %s5056_s24 = sphi %s5123_s24, %s13195_s24   ;;  %s5052_s23 = sphi %s5121_s23, %s16220_s23   ;;  %s5048_s22 = sphi %s5119_s22, %s16219_s22   ;;  %s5044_s21 = sphi %s5117_s21, %s16218_s21   ;;  %s5040_s20 = sphi %s5115_s20, %s16217_s20  }
   0xe   : > { %s41_s29 = sadd.s32 1, %s5064_s0  ;;  %p5037_p1 = scmp.ne.s32.totalorder %s5056_s24, 0 }
   0xf   : > { %p43_p0 = scmp.ge.s32.totalorder %s41_s29, 2  ;;  %p62_p2 = scmp.eq.s32.totalorder %s5068_s26, 0 }
  0x10   : > { %p67_p3 = scmp.ne.s32.totalorder %s5056_s24, %s5052_s23  ;;  %p68_p5 = scmp.eq.s32.totalorder %s4416_s27, 0 }
  0x11   : > { %s16224_s29 = smov (%p43_p0, %s41_s29), 0  ;;  %p5161_p4 = por %p5037_p1, %p62_p2 }
  0x12   : > { %p5165_p6 = por %p68_p5, %p67_p3  ;;  %s141_s7 = ssub.s32 %s5064_s0, %s16224_s29 }
  0x13   : > { %p142_p7 = scmp.eq.s32.totalorder %s141_s7, 0  ;;  %s144_s8 = sadd.s32 1, %s5048_s22 }
  0x14   : > { %p154_p8 = scmp.ne.s32.totalorder %s5048_s22, %s5044_s21  ;;  %p155_p9 = scmp.eq.s32.totalorder %s4416_s27, 1 }
  0x15   : > { %s5173_s9 = scalar_select %p142_p7, %s5048_s22, %s144_s8  }
  0x16   : > { %p160_p10 = scmp.ne.s32.totalorder %s5044_s21, %s5040_s20  ;;  %p161_p11 = scmp.eq.s32.totalorder %s4417_s28, 1 }
  0x17   : > { %p5179_p12 = por %p155_p9, %p154_p8  ;;  %p13211_p0 = scmp.ge.s32.totalorder %s5068_s26, 2 }
  0x18   : > { %p5183_p13 = por %p161_p11, %p160_p10 }
  0x19   : > { %203 = sbr.rel (%p13211_p0) target bundleno = 86 (0x56), region = 16 }
  0x20   : > { %206 = sbr.rel (!%p5161_p4) target bundleno = 59 (0x3b), region = 20 }
  0x27   : > { %220 = vsyncadd [#allocation5], 16128  ;;  %s5070_s12 = smov [#allocation4]   ;;  %s4869_s16 = scalar_lea.hbm %s13206_s1, 256 }
  0x28   : > { %s225_s13 = sshll.u32 %s5070_s12, 4  ;;  %p4870_p1 = scmp.ne.s32.totalorder %s13206_s1, %s4869_s16  ;;  %s226_s13 = int_to_ptr.vmem [resolvable:$true] %s225_s13 }
  0x29   : > { %p4875_p2 = scmp.lt.u32.totalorder %s4869_s16, %s4869_s16  ;;  %p4877_p3 = scmp.lt.u32.totalorder %s4869_s16, %s13206_s1 }
  0x2b   : > { %p4878_p5 = por %p4877_p3, %p4875_p2 }
  0x2d   : > { %p4879_p7 = pnand %p4878_p5, %p4870_p1 }
  0x2f   : > { %4882 = shalt.err (!%p4879_p7)
}
  0x30   : > { %s4883_s27 = scalar_lea.vmem %s226_s13, 256  ;;  %s4889_s28 = scalar_lea.vmem %s226_s13, 32768 }
  0x31   : > { %p4884_p8 = scmp.ne.s32.totalorder %s226_s13, %s4883_s27  ;;  %p4890_p9 = scmp.lt.s32.totalorder %s226_s13, %s226_s13 }
  0x32   : > { %p4891_p10 = scmp.lt.s32.totalorder %s4889_s28, %s4883_s27 }
  0x34   : > { %p4892_p11 = por %p4891_p10, %p4890_p9 }
  0x36   : > { %p4893_p0 = pnand %p4892_p11, %p4884_p8 }
  0x38   : > { %4896 = shalt.err (!%p4893_p0)
}
  0x39   : > { %s5071_s7 = smov 128   ;;  %s5072_s8 = smov 8  }
  0x3a   : > { %231 = dma.hbm_to_vmem [thread:$0]  %s13206_s1, 256, %s226_s13, [#allocation5], %s5071_s7, %s5071_s7, %s5072_s8  }
  0x3b PF: > { %234 = sbr.rel (!%p5161_p4) target bundleno = 86 (0x56), region = 24 }
  0x42   : > { %248 = vsyncadd [#allocation8], 16128  ;;  %s5073_s15 = smov [#allocation7]   ;;  %s4897_s19 = scalar_lea.hbm %s13207_s2, 256 }
  0x43   : > { %s253_s16 = sshll.u32 %s5073_s15, 4  ;;  %p4898_p0 = scmp.ne.s32.totalorder %s13207_s2, %s4897_s19  ;;  %s254_s16 = int_to_ptr.vmem [resolvable:$true] %s253_s16 }
  0x44   : > { %p4903_p1 = scmp.lt.u32.totalorder %s4897_s19, %s4897_s19  ;;  %p4905_p2 = scmp.lt.u32.totalorder %s4897_s19, %s13207_s2 }
  0x46   : > { %p4906_p3 = por %p4905_p2, %p4903_p1 }
  0x48   : > { %p4907_p5 = pnand %p4906_p3, %p4898_p0 }
  0x4a   : > { %4910 = shalt.err (!%p4907_p5)
}
  0x4b   : > { %s4911_s30 = scalar_lea.vmem %s254_s16, 256  ;;  %s4917_s13 = scalar_lea.vmem %s254_s16, 32768 }
  0x4c   : > { %p4912_p4 = scmp.ne.s32.totalorder %s254_s16, %s4911_s30  ;;  %p4918_p7 = scmp.lt.s32.totalorder %s254_s16, %s254_s16 }
  0x4d   : > { %p4919_p8 = scmp.lt.s32.totalorder %s4917_s13, %s4911_s30 }
  0x4f   : > { %p4920_p9 = por %p4919_p8, %p4918_p7 }
  0x51   : > { %p4921_p10 = pnand %p4920_p9, %p4912_p4 }
  0x53   : > { %4924 = shalt.err (!%p4921_p10)
}
  0x54   : > { %s5074_s7 = smov 128   ;;  %s5075_s8 = smov 8  }
  0x55   : > { %259 = dma.hbm_to_vmem [thread:$0]  %s13207_s2, 256, %s254_s16, [#allocation8], %s5074_s7, %s5074_s7, %s5075_s8  }
  0x56 PF: > { %p4434_p11 = scmp.ge.s32.totalorder %s5068_s26, 1  ;;  %p280_p0 = scmp.lt.s32.totalorder %s5068_s26, 3 }
  0x58   : > { %p281_p1 = pnand %p4434_p11, %p280_p0 }
  0x5a   : > { %284 = sbr.rel (%p281_p1) target bundleno = 1219 (0x4c3), region = 32 }
  0x61   : > { %s286_s17 = sand.u32 1, %s5056_s24  }
  0x62   : > { %s4435_s18 = sshll.u32 %s286_s17, 10  ;;  %s287_s19 = scalar_lea.sflag [#allocation5], %s286_s17 }
  0x63   : > { %s5221_s23 = scalar_lea.vmem [#allocation4], %s4435_s18 }
  0x64   : > { %5018 = dma.done.wait (%p5165_p6), %s287_s19, 16384  }
  0x65   : > { %5020 = vsyncadd (%p5165_p6), %s287_s19, 4294950912  ;;  %s296_s16 = scalar_lea.sflag [#allocation8], %s286_s17  ;;  %s5227_s27 = scalar_lea.vmem [#allocation7], %s4435_s18 }
  0x66   : > { %5022 = dma.done.wait (%p5165_p6), %s296_s16, 16384  }
  0x67   : > { %5024 = vsyncadd (%p5165_p6), %s296_s16, 4294950912  ;;  %p357_p2 = scmp.lt.s32.totalorder %s5060_s25, 0  ;;  %v5569_v57 = vld [vmem:[%s5227_s27 + $0x20] sm:$0xff]  ;;  %vm13453_vm11 = vmmov 1   ;;  %s6587_s6 = sld [smem:[#allocation3]] }
  0x68   : > { %13795 = vst [vmem:[#allocation48_spill] sm:$0xff] %v5569_v57  ;;  %vm1278_vm4 = vweird.f32 %v5569_v57  ;;  %s4441_s14 = sshll.u32 %s5060_s25, 10  ;;  %v14400_v57 = vmov 0  ;;  %s9378_s17 = sand.u32 1, %s5044_s21  }
  0x69   : > { %s358_s28 = scalar_select %p357_p2, %s5060_s25, 0  ;;  %vm6087_vm12 = vmxor %vm1278_vm4, %vm13453_vm11 }
  0x6a   : > { %s6636_s15 = sadd.s32 1024, %s4441_s14  ;;  %s4437_s18 = sshll.u32 %s9378_s17, 10 }
  0x6b   : > { %s4439_s12 = sshll.u32 %s358_s28, 7  ;;  %s9499_s19 = scalar_lea.vmem [#allocation9], %s4437_s18 }
  0x6c   : > { %p362_p3 = scmp.lt.s32.totalorder %s4439_s12, 1 }
  0x6d   : > { %p4442_p6 = scmp.gt.s32.totalorder %s6636_s15, %s6587_s6 }
  0x6e   : > { %s16226_s12 = smov (!%p362_p3, %s4439_s12), 1 }
  0x6f   : > { %s4440_s30 = sshll.u32 %s16226_s12, 1 }
  0x70   : > { %s5238_s8 = scalar_lea.vmem %s13208_s3, %s4440_s30 }
  0x71   : > { %v5241_v0 = vld [vmem:[%s5238_s8] sm:$0xff]   ;;  %v5244_v1 = vld [vmem:[%s5238_s8 + $0x8] sm:$0xff]   ;;  %v5250_v5 = vld [vmem:[%s5238_s8 + $0x10] sm:$0xff]  }
  0x72   : > { %v4458_v2 = vunpack.c.0.s8 %v5241_v0  ;;  %v4459_v3 = vunpack.c.1.s8 %v5241_v0  ;;  %v4462_v4 = vunpack.c.2.s8 %v5241_v0  ;;  %v5253_v6 = vld [vmem:[%s5238_s8 + $0x18] sm:$0xff]   ;;  %v4463_v7 = vunpack.c.3.s8 %v5241_v0  ;;  %v5260_v11 = vld [vmem:[%s5238_s8 + $0x20] sm:$0xff]   ;;  %v5267_v16 = vld [vmem:[%s5238_s8 + $0x28] sm:$0xff]  }
  0x73   : > { %v4466_v8 = vunpack.c.0.s8 %v5244_v1  ;;  %v4467_v9 = vunpack.c.1.s8 %v5244_v1  ;;  %v4470_v10 = vunpack.c.2.s8 %v5244_v1  ;;  %v4471_v12 = vunpack.c.3.s8 %v5244_v1  ;;  %v5274_v21 = vld [vmem:[%s5238_s8 + $0x30] sm:$0xff]   ;;  %v5281_v26 = vld [vmem:[%s5238_s8 + $0x38] sm:$0xff]   ;;  %v5288_v31 = vld [vmem:[%s5238_s8 + $0x40] sm:$0xff]  }
  0x74   : > { %v4474_v13 = vunpack.c.0.s8 %v5250_v5  ;;  %v4475_v14 = vunpack.c.1.s8 %v5250_v5  ;;  %v4478_v15 = vunpack.c.2.s8 %v5250_v5  ;;  %v4479_v17 = vunpack.c.3.s8 %v5250_v5  ;;  %v5295_v36 = vld [vmem:[%s5238_s8 + $0x48] sm:$0xff]   ;;  %v5302_v41 = vld [vmem:[%s5238_s8 + $0x50] sm:$0xff]   ;;  %v5309_v46 = vld [vmem:[%s5238_s8 + $0x58] sm:$0xff]  }
  0x75   : > { %v4482_v18 = vunpack.c.0.s8 %v5253_v6  ;;  %v4483_v19 = vunpack.c.1.s8 %v5253_v6  ;;  %v4486_v20 = vunpack.c.2.s8 %v5253_v6  ;;  %v4487_v22 = vunpack.c.3.s8 %v5253_v6  ;;  %v5316_v51 = vld [vmem:[%s5238_s8 + $0x60] sm:$0xff]   ;;  %v5323_v56 = vld [vmem:[%s5238_s8 + $0x68] sm:$0xff]   ;;  %v5330_v61 = vld [vmem:[%s5238_s8 + $0x70] sm:$0xff]  }
  0x76   : > { %v4490_v23 = vunpack.c.0.s8 %v5260_v11  ;;  %v4491_v24 = vunpack.c.1.s8 %v5260_v11  ;;  %v4494_v25 = vunpack.c.2.s8 %v5260_v11  ;;  %v4495_v27 = vunpack.c.3.s8 %v5260_v11  ;;  %v5337_v53 = vld [vmem:[%s5238_s8 + $0x78] sm:$0xff]   ;;  %v5344_v52 = vld [vmem:[%s5238_s8 + $0x80] sm:$0xff]   ;;  %v5351_v50 = vld [vmem:[%s5238_s8 + $0x88] sm:$0xff]  }
  0x77   : > { %v4498_v28 = vunpack.c.0.s8 %v5267_v16  ;;  %v4499_v29 = vunpack.c.1.s8 %v5267_v16  ;;  %v5358_v49 = vld [vmem:[%s5238_s8 + $0x90] sm:$0xff]   ;;  %v5365_v48 = vld [vmem:[%s5238_s8 + $0x98] sm:$0xff]   ;;  %v5372_v47 = vld [vmem:[%s5238_s8 + $0xa0] sm:$0xff]   ;;  %v5466_v59 = vcvt.s32.f32 %v4458_v2  ;;  %v5470_v54 = vcvt.s32.f32 %v4459_v3 }
  0x78   : > { %v5379_v45 = vld [vmem:[%s5238_s8 + $0xa8] sm:$0xff]   ;;  %v5386_v44 = vld [vmem:[%s5238_s8 + $0xb0] sm:$0xff]   ;;  %v5393_v43 = vld [vmem:[%s5238_s8 + $0xb8] sm:$0xff]   ;;  %v5474_v63 = vcvt.s32.f32 %v4462_v4  ;;  %v5478_v30 = vcvt.s32.f32 %v4463_v7  ;;  %v5482_v58 = vcvt.s32.f32 %v4466_v8  ;;  %v5486_v2 = vcvt.s32.f32 %v4467_v9 }
  0x79   : > { %v5400_v42 = vld [vmem:[%s5238_s8 + $0xc0] sm:$0xff]   ;;  %v5407_v40 = vld [vmem:[%s5238_s8 + $0xc8] sm:$0xff]   ;;  %v5414_v39 = vld [vmem:[%s5238_s8 + $0xd0] sm:$0xff]   ;;  %13767 = vst [vmem:[#allocation21_spill] sm:$0xff] %v5466_v59  ;;  %v5490_v3 = vcvt.s32.f32 %v4470_v10  ;;  %v5494_v0 = vcvt.s32.f32 %v4471_v12  ;;  %v5498_v4 = vcvt.s32.f32 %v4474_v13  ;;  %v5502_v7 = vcvt.s32.f32 %v4475_v14 }
  0x7a   : > { %v5421_v38 = vld [vmem:[%s5238_s8 + $0xd8] sm:$0xff]   ;;  %v5428_v37 = vld [vmem:[%s5238_s8 + $0xe0] sm:$0xff]   ;;  %v5435_v35 = vld [vmem:[%s5238_s8 + $0xe8] sm:$0xff]   ;;  %13768 = vst [vmem:[#allocation22_spill] sm:$0xff] %v5470_v54  ;;  %v5506_v8 = vcvt.s32.f32 %v4478_v15  ;;  %v5510_v9 = vcvt.s32.f32 %v4479_v17  ;;  %v5514_v1 = vcvt.s32.f32 %v4482_v18  ;;  %v5518_v10 = vcvt.s32.f32 %v4483_v19 }
  0x7b   : > { %13762 = vst [vmem:[#allocation16_spill] sm:$0xff] %v5421_v38  ;;  %13763 = vst [vmem:[#allocation17_spill] sm:$0xff] %v5428_v37  ;;  %v5442_v34 = vld [vmem:[%s5238_s8 + $0xf0] sm:$0xff]   ;;  %v5449_v33 = vld [vmem:[%s5238_s8 + $0xf8] sm:$0xff]   ;;  %v5522_v12 = vcvt.s32.f32 %v4486_v20  ;;  %v5526_v5 = vcvt.s32.f32 %v4487_v22  ;;  %v5530_v13 = vcvt.s32.f32 %v4490_v23  ;;  %v5534_v14 = vcvt.s32.f32 %v4491_v24 }
  0x7c   : > { %13764 = vst [vmem:[#allocation18_spill] sm:$0xff] %v5435_v35  ;;  %13765 = vst [vmem:[#allocation19_spill] sm:$0xff] %v5442_v34  ;;  %v5538_v15 = vcvt.s32.f32 %v4494_v25  ;;  %v5541_v17 = vld [vmem:[%s5227_s27] sm:$0xff]  ;;  %v5544_v18 = vld [vmem:[%s5227_s27 + $0x8] sm:$0xff]  ;;  %v5551_v19 = vcvt.s32.f32 %v4495_v27  ;;  %v5555_v20 = vcvt.s32.f32 %v4498_v28  ;;  %v5559_v22 = vcvt.s32.f32 %v4499_v29 }
  0x7d   : > { %13766 = vst [vmem:[#allocation20_spill] sm:$0xff] %v5449_v33  ;;  %13769 = vst [vmem:[#allocation23_spill] sm:$0xff] %v5474_v63  ;;  %v5547_v6 = vld [vmem:[%s5227_s27 + $0x10] sm:$0xff]  ;;  %v13792_v23 = vunpack.c.2.s8 %v5267_v16  ;;  %v5566_v25 = vld [vmem:[%s5227_s27 + $0x18] sm:$0xff]  ;;  %v13798_v28 = vunpack.c.3.s8 %v5267_v16  ;;  %v13800_v60 = vunpack.c.0.s8 %v5274_v21  ;;  %v13802_v55 = vunpack.c.1.s8 %v5274_v21 }
  0x7e   : > { %13770 = vst [vmem:[#allocation24_spill] sm:$0xff] %v5478_v30  ;;  %13771 = vst [vmem:[#allocation25_spill] sm:$0xff] %v5482_v58  ;;  %v5572_v11 = vld [vmem:[%s5227_s27 + $0x28] sm:$0xff]  ;;  %v5575_v27 = vld [vmem:[%s5227_s27 + $0x30] sm:$0xff]  ;;  %v13804_v32 = vunpack.c.2.s8 %v5274_v21  ;;  %vm1274_vm0 = vweird.f32 %v5541_v17  ;;  %vm1275_vm1 = vweird.f32 %v5544_v18  ;;  %vm1276_vm2 = vweird.f32 %v5547_v6 }
  0x7f   : > { %13772 = vst [vmem:[#allocation26_spill] sm:$0xff] %v5486_v2  ;;  %13773 = vst [vmem:[#allocation27_spill] sm:$0xff] %v5490_v3  ;;  %v5563_v24 = vcvt.s32.f32 %v13792_v23  ;;  %v5579_v29 = vcvt.s32.f32 %v13798_v28  ;;  %v5583_v23 = vcvt.s32.f32 %v13800_v60  ;;  %v5587_v62 = vcvt.s32.f32 %v13802_v55  ;;  %v5600_v16 = vld [vmem:[%s5227_s27 + $0x48] sm:$0xff]  ;;  %v5603_v28 = vld [vmem:[%s5227_s27 + $0x50] sm:$0xff] }
  0x80   : > { %13774 = vst [vmem:[#allocation28_spill] sm:$0xff] %v5494_v0  ;;  %13775 = vst [vmem:[#allocation29_spill] sm:$0xff] %v5498_v4  ;;  %v13810_v60 = vunpack.c.3.s8 %v5274_v21  ;;  %v5628_v21 = vld [vmem:[%s5227_s27 + $0x68] sm:$0xff]  ;;  %v13864_v4 = vunpack.c.2.s8 %v5309_v46  ;;  %vm1277_vm3 = vweird.f32 %v5566_v25  ;;  %vm1279_vm5 = vweird.f32 %v5572_v11 }
  0x81   : > { %13776 = vst [vmem:[#allocation30_spill] sm:$0xff] %v5502_v7  ;;  %13777 = vst [vmem:[#allocation31_spill] sm:$0xff] %v5506_v8  ;;  %vm1280_vm6 = vweird.f32 %v5575_v27  ;;  %v13876_v2 = vunpack.c.2.s8 %v5316_v51  ;;  %v13888_v63 = vunpack.c.2.s8 %v5323_v56  ;;  %v13899_v59 = vunpack.c.2.s8 %v5330_v61 }
  0x82   : > { %13778 = vst [vmem:[#allocation32_spill] sm:$0xff] %v5510_v9  ;;  %13779 = vst [vmem:[#allocation33_spill] sm:$0xff] %v5514_v1  ;;  %v5607_v55 = vcvt.s32.f32 %v13810_v60  ;;  %v5631_v60 = vld [vmem:[%s5227_s27 + $0x70] sm:$0xff]  ;;  %v5678_v1 = vld [vmem:[%s5227_s27 + $0x98] sm:$0xff]  ;;  %v13850_v9 = vunpack.c.1.s8 %v5302_v41  ;;  %v5734_v0 = vcvt.s32.f32 %v13864_v4  ;;  %v13910_v34 = vunpack.c.2.s8 %v5337_v53 }
  0x83   : > { %13780 = vst [vmem:[#allocation34_spill] sm:$0xff] %v5518_v10  ;;  %13781 = vst [vmem:[#allocation35_spill] sm:$0xff] %v5522_v12  ;;  %v5653_v12 = vld [vmem:[%s5227_s27 + $0x80] sm:$0xff]  ;;  %v5750_v4 = vld [vmem:[%s5227_s27 + $0xf0] sm:$0xff]  ;;  %v5766_v58 = vcvt.s32.f32 %v13876_v2  ;;  %v13882_v2 = vunpack.c.3.s8 %v5316_v51  ;;  %v5798_v54 = vcvt.s32.f32 %v13888_v63  ;;  %v13893_v63 = vunpack.c.3.s8 %v5323_v56 }
  0x84   : > { %13782 = vst [vmem:[#allocation36_spill] sm:$0xff] %v5526_v5  ;;  %13783 = vst [vmem:[#allocation37_spill] sm:$0xff] %v5530_v13  ;;  %v5650_v5 = vld [vmem:[%s5227_s27 + $0x78] sm:$0xff]  ;;  %v5827_v33 = vcvt.s32.f32 %v13899_v59  ;;  %v13904_v59 = vunpack.c.3.s8 %v5330_v61  ;;  %v5856_v35 = vcvt.s32.f32 %v13910_v34  ;;  %v13915_v34 = vunpack.c.3.s8 %v5337_v53 }
  0x85   : > { %13784 = vst [vmem:[#allocation38_spill] sm:$0xff] %v5534_v14  ;;  %13785 = vst [vmem:[#allocation39_spill] sm:$0xff] %v5538_v15  ;;  %v5622_v15 = vld [vmem:[%s5227_s27 + $0x58] sm:$0xff]  ;;  %v5625_v14 = vld [vmem:[%s5227_s27 + $0x60] sm:$0xff]  ;;  %v13921_v37 = vunpack.c.2.s8 %v5344_v52 }
  0x86   : > { %13786 = vst [vmem:[#allocation40_spill] sm:$0xff] %v5541_v17  ;;  %13787 = vst [vmem:[#allocation41_spill] sm:$0xff] %v5544_v18  ;;  %vm14033_vm4 = vweird.f32 %v5622_v15  ;;  %v14325_v17 = vmov 0 }
  0x87   : > { %13788 = vst [vmem:[#allocation42_spill] sm:$0xff] %v5547_v6  ;;  %13789 = vst [vmem:[#allocation43_spill] sm:$0xff] %v5551_v19  ;;  %v5885_v38 = vcvt.s32.f32 %v13921_v37  ;;  %v13926_v37 = vunpack.c.3.s8 %v5344_v52  ;;  %v13988_v6 = vunpack.c.2.s8 %v5386_v44 }
  0x88   : > { %13790 = vst [vmem:[#allocation44_spill] sm:$0xff] %v5555_v20  ;;  %13791 = vst [vmem:[#allocation45_spill] sm:$0xff] %v5559_v22  ;;  %v5594_v22 = vld [vmem:[%s5227_s27 + $0x38] sm:$0xff]  ;;  %v5597_v20 = vld [vmem:[%s5227_s27 + $0x40] sm:$0xff] }
  0x89   : > { %13793 = vst [vmem:[#allocation46_spill] sm:$0xff] %v5563_v24  ;;  %13794 = vst [vmem:[#allocation47_spill] sm:$0xff] %v5566_v25  ;;  %v5591_v24 = vcvt.s32.f32 %v13804_v32  ;;  %vm1281_vm7 = vweird.f32 %v5594_v22  ;;  %vm1282_vm8 = vweird.f32 %v5597_v20  ;;  %v6071_v18 = vcvt.s32.f32 %v13988_v6  ;;  %v6743_v25 = vld [vmem:[%s5227_s27 + $0x248] sm:$0xff] }
  0x8a   : > { %13796 = vst [vmem:[#allocation49_spill] sm:$0xff] %v5572_v11  ;;  %13797 = vst [vmem:[#allocation50_spill] sm:$0xff] %v5575_v27  ;;  %v13993_v6 = vmov 0  ;;  %v14006_v11 = vunpack.c.1.s8 %v5393_v43  ;;  %v14008_v27 = vunpack.c.2.s8 %v5393_v43 }
  0x8b   : > { %13799 = vst [vmem:[#allocation51_spill] sm:$0xff] %v5579_v29  ;;  %13801 = vst [vmem:[#allocation52_spill] sm:$0xff] %v5583_v23  ;;  %v13816_v29 = vunpack.c.2.s8 %v5281_v26  ;;  %v13994_v6 = vsel %vm6087_vm12, 4294967295, %v13993_v6 }
  0x8c   : > { %13803 = vst [vmem:[#allocation53_spill] sm:$0xff] %v5587_v62  ;;  %13805 = vst [vmem:[#allocation54_spill] sm:$0xff] %v5591_v24  ;;  %v13812_v62 = vunpack.c.0.s8 %v5281_v26  ;;  %v13814_v24 = vunpack.c.1.s8 %v5281_v26 }
  0x8d   : > { %13806 = vst [vmem:[#allocation55_spill] sm:$0xff] %v5594_v22  ;;  %13807 = vst [vmem:[#allocation56_spill] sm:$0xff] %v5597_v20  ;;  %v5619_v19 = vcvt.s32.f32 %v13816_v29  ;;  %v14338_v20 = vmov 0  ;;  %v14383_v22 = vmov 0 }
  0x8e   : > { %13808 = vst [vmem:[#allocation57_spill] sm:$0xff] %v5600_v16  ;;  %13809 = vst [vmem:[#allocation58_spill] sm:$0xff] %v5603_v28  ;;  %v5611_v32 = vcvt.s32.f32 %v13812_v62  ;;  %v5615_v23 = vcvt.s32.f32 %v13814_v24  ;;  %v13822_v62 = vunpack.c.3.s8 %v5281_v26  ;;  %v5656_v26 = vld [vmem:[%s5227_s27 + $0x88] sm:$0xff] }
  0x8f   : > { %13811 = vst [vmem:[#allocation59_spill] sm:$0xff] %v5607_v55  ;;  %13817 = vst [vmem:[#allocation62_spill] sm:$0xff] %v5619_v19  ;;  %v13826_v19 = vunpack.c.1.s8 %v5288_v31  ;;  %v13828_v55 = vunpack.c.2.s8 %v5288_v31 }
  0x90   : > { %13813 = vst [vmem:[#allocation60_spill] sm:$0xff] %v5611_v32  ;;  %13815 = vst [vmem:[#allocation61_spill] sm:$0xff] %v5615_v23  ;;  %v5635_v24 = vcvt.s32.f32 %v13822_v62  ;;  %v13824_v23 = vunpack.c.0.s8 %v5288_v31  ;;  %v5659_v62 = vld [vmem:[%s5227_s27 + $0x90] sm:$0xff] }
  0x91   : > { %13818 = vst [vmem:[#allocation63_spill] sm:$0xff] %v5622_v15  ;;  %13819 = vst [vmem:[#allocation64_spill] sm:$0xff] %v5625_v14  ;;  %v5643_v32 = vcvt.s32.f32 %v13826_v19  ;;  %v5647_v13 = vcvt.s32.f32 %v13828_v55  ;;  %v13836_v19 = vunpack.c.0.s8 %v5295_v36  ;;  %v13838_v55 = vunpack.c.1.s8 %v5295_v36  ;;  %v6812_v15 = vld [vmem:[%s5227_s27 + $0x260] sm:$0xff] }
  0x92   : > { %13820 = vst [vmem:[#allocation65_spill] sm:$0xff] %v5628_v21  ;;  %13821 = vst [vmem:[#allocation66_spill] sm:$0xff] %v5631_v60  ;;  %v5639_v29 = vcvt.s32.f32 %v13824_v23 }
  0x93   : > { %13823 = vst [vmem:[#allocation67_spill] sm:$0xff] %v5635_v24  ;;  %13827 = vst [vmem:[#allocation69_spill] sm:$0xff] %v5643_v32  ;;  %v13834_v24 = vunpack.c.3.s8 %v5288_v31  ;;  %v5667_v32 = vcvt.s32.f32 %v13836_v19  ;;  %v5681_v31 = vld [vmem:[%s5227_s27 + $0xa0] sm:$0xff]  ;;  %v13846_v19 = vunpack.c.3.s8 %v5295_v36 }
  0x94   : > { %13825 = vst [vmem:[#allocation68_spill] sm:$0xff] %v5639_v29  ;;  %13829 = vst [vmem:[#allocation70_spill] sm:$0xff] %v5647_v13  ;;  %v5671_v13 = vcvt.s32.f32 %v13838_v55  ;;  %v13840_v29 = vunpack.c.2.s8 %v5295_v36  ;;  %v13848_v55 = vunpack.c.0.s8 %v5302_v41  ;;  %v5709_v36 = vld [vmem:[%s5227_s27 + $0xb8] sm:$0xff] }
  0x95   : > { %13830 = vst [vmem:[#allocation71_spill] sm:$0xff] %v5650_v5  ;;  %13831 = vst [vmem:[#allocation72_spill] sm:$0xff] %v5653_v12  ;;  %v5663_v23 = vcvt.s32.f32 %v13834_v24  ;;  %v5684_v24 = vld [vmem:[%s5227_s27 + $0xa8] sm:$0xff] }
  0x96   : > { %13832 = vst [vmem:[#allocation73_spill] sm:$0xff] %v5656_v26  ;;  %13833 = vst [vmem:[#allocation74_spill] sm:$0xff] %v5659_v62  ;;  %v5675_v10 = vcvt.s32.f32 %v13840_v29  ;;  %v5699_v29 = vcvt.s32.f32 %v13850_v9  ;;  %v5715_v9 = vld [vmem:[%s5227_s27 + $0xc8] sm:$0xff] }
  0x97   : > { %13835 = vst [vmem:[#allocation75_spill] sm:$0xff] %v5663_v23  ;;  %13837 = vst [vmem:[#allocation76_spill] sm:$0xff] %v5667_v32  ;;  %v5687_v23 = vld [vmem:[%s5227_s27 + $0xb0] sm:$0xff]  ;;  %v5691_v32 = vcvt.s32.f32 %v13846_v19  ;;  %v5712_v19 = vld [vmem:[%s5227_s27 + $0xc0] sm:$0xff] }
  0x98   : > { %13839 = vst [vmem:[#allocation77_spill] sm:$0xff] %v5671_v13  ;;  %13841 = vst [vmem:[#allocation78_spill] sm:$0xff] %v5675_v10  ;;  %v5695_v13 = vcvt.s32.f32 %v13848_v55  ;;  %v13852_v10 = vunpack.c.2.s8 %v5302_v41  ;;  %v5718_v55 = vld [vmem:[%s5227_s27 + $0xd0] sm:$0xff] }
  0x99   : > { %13842 = vst [vmem:[#allocation79_spill] sm:$0xff] %v5678_v1  ;;  %13843 = vst [vmem:[#allocation80_spill] sm:$0xff] %v5681_v31 }
  0x9a   : > { %13844 = vst [vmem:[#allocation81_spill] sm:$0xff] %v5684_v24  ;;  %13845 = vst [vmem:[#allocation82_spill] sm:$0xff] %v5687_v23  ;;  %v5703_v8 = vcvt.s32.f32 %v13852_v10  ;;  %v13858_v10 = vunpack.c.3.s8 %v5302_v41  ;;  %v5741_v41 = vld [vmem:[%s5227_s27 + $0xd8] sm:$0xff] }
  0x9b   : > { %13847 = vst [vmem:[#allocation83_spill] sm:$0xff] %v5691_v32  ;;  %13849 = vst [vmem:[#allocation84_spill] sm:$0xff] %v5695_v13  ;;  %v13862_v32 = vunpack.c.1.s8 %v5309_v46 }
  0x9c   : > { %13851 = vst [vmem:[#allocation85_spill] sm:$0xff] %v5699_v29  ;;  %13853 = vst [vmem:[#allocation86_spill] sm:$0xff] %v5703_v8  ;;  %v5722_v8 = vcvt.s32.f32 %v13858_v10  ;;  %v13860_v29 = vunpack.c.0.s8 %v5309_v46  ;;  %v13870_v10 = vunpack.c.3.s8 %v5309_v46  ;;  %v5773_v46 = vld [vmem:[%s5227_s27 + $0xf8] sm:$0xff] }
  0x9d   : > { %13854 = vst [vmem:[#allocation87_spill] sm:$0xff] %v5709_v36  ;;  %13855 = vst [vmem:[#allocation88_spill] sm:$0xff] %v5712_v19  ;;  %v5730_v7 = vcvt.s32.f32 %v13862_v32  ;;  %v5744_v32 = vld [vmem:[%s5227_s27 + $0xe0] sm:$0xff] }
  0x9e   : > { %13856 = vst [vmem:[#allocation89_spill] sm:$0xff] %v5715_v9  ;;  %13857 = vst [vmem:[#allocation90_spill] sm:$0xff] %v5718_v55  ;;  %v5726_v13 = vcvt.s32.f32 %v13860_v29  ;;  %v5747_v29 = vld [vmem:[%s5227_s27 + $0xe8] sm:$0xff]  ;;  %v13932_v55 = vunpack.c.2.s8 %v5351_v50 }
  0x9f   : > { %13859 = vst [vmem:[#allocation91_spill] sm:$0xff] %v5722_v8  ;;  %13863 = vst [vmem:[#allocation93_spill] sm:$0xff] %v5730_v7  ;;  %v13872_v7 = vunpack.c.0.s8 %v5316_v51  ;;  %v13874_v8 = vunpack.c.1.s8 %v5316_v51  ;;  %v5805_v51 = vld [vmem:[%s5227_s27 + $0x118] sm:$0xff] }
  0xa0   : > { %13861 = vst [vmem:[#allocation92_spill] sm:$0xff] %v5726_v13  ;;  %13865 = vst [vmem:[#allocation94_spill] sm:$0xff] %v5734_v0  ;;  %v5754_v0 = vcvt.s32.f32 %v13870_v10  ;;  %v5782_v10 = vld [vmem:[%s5227_s27 + $0x110] sm:$0xff]  ;;  %v5914_v9 = vcvt.s32.f32 %v13932_v55  ;;  %v13936_v55 = vunpack.c.3.s8 %v5351_v50 }
  0xa1   : > { %13866 = vst [vmem:[#allocation95_spill] sm:$0xff] %v5741_v41  ;;  %13867 = vst [vmem:[#allocation96_spill] sm:$0xff] %v5744_v32  ;;  %v5758_v13 = vcvt.s32.f32 %v13872_v7  ;;  %v5762_v3 = vcvt.s32.f32 %v13874_v8  ;;  %v5776_v7 = vld [vmem:[%s5227_s27 + $0x100] sm:$0xff]  ;;  %v5779_v8 = vld [vmem:[%s5227_s27 + $0x108] sm:$0xff] }
  0xa2   : > { %13868 = vst [vmem:[#allocation97_spill] sm:$0xff] %v5747_v29  ;;  %13869 = vst [vmem:[#allocation98_spill] sm:$0xff] %v5750_v4  ;;  %v13942_v4 = vunpack.c.2.s8 %v5358_v49 }
  0xa3   : > { %13871 = vst [vmem:[#allocation99_spill] sm:$0xff] %v5754_v0  ;;  %13873 = vst [vmem:[#allocation100_spill] sm:$0xff] %v5758_v13  ;;  %v13886_v0 = vunpack.c.1.s8 %v5323_v56 }
  0xa4   : > { %13875 = vst [vmem:[#allocation101_spill] sm:$0xff] %v5762_v3  ;;  %13877 = vst [vmem:[#allocation102_spill] sm:$0xff] %v5766_v58  ;;  %v5786_v58 = vcvt.s32.f32 %v13882_v2  ;;  %v13884_v3 = vunpack.c.0.s8 %v5323_v56  ;;  %v5815_v2 = vcvt.s32.f32 %v13893_v63  ;;  %v5837_v56 = vld [vmem:[%s5227_s27 + $0x138] sm:$0xff]  ;;  %v5844_v63 = vcvt.s32.f32 %v13904_v59 }
  0xa5   : > { %13878 = vst [vmem:[#allocation103_spill] sm:$0xff] %v5773_v46  ;;  %13879 = vst [vmem:[#allocation104_spill] sm:$0xff] %v5776_v7  ;;  %v5794_v30 = vcvt.s32.f32 %v13886_v0  ;;  %v5811_v0 = vld [vmem:[%s5227_s27 + $0x128] sm:$0xff]  ;;  %v5873_v59 = vcvt.s32.f32 %v13915_v34  ;;  %v5902_v34 = vcvt.s32.f32 %v13926_v37  ;;  %v5931_v37 = vcvt.s32.f32 %v13936_v55 }
  0xa6   : > { %13880 = vst [vmem:[#allocation105_spill] sm:$0xff] %v5779_v8  ;;  %13881 = vst [vmem:[#allocation106_spill] sm:$0xff] %v5782_v10  ;;  %v5790_v13 = vcvt.s32.f32 %v13884_v3  ;;  %v5808_v3 = vld [vmem:[%s5227_s27 + $0x120] sm:$0xff]  ;;  %v5943_v29 = vcvt.s32.f32 %v13942_v4  ;;  %v13945_v4 = vunpack.c.3.s8 %v5358_v49  ;;  %v13951_v10 = vunpack.c.2.s8 %v5365_v48 }
  0xa7   : > { %13883 = vst [vmem:[#allocation107_spill] sm:$0xff] %v5786_v58  ;;  %13887 = vst [vmem:[#allocation109_spill] sm:$0xff] %v5794_v30 }
  0xa8   : > { %13885 = vst [vmem:[#allocation108_spill] sm:$0xff] %v5790_v13  ;;  %13889 = vst [vmem:[#allocation110_spill] sm:$0xff] %v5798_v54  ;;  %v13895_v54 = vunpack.c.0.s8 %v5330_v61  ;;  %v13897_v13 = vunpack.c.1.s8 %v5330_v61  ;;  %v5866_v61 = vld [vmem:[%s5227_s27 + $0x150] sm:$0xff]  ;;  %v5960_v55 = vcvt.s32.f32 %v13945_v4  ;;  %v5972_v8 = vcvt.s32.f32 %v13951_v10 }
  0xa9   : > { %13890 = vst [vmem:[#allocation111_spill] sm:$0xff] %v5805_v51  ;;  %13891 = vst [vmem:[#allocation112_spill] sm:$0xff] %v5808_v3  ;;  %v13955_v4 = vunpack.c.3.s8 %v5365_v48 }
  0xaa   : > { %13892 = vst [vmem:[#allocation113_spill] sm:$0xff] %v5811_v0  ;;  %13894 = vst [vmem:[#allocation114_spill] sm:$0xff] %v5815_v2  ;;  %v5819_v30 = vcvt.s32.f32 %v13895_v54  ;;  %v5823_v58 = vcvt.s32.f32 %v13897_v13  ;;  %v5834_v54 = vld [vmem:[%s5227_s27 + $0x130] sm:$0xff]  ;;  %v5840_v13 = vld [vmem:[%s5227_s27 + $0x140] sm:$0xff] }
  0xab   : > { %13900 = vst [vmem:[#allocation117_spill] sm:$0xff] %v5827_v33  ;;  %13901 = vst [vmem:[#allocation118_spill] sm:$0xff] %v5834_v54  ;;  %v13906_v33 = vunpack.c.0.s8 %v5337_v53  ;;  %v5989_v10 = vcvt.s32.f32 %v13955_v4  ;;  %v13961_v54 = vunpack.c.2.s8 %v5372_v47 }
  0xac   : > { %13896 = vst [vmem:[#allocation115_spill] sm:$0xff] %v5819_v30  ;;  %13898 = vst [vmem:[#allocation116_spill] sm:$0xff] %v5823_v58  ;;  %v13908_v30 = vunpack.c.1.s8 %v5337_v53  ;;  %v5895_v53 = vld [vmem:[%s5227_s27 + $0x168] sm:$0xff] }
  0xad   : > { %13902 = vst [vmem:[#allocation119_spill] sm:$0xff] %v5837_v56  ;;  %13903 = vst [vmem:[#allocation120_spill] sm:$0xff] %v5840_v13  ;;  %v5848_v58 = vcvt.s32.f32 %v13906_v33  ;;  %v5863_v33 = vld [vmem:[%s5227_s27 + $0x148] sm:$0xff]  ;;  %v6001_v0 = vcvt.s32.f32 %v13961_v54  ;;  %v13966_v54 = vunpack.c.0.s8 %v5379_v45 }
  0xae   : > { %13905 = vst [vmem:[#allocation121_spill] sm:$0xff] %v5844_v63  ;;  %v5852_v2 = vcvt.s32.f32 %v13908_v30  ;;  %13911 = vst [vmem:[#allocation124_spill] sm:$0xff] %v5856_v35  ;;  %v5869_v30 = vld [vmem:[%s5227_s27 + $0x158] sm:$0xff]  ;;  %v13917_v35 = vunpack.c.0.s8 %v5344_v52 }
  0xaf   : > { %13907 = vst [vmem:[#allocation122_spill] sm:$0xff] %v5848_v58  ;;  %13912 = vst [vmem:[#allocation125_spill] sm:$0xff] %v5863_v33  ;;  %v13919_v58 = vunpack.c.1.s8 %v5344_v52  ;;  %v5924_v52 = vld [vmem:[%s5227_s27 + $0x180] sm:$0xff] }
  0xb0   : > { %13909 = vst [vmem:[#allocation123_spill] sm:$0xff] %v5852_v2  ;;  %13913 = vst [vmem:[#allocation126_spill] sm:$0xff] %v5866_v61  ;;  %v5877_v2 = vcvt.s32.f32 %v13917_v35  ;;  %v5892_v35 = vld [vmem:[%s5227_s27 + $0x160] sm:$0xff] }
  0xb1   : > { %13914 = vst [vmem:[#allocation127_spill] sm:$0xff] %v5869_v30  ;;  %13916 = vst [vmem:[#allocation128_spill] sm:$0xff] %v5873_v59  ;;  %v5881_v63 = vcvt.s32.f32 %v13919_v58  ;;  %v5898_v58 = vld [vmem:[%s5227_s27 + $0x170] sm:$0xff] }
  0xb2   : > { %13918 = vst [vmem:[#allocation129_spill] sm:$0xff] %v5877_v2  ;;  %13922 = vst [vmem:[#allocation131_spill] sm:$0xff] %v5885_v38  ;;  %v13928_v38 = vunpack.c.0.s8 %v5351_v50  ;;  %v13930_v2 = vunpack.c.1.s8 %v5351_v50  ;;  %v5950_v50 = vld [vmem:[%s5227_s27 + $0x190] sm:$0xff] }
  0xb3   : > { %13920 = vst [vmem:[#allocation130_spill] sm:$0xff] %v5881_v63  ;;  %13923 = vst [vmem:[#allocation132_spill] sm:$0xff] %v5892_v35 }
  0xb4   : > { %13924 = vst [vmem:[#allocation133_spill] sm:$0xff] %v5895_v53  ;;  %13925 = vst [vmem:[#allocation134_spill] sm:$0xff] %v5898_v58  ;;  %v5906_v63 = vcvt.s32.f32 %v13928_v38  ;;  %v5910_v59 = vcvt.s32.f32 %v13930_v2  ;;  %v5921_v38 = vld [vmem:[%s5227_s27 + $0x178] sm:$0xff]  ;;  %v5927_v2 = vld [vmem:[%s5227_s27 + $0x188] sm:$0xff] }
  0xb5   : > { %13927 = vst [vmem:[#allocation135_spill] sm:$0xff] %v5902_v34  ;;  %13933 = vst [vmem:[#allocation138_spill] sm:$0xff] %v5914_v9  ;;  %v13938_v9 = vunpack.c.0.s8 %v5358_v49 }
  0xb6   : > { %13929 = vst [vmem:[#allocation136_spill] sm:$0xff] %v5906_v63  ;;  %13931 = vst [vmem:[#allocation137_spill] sm:$0xff] %v5910_v59  ;;  %v13940_v63 = vunpack.c.1.s8 %v5358_v49  ;;  %v5979_v49 = vld [vmem:[%s5227_s27 + $0x1a8] sm:$0xff] }
  0xb7   : > { %13934 = vst [vmem:[#allocation139_spill] sm:$0xff] %v5924_v52  ;;  %13935 = vst [vmem:[#allocation140_spill] sm:$0xff] %v5927_v2  ;;  %v5935_v59 = vcvt.s32.f32 %v13938_v9  ;;  %v5953_v9 = vld [vmem:[%s5227_s27 + $0x198] sm:$0xff] }
  0xb8   : > { %13937 = vst [vmem:[#allocation141_spill] sm:$0xff] %v5931_v37  ;;  %v5939_v34 = vcvt.s32.f32 %v13940_v63  ;;  %13943 = vst [vmem:[#allocation144_spill] sm:$0xff] %v5943_v29  ;;  %v5956_v63 = vld [vmem:[%s5227_s27 + $0x1a0] sm:$0xff]  ;;  %v13947_v29 = vunpack.c.0.s8 %v5365_v48 }
  0xb9   : > { %13939 = vst [vmem:[#allocation142_spill] sm:$0xff] %v5935_v59  ;;  %13944 = vst [vmem:[#allocation145_spill] sm:$0xff] %v5950_v50  ;;  %v13949_v59 = vunpack.c.1.s8 %v5365_v48  ;;  %v6008_v48 = vld [vmem:[%s5227_s27 + $0x1c0] sm:$0xff] }
  0xba   : > { %13941 = vst [vmem:[#allocation143_spill] sm:$0xff] %v5939_v34  ;;  %13946 = vst [vmem:[#allocation146_spill] sm:$0xff] %v5960_v55  ;;  %v5964_v34 = vcvt.s32.f32 %v13947_v29  ;;  %v5982_v29 = vld [vmem:[%s5227_s27 + $0x1b0] sm:$0xff] }
  0xbb   : > { %v5968_v37 = vcvt.s32.f32 %v13949_v59  ;;  %13952 = vst [vmem:[#allocation149_spill] sm:$0xff] %v5972_v8  ;;  %13953 = vst [vmem:[#allocation150_spill] sm:$0xff] %v5979_v49  ;;  %v5985_v59 = vld [vmem:[%s5227_s27 + $0x1b8] sm:$0xff]  ;;  %v13957_v8 = vunpack.c.0.s8 %v5372_v47 }
  0xbc   : > { %13948 = vst [vmem:[#allocation147_spill] sm:$0xff] %v5964_v34  ;;  %13954 = vst [vmem:[#allocation151_spill] sm:$0xff] %v5982_v29  ;;  %v13959_v34 = vunpack.c.1.s8 %v5372_v47 }
  0xbd   : > { %13950 = vst [vmem:[#allocation148_spill] sm:$0xff] %v5968_v37  ;;  %13956 = vst [vmem:[#allocation152_spill] sm:$0xff] %v5989_v10  ;;  %v5993_v37 = vcvt.s32.f32 %v13957_v8  ;;  %v6011_v8 = vld [vmem:[%s5227_s27 + $0x1c8] sm:$0xff]  ;;  %v13970_v10 = vunpack.c.2.s8 %v5379_v45 }
  0xbe   : > { %v5997_v55 = vcvt.s32.f32 %v13959_v34  ;;  %13962 = vst [vmem:[#allocation155_spill] sm:$0xff] %v6001_v0  ;;  %13963 = vst [vmem:[#allocation156_spill] sm:$0xff] %v6011_v8  ;;  %v13964_v34 = vunpack.c.3.s8 %v5372_v47  ;;  %v6019_v0 = vcvt.s32.f32 %v13966_v54  ;;  %v13972_v47 = vmov 0 }
  0xbf   : > { %13958 = vst [vmem:[#allocation153_spill] sm:$0xff] %v5993_v37  ;;  %v6027_v33 = vcvt.s32.f32 %v13970_v10  ;;  %vm6036_vm10 = vmxor %vm1274_vm0, %vm13453_vm11  ;;  %v13978_v10 = vmov 0  ;;  %v13982_v54 = vunpack.c.3.s8 %v5379_v45 }
  0xc0   : > { %13960 = vst [vmem:[#allocation154_spill] sm:$0xff] %v5997_v55  ;;  %v6015_v4 = vcvt.s32.f32 %v13964_v34  ;;  %13967 = vst [vmem:[#allocation158_spill] sm:$0xff] %v6019_v0  ;;  %v13968_v55 = vunpack.c.1.s8 %v5379_v45  ;;  %v13973_v47 = vsel %vm6036_vm10, 4294967295, %v13972_v47  ;;  %v6055_v34 = vld [vmem:[%s5227_s27 + $0x1d0] sm:$0xff]  ;;  %v13990_v45 = vmov 0 }
  0xc1   : > { %13971 = vst [vmem:[#allocation160_spill] sm:$0xff] %v6027_v33  ;;  %13974 = vst [vmem:[#allocation161_spill] sm:$0xff] %v13973_v47  ;;  %v6059_v33 = vcvt.s32.f32 %v13982_v54  ;;  %v6106_v54 = vld [vmem:[%s5227_s27 + $0x1d8] sm:$0xff]  ;;  %v14352_v47 = vmov 0 }
  0xc2   : > { %13965 = vst [vmem:[#allocation157_spill] sm:$0xff] %v6015_v4  ;;  %v6023_v37 = vcvt.s32.f32 %v13968_v55  ;;  %vm6043_vm9 = vmxor %vm1275_vm1, %vm13453_vm11  ;;  %v13975_v55 = vmov 0  ;;  %v13986_v4 = vunpack.c.1.s8 %v5386_v44 }
  0xc3   : > { %v13976_v55 = vsel %vm6043_vm9, 4294967295, %v13975_v55  ;;  %vm6050_vm15 = vmxor %vm1276_vm2, %vm13453_vm11  ;;  %13981 = vst [vmem:[#allocation164_spill] sm:$0xff] %v6055_v34  ;;  %vm14265_vm9 = vweird.f32 %v5924_v52  ;;  %v639_v52 = vld [vmem:[%s5221_s23 + $0x28] sm:$0xff] }
  0xc4   : > { %13969 = vst [vmem:[#allocation159_spill] sm:$0xff] %v6023_v37  ;;  %13977 = vst [vmem:[#allocation162_spill] sm:$0xff] %v13976_v55  ;;  %v13979_v10 = vsel %vm6050_vm15, 4294967295, %v13978_v10  ;;  %v13984_v37 = vunpack.c.0.s8 %v5386_v44  ;;  %v6067_v55 = vcvt.s32.f32 %v13986_v4  ;;  %v13999_v4 = vmov 0 }
  0xc5   : > { %13980 = vst [vmem:[#allocation163_spill] sm:$0xff] %v13979_v10  ;;  %13983 = vst [vmem:[#allocation165_spill] sm:$0xff] %v6059_v33  ;;  %vm14268_vm15 = vweird.f32 %v5927_v2  ;;  %v14293_v10 = vmov 0  ;;  %v14305_v2 = vmov 0 }
  0xc6   : > { %v6063_v0 = vcvt.s32.f32 %v13984_v37  ;;  %13987 = vst [vmem:[#allocation167_spill] sm:$0xff] %v6067_v55  ;;  %13989 = vst [vmem:[#allocation168_spill] sm:$0xff] %v6071_v18  ;;  %v13996_v37 = vmov 0  ;;  %v14002_v18 = vunpack.c.3.s8 %v5386_v44  ;;  %v14010_v44 = vmov 0 }
  0xc7   : > { %vm6080_vm13 = vmxor %vm1277_vm3, %vm13453_vm11  ;;  %13995 = vst [vmem:[#allocation170_spill] sm:$0xff] %v13994_v6  ;;  %v6122_v6 = vcvt.s32.f32 %v14008_v27  ;;  %v14021_v27 = vmov 0 }
  0xc8   : > { %13985 = vst [vmem:[#allocation166_spill] sm:$0xff] %v6063_v0  ;;  %v13991_v45 = vsel %vm6080_vm13, 4294967295, %v13990_v45  ;;  %vm6094_vm2 = vmxor %vm1279_vm5, %vm13453_vm11  ;;  %v6110_v55 = vcvt.s32.f32 %v14002_v18  ;;  %v14004_v0 = vunpack.c.0.s8 %v5393_v43  ;;  %v14013_v18 = vmov 0 }
  0xc9   : > { %13992 = vst [vmem:[#allocation169_spill] sm:$0xff] %v13991_v45  ;;  %v13997_v37 = vsel %vm6094_vm2, 4294967295, %v13996_v37  ;;  %vm6101_vm3 = vmxor %vm1280_vm6, %vm13453_vm11  ;;  %vm14016_vm6 = vweird.f32 %v5600_v16  ;;  %v14029_v16 = vunpack.c.1.s8 %v5400_v42  ;;  %vm14285_vm2 = vweird.f32 %v5956_v63 }
  0xca   : > { %13998 = vst [vmem:[#allocation171_spill] sm:$0xff] %v13997_v37  ;;  %v14000_v4 = vsel %vm6101_vm3, 4294967295, %v13999_v4  ;;  %14003 = vst [vmem:[#allocation173_spill] sm:$0xff] %v6110_v55  ;;  %v6114_v33 = vcvt.s32.f32 %v14004_v0  ;;  %v6118_v37 = vcvt.s32.f32 %v14006_v11  ;;  %v14017_v11 = vmov 0  ;;  %v6157_v0 = vld [vmem:[%s5227_s27 + $0x1e0] sm:$0xff] }
  0xcb   : > { %14001 = vst [vmem:[#allocation172_spill] sm:$0xff] %v14000_v4  ;;  %14009 = vst [vmem:[#allocation176_spill] sm:$0xff] %v6122_v6  ;;  %v14025_v6 = vunpack.c.3.s8 %v5393_v43  ;;  %v14034_v43 = vmov 0  ;;  %vm14288_vm3 = vweird.f32 %v5979_v49  ;;  %v14312_v45 = vmov 0  ;;  %v641_v49 = vld [vmem:[%s5221_s23 + $0x38] sm:$0xff] }
  0xcc   : > { %14005 = vst [vmem:[#allocation174_spill] sm:$0xff] %v6114_v33  ;;  %14007 = vst [vmem:[#allocation175_spill] sm:$0xff] %v6118_v37  ;;  %v14027_v33 = vunpack.c.0.s8 %v5400_v42  ;;  %v14367_v4 = vmov 0 }
  0xcd   : > { %vm6131_vm1 = vmxor %vm1281_vm7, %vm13453_vm11  ;;  %vm14020_vm7 = vweird.f32 %v5603_v28  ;;  %14024 = vst [vmem:[#allocation181_spill] sm:$0xff] %v6157_v0  ;;  %v6161_v37 = vcvt.s32.f32 %v14025_v6  ;;  %v14031_v28 = vunpack.c.2.s8 %v5400_v42  ;;  %v6207_v6 = vld [vmem:[%s5227_s27 + $0x1e8] sm:$0xff] }
  0xce   : > { %v14011_v44 = vsel %vm6131_vm1, 4294967295, %v14010_v44  ;;  %vm6138_vm0 = vmxor %vm1282_vm8, %vm13453_vm11  ;;  %v6165_v55 = vcvt.s32.f32 %v14027_v33  ;;  %v14046_v33 = vmov 0  ;;  %14049 = vst [vmem:[#allocation190_spill] sm:$0xff] %v6207_v6  ;;  %vm14304_vm1 = vweird.f32 %v5985_v59 }
  0xcf   : > { %14012 = vst [vmem:[#allocation177_spill] sm:$0xff] %v14011_v44  ;;  %v14014_v18 = vsel %vm6138_vm0, 4294967295, %v14013_v18  ;;  %vm6145_vm5 = vmxor %vm14016_vm6, %vm13453_vm11  ;;  %vm14041_vm6 = vweird.f32 %v5628_v21  ;;  %v14054_v21 = vunpack.c.1.s8 %v5407_v40  ;;  %v6720_v44 = vld [vmem:[%s5227_s27 + $0x240] sm:$0xff] }
  0xd0   : > { %14015 = vst [vmem:[#allocation178_spill] sm:$0xff] %v14014_v18  ;;  %v14018_v11 = vsel %vm6145_vm5, 4294967295, %v14017_v11  ;;  %vm6152_vm14 = vmxor %vm14020_vm7, %vm13453_vm11  ;;  %v6173_v18 = vcvt.s32.f32 %v14031_v28  ;;  %vm14037_vm5 = vweird.f32 %v5625_v14  ;;  %v14042_v28 = vmov 0  ;;  %v14409_v14 = vld [vmem:[#allocation113_spill] sm:$0xff] }
  0xd1   : > { %14019 = vst [vmem:[#allocation179_spill] sm:$0xff] %v14018_v11  ;;  %v14022_v27 = vsel %vm6152_vm14, 4294967295, %v14021_v27  ;;  %14026 = vst [vmem:[#allocation182_spill] sm:$0xff] %v6161_v37  ;;  %v6169_v11 = vcvt.s32.f32 %v14029_v16  ;;  %v14038_v16 = vmov 0 }
  0xd2   : > { %14023 = vst [vmem:[#allocation180_spill] sm:$0xff] %v14022_v27  ;;  %14028 = vst [vmem:[#allocation183_spill] sm:$0xff] %v6165_v55  ;;  %v14052_v55 = vunpack.c.0.s8 %v5407_v40 }
  0xd3   : > { %14030 = vst [vmem:[#allocation184_spill] sm:$0xff] %v6169_v11  ;;  %14032 = vst [vmem:[#allocation185_spill] sm:$0xff] %v6173_v18  ;;  %v14050_v18 = vunpack.c.3.s8 %v5400_v42  ;;  %v14059_v42 = vmov 0 }
  0xd4   : > { %vm6181_vm14 = vmxor %vm14033_vm4, %vm13453_vm11  ;;  %vm14045_vm4 = vweird.f32 %v5631_v60  ;;  %v6215_v37 = vcvt.s32.f32 %v14052_v55  ;;  %v14056_v60 = vunpack.c.2.s8 %v5407_v40  ;;  %v14071_v55 = vmov 0  ;;  %14323 = vst [vmem:[#allocation265_spill] sm:$0xff] %v6720_v44 }
  0xd5   : > { %v14035_v43 = vsel %vm6181_vm14, 4294967295, %v14034_v43  ;;  %vm6188_vm0 = vmxor %vm14037_vm5, %vm13453_vm11  ;;  %v6211_v11 = vcvt.s32.f32 %v14050_v18  ;;  %v6255_v18 = vld [vmem:[%s5227_s27 + $0x1f0] sm:$0xff]  ;;  %14336 = vst [vmem:[#allocation267_spill] sm:$0xff] %v6743_v25 }
  0xd6   : > { %14036 = vst [vmem:[#allocation186_spill] sm:$0xff] %v14035_v43  ;;  %v14039_v16 = vsel %vm6188_vm0, 4294967295, %v14038_v16  ;;  %vm6195_vm8 = vmxor %vm14041_vm6, %vm13453_vm11  ;;  %vm14058_vm6 = vweird.f32 %v5650_v5  ;;  %vm14066_vm0 = vweird.f32 %v5656_v26  ;;  %v14079_v26 = vunpack.c.1.s8 %v5414_v39  ;;  %v6766_v5 = vld [vmem:[%s5227_s27 + $0x250] sm:$0xff]  ;;  %v6835_v43 = vld [vmem:[%s5227_s27 + $0x268] sm:$0xff] }
  0xd7   : > { %14040 = vst [vmem:[#allocation187_spill] sm:$0xff] %v14039_v16  ;;  %v14043_v28 = vsel %vm6195_vm8, 4294967295, %v14042_v28  ;;  %vm6202_vm7 = vmxor %vm14045_vm4, %vm13453_vm11  ;;  %v6223_v16 = vcvt.s32.f32 %v14056_v60  ;;  %v14067_v60 = vmov 0  ;;  %v6858_v25 = vld [vmem:[%s5227_s27 + $0x270] sm:$0xff] }
  0xd8   : > { %14044 = vst [vmem:[#allocation188_spill] sm:$0xff] %v14043_v28  ;;  %v14047_v33 = vsel %vm6202_vm7, 4294967295, %v14046_v33  ;;  %14051 = vst [vmem:[#allocation191_spill] sm:$0xff] %v6211_v11  ;;  %v6219_v28 = vcvt.s32.f32 %v14054_v21  ;;  %vm14062_vm7 = vweird.f32 %v5653_v12  ;;  %v14063_v21 = vmov 0 }
  0xd9   : > { %14048 = vst [vmem:[#allocation189_spill] sm:$0xff] %v14047_v33  ;;  %14053 = vst [vmem:[#allocation192_spill] sm:$0xff] %v6215_v37  ;;  %v14077_v37 = vunpack.c.0.s8 %v5414_v39  ;;  %v14406_v33 = vld [vmem:[#allocation112_spill] sm:$0xff]  ;;  %v14416_v12 = vmov 0 }
  0xda   : > { %14055 = vst [vmem:[#allocation193_spill] sm:$0xff] %v6219_v28  ;;  %14057 = vst [vmem:[#allocation194_spill] sm:$0xff] %v6223_v16  ;;  %v14075_v16 = vunpack.c.3.s8 %v5407_v40  ;;  %v14084_v40 = vmov 0 }
  0xdb   : > { %vm6229_vm4 = vmxor %vm14058_vm6, %vm13453_vm11  ;;  %vm14070_vm6 = vweird.f32 %v5659_v62  ;;  %14074 = vst [vmem:[#allocation199_spill] sm:$0xff] %v6255_v18  ;;  %v6263_v11 = vcvt.s32.f32 %v14077_v37  ;;  %v14081_v62 = vunpack.c.2.s8 %v5414_v39  ;;  %v14096_v37 = vmov 0 }
  0xdc   : > { %v14060_v42 = vsel %vm6229_vm4, 4294967295, %v14059_v42  ;;  %vm6236_vm8 = vmxor %vm14062_vm7, %vm13453_vm11  ;;  %v6259_v28 = vcvt.s32.f32 %v14075_v16  ;;  %vm14083_vm7 = vweird.f32 %v5678_v1  ;;  %v6303_v16 = vld [vmem:[%s5227_s27 + $0x1f8] sm:$0xff]  ;;  %14350 = vst [vmem:[#allocation269_spill] sm:$0xff] %v6766_v5  ;;  %v14437_v1 = vmov 0  ;;  %v636_v5 = vld [vmem:[%s5221_s23 + $0x10] sm:$0xff] }
  0xdd   : > { %14061 = vst [vmem:[#allocation195_spill] sm:$0xff] %v14060_v42  ;;  %v14064_v21 = vsel %vm6236_vm8, 4294967295, %v14063_v21  ;;  %vm6243_vm14 = vmxor %vm14066_vm0, %vm13453_vm11  ;;  %vm14091_vm8 = vweird.f32 %v5684_v24  ;;  %v6789_v42 = vld [vmem:[%s5227_s27 + $0x258] sm:$0xff] }
  0xde   : > { %14065 = vst [vmem:[#allocation196_spill] sm:$0xff] %v14064_v21  ;;  %v14068_v60 = vsel %vm6243_vm14, 4294967295, %v14067_v60  ;;  %vm6250_vm5 = vmxor %vm14070_vm6, %vm13453_vm11  ;;  %v6271_v21 = vcvt.s32.f32 %v14081_v62  ;;  %v14092_v62 = vmov 0 }
  0xdf   : > { %14069 = vst [vmem:[#allocation197_spill] sm:$0xff] %v14068_v60  ;;  %v14072_v55 = vsel %vm6250_vm5, 4294967295, %v14071_v55  ;;  %14076 = vst [vmem:[#allocation200_spill] sm:$0xff] %v6259_v28  ;;  %v6267_v60 = vcvt.s32.f32 %v14079_v26  ;;  %vm14087_vm5 = vweird.f32 %v5681_v31  ;;  %v14088_v26 = vmov 0 }
  0xe0   : > { %14073 = vst [vmem:[#allocation198_spill] sm:$0xff] %v14072_v55  ;;  %14078 = vst [vmem:[#allocation201_spill] sm:$0xff] %v6263_v11  ;;  %v14102_v11 = vld [vmem:[#allocation16_spill] sm:$0xff] }
  0xe1   : > { %14080 = vst [vmem:[#allocation202_spill] sm:$0xff] %v6267_v60  ;;  %14082 = vst [vmem:[#allocation203_spill] sm:$0xff] %v6271_v21  ;;  %v14100_v21 = vunpack.c.3.s8 %v5414_v39  ;;  %v14103_v28 = vunpack.c.0.s8 %v14102_v11  ;;  %v14110_v39 = vmov 0 }
  0xe2   : > { %vm6277_vm6 = vmxor %vm14083_vm7, %vm13453_vm11  ;;  %vm14095_vm7 = vweird.f32 %v5687_v23  ;;  %14099 = vst [vmem:[#allocation208_spill] sm:$0xff] %v6303_v16  ;;  %v14107_v23 = vunpack.c.2.s8 %v14102_v11 }
  0xe3   : > { %v14085_v40 = vsel %vm6277_vm6, 4294967295, %v14084_v40  ;;  %vm6284_vm14 = vmxor %vm14087_vm5, %vm13453_vm11  ;;  %v6307_v60 = vcvt.s32.f32 %v14100_v21  ;;  %v6311_v24 = vcvt.s32.f32 %v14103_v28  ;;  %vm14109_vm5 = vweird.f32 %v5709_v36  ;;  %14365 = vst [vmem:[#allocation270_spill] sm:$0xff] %v6789_v42 }
  0xe4   : > { %14086 = vst [vmem:[#allocation204_spill] sm:$0xff] %v14085_v40  ;;  %v14089_v26 = vsel %vm6284_vm14, 4294967295, %v14088_v26  ;;  %vm6291_vm4 = vmxor %vm14091_vm8, %vm13453_vm11  ;;  %v6319_v31 = vcvt.s32.f32 %v14107_v23  ;;  %v14114_v28 = vmov 0  ;;  %v14117_v23 = vld [vmem:[#allocation89_spill] sm:$0xff]  ;;  %v14119_v21 = vmov 0 }
  0xe5   : > { %14090 = vst [vmem:[#allocation205_spill] sm:$0xff] %v14089_v26  ;;  %v14093_v62 = vsel %vm6291_vm4, 4294967295, %v14092_v62  ;;  %vm6298_vm0 = vmxor %vm14095_vm7, %vm13453_vm11  ;;  %v14105_v26 = vunpack.c.1.s8 %v14102_v11  ;;  %vm14118_vm14 = vweird.f32 %v14117_v23 }
  0xe6   : > { %14094 = vst [vmem:[#allocation206_spill] sm:$0xff] %v14093_v62  ;;  %v14097_v37 = vsel %vm6298_vm0, 4294967295, %v14096_v37  ;;  %14101 = vst [vmem:[#allocation209_spill] sm:$0xff] %v6307_v60  ;;  %vm14113_vm0 = vweird.f32 %v5712_v19 }
  0xe7   : > { %14098 = vst [vmem:[#allocation207_spill] sm:$0xff] %v14097_v37  ;;  %14104 = vst [vmem:[#allocation16_spill] sm:$0xff] %v6311_v24  ;;  %v6315_v62 = vcvt.s32.f32 %v14105_v26  ;;  %v14122_v26 = vld [vmem:[#allocation90_spill] sm:$0xff]  ;;  %v14128_v24 = vunpack.c.3.s8 %v14102_v11  ;;  %v14145_v11 = vld [vmem:[#allocation97_spill] sm:$0xff] }
  0xe8   : > { %14108 = vst [vmem:[#allocation211_spill] sm:$0xff] %v6319_v31  ;;  %vm6325_vm7 = vmxor %vm14109_vm5, %vm13453_vm11  ;;  %vm14123_vm5 = vweird.f32 %v14122_v26  ;;  %v14124_v31 = vmov 0 }
  0xe9   : > { %14106 = vst [vmem:[#allocation210_spill] sm:$0xff] %v6315_v62  ;;  %v14111_v39 = vsel %vm6325_vm7, 4294967295, %v14110_v39  ;;  %vm6332_vm4 = vmxor %vm14113_vm0, %vm13453_vm11  ;;  %v6351_v62 = vld [vmem:[%s5227_s27 + $0x200] sm:$0xff]  ;;  %v6355_v60 = vcvt.s32.f32 %v14128_v24  ;;  %vm14137_vm0 = vweird.f32 %v5741_v41  ;;  %v14138_v24 = vmov 0 }
  0xea   : > { %14112 = vst [vmem:[#allocation212_spill] sm:$0xff] %v14111_v39  ;;  %v14115_v28 = vsel %vm6332_vm4, 4294967295, %v14114_v28  ;;  %vm6339_vm6 = vmxor %vm14118_vm14, %vm13453_vm11  ;;  %vm14146_vm4 = vweird.f32 %v14145_v11  ;;  %v14398_v27 = vld [vmem:[#allocation208_spill] sm:$0xff] }
  0xeb   : > { %14116 = vst [vmem:[#allocation213_spill] sm:$0xff] %v14115_v28  ;;  %v14120_v21 = vsel %vm6339_vm6, 4294967295, %v14119_v21  ;;  %vm6346_vm8 = vmxor %vm14123_vm5, %vm13453_vm11  ;;  %v14130_v28 = vld [vmem:[#allocation17_spill] sm:$0xff] }
  0xec   : > { %14121 = vst [vmem:[#allocation214_spill] sm:$0xff] %v14120_v21  ;;  %v14125_v31 = vsel %vm6346_vm8, 4294967295, %v14124_v31  ;;  %14127 = vst [vmem:[#allocation216_spill] sm:$0xff] %v6351_v62  ;;  %v14131_v19 = vunpack.c.0.s8 %v14130_v28  ;;  %v14133_v39 = vunpack.c.1.s8 %v14130_v28  ;;  %v14135_v26 = vunpack.c.2.s8 %v14130_v28 }
  0xed   : > { %14126 = vst [vmem:[#allocation215_spill] sm:$0xff] %v14125_v31  ;;  %14129 = vst [vmem:[#allocation217_spill] sm:$0xff] %v6355_v60  ;;  %vm14141_vm8 = vweird.f32 %v5744_v32  ;;  %v634_v31 = vld [vmem:[%s5221_s23] sm:$0xff] }
  0xee   : > { %v6359_v23 = vcvt.s32.f32 %v14131_v19  ;;  %v6363_v21 = vcvt.s32.f32 %v14133_v39  ;;  %v6367_v36 = vcvt.s32.f32 %v14135_v26  ;;  %vm6373_vm5 = vmxor %vm14137_vm0, %vm13453_vm11  ;;  %v14142_v19 = vmov 0  ;;  %v14150_v26 = vld [vmem:[#allocation98_spill] sm:$0xff]  ;;  %14381 = vst [vmem:[#allocation272_spill] sm:$0xff] %v6812_v15 }
  0xef   : > { %v14139_v24 = vsel %vm6373_vm5, 4294967295, %v14138_v24  ;;  %vm6380_vm6 = vmxor %vm14141_vm8, %vm13453_vm11  ;;  %v14147_v39 = vmov 0  ;;  %vm14151_vm0 = vweird.f32 %v14150_v26  ;;  %vm14165_vm8 = vweird.f32 %v5773_v46  ;;  %14397 = vst [vmem:[#allocation274_spill] sm:$0xff] %v6835_v43 }
  0xf0   : > { %14132 = vst [vmem:[#allocation17_spill] sm:$0xff] %v6359_v23  ;;  %14134 = vst [vmem:[#allocation218_spill] sm:$0xff] %v6363_v21  ;;  %v14143_v19 = vsel %vm6380_vm6, 4294967295, %v14142_v19  ;;  %v6399_v21 = vld [vmem:[%s5227_s27 + $0x208] sm:$0xff]  ;;  %v14156_v23 = vunpack.c.3.s8 %v14130_v28  ;;  %v14166_v28 = vmov 0 }
  0xf1   : > { %14136 = vst [vmem:[#allocation219_spill] sm:$0xff] %v6367_v36  ;;  %14140 = vst [vmem:[#allocation220_spill] sm:$0xff] %v14139_v24  ;;  %v14152_v36 = vmov 0 }
  0xf2   : > { %14144 = vst [vmem:[#allocation221_spill] sm:$0xff] %v14143_v19  ;;  %vm6387_vm7 = vmxor %vm14146_vm4, %vm13453_vm11  ;;  %v6403_v60 = vcvt.s32.f32 %v14156_v23  ;;  %v14158_v19 = vld [vmem:[#allocation18_spill] sm:$0xff]  ;;  %v14173_v23 = vld [vmem:[#allocation105_spill] sm:$0xff] }
  0xf3   : > { %v14148_v39 = vsel %vm6387_vm7, 4294967295, %v14147_v39  ;;  %vm6394_vm14 = vmxor %vm14151_vm0, %vm13453_vm11  ;;  %14155 = vst [vmem:[#allocation224_spill] sm:$0xff] %v6399_v21  ;;  %v14159_v32 = vunpack.c.0.s8 %v14158_v19  ;;  %v14161_v24 = vunpack.c.1.s8 %v14158_v19  ;;  %v14163_v26 = vunpack.c.2.s8 %v14158_v19 }
  0xf4   : > { %14149 = vst [vmem:[#allocation222_spill] sm:$0xff] %v14148_v39  ;;  %v14153_v36 = vsel %vm6394_vm14, 4294967295, %v14152_v36  ;;  %14157 = vst [vmem:[#allocation225_spill] sm:$0xff] %v6403_v60  ;;  %vm14169_vm14 = vweird.f32 %v5776_v7  ;;  %vm14174_vm6 = vweird.f32 %v14173_v23 }
  0xf5   : > { %14154 = vst [vmem:[#allocation223_spill] sm:$0xff] %v14153_v36  ;;  %v6407_v11 = vcvt.s32.f32 %v14159_v32  ;;  %v6411_v39 = vcvt.s32.f32 %v14161_v24  ;;  %v6415_v41 = vcvt.s32.f32 %v14163_v26  ;;  %vm6421_vm0 = vmxor %vm14165_vm8, %vm13453_vm11  ;;  %v14170_v32 = vmov 0  ;;  %v14178_v26 = vld [vmem:[#allocation106_spill] sm:$0xff]  ;;  %v14403_v36 = vld [vmem:[#allocation111_spill] sm:$0xff] }
  0xf6   : > { %v14167_v28 = vsel %vm6421_vm0, 4294967295, %v14166_v28  ;;  %vm6428_vm7 = vmxor %vm14169_vm14, %vm13453_vm11  ;;  %v14175_v24 = vmov 0  ;;  %vm14179_vm8 = vweird.f32 %v14178_v26  ;;  %vm14193_vm14 = vweird.f32 %v5805_v51  ;;  %14414 = vst [vmem:[#allocation111_spill] sm:$0xff] %v6858_v25 }
  0xf7   : > { %14160 = vst [vmem:[#allocation18_spill] sm:$0xff] %v6407_v11  ;;  %14162 = vst [vmem:[#allocation226_spill] sm:$0xff] %v6411_v39  ;;  %v14171_v32 = vsel %vm6428_vm7, 4294967295, %v14170_v32  ;;  %v6447_v39 = vld [vmem:[%s5227_s27 + $0x210] sm:$0xff]  ;;  %v14184_v11 = vunpack.c.3.s8 %v14158_v19  ;;  %v14194_v19 = vmov 0 }
  0xf8   : > { %14164 = vst [vmem:[#allocation227_spill] sm:$0xff] %v6415_v41  ;;  %14168 = vst [vmem:[#allocation228_spill] sm:$0xff] %v14167_v28  ;;  %v14180_v41 = vmov 0 }
  0xf9   : > { %14172 = vst [vmem:[#allocation229_spill] sm:$0xff] %v14171_v32  ;;  %vm6435_vm5 = vmxor %vm14174_vm6, %vm13453_vm11  ;;  %v6451_v60 = vcvt.s32.f32 %v14184_v11  ;;  %v14186_v32 = vld [vmem:[#allocation19_spill] sm:$0xff]  ;;  %v14201_v11 = vld [vmem:[#allocation113_spill] sm:$0xff] }
  0xfa   : > { %v14176_v24 = vsel %vm6435_vm5, 4294967295, %v14175_v24  ;;  %vm6442_vm4 = vmxor %vm14179_vm8, %vm13453_vm11  ;;  %14183 = vst [vmem:[#allocation232_spill] sm:$0xff] %v6447_v39  ;;  %v14187_v7 = vunpack.c.0.s8 %v14186_v32  ;;  %v14189_v28 = vunpack.c.1.s8 %v14186_v32  ;;  %v14191_v26 = vunpack.c.2.s8 %v14186_v32 }
  0xfb   : > { %14177 = vst [vmem:[#allocation230_spill] sm:$0xff] %v14176_v24  ;;  %v14181_v41 = vsel %vm6442_vm4, 4294967295, %v14180_v41  ;;  %14185 = vst [vmem:[#allocation233_spill] sm:$0xff] %v6451_v60  ;;  %vm14197_vm4 = vweird.f32 %v5808_v3  ;;  %vm14202_vm7 = vweird.f32 %v14201_v11  ;;  %v14213_v60 = vunpack.c.3.s8 %v14186_v32  ;;  %v14215_v11 = vld [vmem:[#allocation20_spill] sm:$0xff]  ;;  %v14230_v32 = vld [vmem:[#allocation125_spill] sm:$0xff] }
  0xfc   : > { %14182 = vst [vmem:[#allocation231_spill] sm:$0xff] %v14181_v41  ;;  %v6455_v23 = vcvt.s32.f32 %v14187_v7  ;;  %v6459_v24 = vcvt.s32.f32 %v14189_v28  ;;  %v6463_v46 = vcvt.s32.f32 %v14191_v26  ;;  %vm6469_vm8 = vmxor %vm14193_vm14, %vm13453_vm11  ;;  %v14198_v7 = vmov 0  ;;  %v14206_v26 = vld [vmem:[#allocation118_spill] sm:$0xff] }
  0xfd   : > { %v14195_v19 = vsel %vm6469_vm8, 4294967295, %v14194_v19  ;;  %vm6476_vm5 = vmxor %vm14197_vm4, %vm13453_vm11  ;;  %v14203_v28 = vmov 0  ;;  %vm14207_vm14 = vweird.f32 %v14206_v26  ;;  %v14216_v3 = vunpack.c.0.s8 %v14215_v11 }
  0xfe   : > { %14188 = vst [vmem:[#allocation19_spill] sm:$0xff] %v6455_v23  ;;  %14190 = vst [vmem:[#allocation234_spill] sm:$0xff] %v6459_v24  ;;  %v14199_v7 = vsel %vm6476_vm5, 4294967295, %v14198_v7  ;;  %v6495_v24 = vld [vmem:[%s5227_s27 + $0x218] sm:$0xff]  ;;  %v6498_v23 = vld [vmem:[%s5227_s27 + $0x220] sm:$0xff]  ;;  %v14220_v26 = vunpack.c.2.s8 %v14215_v11  ;;  %vm14222_vm4 = vweird.f32 %v5837_v56  ;;  %vm14231_vm5 = vweird.f32 %v14230_v32 }
  0xff   : > { %14192 = vst [vmem:[#allocation235_spill] sm:$0xff] %v6463_v46  ;;  %14196 = vst [vmem:[#allocation236_spill] sm:$0xff] %v14195_v19  ;;  %v14208_v46 = vmov 0  ;;  %v6506_v19 = vcvt.s32.f32 %v14216_v3  ;;  %v14227_v3 = vmov 0  ;;  %v14425_v41 = vmov 0 }
 0x100   : > { %14200 = vst [vmem:[#allocation237_spill] sm:$0xff] %v14199_v7  ;;  %vm6483_vm0 = vmxor %vm14202_vm7, %vm13453_vm11  ;;  %v6502_v7 = vcvt.s32.f32 %v14213_v60  ;;  %v6514_v16 = vcvt.s32.f32 %v14220_v26  ;;  %v14223_v60 = vmov 0  ;;  %v14236_v26 = vmov 0 }
 0x101   : > { %v14204_v28 = vsel %vm6483_vm0, 4294967295, %v14203_v28  ;;  %vm6490_vm6 = vmxor %vm14207_vm14, %vm13453_vm11  ;;  %14211 = vst [vmem:[#allocation240_spill] sm:$0xff] %v6495_v24  ;;  %v14446_v56 = vmov 0  ;;  %v14481_v32 = vmov 0 }
 0x102   : > { %14205 = vst [vmem:[#allocation238_spill] sm:$0xff] %v14204_v28  ;;  %v14209_v46 = vsel %vm6490_vm6, 4294967295, %v14208_v46  ;;  %14212 = vst [vmem:[#allocation241_spill] sm:$0xff] %v6498_v23  ;;  %v14218_v28 = vunpack.c.1.s8 %v14215_v11  ;;  %vm14226_vm6 = vweird.f32 %v5840_v13  ;;  %v14462_v13 = vmov 0 }
 0x103   : > { %14210 = vst [vmem:[#allocation239_spill] sm:$0xff] %v14209_v46  ;;  %14214 = vst [vmem:[#allocation242_spill] sm:$0xff] %v6502_v7  ;;  %v14246_v7 = vmov 0  ;;  %v6881_v46 = vld [vmem:[%s5227_s27 + $0x278] sm:$0xff] }
 0x104   : > { %14217 = vst [vmem:[#allocation20_spill] sm:$0xff] %v6506_v19  ;;  %v6510_v51 = vcvt.s32.f32 %v14218_v28  ;;  %14221 = vst [vmem:[#allocation244_spill] sm:$0xff] %v6514_v16  ;;  %v14232_v28 = vmov 0  ;;  %v14239_v16 = vunpack.c.3.s8 %v14215_v11  ;;  %v14242_v19 = vmov 0 }
 0x105   : > { %vm6520_vm14 = vmxor %vm14222_vm4, %vm13453_vm11  ;;  %vm14235_vm4 = vweird.f32 %v5866_v61  ;;  %v14254_v11 = vmov 0  ;;  %14423 = vst [vmem:[#allocation112_spill] sm:$0xff] %v6881_v46  ;;  %v637_v61 = vld [vmem:[%s5221_s23 + $0x18] sm:$0xff] }
 0x106   : > { %14219 = vst [vmem:[#allocation243_spill] sm:$0xff] %v6510_v51  ;;  %v14224_v60 = vsel %vm6520_vm14, 4294967295, %v14223_v60  ;;  %vm6527_vm0 = vmxor %vm14226_vm6, %vm13453_vm11  ;;  %v6547_v51 = vcvt.s32.f32 %v14239_v16  ;;  %v14250_v16 = vmov 0  ;;  %v14404_v40 = vld [vmem:[#allocation236_spill] sm:$0xff] }
 0x107   : > { %14225 = vst [vmem:[#allocation245_spill] sm:$0xff] %v14224_v60  ;;  %v14228_v3 = vsel %vm6527_vm0, 4294967295, %v14227_v3  ;;  %vm6534_vm8 = vmxor %vm14231_vm5, %vm13453_vm11  ;;  %vm14241_vm0 = vweird.f32 %v5869_v30  ;;  %v14407_v55 = vld [vmem:[#allocation237_spill] sm:$0xff]  ;;  %v6904_v60 = vld [vmem:[%s5227_s27 + $0x280] sm:$0xff] }
 0x108   : > { %14229 = vst [vmem:[#allocation246_spill] sm:$0xff] %v14228_v3  ;;  %v14233_v28 = vsel %vm6534_vm8, 4294967295, %v14232_v28  ;;  %vm6541_vm7 = vmxor %vm14235_vm4, %vm13453_vm11  ;;  %vm14245_vm8 = vweird.f32 %v5892_v35  ;;  %v14282_v35 = vmov 0  ;;  %v635_v30 = vld [vmem:[%s5221_s23 + $0x8] sm:$0xff]  ;;  %v638_v3 = vld [vmem:[%s5221_s23 + $0x20] sm:$0xff] }
 0x109   : > { %14234 = vst [vmem:[#allocation247_spill] sm:$0xff] %v14233_v28  ;;  %v14237_v26 = vsel %vm6541_vm7, 4294967295, %v14236_v26  ;;  %14240 = vst [vmem:[#allocation249_spill] sm:$0xff] %v6547_v51  ;;  %vm14249_vm7 = vweird.f32 %v5895_v53  ;;  %v14262_v51 = vmov 0  ;;  %v14266_v53 = vmov 0  ;;  %v14410_v37 = vld [vmem:[#allocation238_spill] sm:$0xff] }
 0x10a   : > { %14238 = vst [vmem:[#allocation248_spill] sm:$0xff] %v14237_v26  ;;  %vm6553_vm5 = vmxor %vm14241_vm0, %vm13453_vm11  ;;  %vm14253_vm0 = vweird.f32 %v5898_v58  ;;  %v6591_v58 = vld [vmem:[%s5227_s27 + $0x228] sm:$0xff]  ;;  %v14470_v26 = vmov 0 }
 0x10b   : > { %v14243_v19 = vsel %vm6553_vm5, 4294967295, %v14242_v19  ;;  %vm6560_vm4 = vmxor %vm14245_vm8, %vm13453_vm11  ;;  %14260 = vst [vmem:[#allocation254_spill] sm:$0xff] %v6591_v58 }
 0x10c   : > { %14244 = vst [vmem:[#allocation250_spill] sm:$0xff] %v14243_v19  ;;  %v14247_v7 = vsel %vm6560_vm4, 4294967295, %v14246_v7  ;;  %vm6567_vm14 = vmxor %vm14249_vm7, %vm13453_vm11  ;;  %vm14261_vm7 = vweird.f32 %v5921_v38  ;;  %v14273_v19 = vmov 0 }
 0x10d   : > { %14248 = vst [vmem:[#allocation251_spill] sm:$0xff] %v14247_v7  ;;  %v14251_v16 = vsel %vm6567_vm14, 4294967295, %v14250_v16  ;;  %vm6574_vm6 = vmxor %vm14253_vm0, %vm13453_vm11  ;;  %v14309_v7 = vmov 0 }
 0x10e   : > { %14252 = vst [vmem:[#allocation252_spill] sm:$0xff] %v14251_v16  ;;  %v14255_v11 = vsel %vm6574_vm6, 4294967295, %v14254_v11  ;;  %vm6597_vm0 = vmxor %vm14261_vm7, %vm13453_vm11  ;;  %v14269_v16 = vmov 0  ;;  %vm14272_vm7 = vweird.f32 %v5950_v50  ;;  %v14289_v50 = vmov 0 }
 0x10f   : > { %14256 = vst [vmem:[#allocation253_spill] sm:$0xff] %v14255_v11  ;;  %v14263_v51 = vsel %vm6597_vm0, 4294967295, %v14262_v51  ;;  %vm6604_vm10 = vmxor %vm14265_vm9, %vm13453_vm11 }
 0x110   : > { %14264 = vst [vmem:[#allocation255_spill] sm:$0xff] %v14263_v51  ;;  %v14267_v53 = vsel %vm6604_vm10, 4294967295, %v14266_v53  ;;  %vm6611_vm6 = vmxor %vm14268_vm15, %vm13453_vm11  ;;  %vm14281_vm15 = vweird.f32 %v5953_v9  ;;  %v6930_v51 = vld [vmem:[%s5227_s27 + $0x288] sm:$0xff] }
 0x111   : > { %v14270_v16 = vsel %vm6611_vm6, 4294967295, %v14269_v16  ;;  %vm6618_vm8 = vmxor %vm14272_vm7, %vm13453_vm11  ;;  %14435 = vst [vmem:[#allocation113_spill] sm:$0xff] %v6904_v60  ;;  %vm14454_vm6 = vweird.f32 %v6498_v23 }
 0x112   : > { %14271 = vst [vmem:[#allocation256_spill] sm:$0xff] %v14270_v16  ;;  %v14274_v19 = vsel %vm6618_vm8, 4294967295, %v14273_v19  ;;  %vm6645_vm7 = vmxor %vm14281_vm15, %vm13453_vm11  ;;  %v14286_v16 = vmov 0  ;;  %vm14292_vm15 = vweird.f32 %v5982_v29  ;;  %v6683_v29 = vld [vmem:[%s5227_s27 + $0x238] sm:$0xff] }
 0x113   : > { %14275 = vst [vmem:[#allocation257_spill] sm:$0xff] %v14274_v19  ;;  %v6639_v19 = vld [vmem:[%s5227_s27 + $0x230] sm:$0xff]  ;;  %v14283_v35 = vsel %vm6645_vm7, 4294967295, %v14282_v35  ;;  %vm6652_vm12 = vmxor %vm14285_vm2, %vm13453_vm11  ;;  %vm14308_vm2 = vweird.f32 %v6008_v48  ;;  %vm14453_vm7 = vmmov 1  }
 0x114   : > { %14280 = vst [vmem:[#allocation258_spill] sm:$0xff] %v6639_v19  ;;  %14284 = vst [vmem:[#allocation259_spill] sm:$0xff] %v14283_v35  ;;  %v14287_v16 = vsel %vm6652_vm12, 4294967295, %v14286_v16  ;;  %v6956_v35 = vld [vmem:[%s5227_s27 + $0x290] sm:$0xff]  ;;  %vm14469_vm0 = vweird.f32 %v6639_v19 }
 0x115   : > { %vm6659_vm13 = vmxor %vm14288_vm3, %vm13453_vm11  ;;  %14303 = vst [vmem:[#allocation262_spill] sm:$0xff] %v6683_v29 }
 0x116   : > { %v14290_v50 = vsel %vm6659_vm13, 4294967295, %v14289_v50  ;;  %vm6666_vm9 = vmxor %vm14292_vm15, %vm13453_vm11  ;;  %vm14311_vm13 = vweird.f32 %v6011_v8  ;;  %vm14337_vm15 = vweird.f32 %v6106_v54  ;;  %14444 = vst [vmem:[#allocation276_spill] sm:$0xff] %v6930_v51  ;;  %v644_v8 = vld [vmem:[%s5221_s23 + $0x50] sm:$0xff] }
 0x117   : > { %14291 = vst [vmem:[#allocation260_spill] sm:$0xff] %v14290_v50  ;;  %v14294_v10 = vsel %vm6666_vm9, 4294967295, %v14293_v10  ;;  %vm6689_vm9 = vmxor %vm14304_vm1, %vm13453_vm11  ;;  %vm14324_vm1 = vweird.f32 %v6055_v34  ;;  %v642_v50 = vld [vmem:[%s5221_s23 + $0x40] sm:$0xff]  ;;  %v14484_v34 = vld [vmem:[#allocation161_spill] sm:$0xff] }
 0x118   : > { %14295 = vst [vmem:[#allocation261_spill] sm:$0xff] %v14294_v10  ;;  %v14306_v2 = vsel %vm6689_vm9, 4294967295, %v14305_v2  ;;  %vm6696_vm3 = vmxor %vm14308_vm2, %vm13453_vm11  ;;  %vm14351_vm2 = vweird.f32 %v6157_v0  ;;  %v640_v10 = vld [vmem:[%s5221_s23 + $0x30] sm:$0xff] }
 0x119   : > { %14307 = vst [vmem:[#allocation263_spill] sm:$0xff] %v14306_v2  ;;  %v14310_v7 = vsel %vm6696_vm3, 4294967295, %v14309_v7  ;;  %vm6703_vm12 = vmxor %vm14311_vm13, %vm13453_vm11  ;;  %vm14366_vm3 = vweird.f32 %v6207_v6  ;;  %vm14382_vm13 = vweird.f32 %v6255_v18  ;;  %v6982_v2 = vld [vmem:[%s5227_s27 + $0x298] sm:$0xff]  ;;  %v647_v6 = vld [vmem:[%s5221_s23 + $0x68] sm:$0xff] }
 0x11a   : > { %v14313_v45 = vsel %vm6703_vm12, 4294967295, %v14312_v45  ;;  %vm6726_vm12 = vmxor %vm14324_vm1, %vm13453_vm11  ;;  %vm14399_vm1 = vweird.f32 %v14398_v27  ;;  %v14486_v18 = vld [vmem:[#allocation40_spill] sm:$0xff] }
 0x11b   : > { %14314 = vst [vmem:[#allocation264_spill] sm:$0xff] %v14313_v45  ;;  %v14326_v17 = vsel %vm6726_vm12, 4294967295, %v14325_v17  ;;  %vm6749_vm12 = vmxor %vm14337_vm15, %vm13453_vm11  ;;  %vm14415_vm15 = vweird.f32 %v6351_v62  ;;  %v645_v45 = vld [vmem:[%s5221_s23 + $0x58] sm:$0xff]  ;;  %v14496_v62 = vld [vmem:[#allocation42_spill] sm:$0xff] }
 0x11c   : > { %14327 = vst [vmem:[#allocation266_spill] sm:$0xff] %v14326_v17  ;;  %v14339_v20 = vsel %vm6749_vm12, 4294967295, %v14338_v20  ;;  %vm6772_vm12 = vmxor %vm14351_vm2, %vm13453_vm11  ;;  %vm14424_vm2 = vweird.f32 %v6399_v21  ;;  %v643_v17 = vld [vmem:[%s5221_s23 + $0x48] sm:$0xff]  ;;  %v650_v21 = vld [vmem:[%s5221_s23 + $0x80] sm:$0xff] }
 0x11d   : > { %14340 = vst [vmem:[#allocation268_spill] sm:$0xff] %v14339_v20  ;;  %v14353_v47 = vsel %vm6772_vm12, 4294967295, %v14352_v47  ;;  %vm6795_vm12 = vmxor %vm14366_vm3, %vm13453_vm11  ;;  %v7008_v20 = vld [vmem:[%s5227_s27 + $0x2a0] sm:$0xff] }
 0x11e   : > { %v14368_v4 = vsel %vm6795_vm12, 4294967295, %v14367_v4  ;;  %vm6818_vm12 = vmxor %vm14382_vm13, %vm13453_vm11  ;;  %vm14421_vm13 = vnez %v14233_v28  ;;  %v14476_v28 = vmov 0 }
 0x11f   : > { %14369 = vst [vmem:[#allocation271_spill] sm:$0xff] %v14368_v4  ;;  %v14384_v22 = vsel %vm6818_vm12, 4294967295, %v14383_v22  ;;  %vm6841_vm12 = vmxor %vm14399_vm1, %vm13453_vm11  ;;  %vm14436_vm1 = vweird.f32 %v6447_v39  ;;  %v648_v4 = vld [vmem:[%s5221_s23 + $0x70] sm:$0xff] }
 0x120   : > { %14385 = vst [vmem:[#allocation273_spill] sm:$0xff] %v14384_v22  ;;  %v14401_v57 = vsel %vm6841_vm12, 4294967295, %v14400_v57  ;;  %vm6864_vm12 = vmxor %vm14415_vm15, %vm13453_vm11  ;;  %vm14434_vm15 = vnez %v14255_v11  ;;  %v14455_v11 = vmov 0  ;;  %v652_v39 = vld [vmem:[%s5221_s23 + $0x90] sm:$0xff] }
 0x121   : > { %14402 = vst [vmem:[#allocation275_spill] sm:$0xff] %v14401_v57  ;;  %v14417_v12 = vsel %vm6864_vm12, 4294967295, %v14416_v12  ;;  %vm6887_vm3 = vmxor %vm14424_vm2, %vm13453_vm11  ;;  %vm14445_vm2 = vweird.f32 %v6495_v24  ;;  %vm14473_vm9 = vnez %v14401_v57  ;;  %v7034_v57 = vld [vmem:[%s5227_s27 + $0x2a8] sm:$0xff]  ;;  %v14494_v24 = vld [vmem:[#allocation163_spill] sm:$0xff] }
 0x122   : > { %14418 = vst [vmem:[#allocation236_spill] sm:$0xff] %v14417_v12  ;;  %v14426_v41 = vsel %vm6887_vm3, 4294967295, %v14425_v41  ;;  %vm6910_vm5 = vmxor %vm14436_vm1, %vm13453_vm11  ;;  %vm14461_vm1 = vweird.f32 %v6591_v58  ;;  %v14489_v58 = vld [vmem:[#allocation162_spill] sm:$0xff] }
 0x123   : > { %14427 = vst [vmem:[#allocation237_spill] sm:$0xff] %v14426_v41  ;;  %v14438_v1 = vsel %vm6910_vm5, 4294967295, %v14437_v1  ;;  %vm6936_vm10 = vmxor %vm14445_vm2, %vm13453_vm11  ;;  %vm14475_vm11 = vweird.f32 %v6683_v29  ;;  %v651_v41 = vld [vmem:[%s5221_s23 + $0x88] sm:$0xff]  ;;  %v654_v29 = vld [vmem:[%s5221_s23 + $0xa0] sm:$0xff] }
 0x124   : > { %14439 = vst [vmem:[#allocation238_spill] sm:$0xff] %v14438_v1  ;;  %v14447_v56 = vsel %vm6936_vm10, 4294967295, %v14446_v56  ;;  %vm6962_vm8 = vmxor %vm14454_vm6, %vm14453_vm7  ;;  %v649_v1 = vld [vmem:[%s5221_s23 + $0x78] sm:$0xff] }
 0x125   : > { %14448 = vst [vmem:[#allocation277_spill] sm:$0xff] %v14447_v56  ;;  %v14456_v11 = vsel %vm6962_vm8, 4294967295, %v14455_v11  ;;  %vm6988_vm2 = vmxor %vm14461_vm1, %vm14453_vm7  ;;  %vm14468_vm1 = vnez %v14384_v22  ;;  %v646_v22 = vld [vmem:[%s5221_s23 + $0x60] sm:$0xff]  ;;  %v7060_v56 = vld [vmem:[%s5227_s27 + $0x2b0] sm:$0xff] }
 0x126   : > { %14457 = vst [vmem:[#allocation278_spill] sm:$0xff] %v14456_v11  ;;  %v14463_v13 = vsel %vm6988_vm2, 4294967295, %v14462_v13  ;;  %vm7014_vm6 = vmxor %vm14469_vm0, %vm14453_vm7  ;;  %vm14480_vm0 = vweird.f32 %v6720_v44  ;;  %v657_v44 = vld [vmem:[%s5221_s23 + $0xb8] sm:$0xff] }
 0x127   : > { %14464 = vst [vmem:[#allocation279_spill] sm:$0xff] %v14463_v13  ;;  %v14471_v26 = vsel %vm7014_vm6, 4294967295, %v14470_v26  ;;  %14474 = vst [vmem:[#allocation281_spill] sm:$0xff] %v7034_v57  ;;  %vm14485_vm6 = vnez %v14484_v34  ;;  %v14491_v13 = vld [vmem:[#allocation41_spill] sm:$0xff]  ;;  %v653_v34 = vld [vmem:[%s5221_s23 + $0x98] sm:$0xff] }
 0x128   : > { %14472 = vst [vmem:[#allocation280_spill] sm:$0xff] %v14471_v26  ;;  %vm7040_vm12 = vmxor %vm14475_vm11, %vm14453_vm7  ;;  %v14487_v19 = vsel %vm14485_vm6, %v14486_v18, 0.0  ;;  %vm14490_vm11 = vnez %v14489_v58  ;;  %v7095_v18 = vld [vmem:[%s5227_s27 + $0x2b8] sm:$0xff] }
 0x129   : > { %v14477_v28 = vsel %vm7040_vm12, 4294967295, %v14476_v28  ;;  %14479 = vst [vmem:[#allocation283_spill] sm:$0xff] %v7060_v56  ;;  %vm7066_vm8 = vmxor %vm14480_vm0, %vm14453_vm7  ;;  %v7077_v26 = vsub.f32 %v634_v31, %v14487_v19  ;;  %v14492_v23 = vsel %vm14490_vm11, %v14491_v13, 0.0  ;;  %vm14495_vm0 = vnez %v14494_v24  ;;  %v14500_v31 = vld [vmem:[#allocation267_spill] sm:$0xff]  ;;  %v14510_v24 = vld [vmem:[#allocation170_spill] sm:$0xff] }
 0x12a   : > { %14478 = vst [vmem:[#allocation282_spill] sm:$0xff] %v14477_v28  ;;  %v14482_v32 = vsel %vm7066_vm8, 4294967295, %v14481_v32  ;;  %v7083_v11 = vsub.f32 %v635_v30, %v14492_v23  ;;  %v14497_v28 = vsel %vm14495_vm0, %v14496_v62, 0.0  ;;  %14499 = vst [vmem:[#allocation41_spill] sm:$0xff] %v7095_v18  ;;  %vm14501_vm12 = vweird.f32 %v14500_v31  ;;  %v14505_v30 = vld [vmem:[#allocation169_spill] sm:$0xff]  ;;  %v14507_v58 = vld [vmem:[#allocation47_spill] sm:$0xff] }
 0x12b   : > { %14483 = vst [vmem:[#allocation284_spill] sm:$0xff] %v14482_v32  ;;  %14488 = vst [vmem:[#allocation161_spill] sm:$0xff] %v7077_v26  ;;  %v7089_v12 = vsub.f32 %v636_v5, %v14497_v28  ;;  %v14502_v13 = vmov 0  ;;  %vm14506_vm0 = vnez %v14505_v30  ;;  %vm14511_vm6 = vnez %v14510_v24  ;;  %v14512_v19 = vld [vmem:[#allocation48_spill] sm:$0xff]  ;;  %v14517_v26 = vld [vmem:[#allocation49_spill] sm:$0xff] }
 0x12c   : > { %14493 = vst [vmem:[#allocation40_spill] sm:$0xff] %v7083_v11  ;;  %vm7101_vm11 = vmxor %vm14501_vm12, %vm14453_vm7  ;;  %v14508_v62 = vsel %vm14506_vm0, %v14507_v58, 0.0  ;;  %v14513_v28 = vsel %vm14511_vm6, %v14512_v19, 0.0  ;;  %v14515_v11 = vld [vmem:[#allocation171_spill] sm:$0xff]  ;;  %v655_v5 = vld [vmem:[%s5221_s23 + $0xa8] sm:$0xff] }
 0x12d   : > { %14498 = vst [vmem:[#allocation162_spill] sm:$0xff] %v7089_v12  ;;  %v14503_v13 = vsel %vm7101_vm11, 4294967295, %v14502_v13  ;;  %v7112_v23 = vsub.f32 %v637_v61, %v14508_v62  ;;  %v7118_v12 = vsub.f32 %v638_v3, %v14513_v28  ;;  %vm14516_vm12 = vnez %v14515_v11  ;;  %v656_v30 = vld [vmem:[%s5221_s23 + $0xb0] sm:$0xff]  ;;  %v7130_v58 = vld [vmem:[%s5227_s27 + $0x2c0] sm:$0xff]  ;;  %v14520_v61 = vld [vmem:[#allocation269_spill] sm:$0xff] }
 0x12e   : > { %14504 = vst [vmem:[#allocation163_spill] sm:$0xff] %v14503_v13  ;;  %v14518_v32 = vsel %vm14516_vm12, %v14517_v26, 0.0  ;;  %vm14521_vm8 = vweird.f32 %v14520_v61  ;;  %v14522_v3 = vmov 0  ;;  %v14527_v26 = vld [vmem:[#allocation50_spill] sm:$0xff]  ;;  %v14530_v24 = vld [vmem:[#allocation177_spill] sm:$0xff]  ;;  %v14532_v19 = vld [vmem:[#allocation55_spill] sm:$0xff]  ;;  %vm14540_vm11 = vweird.f32 %v6789_v42 }
 0x12f   : > { %14509 = vst [vmem:[#allocation42_spill] sm:$0xff] %v7112_v23  ;;  %14514 = vst [vmem:[#allocation169_spill] sm:$0xff] %v7118_v12  ;;  %v7124_v27 = vsub.f32 %v639_v52, %v14518_v32  ;;  %v14525_v32 = vld [vmem:[#allocation172_spill] sm:$0xff]  ;;  %vm14531_vm0 = vnez %v14530_v24  ;;  %v14535_v12 = vld [vmem:[#allocation178_spill] sm:$0xff] }
 0x130   : > { %vm7136_vm6 = vmxor %vm14521_vm8, %vm14453_vm7  ;;  %vm14526_vm12 = vnez %v14525_v32  ;;  %v14533_v28 = vsel %vm14531_vm0, %v14532_v19, 0.0  ;;  %vm14536_vm8 = vnez %v14535_v12  ;;  %v14537_v23 = vld [vmem:[#allocation56_spill] sm:$0xff]  ;;  %v659_v32 = vld [vmem:[%s5221_s23 + $0xc8] sm:$0xff] }
 0x131   : > { %14519 = vst [vmem:[#allocation47_spill] sm:$0xff] %v7124_v27  ;;  %v14523_v3 = vsel %vm7136_vm6, 4294967295, %v14522_v3  ;;  %v14528_v11 = vsel %vm14526_vm12, %v14527_v26, 0.0  ;;  %v7153_v27 = vsub.f32 %v641_v49, %v14533_v28  ;;  %v14538_v13 = vsel %vm14536_vm8, %v14537_v23, 0.0  ;;  %v658_v52 = vld [vmem:[%s5221_s23 + $0xc0] sm:$0xff]  ;;  %v660_v31 = vld [vmem:[%s5221_s23 + $0xd0] sm:$0xff]  ;;  %vm7171_vm0 = vmxor %vm14540_vm11, %vm14453_vm7 }
 0x132   : > { %14524 = vst [vmem:[#allocation170_spill] sm:$0xff] %v14523_v3  ;;  %v7147_v62 = vsub.f32 %v640_v10, %v14528_v11  ;;  %v7159_v0 = vsub.f32 %v642_v50, %v14538_v13  ;;  %v7165_v26 = vld [vmem:[%s5227_s27 + $0x2c8] sm:$0xff]  ;;  %v14541_v49 = vmov 0  ;;  %v14544_v50 = vld [vmem:[#allocation179_spill] sm:$0xff]  ;;  %v14549_v11 = vld [vmem:[#allocation180_spill] sm:$0xff]  ;;  %vm14559_vm6 = vweird.f32 %v6812_v15 }
 0x133   : > { %14534 = vst [vmem:[#allocation171_spill] sm:$0xff] %v7153_v27  ;;  %v14542_v49 = vsel %vm7171_vm0, 4294967295, %v14541_v49  ;;  %vm14545_vm8 = vnez %v14544_v50  ;;  %v14546_v10 = vld [vmem:[#allocation57_spill] sm:$0xff]  ;;  %vm14550_vm12 = vnez %v14549_v11  ;;  %v14551_v24 = vld [vmem:[#allocation58_spill] sm:$0xff]  ;;  %v14556_v27 = vld [vmem:[#allocation63_spill] sm:$0xff]  ;;  %vm14578_vm0 = vweird.f32 %v6835_v43 }
 0x134   : > { %14529 = vst [vmem:[#allocation48_spill] sm:$0xff] %v7147_v62  ;;  %14539 = vst [vmem:[#allocation49_spill] sm:$0xff] %v7159_v0  ;;  %v14547_v13 = vsel %vm14545_vm8, %v14546_v10, 0.0  ;;  %v14552_v19 = vsel %vm14550_vm12, %v14551_v24, 0.0  ;;  %v14554_v0 = vld [vmem:[#allocation186_spill] sm:$0xff]  ;;  %v661_v12 = vld [vmem:[%s5221_s23 + $0xd8] sm:$0xff] }
 0x135   : > { %14543 = vst [vmem:[#allocation172_spill] sm:$0xff] %v14542_v49  ;;  %v7182_v23 = vsub.f32 %v643_v17, %v14547_v13  ;;  %v7188_v28 = vsub.f32 %v644_v8, %v14552_v19  ;;  %vm14555_vm11 = vnez %v14554_v0  ;;  %v662_v50 = vld [vmem:[%s5221_s23 + $0xe0] sm:$0xff]  ;;  %v663_v61 = vld [vmem:[%s5221_s23 + $0xe8] sm:$0xff]  ;;  %v7200_v10 = vld [vmem:[%s5227_s27 + $0x2d0] sm:$0xff]  ;;  %v14560_v17 = vmov 0 }
 0x136   : > { %v14557_v62 = vsel %vm14555_vm11, %v14556_v27, 0.0  ;;  %vm7206_vm12 = vmxor %vm14559_vm6, %vm14453_vm7  ;;  %v14565_v27 = vld [vmem:[#allocation64_spill] sm:$0xff]  ;;  %v14570_v11 = vld [vmem:[#allocation65_spill] sm:$0xff] }
 0x137   : > { %14548 = vst [vmem:[#allocation50_spill] sm:$0xff] %v7182_v23  ;;  %14553 = vst [vmem:[#allocation177_spill] sm:$0xff] %v7188_v28  ;;  %v7194_v3 = vsub.f32 %v645_v45, %v14557_v62  ;;  %v14561_v17 = vsel %vm7206_vm12, 4294967295, %v14560_v17  ;;  %v14563_v45 = vld [vmem:[#allocation187_spill] sm:$0xff]  ;;  %v14568_v13 = vld [vmem:[#allocation188_spill] sm:$0xff]  ;;  %vm14597_vm12 = vweird.f32 %v6858_v25 }
 0x138   : > { %14562 = vst [vmem:[#allocation178_spill] sm:$0xff] %v14561_v17  ;;  %vm14564_vm11 = vnez %v14563_v45  ;;  %vm14569_vm8 = vnez %v14568_v13  ;;  %v14575_v28 = vld [vmem:[#allocation66_spill] sm:$0xff]  ;;  %v665_v45 = vld [vmem:[%s5221_s23 + $0xf8] sm:$0xff]  ;;  %v666_v42 = vld [vmem:[%s5221_s23 + $0x100] sm:$0xff] }
 0x139   : > { %14558 = vst [vmem:[#allocation55_spill] sm:$0xff] %v7194_v3  ;;  %v14566_v0 = vsel %vm14564_vm11, %v14565_v27, 0.0  ;;  %v14571_v24 = vsel %vm14569_vm8, %v14570_v11, 0.0  ;;  %v14573_v3 = vld [vmem:[#allocation189_spill] sm:$0xff]  ;;  %v664_v8 = vld [vmem:[%s5221_s23 + $0xf0] sm:$0xff]  ;;  %v7235_v27 = vld [vmem:[%s5227_s27 + $0x2d8] sm:$0xff] }
 0x13a   : > { %v7217_v62 = vsub.f32 %v646_v22, %v14566_v0  ;;  %v7223_v19 = vsub.f32 %v647_v6, %v14571_v24  ;;  %vm14574_vm6 = vnez %v14573_v3  ;;  %vm7241_vm8 = vmxor %vm14578_vm0, %vm14453_vm7  ;;  %v14579_v22 = vmov 0  ;;  %v14582_v6 = vld [vmem:[#allocation195_spill] sm:$0xff]  ;;  %v14587_v0 = vld [vmem:[#allocation196_spill] sm:$0xff] }
 0x13b   : > { %v14576_v23 = vsel %vm14574_vm6, %v14575_v28, 0.0  ;;  %v14580_v22 = vsel %vm7241_vm8, 4294967295, %v14579_v22  ;;  %vm14583_vm6 = vnez %v14582_v6  ;;  %v14584_v3 = vld [vmem:[#allocation71_spill] sm:$0xff]  ;;  %vm14588_vm11 = vnez %v14587_v0  ;;  %v14589_v13 = vld [vmem:[#allocation72_spill] sm:$0xff]  ;;  %v668_v6 = vld [vmem:[%s5221_s23 + $0x110] sm:$0xff] }
 0x13c   : > { %14567 = vst [vmem:[#allocation56_spill] sm:$0xff] %v7217_v62  ;;  %14572 = vst [vmem:[#allocation179_spill] sm:$0xff] %v7223_v19  ;;  %v7229_v49 = vsub.f32 %v648_v4, %v14576_v23  ;;  %v14585_v23 = vsel %vm14583_vm6, %v14584_v3, 0.0  ;;  %v14590_v11 = vsel %vm14588_vm11, %v14589_v13, 0.0  ;;  %v14594_v19 = vld [vmem:[#allocation73_spill] sm:$0xff]  ;;  %v669_v15 = vld [vmem:[%s5221_s23 + $0x118] sm:$0xff]  ;;  %vm14617_vm8 = vweird.f32 %v6881_v46 }
 0x13d   : > { %14581 = vst [vmem:[#allocation180_spill] sm:$0xff] %v14580_v22  ;;  %v7252_v28 = vsub.f32 %v649_v1, %v14585_v23  ;;  %v7258_v24 = vsub.f32 %v650_v21, %v14590_v11  ;;  %v667_v4 = vld [vmem:[%s5221_s23 + $0x108] sm:$0xff]  ;;  %v7270_v3 = vld [vmem:[%s5227_s27 + $0x2e0] sm:$0xff]  ;;  %vm7276_vm11 = vmxor %vm14597_vm12, %vm14453_vm7  ;;  %v14598_v1 = vmov 0 }
 0x13e   : > { %14577 = vst [vmem:[#allocation57_spill] sm:$0xff] %v7229_v49  ;;  %v14592_v49 = vld [vmem:[#allocation197_spill] sm:$0xff]  ;;  %v14599_v1 = vsel %vm7276_vm11, 4294967295, %v14598_v1  ;;  %v14601_v21 = vld [vmem:[#allocation198_spill] sm:$0xff]  ;;  %v14606_v23 = vld [vmem:[#allocation204_spill] sm:$0xff]  ;;  %vm14637_vm11 = vweird.f32 %v6904_v60 }
 0x13f   : > { %14586 = vst [vmem:[#allocation58_spill] sm:$0xff] %v7252_v28  ;;  %14591 = vst [vmem:[#allocation186_spill] sm:$0xff] %v7258_v24  ;;  %vm14593_vm0 = vnez %v14592_v49  ;;  %v14603_v49 = vld [vmem:[#allocation74_spill] sm:$0xff]  ;;  %vm14607_vm6 = vnez %v14606_v23  ;;  %v14608_v0 = vld [vmem:[#allocation79_spill] sm:$0xff] }
 0x140   : > { %v14595_v62 = vsel %vm14593_vm0, %v14594_v19, 0.0  ;;  %14600 = vst [vmem:[#allocation187_spill] sm:$0xff] %v14599_v1  ;;  %vm14602_vm0 = vnez %v14601_v21  ;;  %v14609_v13 = vsel %vm14607_vm6, %v14608_v0, 0.0  ;;  %v14613_v24 = vld [vmem:[#allocation80_spill] sm:$0xff]  ;;  %v671_v21 = vld [vmem:[%s5221_s23 + $0x128] sm:$0xff]  ;;  %v672_v43 = vld [vmem:[%s5221_s23 + $0x130] sm:$0xff] }
 0x141   : > { %v7264_v17 = vsub.f32 %v651_v41, %v14595_v62  ;;  %v14604_v62 = vsel %vm14602_vm0, %v14603_v49, 0.0  ;;  %v7293_v11 = vsub.f32 %v653_v34, %v14609_v13  ;;  %v670_v41 = vld [vmem:[%s5221_s23 + $0x120] sm:$0xff]  ;;  %v7305_v49 = vld [vmem:[%s5227_s27 + $0x2e8] sm:$0xff]  ;;  %vm7311_vm6 = vmxor %vm14617_vm8, %vm14453_vm7 }
 0x142   : > { %v7287_v19 = vsub.f32 %v652_v39, %v14604_v62  ;;  %14616 = vst [vmem:[#allocation189_spill] sm:$0xff] %v7305_v49  ;;  %v14618_v39 = vmov 0  ;;  %v14621_v34 = vld [vmem:[#allocation206_spill] sm:$0xff]  ;;  %v14626_v62 = vld [vmem:[#allocation207_spill] sm:$0xff]  ;;  %v675_v25 = vld [vmem:[%s5221_s23 + $0x148] sm:$0xff] }
 0x143   : > { %14596 = vst [vmem:[#allocation63_spill] sm:$0xff] %v7264_v17  ;;  %14610 = vst [vmem:[#allocation188_spill] sm:$0xff] %v7293_v11  ;;  %v14611_v17 = vld [vmem:[#allocation205_spill] sm:$0xff]  ;;  %v14619_v39 = vsel %vm7311_vm6, 4294967295, %v14618_v39  ;;  %vm14627_vm0 = vnez %v14626_v62  ;;  %v14628_v23 = vld [vmem:[#allocation82_spill] sm:$0xff]  ;;  %vm14657_vm6 = vweird.f32 %v6930_v51 }
 0x144   : > { %14605 = vst [vmem:[#allocation64_spill] sm:$0xff] %v7287_v19  ;;  %vm14612_vm12 = vnez %v14611_v17  ;;  %14620 = vst [vmem:[#allocation66_spill] sm:$0xff] %v14619_v39  ;;  %v14623_v17 = vld [vmem:[#allocation81_spill] sm:$0xff]  ;;  %v14629_v0 = vsel %vm14627_vm0, %v14628_v23, 0.0  ;;  %v14633_v11 = vld [vmem:[#allocation87_spill] sm:$0xff] }
 0x145   : > { %v14614_v28 = vsel %vm14612_vm12, %v14613_v24, 0.0  ;;  %vm14622_vm12 = vnez %v14621_v34  ;;  %v7328_v13 = vsub.f32 %v656_v30, %v14629_v0  ;;  %v674_v34 = vld [vmem:[%s5221_s23 + $0x140] sm:$0xff]  ;;  %vm7346_vm0 = vmxor %vm14637_vm11, %vm14453_vm7  ;;  %v14641_v30 = vld [vmem:[#allocation213_spill] sm:$0xff] }
 0x146   : > { %v7299_v22 = vsub.f32 %v654_v29, %v14614_v28  ;;  %v14624_v28 = vsel %vm14622_vm12, %v14623_v17, 0.0  ;;  %v673_v29 = vld [vmem:[%s5221_s23 + $0x138] sm:$0xff]  ;;  %v7340_v17 = vld [vmem:[%s5227_s27 + $0x2f0] sm:$0xff]  ;;  %v14648_v62 = vld [vmem:[#allocation89_spill] sm:$0xff] }
 0x147   : > { %v7322_v24 = vsub.f32 %v655_v5, %v14624_v28  ;;  %14630 = vst [vmem:[#allocation71_spill] sm:$0xff] %v7328_v13  ;;  %14636 = vst [vmem:[#allocation72_spill] sm:$0xff] %v7340_v17  ;;  %v14638_v5 = vmov 0  ;;  %v14646_v28 = vld [vmem:[#allocation214_spill] sm:$0xff]  ;;  %v678_v46 = vld [vmem:[%s5221_s23 + $0x160] sm:$0xff] }
 0x148   : > { %14615 = vst [vmem:[#allocation65_spill] sm:$0xff] %v7299_v22  ;;  %v14631_v22 = vld [vmem:[#allocation212_spill] sm:$0xff]  ;;  %v14639_v5 = vsel %vm7346_vm0, 4294967295, %v14638_v5  ;;  %vm14647_vm12 = vnez %v14646_v28  ;;  %v14653_v13 = vld [vmem:[#allocation90_spill] sm:$0xff]  ;;  %v681_v60 = vld [vmem:[%s5221_s23 + $0x178] sm:$0xff]  ;;  %vm14677_vm0 = vweird.f32 %v6956_v35 }
 0x149   : > { %14625 = vst [vmem:[#allocation195_spill] sm:$0xff] %v7322_v24  ;;  %vm14632_vm8 = vnez %v14631_v22  ;;  %14640 = vst [vmem:[#allocation197_spill] sm:$0xff] %v14639_v5  ;;  %v14643_v22 = vld [vmem:[#allocation88_spill] sm:$0xff]  ;;  %v14649_v23 = vsel %vm14647_vm12, %v14648_v62, 0.0  ;;  %v684_v51 = vld [vmem:[%s5221_s23 + $0x190] sm:$0xff] }
 0x14a   : > { %v14634_v19 = vsel %vm14632_vm8, %v14633_v11, 0.0  ;;  %vm14642_vm8 = vnez %v14641_v30  ;;  %v7363_v0 = vsub.f32 %v659_v32, %v14649_v23  ;;  %v677_v30 = vld [vmem:[%s5221_s23 + $0x158] sm:$0xff]  ;;  %vm7381_vm12 = vmxor %vm14657_vm6, %vm14453_vm7  ;;  %v14661_v32 = vld [vmem:[#allocation220_spill] sm:$0xff] }
 0x14b   : > { %v7334_v1 = vsub.f32 %v657_v44, %v14634_v19  ;;  %v14644_v19 = vsel %vm14642_vm8, %v14643_v22, 0.0  ;;  %v676_v44 = vld [vmem:[%s5221_s23 + $0x150] sm:$0xff]  ;;  %v7375_v22 = vld [vmem:[%s5227_s27 + $0x2f8] sm:$0xff]  ;;  %v14668_v28 = vld [vmem:[#allocation96_spill] sm:$0xff] }
 0x14c   : > { %v7357_v11 = vsub.f32 %v658_v52, %v14644_v19  ;;  %14650 = vst [vmem:[#allocation198_spill] sm:$0xff] %v7363_v0  ;;  %14656 = vst [vmem:[#allocation204_spill] sm:$0xff] %v7375_v22  ;;  %v14658_v52 = vmov 0  ;;  %v14666_v19 = vld [vmem:[#allocation221_spill] sm:$0xff] }
 0x14d   : > { %14635 = vst [vmem:[#allocation196_spill] sm:$0xff] %v7334_v1  ;;  %v14651_v1 = vld [vmem:[#allocation215_spill] sm:$0xff]  ;;  %v14659_v52 = vsel %vm7381_vm12, 4294967295, %v14658_v52  ;;  %vm14667_vm8 = vnez %v14666_v19  ;;  %v14673_v0 = vld [vmem:[#allocation97_spill] sm:$0xff]  ;;  %vm14695_vm12 = vweird.f32 %v6982_v2 }
 0x14e   : > { %14645 = vst [vmem:[#allocation73_spill] sm:$0xff] %v7357_v11  ;;  %vm14652_vm11 = vnez %v14651_v1  ;;  %14660 = vst [vmem:[#allocation79_spill] sm:$0xff] %v14659_v52  ;;  %v14663_v1 = vld [vmem:[#allocation95_spill] sm:$0xff]  ;;  %v14669_v62 = vsel %vm14667_vm8, %v14668_v28, 0.0 }
 0x14f   : > { %v14654_v24 = vsel %vm14652_vm11, %v14653_v13, 0.0  ;;  %vm14662_vm11 = vnez %v14661_v32  ;;  %v7398_v23 = vsub.f32 %v662_v50, %v14669_v62  ;;  %v680_v32 = vld [vmem:[%s5221_s23 + $0x170] sm:$0xff]  ;;  %vm7416_vm8 = vmxor %vm14677_vm0, %vm14453_vm7  ;;  %v14680_v50 = vld [vmem:[#allocation223_spill] sm:$0xff] }
 0x150   : > { %v7369_v39 = vsub.f32 %v660_v31, %v14654_v24  ;;  %v14664_v24 = vsel %vm14662_vm11, %v14663_v1, 0.0  ;;  %v679_v31 = vld [vmem:[%s5221_s23 + $0x168] sm:$0xff]  ;;  %v7410_v1 = vld [vmem:[%s5227_s27 + $0x300] sm:$0xff]  ;;  %v14687_v19 = vld [vmem:[#allocation103_spill] sm:$0xff] }
 0x151   : > { %v7392_v13 = vsub.f32 %v661_v12, %v14664_v24  ;;  %14670 = vst [vmem:[#allocation80_spill] sm:$0xff] %v7398_v23  ;;  %14676 = vst [vmem:[#allocation81_spill] sm:$0xff] %v7410_v1  ;;  %v14678_v12 = vmov 0  ;;  %v14685_v24 = vld [vmem:[#allocation228_spill] sm:$0xff] }
 0x152   : > { %14655 = vst [vmem:[#allocation74_spill] sm:$0xff] %v7369_v39  ;;  %v14671_v39 = vld [vmem:[#allocation222_spill] sm:$0xff]  ;;  %v14679_v12 = vsel %vm7416_vm8, 4294967295, %v14678_v12  ;;  %vm14686_vm11 = vnez %v14685_v24  ;;  %v14692_v23 = vld [vmem:[#allocation104_spill] sm:$0xff]  ;;  %vm14711_vm8 = vweird.f32 %v7008_v20 }
 0x153   : > { %14665 = vst [vmem:[#allocation205_spill] sm:$0xff] %v7392_v13  ;;  %vm14672_vm6 = vnez %v14671_v39  ;;  %v14682_v39 = vld [vmem:[#allocation98_spill] sm:$0xff]  ;;  %v14688_v28 = vsel %vm14686_vm11, %v14687_v19, 0.0  ;;  %vm7451_vm11 = vmxor %vm14695_vm12, %vm14453_vm7  ;;  %vm14708_vm12 = vnez %v14404_v40 }
 0x154   : > { %v14674_v11 = vsel %vm14672_vm6, %v14673_v0, 0.0  ;;  %vm14681_vm6 = vnez %v14680_v50  ;;  %v7433_v62 = vsub.f32 %v665_v45, %v14688_v28  ;;  %v683_v50 = vld [vmem:[%s5221_s23 + $0x188] sm:$0xff]  ;;  %v14698_v45 = vld [vmem:[#allocation230_spill] sm:$0xff] }
 0x155   : > { %v7404_v5 = vsub.f32 %v663_v61, %v14674_v11  ;;  %v14683_v11 = vsel %vm14681_vm6, %v14682_v39, 0.0  ;;  %v682_v61 = vld [vmem:[%s5221_s23 + $0x180] sm:$0xff]  ;;  %v7445_v39 = vld [vmem:[%s5227_s27 + $0x308] sm:$0xff]  ;;  %v14705_v24 = vld [vmem:[#allocation106_spill] sm:$0xff] }
 0x156   : > { %v7427_v0 = vsub.f32 %v664_v8, %v14683_v11  ;;  %14689 = vst [vmem:[#allocation82_spill] sm:$0xff] %v7433_v62  ;;  %v14696_v8 = vmov 0  ;;  %v14703_v11 = vld [vmem:[#allocation231_spill] sm:$0xff] }
 0x157   : > { %14675 = vst [vmem:[#allocation206_spill] sm:$0xff] %v7404_v5  ;;  %v14690_v5 = vld [vmem:[#allocation229_spill] sm:$0xff]  ;;  %v14697_v8 = vsel %vm7451_vm11, 4294967295, %v14696_v8  ;;  %vm14704_vm6 = vnez %v14703_v11  ;;  %v14722_v11 = vld [vmem:[#allocation118_spill] sm:$0xff]  ;;  %vm14725_vm11 = vweird.f32 %v7034_v57 }
 0x158   : > { %14684 = vst [vmem:[#allocation207_spill] sm:$0xff] %v7427_v0  ;;  %vm14691_vm0 = vnez %v14690_v5  ;;  %v14700_v5 = vld [vmem:[#allocation105_spill] sm:$0xff]  ;;  %v14706_v19 = vsel %vm14704_vm6, %v14705_v24, 0.0  ;;  %vm7486_vm6 = vmxor %vm14711_vm8, %vm14453_vm7  ;;  %v696_v57 = vld [vmem:[%s5221_s23 + $0x1f0] sm:$0xff] }
 0x159   : > { %v14693_v13 = vsel %vm14691_vm0, %v14692_v23, 0.0  ;;  %vm14699_vm0 = vnez %v14698_v45  ;;  %v7468_v28 = vsub.f32 %v668_v6, %v14706_v19  ;;  %v686_v45 = vld [vmem:[%s5221_s23 + $0x1a0] sm:$0xff]  ;;  %v687_v0 = vld [vmem:[%s5221_s23 + $0x1a8] sm:$0xff] }
 0x15a   : > { %v7439_v52 = vsub.f32 %v666_v42, %v14693_v13  ;;  %v14701_v13 = vsel %vm14699_vm0, %v14700_v5, 0.0  ;;  %v685_v42 = vld [vmem:[%s5221_s23 + $0x198] sm:$0xff]  ;;  %v7480_v5 = vld [vmem:[%s5227_s27 + $0x310] sm:$0xff]  ;;  %vm14717_vm0 = vnez %v14410_v37  ;;  %v14729_v37 = vld [vmem:[#allocation245_spill] sm:$0xff] }
 0x15b   : > { %v7462_v23 = vsub.f32 %v667_v4, %v14701_v13  ;;  %14707 = vst [vmem:[#allocation213_spill] sm:$0xff] %v7468_v28  ;;  %v14718_v6 = vsel %vm14717_vm0, %v14409_v14, 0.0  ;;  %v14720_v13 = vld [vmem:[#allocation239_spill] sm:$0xff]  ;;  %vm7521_vm0 = vmxor %vm14725_vm11, %vm14453_vm7  ;;  %v14726_v14 = vmov 0 }
 0x15c   : > { %14694 = vst [vmem:[#allocation212_spill] sm:$0xff] %v7439_v52  ;;  %v14709_v52 = vsel %vm14708_vm12, %v14403_v36, 0.0  ;;  %vm14714_vm12 = vnez %v14407_v55  ;;  %vm14721_vm8 = vnez %v14720_v13  ;;  %v689_v55 = vld [vmem:[%s5221_s23 + $0x1b8] sm:$0xff]  ;;  %v14727_v14 = vsel %vm7521_vm0, 4294967295, %v14726_v14  ;;  %v14736_v13 = vld [vmem:[#allocation120_spill] sm:$0xff] }
 0x15d   : > { %14702 = vst [vmem:[#allocation87_spill] sm:$0xff] %v7462_v23  ;;  %v7474_v62 = vsub.f32 %v669_v15, %v14709_v52  ;;  %v14715_v36 = vsel %vm14714_vm12, %v14406_v33, 0.0  ;;  %v7503_v52 = vsub.f32 %v671_v21, %v14718_v6  ;;  %v14723_v24 = vsel %vm14721_vm8, %v14722_v11, 0.0  ;;  %v688_v15 = vld [vmem:[%s5221_s23 + $0x1b0] sm:$0xff]  ;;  %v7515_v33 = vld [vmem:[%s5227_s27 + $0x318] sm:$0xff]  ;;  %14728 = vst [vmem:[#allocation90_spill] sm:$0xff] %v14727_v14 }
 0x15e   : > { %v7497_v40 = vsub.f32 %v670_v41, %v14715_v36  ;;  %v7509_v19 = vsub.f32 %v672_v43, %v14723_v24  ;;  %vm14730_vm8 = vnez %v14729_v37  ;;  %v14731_v41 = vld [vmem:[#allocation119_spill] sm:$0xff]  ;;  %v14734_v6 = vld [vmem:[#allocation246_spill] sm:$0xff]  ;;  %v691_v43 = vld [vmem:[%s5221_s23 + $0x1c8] sm:$0xff] }
 0x15f   : > { %14710 = vst [vmem:[#allocation88_spill] sm:$0xff] %v7474_v62  ;;  %14719 = vst [vmem:[#allocation89_spill] sm:$0xff] %v7503_v52  ;;  %v690_v62 = vld [vmem:[%s5221_s23 + $0x1c0] sm:$0xff]  ;;  %v14732_v21 = vsel %vm14730_vm8, %v14731_v41, 0.0  ;;  %vm14735_vm12 = vnez %v14734_v6  ;;  %v14740_v52 = vld [vmem:[#allocation125_spill] sm:$0xff]  ;;  %vm14743_vm8 = vweird.f32 %v7060_v56 }
 0x160   : > { %14716 = vst [vmem:[#allocation214_spill] sm:$0xff] %v7497_v40  ;;  %14724 = vst [vmem:[#allocation215_spill] sm:$0xff] %v7509_v19  ;;  %v7532_v36 = vsub.f32 %v673_v29, %v14732_v21  ;;  %v14737_v11 = vsel %vm14735_vm12, %v14736_v13, 0.0  ;;  %v14741_v40 = vsel %vm14421_vm13, %v14740_v52, 0.0  ;;  %v692_v37 = vld [vmem:[%s5221_s23 + $0x1d0] sm:$0xff]  ;;  %v693_v23 = vld [vmem:[%s5221_s23 + $0x1d8] sm:$0xff] }
 0x161   : > { %v7538_v24 = vsub.f32 %v674_v34, %v14737_v11  ;;  %v7544_v28 = vsub.f32 %v675_v25, %v14741_v40  ;;  %v7550_v41 = vld [vmem:[%s5227_s27 + $0x320] sm:$0xff]  ;;  %vm7556_vm12 = vmxor %vm14743_vm8, %vm14453_vm7  ;;  %v14748_v40 = vld [vmem:[#allocation126_spill] sm:$0xff]  ;;  %vm14793_vm8 = vweird.f32 %v7165_v26 }
 0x162   : > { %14733 = vst [vmem:[#allocation220_spill] sm:$0xff] %v7532_v36  ;;  %v14746_v34 = vld [vmem:[#allocation248_spill] sm:$0xff]  ;;  %v14751_v21 = vld [vmem:[#allocation250_spill] sm:$0xff]  ;;  %v14753_v6 = vld [vmem:[#allocation127_spill] sm:$0xff] }
 0x163   : > { %14738 = vst [vmem:[#allocation95_spill] sm:$0xff] %v7538_v24  ;;  %14742 = vst [vmem:[#allocation221_spill] sm:$0xff] %v7544_v28  ;;  %vm14747_vm13 = vnez %v14746_v34  ;;  %vm14752_vm11 = vnez %v14751_v21  ;;  %v14757_v24 = vld [vmem:[#allocation132_spill] sm:$0xff]  ;;  %v695_v34 = vld [vmem:[%s5221_s23 + $0x1e8] sm:$0xff] }
 0x164   : > { %v14749_v52 = vsel %vm14747_vm13, %v14748_v40, 0.0  ;;  %v14754_v13 = vsel %vm14752_vm11, %v14753_v6, 0.0  ;;  %v14758_v36 = vsel %vm6560_vm4, %v14757_v24, 0.0  ;;  %v694_v25 = vld [vmem:[%s5221_s23 + $0x1e0] sm:$0xff]  ;;  %v7585_v40 = vld [vmem:[%s5227_s27 + $0x328] sm:$0xff]  ;;  %vm14760_vm13 = vweird.f32 %v7095_v18  ;;  %v14768_v21 = vld [vmem:[#allocation134_spill] sm:$0xff] }
 0x165   : > { %v7567_v19 = vsub.f32 %v676_v44, %v14749_v52  ;;  %v7573_v11 = vsub.f32 %v677_v30, %v14754_v13  ;;  %v7579_v14 = vsub.f32 %v678_v46, %v14758_v36  ;;  %vm7591_vm11 = vmxor %vm14760_vm13, %vm14453_vm7  ;;  %v14764_v28 = vld [vmem:[#allocation133_spill] sm:$0xff]  ;;  %v14769_v6 = vsel %vm14434_vm15, %v14768_v21, 0.0  ;;  %v697_v46 = vld [vmem:[%s5221_s23 + $0x1f8] sm:$0xff] }
 0x166   : > { %v14765_v36 = vsel %vm6567_vm14, %v14764_v28, 0.0  ;;  %v7608_v13 = vsub.f32 %v680_v32, %v14769_v6  ;;  %v698_v30 = vld [vmem:[%s5221_s23 + $0x200] sm:$0xff]  ;;  %v699_v56 = vld [vmem:[%s5221_s23 + $0x208] sm:$0xff]  ;;  %v7620_v28 = vld [vmem:[%s5227_s27 + $0x330] sm:$0xff]  ;;  %vm14775_vm13 = vweird.f32 %v7130_v58 }
 0x167   : > { %14750 = vst [vmem:[#allocation96_spill] sm:$0xff] %v7567_v19  ;;  %14755 = vst [vmem:[#allocation222_spill] sm:$0xff] %v7573_v11  ;;  %v7602_v24 = vsub.f32 %v679_v31, %v14765_v36  ;;  %v14776_v31 = vmov 0  ;;  %v14784_v36 = vld [vmem:[#allocation140_spill] sm:$0xff]  ;;  %v14787_v6 = vld [vmem:[#allocation257_spill] sm:$0xff] }
 0x168   : > { %14759 = vst [vmem:[#allocation97_spill] sm:$0xff] %v7579_v14  ;;  %14770 = vst [vmem:[#allocation98_spill] sm:$0xff] %v7608_v13  ;;  %v14771_v14 = vld [vmem:[#allocation255_spill] sm:$0xff]  ;;  %v702_v18 = vld [vmem:[%s5221_s23 + $0x220] sm:$0xff] }
 0x169   : > { %14766 = vst [vmem:[#allocation223_spill] sm:$0xff] %v7602_v24  ;;  %vm14772_vm4 = vnez %v14771_v14  ;;  %vm7626_vm15 = vmxor %vm14775_vm13, %vm14453_vm7  ;;  %vm14788_vm13 = vnez %v14787_v6 }
 0x16a   : > { %v14773_v11 = vsel %vm14772_vm4, %v5921_v38, 0.0  ;;  %v14777_v31 = vsel %vm7626_vm15, 4294967295, %v14776_v31  ;;  %vm14778_vm4 = vnez %v14267_v53  ;;  %v700_v38 = vld [vmem:[%s5221_s23 + $0x210] sm:$0xff]  ;;  %v701_v53 = vld [vmem:[%s5221_s23 + $0x218] sm:$0xff]  ;;  %vm14809_vm15 = vweird.f32 %v7200_v10 }
 0x16b   : > { %v7614_v19 = vsub.f32 %v681_v60, %v14773_v11  ;;  %v14779_v60 = vld [vmem:[#allocation139_spill] sm:$0xff]  ;;  %v14782_v11 = vld [vmem:[#allocation256_spill] sm:$0xff] }
 0x16c   : > { %v14780_v32 = vsel %vm14778_vm4, %v14779_v60, 0.0  ;;  %vm14783_vm14 = vnez %v14782_v11  ;;  %v7655_v60 = vld [vmem:[%s5227_s27 + $0x338] sm:$0xff]  ;;  %vm14800_vm4 = vnez %v14287_v16  ;;  %v706_v16 = vld [vmem:[%s5221_s23 + $0x240] sm:$0xff] }
 0x16d   : > { %14774 = vst [vmem:[#allocation228_spill] sm:$0xff] %v7614_v19  ;;  %v7637_v14 = vsub.f32 %v682_v61, %v14780_v32  ;;  %v14785_v52 = vsel %vm14783_vm14, %v14784_v36, 0.0  ;;  %v14789_v19 = vld [vmem:[#allocation145_spill] sm:$0xff]  ;;  %14792 = vst [vmem:[#allocation230_spill] sm:$0xff] %v7655_v60  ;;  %v14794_v61 = vmov 0  ;;  %v14801_v32 = vsel %vm14800_vm4, %v5956_v63, 0.0 }
 0x16e   : > { %v7643_v21 = vsub.f32 %v683_v50, %v14785_v52  ;;  %v14790_v13 = vsel %vm14788_vm13, %v14789_v19, 0.0  ;;  %vm7661_vm14 = vmxor %vm14793_vm8, %vm14453_vm7  ;;  %v14796_v50 = vld [vmem:[#allocation259_spill] sm:$0xff]  ;;  %v7678_v11 = vsub.f32 %v686_v45, %v14801_v32  ;;  %v14803_v36 = vld [vmem:[#allocation260_spill] sm:$0xff]  ;;  %v14810_v63 = vmov 0 }
 0x16f   : > { %14781 = vst [vmem:[#allocation103_spill] sm:$0xff] %v7637_v14  ;;  %v7649_v24 = vsub.f32 %v684_v51, %v14790_v13  ;;  %v14795_v61 = vsel %vm7661_vm14, 4294967295, %v14794_v61  ;;  %vm14797_vm13 = vnez %v14796_v50  ;;  %vm14804_vm8 = vnez %v14803_v36  ;;  %v14805_v52 = vld [vmem:[#allocation150_spill] sm:$0xff]  ;;  %v703_v51 = vld [vmem:[%s5221_s23 + $0x228] sm:$0xff]  ;;  %vm7696_vm4 = vmxor %vm14809_vm15, %vm14453_vm7 }
 0x170   : > { %14786 = vst [vmem:[#allocation229_spill] sm:$0xff] %v7643_v21  ;;  %v14798_v19 = vsel %vm14797_vm13, %v5953_v9, 0.0  ;;  %14802 = vst [vmem:[#allocation231_spill] sm:$0xff] %v7678_v11  ;;  %v14806_v6 = vsel %vm14804_vm8, %v14805_v52, 0.0  ;;  %v704_v50 = vld [vmem:[%s5221_s23 + $0x230] sm:$0xff]  ;;  %v705_v21 = vld [vmem:[%s5221_s23 + $0x238] sm:$0xff]  ;;  %vm14821_vm15 = vnez %v14310_v7  ;;  %vm14825_vm14 = vweird.f32 %v7235_v27 }
 0x171   : > { %14791 = vst [vmem:[#allocation104_spill] sm:$0xff] %v7649_v24  ;;  %v7672_v13 = vsub.f32 %v685_v42, %v14798_v19  ;;  %v7684_v24 = vsub.f32 %v687_v0, %v14806_v6  ;;  %v7690_v9 = vld [vmem:[%s5227_s27 + $0x340] sm:$0xff]  ;;  %v14811_v63 = vsel %vm7696_vm4, 4294967295, %v14810_v63  ;;  %v14812_v0 = vld [vmem:[#allocation261_spill] sm:$0xff]  ;;  %v14814_v42 = vld [vmem:[#allocation151_spill] sm:$0xff]  ;;  %v14822_v6 = vsel %vm14821_vm15, %v6008_v48, 0.0 }
 0x172   : > { %14808 = vst [vmem:[#allocation239_spill] sm:$0xff] %v7690_v9  ;;  %vm14813_vm8 = vnez %v14812_v0  ;;  %v14817_v32 = vld [vmem:[#allocation263_spill] sm:$0xff]  ;;  %v707_v0 = vld [vmem:[%s5221_s23 + $0x248] sm:$0xff]  ;;  %v708_v11 = vld [vmem:[%s5221_s23 + $0x250] sm:$0xff]  ;;  %vm14843_vm4 = vweird.f32 %v7270_v3 }
 0x173   : > { %14799 = vst [vmem:[#allocation105_spill] sm:$0xff] %v7672_v13  ;;  %14807 = vst [vmem:[#allocation106_spill] sm:$0xff] %v7684_v24  ;;  %v14815_v45 = vsel %vm14813_vm8, %v14814_v42, 0.0  ;;  %vm14818_vm13 = vnez %v14817_v32  ;;  %v7719_v24 = vsub.f32 %v690_v62, %v14822_v6  ;;  %v7725_v42 = vld [vmem:[%s5227_s27 + $0x348] sm:$0xff]  ;;  %v14828_v7 = vld [vmem:[#allocation264_spill] sm:$0xff] }
 0x174   : > { %v7707_v19 = vsub.f32 %v688_v15, %v14815_v45  ;;  %v14819_v36 = vsel %vm14818_vm13, %v5985_v59, 0.0  ;;  %14824 = vst [vmem:[#allocation246_spill] sm:$0xff] %v7725_v42  ;;  %vm7731_vm13 = vmxor %vm14825_vm14, %vm14453_vm7  ;;  %vm14829_vm15 = vnez %v14828_v7  ;;  %v14830_v62 = vld [vmem:[#allocation156_spill] sm:$0xff]  ;;  %v14833_v45 = vld [vmem:[#allocation266_spill] sm:$0xff] }
 0x175   : > { %v7713_v52 = vsub.f32 %v689_v55, %v14819_v36  ;;  %14823 = vst [vmem:[#allocation119_spill] sm:$0xff] %v7719_v24  ;;  %v14831_v15 = vsel %vm14829_vm15, %v14830_v62, 0.0  ;;  %vm14834_vm8 = vnez %v14833_v45  ;;  %v14835_v32 = vld [vmem:[#allocation164_spill] sm:$0xff]  ;;  %v709_v48 = vld [vmem:[%s5221_s23 + $0x258] sm:$0xff]  ;;  %v711_v13 = vld [vmem:[%s5221_s23 + $0x268] sm:$0xff] }
 0x176   : > { %14816 = vst [vmem:[#allocation118_spill] sm:$0xff] %v7707_v19  ;;  %v7742_v55 = vsub.f32 %v691_v43, %v14831_v15  ;;  %v14836_v36 = vsel %vm14834_vm8, %v14835_v32, 0.0  ;;  %v14838_v24 = vld [vmem:[#allocation268_spill] sm:$0xff]  ;;  %v7760_v62 = vld [vmem:[%s5227_s27 + $0x350] sm:$0xff]  ;;  %vm7766_vm8 = vmxor %vm14843_vm4, %vm14453_vm7  ;;  %vm14947_vm4 = vweird.f32 %v7480_v5 }
 0x177   : > { %14820 = vst [vmem:[#allocation245_spill] sm:$0xff] %v7713_v52  ;;  %v7748_v6 = vsub.f32 %v692_v37, %v14836_v36  ;;  %vm14839_vm14 = vnez %v14838_v24  ;;  %v710_v7 = vld [vmem:[%s5221_s23 + $0x260] sm:$0xff]  ;;  %14842 = vst [vmem:[#allocation248_spill] sm:$0xff] %v7760_v62  ;;  %v14852_v15 = vld [vmem:[#allocation190_spill] sm:$0xff] }
 0x178   : > { %14832 = vst [vmem:[#allocation120_spill] sm:$0xff] %v7742_v55  ;;  %v14840_v52 = vsel %vm14839_vm14, %v6106_v54, 0.0  ;;  %vm14846_vm14 = vnez %v14353_v47  ;;  %v712_v54 = vld [vmem:[%s5221_s23 + $0x270] sm:$0xff]  ;;  %v713_v47 = vld [vmem:[%s5221_s23 + $0x278] sm:$0xff]  ;;  %v714_v14 = vld [vmem:[%s5221_s23 + $0x280] sm:$0xff] }
 0x179   : > { %14837 = vst [vmem:[#allocation247_spill] sm:$0xff] %v7748_v6  ;;  %v7754_v19 = vsub.f32 %v693_v23, %v14840_v52  ;;  %v14847_v23 = vld [vmem:[#allocation181_spill] sm:$0xff]  ;;  %v14850_v52 = vld [vmem:[#allocation271_spill] sm:$0xff]  ;;  %v15005_v43 = vld [vmem:[#allocation72_spill] sm:$0xff] }
 0x17a   : > { %v14848_v37 = vsel %vm14846_vm14, %v14847_v23, 0.0  ;;  %vm14851_vm15 = vnez %v14850_v52  ;;  %v7795_v23 = vld [vmem:[%s5227_s27 + $0x358] sm:$0xff]  ;;  %vm14860_vm14 = vweird.f32 %v7305_v49  ;;  %v14867_v52 = vld [vmem:[#allocation236_spill] sm:$0xff]  ;;  %v720_v49 = vld [vmem:[%s5221_s23 + $0x2b0] sm:$0xff] }
 0x17b   : > { %14841 = vst [vmem:[#allocation125_spill] sm:$0xff] %v7754_v19  ;;  %v7777_v24 = vsub.f32 %v694_v25, %v14848_v37  ;;  %v14853_v45 = vsel %vm14851_vm15, %v14852_v15, 0.0  ;;  %v14856_v19 = vld [vmem:[#allocation199_spill] sm:$0xff]  ;;  %14859 = vst [vmem:[#allocation251_spill] sm:$0xff] %v7795_v23  ;;  %v14869_v15 = vld [vmem:[#allocation216_spill] sm:$0xff] }
 0x17c   : > { %v7783_v32 = vsub.f32 %v695_v34, %v14853_v45  ;;  %v14857_v6 = vsel %vm14468_vm1, %v14856_v19, 0.0  ;;  %vm7801_vm15 = vmxor %vm14860_vm14, %vm14453_vm7  ;;  %v14864_v19 = vld [vmem:[#allocation208_spill] sm:$0xff]  ;;  %vm14868_vm1 = vnez %v14867_v52  ;;  %v716_v34 = vld [vmem:[%s5221_s23 + $0x290] sm:$0xff]  ;;  %vm14877_vm14 = vweird.f32 %v7340_v17 }
 0x17d   : > { %14849 = vst [vmem:[#allocation126_spill] sm:$0xff] %v7777_v24  ;;  %v7789_v55 = vsub.f32 %v696_v57, %v14857_v6  ;;  %v14865_v6 = vsel %vm14473_vm9, %v14864_v19, 0.0  ;;  %v14870_v45 = vsel %vm14868_vm1, %v14869_v15, 0.0  ;;  %v715_v57 = vld [vmem:[%s5221_s23 + $0x288] sm:$0xff]  ;;  %v717_v60 = vld [vmem:[%s5221_s23 + $0x298] sm:$0xff]  ;;  %v7830_v19 = vld [vmem:[%s5227_s27 + $0x360] sm:$0xff]  ;;  %vm14929_vm9 = vweird.f32 %v7445_v39 }
 0x17e   : > { %14854 = vst [vmem:[#allocation250_spill] sm:$0xff] %v7783_v32  ;;  %v7812_v37 = vsub.f32 %v697_v46, %v14865_v6  ;;  %v7818_v36 = vsub.f32 %v698_v30, %v14870_v45  ;;  %v14873_v32 = vld [vmem:[#allocation224_spill] sm:$0xff]  ;;  %14876 = vst [vmem:[#allocation253_spill] sm:$0xff] %v7830_v19  ;;  %v719_v30 = vld [vmem:[%s5221_s23 + $0x2a8] sm:$0xff] }
 0x17f   : > { %14858 = vst [vmem:[#allocation127_spill] sm:$0xff] %v7789_v55  ;;  %v14874_v24 = vsel %vm6887_vm3, %v14873_v32, 0.0  ;;  %vm7836_vm1 = vmxor %vm14877_vm14, %vm14453_vm7  ;;  %v14881_v55 = vld [vmem:[#allocation232_spill] sm:$0xff]  ;;  %vm14894_vm14 = vweird.f32 %v7375_v22  ;;  %v14903_v6 = vld [vmem:[#allocation258_spill] sm:$0xff] }
 0x180   : > { %14866 = vst [vmem:[#allocation132_spill] sm:$0xff] %v7812_v37  ;;  %14871 = vst [vmem:[#allocation252_spill] sm:$0xff] %v7818_v36  ;;  %v7824_v9 = vsub.f32 %v699_v56, %v14874_v24  ;;  %v14882_v24 = vsel %vm6910_vm5, %v14881_v55, 0.0  ;;  %v14885_v52 = vld [vmem:[#allocation240_spill] sm:$0xff]  ;;  %v14890_v36 = vld [vmem:[#allocation241_spill] sm:$0xff]  ;;  %vm14911_vm5 = vweird.f32 %v7410_v1 }
 0x181   : > { %v7847_v32 = vsub.f32 %v700_v38, %v14882_v24  ;;  %v14886_v15 = vsel %vm6936_vm10, %v14885_v52, 0.0  ;;  %v718_v56 = vld [vmem:[%s5221_s23 + $0x2a0] sm:$0xff]  ;;  %v7865_v55 = vld [vmem:[%s5227_s27 + $0x368] sm:$0xff]  ;;  %vm7871_vm10 = vmxor %vm14894_vm14, %vm14453_vm7 }
 0x182   : > { %14875 = vst [vmem:[#allocation133_spill] sm:$0xff] %v7824_v9  ;;  %v7853_v45 = vsub.f32 %v701_v53, %v14886_v15  ;;  %v14888_v9 = vld [vmem:[#allocation278_spill] sm:$0xff]  ;;  %14893 = vst [vmem:[#allocation256_spill] sm:$0xff] %v7865_v55  ;;  %v14901_v24 = vld [vmem:[#allocation280_spill] sm:$0xff] }
 0x183   : > { %14883 = vst [vmem:[#allocation134_spill] sm:$0xff] %v7847_v32  ;;  %vm14889_vm3 = vnez %v14888_v9  ;;  %v14898_v9 = vld [vmem:[#allocation254_spill] sm:$0xff]  ;;  %v722_v53 = vld [vmem:[%s5221_s23 + $0x2c0] sm:$0xff]  ;;  %v723_v17 = vld [vmem:[%s5221_s23 + $0x2c8] sm:$0xff] }
 0x184   : > { %14887 = vst [vmem:[#allocation255_spill] sm:$0xff] %v7853_v45  ;;  %v14891_v37 = vsel %vm14889_vm3, %v14890_v36, 0.0  ;;  %vm14902_vm3 = vnez %v14901_v24  ;;  %v14908_v45 = vld [vmem:[#allocation262_spill] sm:$0xff]  ;;  %v14921_v24 = vld [vmem:[#allocation267_spill] sm:$0xff]  ;;  %v726_v22 = vld [vmem:[%s5221_s23 + $0x2e0] sm:$0xff] }
 0x185   : > { %v7859_v42 = vsub.f32 %v702_v18, %v14891_v37  ;;  %v14899_v37 = vsel %vm6988_vm2, %v14898_v9, 0.0  ;;  %v14904_v52 = vsel %vm14902_vm3, %v14903_v6, 0.0  ;;  %v721_v18 = vld [vmem:[%s5221_s23 + $0x2b8] sm:$0xff]  ;;  %v7900_v9 = vld [vmem:[%s5227_s27 + $0x370] sm:$0xff]  ;;  %vm7906_vm3 = vmxor %vm14911_vm5, %vm14453_vm7 }
 0x186   : > { %v7882_v36 = vsub.f32 %v703_v51, %v14899_v37  ;;  %v7888_v15 = vsub.f32 %v704_v50, %v14904_v52  ;;  %v14914_v50 = vld [vmem:[#allocation284_spill] sm:$0xff]  ;;  %v14919_v37 = vld [vmem:[#allocation163_spill] sm:$0xff]  ;;  %v732_v55 = vld [vmem:[%s5221_s23 + $0x310] sm:$0xff] }
 0x187   : > { %14892 = vst [vmem:[#allocation139_spill] sm:$0xff] %v7859_v42  ;;  %v14906_v42 = vld [vmem:[#allocation282_spill] sm:$0xff]  ;;  %vm14920_vm2 = vnez %v14919_v37  ;;  %v14939_v37 = vld [vmem:[#allocation272_spill] sm:$0xff]  ;;  %v729_v1 = vld [vmem:[%s5221_s23 + $0x2f8] sm:$0xff] }
 0x188   : > { %14900 = vst [vmem:[#allocation140_spill] sm:$0xff] %v7882_v36  ;;  %14905 = vst [vmem:[#allocation257_spill] sm:$0xff] %v7888_v15  ;;  %vm14907_vm14 = vnez %v14906_v42  ;;  %v14916_v42 = vld [vmem:[#allocation265_spill] sm:$0xff]  ;;  %v14922_v6 = vsel %vm14920_vm2, %v14921_v24, 0.0  ;;  %v15009_v25 = vld [vmem:[#allocation239_spill] sm:$0xff] }
 0x189   : > { %v14909_v32 = vsel %vm14907_vm14, %v14908_v45, 0.0  ;;  %vm14915_vm14 = vnez %v14914_v50  ;;  %v7923_v52 = vsub.f32 %v707_v0, %v14922_v6  ;;  %v14926_v15 = vld [vmem:[#allocation269_spill] sm:$0xff]  ;;  %v725_v50 = vld [vmem:[%s5221_s23 + $0x2d8] sm:$0xff]  ;;  %vm7941_vm2 = vmxor %vm14929_vm9, %vm14453_vm7 }
 0x18a   : > { %v7894_v62 = vsub.f32 %v705_v21, %v14909_v32  ;;  %v14917_v32 = vsel %vm14915_vm14, %v14916_v42, 0.0  ;;  %v724_v21 = vld [vmem:[%s5221_s23 + $0x2d0] sm:$0xff]  ;;  %v7935_v42 = vld [vmem:[%s5227_s27 + $0x378] sm:$0xff]  ;;  %v14932_v0 = vld [vmem:[#allocation172_spill] sm:$0xff] }
 0x18b   : > { %v7917_v45 = vsub.f32 %v706_v16, %v14917_v32  ;;  %14923 = vst [vmem:[#allocation260_spill] sm:$0xff] %v7923_v52  ;;  %v14937_v32 = vld [vmem:[#allocation178_spill] sm:$0xff] }
 0x18c   : > { %14910 = vst [vmem:[#allocation145_spill] sm:$0xff] %v7894_v62  ;;  %v14924_v62 = vld [vmem:[#allocation170_spill] sm:$0xff]  ;;  %vm14938_vm14 = vnez %v14937_v32  ;;  %v14956_v32 = vld [vmem:[#allocation112_spill] sm:$0xff] }
 0x18d   : > { %14918 = vst [vmem:[#allocation259_spill] sm:$0xff] %v7917_v45  ;;  %vm14925_vm5 = vnez %v14924_v62  ;;  %v14934_v62 = vld [vmem:[#allocation270_spill] sm:$0xff]  ;;  %v14940_v24 = vsel %vm14938_vm14, %v14939_v37, 0.0  ;;  %vm7976_vm14 = vmxor %vm14947_vm4, %vm14453_vm7 }
 0x18e   : > { %v14927_v36 = vsel %vm14925_vm5, %v14926_v15, 0.0  ;;  %vm14933_vm5 = vnez %v14932_v0  ;;  %v7958_v6 = vsub.f32 %v710_v7, %v14940_v24  ;;  %v14944_v52 = vld [vmem:[#allocation274_spill] sm:$0xff]  ;;  %v14950_v7 = vld [vmem:[#allocation187_spill] sm:$0xff] }
 0x18f   : > { %v7929_v23 = vsub.f32 %v708_v11, %v14927_v36  ;;  %v14935_v36 = vsel %vm14933_vm5, %v14934_v62, 0.0  ;;  %v727_v11 = vld [vmem:[%s5221_s23 + $0x2e8] sm:$0xff]  ;;  %v728_v0 = vld [vmem:[%s5221_s23 + $0x2f0] sm:$0xff]  ;;  %v7970_v62 = vld [vmem:[%s5227_s27 + $0x380] sm:$0xff] }
 0x190   : > { %v7952_v15 = vsub.f32 %v709_v48, %v14935_v36  ;;  %14941 = vst [vmem:[#allocation151_spill] sm:$0xff] %v7958_v6  ;;  %v14954_v36 = vld [vmem:[#allocation66_spill] sm:$0xff]  ;;  %v14960_v6 = vld [vmem:[#allocation113_spill] sm:$0xff]  ;;  %v733_v48 = vld [vmem:[%s5221_s23 + $0x318] sm:$0xff] }
 0x191   : > { %14928 = vst [vmem:[#allocation150_spill] sm:$0xff] %v7929_v23  ;;  %v14942_v23 = vld [vmem:[#allocation180_spill] sm:$0xff]  ;;  %vm14955_vm5 = vnez %v14954_v36  ;;  %v744_v51 = vld [vmem:[%s5221_s23 + $0x370] sm:$0xff] }
 0x192   : > { %14936 = vst [vmem:[#allocation261_spill] sm:$0xff] %v7952_v15  ;;  %vm14943_vm9 = vnez %v14942_v23  ;;  %v14952_v23 = vld [vmem:[#allocation111_spill] sm:$0xff]  ;;  %v14957_v37 = vsel %vm14955_vm5, %v14956_v32, 0.0 }
 0x193   : > { %v14945_v45 = vsel %vm14943_vm9, %v14944_v52, 0.0  ;;  %vm14951_vm9 = vnez %v14950_v7  ;;  %v7993_v24 = vsub.f32 %v713_v47, %v14957_v37  ;;  %v731_v7 = vld [vmem:[%s5221_s23 + $0x308] sm:$0xff]  ;;  %v14966_v47 = vld [vmem:[#allocation79_spill] sm:$0xff] }
 0x194   : > { %v7964_v19 = vsub.f32 %v711_v13, %v14945_v45  ;;  %v1627_v13 = vsel %vm7941_vm2, %v7445_v39, 0.0  ;;  %v14953_v45 = vsel %vm14951_vm9, %v14952_v23, 0.0  ;;  %v730_v39 = vld [vmem:[%s5221_s23 + $0x300] sm:$0xff]  ;;  %v8005_v23 = vld [vmem:[%s5227_s27 + $0x388] sm:$0xff]  ;;  %vm14963_vm9 = vweird.f32 %v7515_v33 }
 0x195   : > { %v7987_v52 = vsub.f32 %v712_v54, %v14953_v45  ;;  %vm8011_vm5 = vmxor %vm14963_vm9, %vm14453_vm7  ;;  %vm14970_vm2 = vnez %v14679_v12  ;;  %vm14972_vm9 = vnez %v14697_v8  ;;  %v14977_v12 = vsel %vm7486_vm6, %v7008_v20, 0.0  ;;  %v736_v54 = vld [vmem:[%s5221_s23 + $0x330] sm:$0xff] }
 0x196   : > { %14946 = vst [vmem:[#allocation263_spill] sm:$0xff] %v7964_v19  ;;  %v14958_v19 = vld [vmem:[#allocation197_spill] sm:$0xff]  ;;  %v14971_v36 = vsel %vm14970_vm2, %v6956_v35, 0.0  ;;  %v14973_v37 = vsel %vm14972_vm9, %v6982_v2, 0.0  ;;  %vm14974_vm2 = vweird.f32 %v7550_v41  ;;  %v1629_v2 = vsel %vm8011_vm5, %v7515_v33, 0.0  ;;  %v8073_v33 = vld [vmem:[%s5227_s27 + $0x398] sm:$0xff] }
 0x197   : > { %vm14959_vm4 = vnez %v14958_v19  ;;  %v14968_v19 = vld [vmem:[#allocation276_spill] sm:$0xff]  ;;  %v8028_v32 = vsub.f32 %v716_v34, %v14971_v36  ;;  %v8057_v8 = vsub.f32 %v718_v56, %v14977_v12  ;;  %vm1386_vm6 = vweird.f32 %v7970_v62  ;;  %v737_v35 = vld [vmem:[%s5221_s23 + $0x338] sm:$0xff] }
 0x198   : > { %v14961_v16 = vsel %vm14959_vm4, %v14960_v6, 0.0  ;;  %vm14967_vm4 = vnez %v14966_v47  ;;  %v8040_v47 = vld [vmem:[%s5227_s27 + $0x390] sm:$0xff]  ;;  %vm14983_vm5 = vweird.f32 %v7585_v40 }
 0x199   : > { %v7999_v15 = vsub.f32 %v714_v14, %v14961_v16  ;;  %v1628_v14 = vsel %vm7976_vm14, %v7480_v5, 0.0  ;;  %v14969_v6 = vsel %vm14967_vm4, %v14968_v19, 0.0  ;;  %v8034_v16 = vsub.f32 %v717_v60, %v14973_v37  ;;  %v734_v5 = vld [vmem:[%s5221_s23 + $0x320] sm:$0xff]  ;;  %vm8046_vm4 = vmxor %vm14974_vm2, %vm14453_vm7 }
 0x19a   : > { %v8022_v45 = vsub.f32 %v715_v57, %v14969_v6  ;;  %vm1385_vm14 = vweird.f32 %v7935_v42  ;;  %v14979_v57 = vld [vmem:[#allocation281_spill] sm:$0xff]  ;;  %v14981_v6 = vld [vmem:[#allocation283_spill] sm:$0xff]  ;;  %vm8079_vm9 = vmxor %vm14983_vm5, %vm14453_vm7  ;;  %v1630_v4 = vsel %vm8046_vm4, %v7550_v41, 0.0  ;;  %vm14992_vm2 = vweird.f32 %v7620_v28 }
 0x19b   : > { %14962 = vst [vmem:[#allocation264_spill] sm:$0xff] %v7999_v15  ;;  %v735_v15 = vld [vmem:[%s5221_s23 + $0x328] sm:$0xff]  ;;  %v14980_v34 = vsel %vm7521_vm0, %v14979_v57, 0.0  ;;  %v14982_v36 = vsel %vm7556_vm12, %v14981_v6, 0.0  ;;  %vm14988_vm0 = vnez %v14777_v31  ;;  %vm14990_vm12 = vnez %v14795_v61  ;;  %v8106_v41 = vld [vmem:[%s5227_s27 + $0x3a0] sm:$0xff]  ;;  %vm8112_vm4 = vmxor %vm14992_vm2, %vm14453_vm7 }
 0x19c   : > { %v8063_v19 = vsub.f32 %v719_v30, %v14980_v34  ;;  %v8069_v37 = vsub.f32 %v720_v49, %v14982_v36  ;;  %v14986_v49 = vld [vmem:[#allocation41_spill] sm:$0xff]  ;;  %v14989_v30 = vsel %vm14988_vm0, %v7130_v58, 0.0  ;;  %v14991_v60 = vsel %vm14990_vm12, %v7165_v26, 0.0  ;;  %v738_v34 = vld [vmem:[%s5221_s23 + $0x340] sm:$0xff]  ;;  %v8197_v58 = vld [vmem:[%s5227_s27 + $0x3b8] sm:$0xff] }
 0x19d   : > { %v14987_v29 = vsel %vm7591_vm11, %v14986_v49, 0.0  ;;  %v8096_v12 = vsub.f32 %v722_v53, %v14989_v30  ;;  %v8102_v57 = vsub.f32 %v723_v17, %v14991_v60  ;;  %vm1387_vm11 = vweird.f32 %v8005_v23  ;;  %v15007_v6 = vld [vmem:[#allocation204_spill] sm:$0xff]  ;;  %v739_v49 = vld [vmem:[%s5221_s23 + $0x348] sm:$0xff]  ;;  %v740_v60 = vld [vmem:[%s5221_s23 + $0x350] sm:$0xff] }
 0x19e   : > { %v8090_v56 = vsub.f32 %v721_v18, %v14987_v29  ;;  %v1631_v26 = vsel %vm8079_vm9, %v7585_v40, 0.0  ;;  %vm14995_vm5 = vnez %v14811_v63  ;;  %v14997_v31 = vsel %vm7731_vm13, %v7235_v27, 0.0  ;;  %v8139_v40 = vld [vmem:[%s5227_s27 + $0x3a8] sm:$0xff]  ;;  %v15023_v27 = vld [vmem:[#allocation251_spill] sm:$0xff] }
 0x19f   : > { %v14996_v17 = vsel %vm14995_vm5, %v7200_v10, 0.0  ;;  %v8129_v61 = vsub.f32 %v725_v50, %v14997_v31  ;;  %v14998_v18 = vsel %vm7766_vm8, %v7270_v3, 0.0  ;;  %vm1388_vm9 = vweird.f32 %v8040_v47  ;;  %v14999_v10 = vld [vmem:[#allocation230_spill] sm:$0xff]  ;;  %v8218_v31 = vld [vmem:[%s5227_s27 + $0x3c0] sm:$0xff] }
 0x1a0   : > { %v8123_v44 = vsub.f32 %v724_v21, %v14996_v17  ;;  %v8135_v53 = vsub.f32 %v726_v22, %v14998_v18  ;;  %vm15000_vm0 = vweird.f32 %v14999_v10  ;;  %v1632_v3 = vsel %vm8112_vm4, %v7620_v28, 0.0  ;;  %v15003_v22 = vld [vmem:[#allocation189_spill] sm:$0xff]  ;;  %v8172_v28 = vld [vmem:[%s5227_s27 + $0x3b0] sm:$0xff]  ;;  %v15019_v18 = vld [vmem:[#allocation248_spill] sm:$0xff] }
 0x1a1   : > { %vm8145_vm12 = vmxor %vm15000_vm0, %vm14453_vm7  ;;  %v15004_v63 = vsel %vm7801_vm15, %v15003_v22, 0.0  ;;  %v15006_v21 = vsel %vm7836_vm1, %v15005_v43, 0.0  ;;  %v15008_v36 = vsel %vm7871_vm10, %v15007_v6, 0.0  ;;  %vm1389_vm13 = vweird.f32 %v8073_v33  ;;  %v15015_v17 = vld [vmem:[#allocation246_spill] sm:$0xff] }
 0x1a2   : > { %v8156_v59 = vsub.f32 %v727_v11, %v15004_v63  ;;  %v8162_v50 = vsub.f32 %v728_v0, %v15006_v21  ;;  %v8168_v20 = vsub.f32 %v729_v1, %v15008_v36  ;;  %vm15010_vm8 = vweird.f32 %v15009_v25  ;;  %v15013_v1 = vld [vmem:[#allocation81_spill] sm:$0xff]  ;;  %v15028_v63 = vld [vmem:[#allocation40_spill] sm:$0xff]  ;;  %v8264_v6 = vld [vmem:[%s5227_s27 + $0x3d0] sm:$0xff] }
 0x1a3   : > { %vm8178_vm15 = vmxor %vm15010_vm8, %vm14453_vm7  ;;  %v1633_v38 = vsel %vm8145_vm12, %v14999_v10, 0.0  ;;  %v15014_v11 = vsel %vm7906_vm3, %v15013_v1, 0.0  ;;  %v8191_v29 = vsub.f32 %v731_v7, %v1627_v13  ;;  %v8193_v30 = vsub.f32 %v732_v55, %v1628_v14  ;;  %v741_v14 = vld [vmem:[%s5221_s23 + $0x358] sm:$0xff]  ;;  %v743_v21 = vld [vmem:[%s5221_s23 + $0x368] sm:$0xff] }
 0x1a4   : > { %v8189_v0 = vsub.f32 %v730_v39, %v15014_v11  ;;  %vm1390_vm1 = vweird.f32 %v8106_v41  ;;  %vm15016_vm10 = vweird.f32 %v15015_v17  ;;  %v1634_v13 = vsel %vm8178_vm15, %v15009_v25, 0.0  ;;  %v15030_v36 = vld [vmem:[#allocation253_spill] sm:$0xff]  ;;  %v15036_v11 = vld [vmem:[#allocation42_spill] sm:$0xff] }
 0x1a5   : > { %vm8203_vm2 = vmxor %vm15016_vm10, %vm14453_vm7  ;;  %v8210_v55 = vsub.f32 %v733_v48, %v1629_v2  ;;  %v8212_v39 = vsub.f32 %v734_v5, %v1630_v4  ;;  %v8214_v7 = vsub.f32 %v735_v15, %v1631_v26  ;;  %vm1391_vm3 = vweird.f32 %v8139_v40  ;;  %v742_v4 = vld [vmem:[%s5221_s23 + $0x360] sm:$0xff]  ;;  %v8239_v26 = vld [vmem:[%s5227_s27 + $0x3c8] sm:$0xff] }
 0x1a6   : > { %vm15020_vm4 = vweird.f32 %v15019_v18  ;;  %v1635_v48 = vsel %vm8203_vm2, %v15015_v17, 0.0  ;;  %v8231_v15 = vsub.f32 %v736_v54, %v1632_v3  ;;  %v8233_v5 = vsub.f32 %v737_v35, %v1633_v38  ;;  %v15034_v38 = vld [vmem:[#allocation162_spill] sm:$0xff] }
 0x1a7   : > { %vm8224_vm5 = vmxor %vm15020_vm4, %vm14453_vm7  ;;  %v8235_v2 = vsub.f32 %v738_v34, %v1634_v13  ;;  %vm1392_vm0 = vweird.f32 %v8172_v28  ;;  %vm15024_vm12 = vweird.f32 %v15023_v27  ;;  %v8252_v35 = vsub.f32 %v739_v49, %v1635_v48  ;;  %v15027_v34 = vld [vmem:[#allocation161_spill] sm:$0xff]  ;;  %v8289_v13 = vld [vmem:[%s5227_s27 + $0x3d8] sm:$0xff] }
 0x1a8   : > { %vm8245_vm8 = vmxor %vm15024_vm12, %vm14453_vm7  ;;  %v1636_v54 = vsel %vm8224_vm5, %v15019_v18, 0.0  ;;  %v8256_v3 = vmul.f32 %v15027_v34, %v15027_v34  ;;  %v8260_v43 = vmul.f32 %v15028_v63, %v15028_v63  ;;  %vm1393_vm15 = vweird.f32 %v8197_v58  ;;  %v15038_v18 = vld [vmem:[#allocation256_spill] sm:$0xff]  ;;  %v745_v63 = vld [vmem:[%s5221_s23 + $0x378] sm:$0xff] }
 0x1a9   : > { %vm15031_vm10 = vweird.f32 %v15030_v36  ;;  %v1637_v25 = vsel %vm8245_vm8, %v15023_v27, 0.0  ;;  %v8277_v46 = vsub.f32 %v740_v60, %v1636_v54  ;;  %v8281_v1 = vmul.f32 %v15034_v38, %v15034_v38  ;;  %v15042_v27 = vld [vmem:[#allocation169_spill] sm:$0xff]  ;;  %v15044_v54 = vld [vmem:[#allocation47_spill] sm:$0xff]  ;;  %v8314_v38 = vld [vmem:[%s5227_s27 + $0x3e0] sm:$0xff] }
 0x1aa   : > { %15029 = vst [vmem:[#allocation156_spill] sm:$0xff] %v8260_v43  ;;  %vm8270_vm2 = vmxor %vm15031_vm10, %vm14453_vm7  ;;  %v8285_v17 = vmul.f32 %v15036_v11, %v15036_v11  ;;  %vm1394_vm4 = vweird.f32 %v8218_v31  ;;  %vm15039_vm5 = vweird.f32 %v15038_v18  ;;  %v8302_v48 = vsub.f32 %v741_v14, %v1637_v25  ;;  %v15049_v25 = vld [vmem:[#allocation48_spill] sm:$0xff]  ;;  %v15129_v43 = vld [vmem:[#allocation222_spill] sm:$0xff] }
 0x1ab   : > { %15035 = vst [vmem:[#allocation266_spill] sm:$0xff] %v8281_v1  ;;  %vm8295_vm12 = vmxor %vm15039_vm5, %vm14453_vm7  ;;  %v1638_v10 = vsel %vm8270_vm2, %v15030_v36, 0.0  ;;  %v8306_v22 = vmul.f32 %v15042_v27, %v15042_v27  ;;  %v8310_v34 = vmul.f32 %v15044_v54, %v15044_v54  ;;  %vm1395_vm8 = vweird.f32 %v8239_v26  ;;  %v15051_v27 = vld [vmem:[#allocation171_spill] sm:$0xff] }
 0x1ac   : > { %15037 = vst [vmem:[#allocation164_spill] sm:$0xff] %v8285_v17  ;;  %vm15046_vm10 = vweird.f32 %v7900_v9  ;;  %v1639_v36 = vsel %vm8295_vm12, %v15038_v18, 0.0  ;;  %v8327_v49 = vsub.f32 %v742_v4, %v1638_v10  ;;  %v8331_v11 = vmul.f32 %v15049_v25, %v15049_v25  ;;  %vm8345_vm12 = vmxor %vm1385_vm14, %vm14453_vm7  ;;  %v15055_v10 = vld [vmem:[#allocation49_spill] sm:$0xff]  ;;  %v8364_v17 = vld [vmem:[%s5227_s27 + $0x3f0] sm:$0xff] }
 0x1ad   : > { %15043 = vst [vmem:[#allocation268_spill] sm:$0xff] %v8306_v22  ;;  %15045 = vst [vmem:[#allocation181_spill] sm:$0xff] %v8310_v34  ;;  %v8335_v54 = vmul.f32 %v15051_v27, %v15051_v27  ;;  %v746_v34 = vld [vmem:[%s5221_s23 + $0x380] sm:$0xff]  ;;  %v8339_v22 = vld [vmem:[%s5227_s27 + $0x3e8] sm:$0xff]  ;;  %vm1396_vm5 = vweird.f32 %v8264_v6  ;;  %v8352_v60 = vsub.f32 %v743_v21, %v1639_v36  ;;  %v8356_v25 = vmul.f32 %v15055_v10, %v15055_v10 }
 0x1ae   : > { %vm8320_vm2 = vmxor %vm15046_vm10, %vm14453_vm7  ;;  %15050 = vst [vmem:[#allocation271_spill] sm:$0xff] %v8331_v11  ;;  %v15057_v27 = vld [vmem:[#allocation50_spill] sm:$0xff]  ;;  %v747_v11 = vld [vmem:[%s5221_s23 + $0x388] sm:$0xff]  ;;  %vm1397_vm14 = vweird.f32 %v8289_v13  ;;  %v1641_v21 = vsel %vm8345_vm12, %v7935_v42, 0.0 }
 0x1af   : > { %15052 = vst [vmem:[#allocation190_spill] sm:$0xff] %v8335_v54  ;;  %v1640_v18 = vsel %vm8320_vm2, %v7900_v9, 0.0  ;;  %15056 = vst [vmem:[#allocation273_spill] sm:$0xff] %v8356_v25  ;;  %v8360_v54 = vmul.f32 %v15057_v27, %v15057_v27  ;;  %v15061_v36 = vld [vmem:[#allocation177_spill] sm:$0xff]  ;;  %v15063_v27 = vld [vmem:[#allocation55_spill] sm:$0xff]  ;;  %v8402_v4 = vsub.f32 %v745_v63, %v1641_v21 }
 0x1b0   : > { %vm8370_vm10 = vmxor %vm1386_vm6, %vm14453_vm7  ;;  %v8377_v14 = vsub.f32 %v744_v51, %v1640_v18  ;;  %v8381_v10 = vmul.f32 %v15061_v36, %v15061_v36  ;;  %v748_v25 = vld [vmem:[%s5221_s23 + $0x390] sm:$0xff]  ;;  %v8389_v1 = vld [vmem:[%s5227_s27 + $0x3f8] sm:$0xff]  ;;  %vm1398_vm6 = vweird.f32 %v8314_v38 }
 0x1b1   : > { %15058 = vst [vmem:[#allocation199_spill] sm:$0xff] %v8360_v54  ;;  %v8385_v54 = vmul.f32 %v15063_v27, %v15063_v27  ;;  %vm8395_vm2 = vmxor %vm1387_vm11, %vm14453_vm7  ;;  %v1642_v51 = vsel %vm8370_vm10, %v7970_v62, 0.0  ;;  %v15067_v18 = vld [vmem:[#allocation56_spill] sm:$0xff]  ;;  %v15069_v27 = vld [vmem:[#allocation179_spill] sm:$0xff]  ;;  %vm1399_vm11 = vweird.f32 %v8339_v22 }
 0x1b2   : > { %15062 = vst [vmem:[#allocation275_spill] sm:$0xff] %v8381_v10  ;;  %v8406_v36 = vmul.f32 %v15067_v18, %v15067_v18  ;;  %v749_v10 = vld [vmem:[%s5221_s23 + $0x398] sm:$0xff]  ;;  %vm8417_vm12 = vmxor %vm1388_vm9, %vm14453_vm7  ;;  %v1643_v62 = vsel %vm8395_vm2, %v8005_v23, 0.0  ;;  %v8424_v63 = vsub.f32 %v746_v34, %v1642_v51  ;;  %v15073_v21 = vld [vmem:[#allocation57_spill] sm:$0xff]  ;;  %vm1400_vm9 = vweird.f32 %v8364_v17 }
 0x1b3   : > { %15064 = vst [vmem:[#allocation208_spill] sm:$0xff] %v8385_v54  ;;  %v8410_v54 = vmul.f32 %v15069_v27, %v15069_v27  ;;  %v8428_v18 = vmul.f32 %v15073_v21, %v15073_v21  ;;  %v15075_v27 = vld [vmem:[#allocation58_spill] sm:$0xff]  ;;  %vm1517_vm10 = vmxor %vm1389_vm13, %vm14453_vm7  ;;  %v1644_v23 = vsel %vm8417_vm12, %v8040_v47, 0.0  ;;  %v8442_v34 = vsub.f32 %v747_v11, %v1643_v62  ;;  %v15079_v21 = vld [vmem:[#allocation63_spill] sm:$0xff] }
 0x1b4   : > { %15068 = vst [vmem:[#allocation236_spill] sm:$0xff] %v8406_v36  ;;  %v750_v36 = vld [vmem:[%s5221_s23 + $0x3a0] sm:$0xff]  ;;  %v15077_v42 = vld [vmem:[#allocation186_spill] sm:$0xff]  ;;  %vm1401_vm2 = vweird.f32 %v8389_v1  ;;  %vm1518_vm13 = vmxor %vm1390_vm1, %vm14453_vm7  ;;  %v1645_v47 = vsel %vm1517_vm10, %v8073_v33, 0.0  ;;  %v8458_v11 = vsub.f32 %v748_v25, %v1644_v23 }
 0x1b5   : > { %15070 = vst [vmem:[#allocation216_spill] sm:$0xff] %v8410_v54  ;;  %15074 = vst [vmem:[#allocation237_spill] sm:$0xff] %v8428_v18  ;;  %v8432_v54 = vmul.f32 %v15075_v27, %v15075_v27  ;;  %v8446_v51 = vmul.f32 %v15077_v42, %v15077_v42  ;;  %v8450_v27 = vmul.f32 %v15079_v21, %v15079_v21  ;;  %v15081_v9 = vld [vmem:[#allocation64_spill] sm:$0xff]  ;;  %v15085_v25 = vld [vmem:[#allocation65_spill] sm:$0xff] }
 0x1b6   : > { %v8462_v62 = vmul.f32 %v15081_v9, %v15081_v9  ;;  %v15083_v42 = vld [vmem:[#allocation188_spill] sm:$0xff]  ;;  %vm1519_vm12 = vmxor %vm1391_vm3, %vm14453_vm7  ;;  %v8473_v33 = vsub.f32 %v749_v10, %v1645_v47  ;;  %v8477_v23 = vmul.f32 %v15085_v25, %v15085_v25  ;;  %v15087_v9 = vld [vmem:[#allocation195_spill] sm:$0xff] }
 0x1b7   : > { %15076 = vst [vmem:[#allocation224_spill] sm:$0xff] %v8432_v54  ;;  %15078 = vst [vmem:[#allocation238_spill] sm:$0xff] %v8446_v51  ;;  %v751_v54 = vld [vmem:[%s5221_s23 + $0x3a8] sm:$0xff]  ;;  %v8466_v21 = vmul.f32 %v15083_v42, %v15083_v42  ;;  %v1646_v51 = vsel %vm1518_vm13, %v8106_v41, 0.0  ;;  %v753_v42 = vld [vmem:[%s5221_s23 + $0x3b8] sm:$0xff] }
 0x1b8   : > { %15080 = vst [vmem:[#allocation232_spill] sm:$0xff] %v8450_v27  ;;  %15082 = vst [vmem:[#allocation277_spill] sm:$0xff] %v8462_v62  ;;  %v752_v27 = vld [vmem:[%s5221_s23 + $0x3b0] sm:$0xff]  ;;  %v8481_v62 = vmul.f32 %v15087_v9, %v15087_v9  ;;  %v8488_v41 = vsub.f32 %v750_v36, %v1646_v51  ;;  %v15089_v10 = vld [vmem:[#allocation71_spill] sm:$0xff] }
 0x1b9   : > { %15084 = vst [vmem:[#allocation240_spill] sm:$0xff] %v8466_v21  ;;  %15086 = vst [vmem:[#allocation278_spill] sm:$0xff] %v8477_v23  ;;  %v1647_v21 = vsel %vm1519_vm12, %v8139_v40, 0.0  ;;  %v8492_v47 = vmul.f32 %v15089_v10, %v15089_v10  ;;  %v15091_v25 = vld [vmem:[#allocation196_spill] sm:$0xff]  ;;  %v15093_v36 = vld [vmem:[#allocation73_spill] sm:$0xff] }
 0x1ba   : > { %15088 = vst [vmem:[#allocation241_spill] sm:$0xff] %v8481_v62  ;;  %vm1520_vm1 = vmxor %vm1392_vm0, %vm14453_vm7  ;;  %v8496_v23 = vmul.f32 %v15091_v25, %v15091_v25  ;;  %v754_v9 = vld [vmem:[%s5221_s23 + $0x3c0] sm:$0xff]  ;;  %v8503_v40 = vsub.f32 %v751_v54, %v1647_v21  ;;  %v8507_v51 = vmul.f32 %v15093_v36, %v15093_v36  ;;  %v15095_v10 = vld [vmem:[#allocation198_spill] sm:$0xff] }
 0x1bb   : > { %15090 = vst [vmem:[#allocation279_spill] sm:$0xff] %v8492_v47  ;;  %vm1521_vm3 = vmxor %vm1393_vm15, %vm14453_vm7  ;;  %v1648_v62 = vsel %vm1520_vm1, %v8172_v28, 0.0  ;;  %v8511_v47 = vmul.f32 %v15095_v10, %v15095_v10  ;;  %v755_v25 = vld [vmem:[%s5221_s23 + $0x3c8] sm:$0xff]  ;;  %v15097_v54 = vld [vmem:[#allocation74_spill] sm:$0xff] }
 0x1bc   : > { %15092 = vst [vmem:[#allocation254_spill] sm:$0xff] %v8496_v23  ;;  %15094 = vst [vmem:[#allocation280_spill] sm:$0xff] %v8507_v51  ;;  %v1649_v23 = vsel %vm1521_vm3, %v8197_v58, 0.0  ;;  %v8518_v28 = vsub.f32 %v752_v27, %v1648_v62  ;;  %v8522_v21 = vmul.f32 %v15097_v54, %v15097_v54  ;;  %v15099_v36 = vld [vmem:[#allocation205_spill] sm:$0xff]  ;;  %v756_v10 = vld [vmem:[%s5221_s23 + $0x3d0] sm:$0xff] }
 0x1bd   : > { %15096 = vst [vmem:[#allocation258_spill] sm:$0xff] %v8511_v47  ;;  %vm1522_vm0 = vmxor %vm1394_vm4, %vm14453_vm7  ;;  %v8526_v51 = vmul.f32 %v15099_v36, %v15099_v36  ;;  %v8533_v58 = vsub.f32 %v753_v42, %v1649_v23  ;;  %v15101_v27 = vld [vmem:[#allocation80_spill] sm:$0xff]  ;;  %v15103_v54 = vld [vmem:[#allocation206_spill] sm:$0xff] }
 0x1be   : > { %15098 = vst [vmem:[#allocation282_spill] sm:$0xff] %v8522_v21  ;;  %vm1523_vm15 = vmxor %vm1395_vm8, %vm14453_vm7  ;;  %v1650_v47 = vsel %vm1522_vm0, %v8218_v31, 0.0  ;;  %v8537_v62 = vmul.f32 %v15101_v27, %v15101_v27  ;;  %v8541_v21 = vmul.f32 %v15103_v54, %v15103_v54  ;;  %v757_v36 = vld [vmem:[%s5221_s23 + $0x3d8] sm:$0xff]  ;;  %v15107_v27 = vld [vmem:[#allocation82_spill] sm:$0xff] }
 0x1bf   : > { %15100 = vst [vmem:[#allocation262_spill] sm:$0xff] %v8526_v51  ;;  %vm1524_vm4 = vmxor %vm1396_vm5, %vm14453_vm7  ;;  %v1651_v51 = vsel %vm1523_vm15, %v8239_v26, 0.0  ;;  %v8548_v31 = vsub.f32 %v754_v9, %v1650_v47  ;;  %v15105_v23 = vld [vmem:[#allocation207_spill] sm:$0xff]  ;;  %v758_v54 = vld [vmem:[%s5221_s23 + $0x3e0] sm:$0xff] }
 0x1c0   : > { %15102 = vst [vmem:[#allocation284_spill] sm:$0xff] %v8537_v62  ;;  %15104 = vst [vmem:[#allocation265_spill] sm:$0xff] %v8541_v21  ;;  %v8552_v42 = vmul.f32 %v15105_v23, %v15105_v23  ;;  %v8556_v62 = vmul.f32 %v15107_v27, %v15107_v27  ;;  %v1652_v21 = vsel %vm1524_vm4, %v8264_v6, 0.0  ;;  %v8563_v26 = vsub.f32 %v755_v25, %v1651_v51  ;;  %v15109_v47 = vld [vmem:[#allocation212_spill] sm:$0xff]  ;;  %v15111_v23 = vld [vmem:[#allocation87_spill] sm:$0xff] }
 0x1c1   : > { %vm1525_vm8 = vmxor %vm1397_vm14, %vm14453_vm7  ;;  %v8567_v9 = vmul.f32 %v15109_v47, %v15109_v47  ;;  %v759_v27 = vld [vmem:[%s5221_s23 + $0x3e8] sm:$0xff]  ;;  %v8578_v18 = vsub.f32 %v756_v10, %v1652_v21  ;;  %v15115_v25 = vld [vmem:[#allocation88_spill] sm:$0xff] }
 0x1c2   : > { %15106 = vst [vmem:[#allocation163_spill] sm:$0xff] %v8552_v42  ;;  %15108 = vst [vmem:[#allocation267_spill] sm:$0xff] %v8556_v62  ;;  %v8571_v42 = vmul.f32 %v15111_v23, %v15111_v23  ;;  %v1653_v62 = vsel %vm1525_vm8, %v8289_v13, 0.0  ;;  %v15113_v6 = vld [vmem:[#allocation213_spill] sm:$0xff]  ;;  %v8586_v47 = vmul.f32 %v15115_v25, %v15115_v25  ;;  %v15117_v13 = vld [vmem:[#allocation214_spill] sm:$0xff] }
 0x1c3   : > { %15110 = vst [vmem:[#allocation170_spill] sm:$0xff] %v8567_v9  ;;  %vm1526_vm5 = vmxor %vm1398_vm6, %vm14453_vm7  ;;  %v8582_v51 = vmul.f32 %v15113_v6, %v15113_v6  ;;  %v760_v9 = vld [vmem:[%s5221_s23 + $0x3f0] sm:$0xff]  ;;  %v8597_v21 = vmul.f32 %v15117_v13, %v15117_v13  ;;  %v15119_v10 = vld [vmem:[#allocation89_spill] sm:$0xff] }
 0x1c4   : > { %15112 = vst [vmem:[#allocation269_spill] sm:$0xff] %v8571_v42  ;;  %15116 = vst [vmem:[#allocation270_spill] sm:$0xff] %v8586_v47  ;;  %v1654_v23 = vsel %vm1526_vm5, %v8314_v38, 0.0  ;;  %v8593_v42 = vsub.f32 %v757_v36, %v1653_v62  ;;  %v8601_v6 = vmul.f32 %v15119_v10, %v15119_v10  ;;  %v15121_v38 = vld [vmem:[#allocation215_spill] sm:$0xff]  ;;  %v15123_v36 = vld [vmem:[#allocation220_spill] sm:$0xff] }
 0x1c5   : > { %15114 = vst [vmem:[#allocation172_spill] sm:$0xff] %v8582_v51  ;;  %vm1527_vm14 = vmxor %vm1399_vm11, %vm14453_vm7  ;;  %v761_v51 = vld [vmem:[%s5221_s23 + $0x3f8] sm:$0xff]  ;;  %v8608_v47 = vsub.f32 %v758_v54, %v1654_v23  ;;  %v8612_v62 = vmul.f32 %v15121_v38, %v15121_v38  ;;  %v8616_v13 = vmul.f32 %v15123_v36, %v15123_v36  ;;  %v15126_v54 = vld [vmem:[#allocation221_spill] sm:$0xff]  ;;  %s9759_s23 = scalar_lea.vmem [#allocation10], %s4437_s18 }
 0x1c6   : > { %15118 = vst [vmem:[#allocation178_spill] sm:$0xff] %v8597_v21  ;;  %15120 = vst [vmem:[#allocation272_spill] sm:$0xff] %v8601_v6  ;;  %v1655_v25 = vsel %vm1527_vm14, %v8339_v22, 0.0  ;;  %v15125_v21 = vld [vmem:[#allocation95_spill] sm:$0xff]  ;;  %v8630_v23 = vmul.f32 %v15126_v54, %v15126_v54 }
 0x1c7   : > { %vm1528_vm6 = vmxor %vm1400_vm9, %vm14453_vm7  ;;  %15122 = vst [vmem:[#allocation180_spill] sm:$0xff] %v8612_v62  ;;  %v8622_v6 = vsub.f32 %v759_v27, %v1655_v25  ;;  %v8626_v22 = vmul.f32 %v15125_v21, %v15125_v21  ;;  %v15130_v21 = vld [vmem:[#allocation97_spill] sm:$0xff]  ;;  %v15132_v54 = vld [vmem:[#allocation223_spill] sm:$0xff] }
 0x1c8   : > { %15124 = vst [vmem:[#allocation274_spill] sm:$0xff] %v8616_v13  ;;  %vm1529_vm11 = vmxor %vm1401_vm2, %vm14453_vm7  ;;  %v1656_v10 = vsel %vm1528_vm6, %v8364_v17, 0.0  ;;  %v15128_v13 = vld [vmem:[#allocation96_spill] sm:$0xff]  ;;  %v8641_v17 = vmul.f32 %v15129_v43, %v15129_v43  ;;  %v8647_v25 = vmul.f32 %v15130_v21, %v15130_v21  ;;  %v15138_v43 = vld [vmem:[#allocation103_spill] sm:$0xff] }
 0x1c9   : > { %15127 = vst [vmem:[#allocation187_spill] sm:$0xff] %v8630_v23  ;;  %v1657_v38 = vsel %vm1529_vm11, %v8389_v1, 0.0  ;;  %v8633_v36 = vsub.f32 %v760_v9, %v1656_v10  ;;  %v8637_v62 = vmul.f32 %v15128_v13, %v15128_v13  ;;  %v8651_v23 = vmul.f32 %v15132_v54, %v15132_v54  ;;  %v15134_v1 = vld [vmem:[#allocation98_spill] sm:$0xff]  ;;  %v15136_v13 = vld [vmem:[#allocation228_spill] sm:$0xff] }
 0x1ca   : > { %v8643_v27 = vsub.f32 %v761_v51, %v1657_v38  ;;  %15131 = vst [vmem:[#allocation111_spill] sm:$0xff] %v8647_v25  ;;  %v8655_v9 = vmul.f32 %v15134_v1, %v15134_v1  ;;  %v8659_v10 = vmul.f32 %v15136_v13, %v15136_v13  ;;  %v8663_v51 = vmul.f32 %v15138_v43, %v15138_v43  ;;  %v15140_v38 = vld [vmem:[#allocation229_spill] sm:$0xff]  ;;  %v15142_v25 = vld [vmem:[#allocation104_spill] sm:$0xff] }
 0x1cb   : > { %15133 = vst [vmem:[#allocation66_spill] sm:$0xff] %v8651_v23  ;;  %v8667_v21 = vmul.f32 %v15140_v38, %v15140_v38  ;;  %v8671_v54 = vmul.f32 %v15142_v25, %v15142_v25  ;;  %v15144_v23 = vld [vmem:[#allocation105_spill] sm:$0xff] }
 0x1cc   : > { %15135 = vst [vmem:[#allocation112_spill] sm:$0xff] %v8655_v9  ;;  %15137 = vst [vmem:[#allocation197_spill] sm:$0xff] %v8659_v10  ;;  %v8675_v1 = vmul.f32 %v15144_v23, %v15144_v23  ;;  %v15146_v9 = vld [vmem:[#allocation231_spill] sm:$0xff]  ;;  %v15148_v10 = vld [vmem:[#allocation106_spill] sm:$0xff] }
 0x1cd   : > { %15139 = vst [vmem:[#allocation113_spill] sm:$0xff] %v8663_v51  ;;  %15141 = vst [vmem:[#allocation79_spill] sm:$0xff] %v8667_v21  ;;  %v8679_v13 = vmul.f32 %v15146_v9, %v15146_v9  ;;  %v8683_v43 = vmul.f32 %v15148_v10, %v15148_v10  ;;  %v15150_v51 = vld [vmem:[#allocation118_spill] sm:$0xff]  ;;  %v15152_v21 = vld [vmem:[#allocation245_spill] sm:$0xff] }
 0x1ce   : > { %15143 = vst [vmem:[#allocation276_spill] sm:$0xff] %v8671_v54  ;;  %15145 = vst [vmem:[#allocation90_spill] sm:$0xff] %v8675_v1  ;;  %v8687_v38 = vmul.f32 %v15150_v51, %v15150_v51  ;;  %v8691_v25 = vmul.f32 %v15152_v21, %v15152_v21  ;;  %v15154_v54 = vld [vmem:[#allocation119_spill] sm:$0xff]  ;;  %v15156_v1 = vld [vmem:[#allocation120_spill] sm:$0xff] }
 0x1cf   : > { %15147 = vst [vmem:[#allocation281_spill] sm:$0xff] %v8679_v13  ;;  %15149 = vst [vmem:[#allocation283_spill] sm:$0xff] %v8683_v43  ;;  %v8695_v23 = vmul.f32 %v15154_v54, %v15154_v54  ;;  %v8699_v9 = vmul.f32 %v15156_v1, %v15156_v1  ;;  %v15158_v13 = vld [vmem:[#allocation247_spill] sm:$0xff]  ;;  %v15160_v43 = vld [vmem:[#allocation125_spill] sm:$0xff] }
 0x1d0   : > { %15151 = vst [vmem:[#allocation41_spill] sm:$0xff] %v8687_v38  ;;  %15153 = vst [vmem:[#allocation230_spill] sm:$0xff] %v8691_v25  ;;  %v8703_v10 = vmul.f32 %v15158_v13, %v15158_v13  ;;  %v8707_v51 = vmul.f32 %v15160_v43, %v15160_v43  ;;  %v15162_v38 = vld [vmem:[#allocation126_spill] sm:$0xff] }
 0x1d1   : > { %15155 = vst [vmem:[#allocation189_spill] sm:$0xff] %v8695_v23  ;;  %15157 = vst [vmem:[#allocation72_spill] sm:$0xff] %v8699_v9  ;;  %v8711_v21 = vmul.f32 %v15162_v38, %v15162_v38  ;;  %v15164_v25 = vld [vmem:[#allocation250_spill] sm:$0xff]  ;;  %v15166_v23 = vld [vmem:[#allocation127_spill] sm:$0xff] }
 0x1d2   : > { %15159 = vst [vmem:[#allocation204_spill] sm:$0xff] %v8703_v10  ;;  %15161 = vst [vmem:[#allocation239_spill] sm:$0xff] %v8707_v51  ;;  %v8715_v54 = vmul.f32 %v15164_v25, %v15164_v25  ;;  %v8719_v1 = vmul.f32 %v15166_v23, %v15166_v23  ;;  %v15168_v9 = vld [vmem:[#allocation132_spill] sm:$0xff]  ;;  %v15172_v51 = vld [vmem:[#allocation133_spill] sm:$0xff] }
 0x1d3   : > { %15163 = vst [vmem:[#allocation81_spill] sm:$0xff] %v8711_v21  ;;  %v8723_v13 = vmul.f32 %v15168_v9, %v15168_v9  ;;  %v15170_v10 = vld [vmem:[#allocation252_spill] sm:$0xff]  ;;  %v8731_v38 = vmul.f32 %v15172_v51, %v15172_v51  ;;  %v15174_v21 = vld [vmem:[#allocation134_spill] sm:$0xff] }
 0x1d4   : > { %15165 = vst [vmem:[#allocation246_spill] sm:$0xff] %v8715_v54  ;;  %15167 = vst [vmem:[#allocation248_spill] sm:$0xff] %v8719_v1  ;;  %v8727_v43 = vmul.f32 %v15170_v10, %v15170_v10  ;;  %v8735_v25 = vmul.f32 %v15174_v21, %v15174_v21  ;;  %v15176_v54 = vld [vmem:[#allocation255_spill] sm:$0xff] }
 0x1d5   : > { %15169 = vst [vmem:[#allocation251_spill] sm:$0xff] %v8723_v13  ;;  %15173 = vst [vmem:[#allocation40_spill] sm:$0xff] %v8731_v38  ;;  %v8739_v23 = vmul.f32 %v15176_v54, %v15176_v54  ;;  %v15178_v1 = vld [vmem:[#allocation139_spill] sm:$0xff]  ;;  %v15180_v13 = vld [vmem:[#allocation140_spill] sm:$0xff] }
 0x1d6   : > { %15171 = vst [vmem:[#allocation161_spill] sm:$0xff] %v8727_v43  ;;  %15175 = vst [vmem:[#allocation253_spill] sm:$0xff] %v8735_v25  ;;  %v8743_v9 = vmul.f32 %v15178_v1, %v15178_v1  ;;  %v8747_v10 = vmul.f32 %v15180_v13, %v15180_v13  ;;  %v15182_v43 = vld [vmem:[#allocation257_spill] sm:$0xff]  ;;  %v15186_v25 = vld [vmem:[#allocation259_spill] sm:$0xff] }
 0x1d7   : > { %15177 = vst [vmem:[#allocation162_spill] sm:$0xff] %v8739_v23  ;;  %v8751_v51 = vmul.f32 %v15182_v43, %v15182_v43  ;;  %v15184_v38 = vld [vmem:[#allocation145_spill] sm:$0xff]  ;;  %v8759_v54 = vmul.f32 %v15186_v25, %v15186_v25  ;;  %v15187_v23 = vld [vmem:[#allocation260_spill] sm:$0xff] }
 0x1d8   : > { %15179 = vst [vmem:[#allocation42_spill] sm:$0xff] %v8743_v9  ;;  %15181 = vst [vmem:[#allocation256_spill] sm:$0xff] %v8747_v10  ;;  %v8755_v21 = vmul.f32 %v15184_v38, %v15184_v38  ;;  %v8763_v1 = vmul.f32 %v15187_v23, %v15187_v23  ;;  %v15188_v9 = vld [vmem:[#allocation150_spill] sm:$0xff]  ;;  %v15190_v10 = vld [vmem:[#allocation261_spill] sm:$0xff]  ;;  %v8783_v23 = vmul.f32 %v7987_v52, %v7987_v52 }
 0x1d9   : > { %15183 = vst [vmem:[#allocation169_spill] sm:$0xff] %v8751_v51  ;;  %v8767_v13 = vmul.f32 %v15188_v9, %v15188_v9  ;;  %v8771_v43 = vmul.f32 %v15190_v10, %v15190_v10  ;;  %v15191_v51 = vld [vmem:[#allocation151_spill] sm:$0xff]  ;;  %v8787_v9 = vmul.f32 %v7993_v24, %v7993_v24  ;;  %v8803_v52 = vmul.f32 %v8034_v16, %v8034_v16 }
 0x1da   : > { %15185 = vst [vmem:[#allocation47_spill] sm:$0xff] %v8755_v21  ;;  %v8775_v38 = vmul.f32 %v15191_v51, %v15191_v51  ;;  %v15192_v21 = vld [vmem:[#allocation263_spill] sm:$0xff]  ;;  %v8795_v51 = vmul.f32 %v8022_v45, %v8022_v45  ;;  %v8807_v24 = vmul.f32 %v8057_v8, %v8057_v8  ;;  %v8815_v45 = vmul.f32 %v8069_v37, %v8069_v37 }
 0x1db   : > { %15189 = vst [vmem:[#allocation48_spill] sm:$0xff] %v8767_v13  ;;  %v8779_v25 = vmul.f32 %v15192_v21, %v15192_v21  ;;  %v15193_v13 = vld [vmem:[#allocation264_spill] sm:$0xff]  ;;  %v8799_v21 = vmul.f32 %v8028_v32, %v8028_v32  ;;  %v8819_v32 = vmul.f32 %v8090_v56, %v8090_v56  ;;  %v8823_v16 = vmul.f32 %v8096_v12, %v8096_v12 }
 0x1dc   : > { %v8791_v10 = vmul.f32 %v15193_v13, %v15193_v13  ;;  %v8811_v13 = vmul.f32 %v8063_v19, %v8063_v19  ;;  %v8827_v8 = vmul.f32 %v8102_v57, %v8102_v57  ;;  %v8831_v19 = vmul.f32 %v8123_v44, %v8123_v44 }
 0x1dd   : > { %v8835_v37 = vmul.f32 %v8129_v61, %v8129_v61  ;;  %v8839_v56 = vmul.f32 %v8135_v53, %v8135_v53  ;;  %v8843_v12 = vmul.f32 %v8156_v59, %v8156_v59  ;;  %v8847_v57 = vmul.f32 %v8162_v50, %v8162_v50 }
 0x1de   : > { %v8851_v44 = vmul.f32 %v8168_v20, %v8168_v20  ;;  %v8855_v61 = vmul.f32 %v8189_v0, %v8189_v0  ;;  %v8859_v53 = vmul.f32 %v8191_v29, %v8191_v29  ;;  %v8863_v59 = vmul.f32 %v8193_v30, %v8193_v30 }
 0x1df   : > { %v8867_v50 = vmul.f32 %v8210_v55, %v8210_v55  ;;  %v8871_v20 = vmul.f32 %v8212_v39, %v8212_v39  ;;  %v8875_v0 = vmul.f32 %v8214_v7, %v8214_v7  ;;  %v8879_v29 = vmul.f32 %v8231_v15, %v8231_v15 }
 0x1e0   : > { %v8883_v30 = vmul.f32 %v8233_v5, %v8233_v5  ;;  %v8887_v55 = vmul.f32 %v8235_v2, %v8235_v2  ;;  %v8891_v39 = vmul.f32 %v8252_v35, %v8252_v35  ;;  %v8895_v7 = vmul.f32 %v8277_v46, %v8277_v46 }
 0x1e1   : > { %v8899_v15 = vmul.f32 %v8302_v48, %v8302_v48  ;;  %v8903_v5 = vmul.f32 %v8327_v49, %v8327_v49  ;;  %v8907_v2 = vmul.f32 %v8352_v60, %v8352_v60  ;;  %v8911_v35 = vmul.f32 %v8377_v14, %v8377_v14 }
 0x1e2   : > { %v8915_v46 = vmul.f32 %v8402_v4, %v8402_v4  ;;  %v8919_v48 = vmul.f32 %v8424_v63, %v8424_v63  ;;  %v8923_v49 = vmul.f32 %v8442_v34, %v8442_v34  ;;  %v8927_v60 = vmul.f32 %v8458_v11, %v8458_v11 }
 0x1e3   : > { %v8931_v14 = vmul.f32 %v8473_v33, %v8473_v33  ;;  %v8935_v4 = vmul.f32 %v8488_v41, %v8488_v41  ;;  %v8939_v63 = vmul.f32 %v8503_v40, %v8503_v40  ;;  %v8943_v34 = vmul.f32 %v8518_v28, %v8518_v28 }
 0x1e4   : > { %v8947_v11 = vmul.f32 %v8533_v58, %v8533_v58  ;;  %v8951_v33 = vmul.f32 %v8548_v31, %v8548_v31  ;;  %v8955_v41 = vmul.f32 %v8563_v26, %v8563_v26  ;;  %v8959_v40 = vmul.f32 %v8578_v18, %v8578_v18 }
 0x1e5   : > { %15194 = vst [vmem:[#allocation171_spill] sm:$0xff] %v8939_v63  ;;  %15195 = vst [vmem:[#allocation49_spill] sm:$0xff] %v8943_v34  ;;  %v8963_v28 = vmul.f32 %v8593_v42, %v8593_v42  ;;  %v8967_v58 = vmul.f32 %v8608_v47, %v8608_v47  ;;  %v8971_v31 = vmul.f32 %v8622_v6, %v8622_v6  ;;  %v15217_v34 = vld [vmem:[#allocation268_spill] sm:$0xff]  ;;  %v15220_v63 = vld [vmem:[#allocation181_spill] sm:$0xff] }
 0x1e6   : > { %15196 = vst [vmem:[#allocation50_spill] sm:$0xff] %v8947_v11  ;;  %15197 = vst [vmem:[#allocation177_spill] sm:$0xff] %v8951_v33  ;;  %v8975_v26 = vmul.f32 %v8633_v36, %v8633_v36  ;;  %v8979_v18 = vmul.f32 %v8643_v27, %v8643_v27  ;;  %v15211_v33 = vld [vmem:[#allocation266_spill] sm:$0xff]  ;;  %v15214_v11 = vld [vmem:[#allocation164_spill] sm:$0xff] }
 0x1e7   : > { %15198 = vst [vmem:[#allocation55_spill] sm:$0xff] %v8955_v41  ;;  %15199 = vst [vmem:[#allocation56_spill] sm:$0xff] %v8959_v40  ;;  %v15205_v40 = vld [vmem:[#allocation21_spill] sm:$0xff]  ;;  %v15208_v41 = vld [vmem:[#allocation156_spill] sm:$0xff] }
 0x1e8   : > { %15200 = vst [vmem:[#allocation179_spill] sm:$0xff] %v8963_v28  ;;  %15201 = vst [vmem:[#allocation57_spill] sm:$0xff] %v8967_v58  ;;  %v8983_v42 = vmul.f32 %v8256_v3, %v15205_v40  ;;  %v15207_v28 = vld [vmem:[#allocation22_spill] sm:$0xff]  ;;  %v15210_v58 = vld [vmem:[#allocation23_spill] sm:$0xff] }
 0x1e9   : > { %15202 = vst [vmem:[#allocation58_spill] sm:$0xff] %v8971_v31  ;;  %15203 = vst [vmem:[#allocation186_spill] sm:$0xff] %v8975_v26  ;;  %v8987_v47 = vmul.f32 %v15208_v41, %v15207_v28  ;;  %v8991_v6 = vmul.f32 %v15211_v33, %v15210_v58  ;;  %v15213_v31 = vld [vmem:[#allocation24_spill] sm:$0xff]  ;;  %v15216_v26 = vld [vmem:[#allocation25_spill] sm:$0xff] }
 0x1ea   : > { %15204 = vst [vmem:[#allocation63_spill] sm:$0xff] %v8979_v18  ;;  %15206 = vst [vmem:[#allocation64_spill] sm:$0xff] %v8983_v42  ;;  %v8995_v36 = vmul.f32 %v15214_v11, %v15213_v31  ;;  %v8999_v27 = vmul.f32 %v15217_v34, %v15216_v26  ;;  %v15219_v18 = vld [vmem:[#allocation26_spill] sm:$0xff]  ;;  %v15222_v40 = vld [vmem:[#allocation27_spill] sm:$0xff] }
 0x1eb   : > { %15209 = vst [vmem:[#allocation188_spill] sm:$0xff] %v8987_v47  ;;  %15212 = vst [vmem:[#allocation65_spill] sm:$0xff] %v8991_v6  ;;  %v9003_v3 = vmul.f32 %v15220_v63, %v15219_v18  ;;  %v15223_v42 = vld [vmem:[#allocation271_spill] sm:$0xff]  ;;  %v15225_v28 = vld [vmem:[#allocation28_spill] sm:$0xff] }
 0x1ec   : > { %15215 = vst [vmem:[#allocation195_spill] sm:$0xff] %v8995_v36  ;;  %15218 = vst [vmem:[#allocation71_spill] sm:$0xff] %v8999_v27  ;;  %v9007_v41 = vmul.f32 %v15223_v42, %v15222_v40  ;;  %v15226_v47 = vld [vmem:[#allocation190_spill] sm:$0xff]  ;;  %v15228_v58 = vld [vmem:[#allocation29_spill] sm:$0xff] }
 0x1ed   : > { %15221 = vst [vmem:[#allocation196_spill] sm:$0xff] %v9003_v3  ;;  %v9011_v33 = vmul.f32 %v15226_v47, %v15225_v28  ;;  %v15229_v6 = vld [vmem:[#allocation273_spill] sm:$0xff]  ;;  %v15231_v31 = vld [vmem:[#allocation30_spill] sm:$0xff]  ;;  %v15232_v36 = vld [vmem:[#allocation199_spill] sm:$0xff] }
 0x1ee   : > { %15224 = vst [vmem:[#allocation73_spill] sm:$0xff] %v9007_v41  ;;  %v9015_v11 = vmul.f32 %v15229_v6, %v15228_v58  ;;  %v9019_v34 = vmul.f32 %v15232_v36, %v15231_v31  ;;  %v15234_v26 = vld [vmem:[#allocation31_spill] sm:$0xff]  ;;  %v15237_v18 = vld [vmem:[#allocation32_spill] sm:$0xff]  ;;  %v15240_v40 = vld [vmem:[#allocation33_spill] sm:$0xff] }
 0x1ef   : > { %15227 = vst [vmem:[#allocation198_spill] sm:$0xff] %v9011_v33  ;;  %v15235_v27 = vld [vmem:[#allocation275_spill] sm:$0xff]  ;;  %v15238_v3 = vld [vmem:[#allocation208_spill] sm:$0xff]  ;;  %v15243_v28 = vld [vmem:[#allocation34_spill] sm:$0xff] }
 0x1f0   : > { %15230 = vst [vmem:[#allocation74_spill] sm:$0xff] %v9015_v11  ;;  %15233 = vst [vmem:[#allocation205_spill] sm:$0xff] %v9019_v34  ;;  %v9023_v63 = vmul.f32 %v15235_v27, %v15234_v26  ;;  %v9027_v42 = vmul.f32 %v15238_v3, %v15237_v18  ;;  %v15241_v41 = vld [vmem:[#allocation236_spill] sm:$0xff]  ;;  %v15246_v58 = vld [vmem:[#allocation35_spill] sm:$0xff] }
 0x1f1   : > { %v9031_v47 = vmul.f32 %v15241_v41, %v15240_v40  ;;  %v15244_v33 = vld [vmem:[#allocation216_spill] sm:$0xff]  ;;  %v15247_v11 = vld [vmem:[#allocation237_spill] sm:$0xff]  ;;  %v15255_v18 = vld [vmem:[#allocation38_spill] sm:$0xff] }
 0x1f2   : > { %15236 = vst [vmem:[#allocation80_spill] sm:$0xff] %v9023_v63  ;;  %15239 = vst [vmem:[#allocation206_spill] sm:$0xff] %v9027_v42  ;;  %v9035_v6 = vmul.f32 %v15244_v33, %v15243_v28  ;;  %v9039_v36 = vmul.f32 %v15247_v11, %v15246_v58  ;;  %v15249_v31 = vld [vmem:[#allocation36_spill] sm:$0xff]  ;;  %v15252_v26 = vld [vmem:[#allocation37_spill] sm:$0xff] }
 0x1f3   : > { %15242 = vst [vmem:[#allocation207_spill] sm:$0xff] %v9031_v47  ;;  %v15250_v34 = vld [vmem:[#allocation224_spill] sm:$0xff]  ;;  %v15253_v63 = vld [vmem:[#allocation238_spill] sm:$0xff]  ;;  %v15258_v40 = vld [vmem:[#allocation39_spill] sm:$0xff] }
 0x1f4   : > { %15245 = vst [vmem:[#allocation82_spill] sm:$0xff] %v9035_v6  ;;  %15248 = vst [vmem:[#allocation212_spill] sm:$0xff] %v9039_v36  ;;  %v9043_v27 = vmul.f32 %v15250_v34, %v15249_v31  ;;  %v9047_v3 = vmul.f32 %v15253_v63, %v15252_v26  ;;  %v15256_v42 = vld [vmem:[#allocation232_spill] sm:$0xff]  ;;  %v15259_v47 = vld [vmem:[#allocation277_spill] sm:$0xff] }
 0x1f5   : > { %v9051_v41 = vmul.f32 %v15256_v42, %v15255_v18  ;;  %v9055_v33 = vmul.f32 %v15259_v47, %v15258_v40  ;;  %v15261_v28 = vld [vmem:[#allocation43_spill] sm:$0xff]  ;;  %v15262_v6 = vld [vmem:[#allocation240_spill] sm:$0xff]  ;;  %v15265_v36 = vld [vmem:[#allocation278_spill] sm:$0xff] }
 0x1f6   : > { %15251 = vst [vmem:[#allocation87_spill] sm:$0xff] %v9043_v27  ;;  %15254 = vst [vmem:[#allocation213_spill] sm:$0xff] %v9047_v3  ;;  %v9059_v11 = vmul.f32 %v15262_v6, %v15261_v28  ;;  %v15264_v58 = vld [vmem:[#allocation44_spill] sm:$0xff]  ;;  %v15267_v31 = vld [vmem:[#allocation45_spill] sm:$0xff] }
 0x1f7   : > { %15257 = vst [vmem:[#allocation88_spill] sm:$0xff] %v9051_v41  ;;  %15260 = vst [vmem:[#allocation214_spill] sm:$0xff] %v9055_v33  ;;  %v9063_v34 = vmul.f32 %v15265_v36, %v15264_v58  ;;  %v15268_v27 = vld [vmem:[#allocation241_spill] sm:$0xff]  ;;  %v15270_v26 = vld [vmem:[#allocation46_spill] sm:$0xff] }
 0x1f8   : > { %15263 = vst [vmem:[#allocation89_spill] sm:$0xff] %v9059_v11  ;;  %v9067_v63 = vmul.f32 %v15268_v27, %v15267_v31  ;;  %v15271_v3 = vld [vmem:[#allocation279_spill] sm:$0xff]  ;;  %v15274_v41 = vld [vmem:[#allocation254_spill] sm:$0xff]  ;;  %v15276_v40 = vld [vmem:[#allocation52_spill] sm:$0xff] }
 0x1f9   : > { %15266 = vst [vmem:[#allocation215_spill] sm:$0xff] %v9063_v34  ;;  %v9071_v42 = vmul.f32 %v15271_v3, %v15270_v26  ;;  %v15273_v18 = vld [vmem:[#allocation51_spill] sm:$0xff]  ;;  %v15277_v33 = vld [vmem:[#allocation280_spill] sm:$0xff]  ;;  %v15279_v28 = vld [vmem:[#allocation53_spill] sm:$0xff] }
 0x1fa   : > { %15269 = vst [vmem:[#allocation220_spill] sm:$0xff] %v9067_v63  ;;  %v9075_v47 = vmul.f32 %v15274_v41, %v15273_v18  ;;  %v9079_v6 = vmul.f32 %v15277_v33, %v15276_v40  ;;  %v15280_v11 = vld [vmem:[#allocation258_spill] sm:$0xff]  ;;  %v15285_v31 = vld [vmem:[#allocation59_spill] sm:$0xff]  ;;  %v15288_v26 = vld [vmem:[#allocation60_spill] sm:$0xff] }
 0x1fb   : > { %15272 = vst [vmem:[#allocation95_spill] sm:$0xff] %v9071_v42  ;;  %v9083_v36 = vmul.f32 %v15280_v11, %v15279_v28  ;;  %v15282_v58 = vld [vmem:[#allocation54_spill] sm:$0xff]  ;;  %v15289_v42 = vld [vmem:[#allocation284_spill] sm:$0xff]  ;;  %v15291_v18 = vld [vmem:[#allocation61_spill] sm:$0xff] }
 0x1fc   : > { %15275 = vst [vmem:[#allocation221_spill] sm:$0xff] %v9075_v47  ;;  %15278 = vst [vmem:[#allocation96_spill] sm:$0xff] %v9079_v6  ;;  %v15283_v34 = vld [vmem:[#allocation282_spill] sm:$0xff]  ;;  %v9095_v41 = vmul.f32 %v15289_v42, %v15288_v26  ;;  %v15292_v47 = vld [vmem:[#allocation265_spill] sm:$0xff] }
 0x1fd   : > { %15281 = vst [vmem:[#allocation222_spill] sm:$0xff] %v9083_v36  ;;  %v9087_v27 = vmul.f32 %v15283_v34, %v15282_v58  ;;  %v15286_v63 = vld [vmem:[#allocation262_spill] sm:$0xff]  ;;  %v9099_v33 = vmul.f32 %v15292_v47, %v15291_v18  ;;  %v15295_v6 = vld [vmem:[#allocation163_spill] sm:$0xff]  ;;  %v15300_v58 = vld [vmem:[#allocation68_spill] sm:$0xff] }
 0x1fe   : > { %v9091_v3 = vmul.f32 %v15286_v63, %v15285_v31  ;;  %15290 = vst [vmem:[#allocation98_spill] sm:$0xff] %v9095_v41  ;;  %v15294_v40 = vld [vmem:[#allocation62_spill] sm:$0xff]  ;;  %v15297_v28 = vld [vmem:[#allocation67_spill] sm:$0xff]  ;;  %v15303_v31 = vld [vmem:[#allocation69_spill] sm:$0xff] }
 0x1ff   : > { %15284 = vst [vmem:[#allocation97_spill] sm:$0xff] %v9087_v27  ;;  %15293 = vst [vmem:[#allocation228_spill] sm:$0xff] %v9099_v33  ;;  %v9103_v11 = vmul.f32 %v15295_v6, %v15294_v40  ;;  %v15298_v36 = vld [vmem:[#allocation267_spill] sm:$0xff]  ;;  %v15301_v27 = vld [vmem:[#allocation170_spill] sm:$0xff] }
 0x200   : > { %15287 = vst [vmem:[#allocation223_spill] sm:$0xff] %v9091_v3  ;;  %v9107_v34 = vmul.f32 %v15298_v36, %v15297_v28  ;;  %v9111_v63 = vmul.f32 %v15301_v27, %v15300_v58  ;;  %v15304_v3 = vld [vmem:[#allocation269_spill] sm:$0xff]  ;;  %v15306_v26 = vld [vmem:[#allocation70_spill] sm:$0xff]  ;;  %v15307_v41 = vld [vmem:[#allocation172_spill] sm:$0xff] }
 0x201   : > { %15296 = vst [vmem:[#allocation103_spill] sm:$0xff] %v9103_v11  ;;  %v9115_v42 = vmul.f32 %v15304_v3, %v15303_v31  ;;  %v9119_v47 = vmul.f32 %v15307_v41, %v15306_v26  ;;  %v15308_v18 = vld [vmem:[#allocation75_spill] sm:$0xff]  ;;  %v15309_v33 = vld [vmem:[#allocation270_spill] sm:$0xff]  ;;  %v15311_v40 = vld [vmem:[#allocation76_spill] sm:$0xff] }
 0x202   : > { %15299 = vst [vmem:[#allocation229_spill] sm:$0xff] %v9107_v34  ;;  %15302 = vst [vmem:[#allocation104_spill] sm:$0xff] %v9111_v63  ;;  %v9123_v6 = vmul.f32 %v15309_v33, %v15308_v18  ;;  %v15312_v11 = vld [vmem:[#allocation178_spill] sm:$0xff]  ;;  %v15313_v28 = vld [vmem:[#allocation77_spill] sm:$0xff] }
 0x203   : > { %15305 = vst [vmem:[#allocation105_spill] sm:$0xff] %v9115_v42  ;;  %v9127_v36 = vmul.f32 %v15312_v11, %v15311_v40  ;;  %v15314_v34 = vld [vmem:[#allocation272_spill] sm:$0xff]  ;;  %v15315_v58 = vld [vmem:[#allocation78_spill] sm:$0xff]  ;;  %v15318_v31 = vld [vmem:[#allocation83_spill] sm:$0xff] }
 0x204   : > { %15310 = vst [vmem:[#allocation231_spill] sm:$0xff] %v9123_v6  ;;  %v9131_v27 = vmul.f32 %v15314_v34, %v15313_v28  ;;  %v15316_v63 = vld [vmem:[#allocation180_spill] sm:$0xff]  ;;  %v15319_v42 = vld [vmem:[#allocation274_spill] sm:$0xff]  ;;  %v15323_v18 = vld [vmem:[#allocation85_spill] sm:$0xff] }
 0x205   : > { %v9135_v3 = vmul.f32 %v15316_v63, %v15315_v58  ;;  %v9139_v41 = vmul.f32 %v15319_v42, %v15318_v31  ;;  %v15321_v26 = vld [vmem:[#allocation84_spill] sm:$0xff]  ;;  %v15324_v6 = vld [vmem:[#allocation187_spill] sm:$0xff]  ;;  %v15326_v40 = vld [vmem:[#allocation86_spill] sm:$0xff] }
 0x206   : > { %v9143_v33 = vmul.f32 %v8626_v22, %v15321_v26  ;;  %v9147_v11 = vmul.f32 %v15324_v6, %v15323_v18  ;;  %v9151_v34 = vmul.f32 %v8637_v62, %v15326_v40  ;;  %v15328_v28 = vld [vmem:[#allocation91_spill] sm:$0xff]  ;;  %v15330_v58 = vld [vmem:[#allocation92_spill] sm:$0xff]  ;;  %v15333_v31 = vld [vmem:[#allocation93_spill] sm:$0xff] }
 0x207   : > { %15317 = vst [vmem:[#allocation106_spill] sm:$0xff] %v9135_v3  ;;  %15320 = vst [vmem:[#allocation118_spill] sm:$0xff] %v9139_v41  ;;  %v9155_v63 = vmul.f32 %v8641_v17, %v15328_v28  ;;  %v15331_v3 = vld [vmem:[#allocation111_spill] sm:$0xff]  ;;  %v15334_v41 = vld [vmem:[#allocation66_spill] sm:$0xff] }
 0x208   : > { %15322 = vst [vmem:[#allocation245_spill] sm:$0xff] %v9143_v33  ;;  %15325 = vst [vmem:[#allocation119_spill] sm:$0xff] %v9147_v11  ;;  %v9159_v42 = vmul.f32 %v15331_v3, %v15330_v58  ;;  %v9163_v22 = vmul.f32 %v15334_v41, %v15333_v31  ;;  %v15336_v26 = vld [vmem:[#allocation94_spill] sm:$0xff]  ;;  %v15337_v33 = vld [vmem:[#allocation112_spill] sm:$0xff] }
 0x209   : > { %15327 = vst [vmem:[#allocation120_spill] sm:$0xff] %v9151_v34  ;;  %15329 = vst [vmem:[#allocation247_spill] sm:$0xff] %v9155_v63  ;;  %v9167_v6 = vmul.f32 %v15337_v33, %v15336_v26  ;;  %v15339_v18 = vld [vmem:[#allocation99_spill] sm:$0xff]  ;;  %v15340_v11 = vld [vmem:[#allocation197_spill] sm:$0xff] }
 0x20a   : > { %15332 = vst [vmem:[#allocation125_spill] sm:$0xff] %v9159_v42  ;;  %15335 = vst [vmem:[#allocation126_spill] sm:$0xff] %v9163_v22  ;;  %v9171_v62 = vmul.f32 %v15340_v11, %v15339_v18  ;;  %v15342_v40 = vld [vmem:[#allocation100_spill] sm:$0xff]  ;;  %v15343_v34 = vld [vmem:[#allocation113_spill] sm:$0xff] }
 0x20b   : > { %15338 = vst [vmem:[#allocation250_spill] sm:$0xff] %v9167_v6  ;;  %v9175_v17 = vmul.f32 %v15343_v34, %v15342_v40  ;;  %v15345_v28 = vld [vmem:[#allocation101_spill] sm:$0xff]  ;;  %v15346_v63 = vld [vmem:[#allocation79_spill] sm:$0xff]  ;;  %v15348_v58 = vld [vmem:[#allocation102_spill] sm:$0xff] }
 0x20c   : > { %15341 = vst [vmem:[#allocation127_spill] sm:$0xff] %v9171_v62  ;;  %v9179_v3 = vmul.f32 %v15346_v63, %v15345_v28  ;;  %v15349_v42 = vld [vmem:[#allocation276_spill] sm:$0xff]  ;;  %v15351_v31 = vld [vmem:[#allocation107_spill] sm:$0xff]  ;;  %v15352_v22 = vld [vmem:[#allocation90_spill] sm:$0xff] }
 0x20d   : > { %15344 = vst [vmem:[#allocation132_spill] sm:$0xff] %v9175_v17  ;;  %v9183_v41 = vmul.f32 %v15349_v42, %v15348_v58  ;;  %v9187_v33 = vmul.f32 %v15352_v22, %v15351_v31  ;;  %v15354_v26 = vld [vmem:[#allocation108_spill] sm:$0xff]  ;;  %v15355_v6 = vld [vmem:[#allocation281_spill] sm:$0xff]  ;;  %v15358_v62 = vld [vmem:[#allocation283_spill] sm:$0xff] }
 0x20e   : > { %15347 = vst [vmem:[#allocation252_spill] sm:$0xff] %v9179_v3  ;;  %v9191_v11 = vmul.f32 %v15355_v6, %v15354_v26  ;;  %v15357_v18 = vld [vmem:[#allocation109_spill] sm:$0xff]  ;;  %v15360_v40 = vld [vmem:[#allocation110_spill] sm:$0xff]  ;;  %v15366_v58 = vld [vmem:[#allocation115_spill] sm:$0xff] }
 0x20f   : > { %15350 = vst [vmem:[#allocation133_spill] sm:$0xff] %v9183_v41  ;;  %15353 = vst [vmem:[#allocation134_spill] sm:$0xff] %v9187_v33  ;;  %v9195_v34 = vmul.f32 %v15358_v62, %v15357_v18  ;;  %v15361_v17 = vld [vmem:[#allocation41_spill] sm:$0xff]  ;;  %v15363_v28 = vld [vmem:[#allocation114_spill] sm:$0xff] }
 0x210   : > { %15356 = vst [vmem:[#allocation255_spill] sm:$0xff] %v9191_v11  ;;  %v9199_v63 = vmul.f32 %v15361_v17, %v15360_v40  ;;  %v15364_v3 = vld [vmem:[#allocation230_spill] sm:$0xff]  ;;  %v15367_v41 = vld [vmem:[#allocation189_spill] sm:$0xff]  ;;  %v15369_v31 = vld [vmem:[#allocation116_spill] sm:$0xff] }
 0x211   : > { %15359 = vst [vmem:[#allocation139_spill] sm:$0xff] %v9195_v34  ;;  %v9203_v42 = vmul.f32 %v15364_v3, %v15363_v28  ;;  %v9207_v22 = vmul.f32 %v15367_v41, %v15366_v58  ;;  %v15370_v33 = vld [vmem:[#allocation72_spill] sm:$0xff]  ;;  %v15372_v26 = vld [vmem:[#allocation117_spill] sm:$0xff]  ;;  %v15376_v34 = vld [vmem:[#allocation239_spill] sm:$0xff] }
 0x212   : > { %15362 = vst [vmem:[#allocation140_spill] sm:$0xff] %v9199_v63  ;;  %v9211_v6 = vmul.f32 %v15370_v33, %v15369_v31  ;;  %v15373_v11 = vld [vmem:[#allocation204_spill] sm:$0xff]  ;;  %v15375_v18 = vld [vmem:[#allocation121_spill] sm:$0xff]  ;;  %v15378_v40 = vld [vmem:[#allocation122_spill] sm:$0xff] }
 0x213   : > { %15365 = vst [vmem:[#allocation257_spill] sm:$0xff] %v9203_v42  ;;  %15368 = vst [vmem:[#allocation145_spill] sm:$0xff] %v9207_v22  ;;  %v9215_v62 = vmul.f32 %v15373_v11, %v15372_v26  ;;  %v9219_v17 = vmul.f32 %v15376_v34, %v15375_v18  ;;  %v15379_v63 = vld [vmem:[#allocation81_spill] sm:$0xff]  ;;  %v15381_v28 = vld [vmem:[#allocation123_spill] sm:$0xff] }
 0x214   : > { %15371 = vst [vmem:[#allocation259_spill] sm:$0xff] %v9211_v6  ;;  %v9223_v3 = vmul.f32 %v15379_v63, %v15378_v40  ;;  %v15382_v42 = vld [vmem:[#allocation246_spill] sm:$0xff]  ;;  %v15384_v58 = vld [vmem:[#allocation124_spill] sm:$0xff]  ;;  %v15388_v6 = vld [vmem:[#allocation251_spill] sm:$0xff] }
 0x215   : > { %15374 = vst [vmem:[#allocation260_spill] sm:$0xff] %v9215_v62  ;;  %15377 = vst [vmem:[#allocation150_spill] sm:$0xff] %v9219_v17  ;;  %v9227_v41 = vmul.f32 %v15382_v42, %v15381_v28  ;;  %v15385_v22 = vld [vmem:[#allocation248_spill] sm:$0xff]  ;;  %v15390_v26 = vld [vmem:[#allocation129_spill] sm:$0xff] }
 0x216   : > { %15380 = vst [vmem:[#allocation261_spill] sm:$0xff] %v9223_v3  ;;  %v9231_v33 = vmul.f32 %v15385_v22, %v15384_v58  ;;  %v15387_v31 = vld [vmem:[#allocation128_spill] sm:$0xff]  ;;  %v15391_v62 = vld [vmem:[#allocation161_spill] sm:$0xff]  ;;  %v15393_v18 = vld [vmem:[#allocation130_spill] sm:$0xff] }
 0x217   : > { %15383 = vst [vmem:[#allocation151_spill] sm:$0xff] %v9227_v41  ;;  %v9235_v11 = vmul.f32 %v15388_v6, %v15387_v31  ;;  %v9239_v34 = vmul.f32 %v15391_v62, %v15390_v26  ;;  %v15394_v17 = vld [vmem:[#allocation40_spill] sm:$0xff]  ;;  %v15396_v40 = vld [vmem:[#allocation131_spill] sm:$0xff]  ;;  %v15397_v3 = vld [vmem:[#allocation253_spill] sm:$0xff] }
 0x218   : > { %15386 = vst [vmem:[#allocation263_spill] sm:$0xff] %v9231_v33  ;;  %v9243_v63 = vmul.f32 %v15394_v17, %v15393_v18  ;;  %v9247_v42 = vmul.f32 %v15397_v3, %v15396_v40  ;;  %v15398_v28 = vld [vmem:[#allocation135_spill] sm:$0xff]  ;;  %v15399_v41 = vld [vmem:[#allocation162_spill] sm:$0xff]  ;;  %v15400_v58 = vld [vmem:[#allocation136_spill] sm:$0xff] }
 0x219   : > { %15389 = vst [vmem:[#allocation264_spill] sm:$0xff] %v9235_v11  ;;  %15392 = vst [vmem:[#allocation156_spill] sm:$0xff] %v9239_v34  ;;  %v9251_v22 = vmul.f32 %v15399_v41, %v15398_v28  ;;  %v15401_v33 = vld [vmem:[#allocation42_spill] sm:$0xff]  ;;  %v15403_v31 = vld [vmem:[#allocation137_spill] sm:$0xff] }
 0x21a   : > { %15395 = vst [vmem:[#allocation266_spill] sm:$0xff] %v9243_v63  ;;  %v9255_v6 = vmul.f32 %v15401_v33, %v15400_v58  ;;  %v15404_v11 = vld [vmem:[#allocation256_spill] sm:$0xff]  ;;  %v15405_v26 = vld [vmem:[#allocation138_spill] sm:$0xff]  ;;  %v15406_v34 = vld [vmem:[#allocation169_spill] sm:$0xff] }
 0x21b   : > { %v9259_v62 = vmul.f32 %v15404_v11, %v15403_v31  ;;  %v9263_v17 = vmul.f32 %v15406_v34, %v15405_v26  ;;  %v15407_v18 = vld [vmem:[#allocation141_spill] sm:$0xff]  ;;  %v15408_v63 = vld [vmem:[#allocation47_spill] sm:$0xff]  ;;  %v15409_v40 = vld [vmem:[#allocation142_spill] sm:$0xff] }
 0x21c   : > { %15402 = vst [vmem:[#allocation164_spill] sm:$0xff] %v9255_v6  ;;  %v9267_v3 = vmul.f32 %v15408_v63, %v15407_v18  ;;  %v9271_v41 = vmul.f32 %v8759_v54, %v15409_v40  ;;  %v15410_v28 = vld [vmem:[#allocation143_spill] sm:$0xff]  ;;  %v15411_v58 = vld [vmem:[#allocation144_spill] sm:$0xff]  ;;  %v15413_v31 = vld [vmem:[#allocation146_spill] sm:$0xff] }
 0x21d   : > { %v9275_v33 = vmul.f32 %v8763_v1, %v15410_v28  ;;  %v15412_v6 = vld [vmem:[#allocation48_spill] sm:$0xff]  ;;  %v9283_v34 = vmul.f32 %v8771_v43, %v15413_v31  ;;  %v15414_v26 = vld [vmem:[#allocation147_spill] sm:$0xff]  ;;  %v15416_v40 = vld [vmem:[#allocation149_spill] sm:$0xff] }
 0x21e   : > { %v9279_v11 = vmul.f32 %v15412_v6, %v15411_v58  ;;  %v9287_v63 = vmul.f32 %v8775_v38, %v15414_v26  ;;  %v15415_v18 = vld [vmem:[#allocation148_spill] sm:$0xff]  ;;  %v9295_v1 = vmul.f32 %v8783_v23, %v15416_v40  ;;  %v15418_v58 = vld [vmem:[#allocation153_spill] sm:$0xff]  ;;  %v15419_v31 = vld [vmem:[#allocation154_spill] sm:$0xff] }
 0x21f   : > { %v9291_v54 = vmul.f32 %v8779_v25, %v15415_v18  ;;  %v15417_v28 = vld [vmem:[#allocation152_spill] sm:$0xff]  ;;  %v9303_v43 = vmul.f32 %v8791_v10, %v15418_v58  ;;  %v9307_v38 = vmul.f32 %v8795_v51, %v15419_v31  ;;  %v15420_v26 = vld [vmem:[#allocation155_spill] sm:$0xff]  ;;  %v15421_v18 = vld [vmem:[#allocation157_spill] sm:$0xff] }
 0x220   : > { %v9299_v6 = vmul.f32 %v8787_v9, %v15417_v28  ;;  %v9311_v25 = vmul.f32 %v8799_v21, %v15420_v26  ;;  %v9315_v23 = vmul.f32 %v8803_v52, %v15421_v18  ;;  %v15422_v40 = vld [vmem:[#allocation158_spill] sm:$0xff]  ;;  %v15423_v28 = vld [vmem:[#allocation159_spill] sm:$0xff]  ;;  %v15424_v58 = vld [vmem:[#allocation160_spill] sm:$0xff] }
 0x221   : > { %v9319_v9 = vmul.f32 %v8807_v24, %v15422_v40  ;;  %v9323_v10 = vmul.f32 %v8811_v13, %v15423_v28  ;;  %v9327_v51 = vmul.f32 %v8815_v45, %v15424_v58  ;;  %v15425_v31 = vld [vmem:[#allocation165_spill] sm:$0xff]  ;;  %v15426_v26 = vld [vmem:[#allocation166_spill] sm:$0xff]  ;;  %v15427_v18 = vld [vmem:[#allocation167_spill] sm:$0xff] }
 0x222   : > { %v9331_v21 = vmul.f32 %v8819_v32, %v15425_v31  ;;  %v9335_v52 = vmul.f32 %v8823_v16, %v15426_v26  ;;  %v9339_v24 = vmul.f32 %v8827_v8, %v15427_v18  ;;  %v15428_v40 = vld [vmem:[#allocation168_spill] sm:$0xff]  ;;  %v15429_v28 = vld [vmem:[#allocation173_spill] sm:$0xff]  ;;  %v15430_v58 = vld [vmem:[#allocation174_spill] sm:$0xff] }
 0x223   : > { %v9343_v13 = vmul.f32 %v8831_v19, %v15428_v40  ;;  %v9347_v45 = vmul.f32 %v8835_v37, %v15429_v28  ;;  %v9351_v32 = vmul.f32 %v8839_v56, %v15430_v58  ;;  %v15431_v31 = vld [vmem:[#allocation175_spill] sm:$0xff]  ;;  %v15432_v26 = vld [vmem:[#allocation176_spill] sm:$0xff]  ;;  %v15433_v18 = vld [vmem:[#allocation182_spill] sm:$0xff] }
 0x224   : > { %v9355_v16 = vmul.f32 %v8843_v12, %v15431_v31  ;;  %v9359_v8 = vmul.f32 %v8847_v57, %v15432_v26  ;;  %v9363_v19 = vmul.f32 %v8851_v44, %v15433_v18  ;;  %v15434_v40 = vld [vmem:[#allocation183_spill] sm:$0xff]  ;;  %v15435_v28 = vld [vmem:[#allocation184_spill] sm:$0xff]  ;;  %v15436_v58 = vld [vmem:[#allocation185_spill] sm:$0xff] }
 0x225   : > { %v9367_v37 = vmul.f32 %v8855_v61, %v15434_v40  ;;  %v9371_v56 = vmul.f32 %v8859_v53, %v15435_v28  ;;  %v9375_v12 = vmul.f32 %v8863_v59, %v15436_v58  ;;  %v15437_v57 = vld [vmem:[#allocation191_spill] sm:$0xff]  ;;  %v15438_v44 = vld [vmem:[#allocation192_spill] sm:$0xff]  ;;  %v15439_v61 = vld [vmem:[#allocation193_spill] sm:$0xff] }
 0x226   : > { %v9382_v31 = vmul.f32 %v8867_v50, %v15437_v57  ;;  %v9386_v26 = vmul.f32 %v8871_v20, %v15438_v44  ;;  %v9390_v18 = vmul.f32 %v8875_v0, %v15439_v61  ;;  %v15440_v53 = vld [vmem:[#allocation194_spill] sm:$0xff]  ;;  %v15441_v59 = vld [vmem:[#allocation200_spill] sm:$0xff]  ;;  %v15443_v58 = vld [vmem:[#allocation201_spill] sm:$0xff] }
 0x227   : > { %v9394_v40 = vmul.f32 %v8879_v29, %v15440_v53  ;;  %v9398_v28 = vmul.f32 %v8883_v30, %v15441_v59  ;;  %v9402_v50 = vmul.f32 %v8887_v55, %v15443_v58  ;;  %v15445_v57 = vld [vmem:[#allocation202_spill] sm:$0xff]  ;;  %v15447_v44 = vld [vmem:[#allocation203_spill] sm:$0xff]  ;;  %v15449_v61 = vld [vmem:[#allocation209_spill] sm:$0xff] }
 0x228   : > { %v9406_v20 = vmul.f32 %v8891_v39, %v15445_v57  ;;  %v9410_v0 = vmul.f32 %v8895_v7, %v15447_v44  ;;  %v9414_v29 = vmul.f32 %v8899_v15, %v15449_v61  ;;  %v15451_v53 = vld [vmem:[#allocation16_spill] sm:$0xff]  ;;  %v15453_v59 = vld [vmem:[#allocation210_spill] sm:$0xff]  ;;  %v15455_v58 = vld [vmem:[#allocation211_spill] sm:$0xff] }
 0x229   : > { %15442 = vst [vmem:[#allocation268_spill] sm:$0xff] %v9398_v28  ;;  %15444 = vst [vmem:[#allocation181_spill] sm:$0xff] %v9402_v50  ;;  %v9418_v30 = vmul.f32 %v8903_v5, %v15451_v53  ;;  %v9422_v55 = vmul.f32 %v8907_v2, %v15453_v59  ;;  %v9426_v39 = vmul.f32 %v8911_v35, %v15455_v58  ;;  %v15457_v57 = vld [vmem:[#allocation217_spill] sm:$0xff]  ;;  %v15461_v61 = vld [vmem:[#allocation218_spill] sm:$0xff] }
 0x22a   : > { %15446 = vst [vmem:[#allocation271_spill] sm:$0xff] %v9406_v20  ;;  %15448 = vst [vmem:[#allocation190_spill] sm:$0xff] %v9410_v0  ;;  %v9431_v7 = vmul.f32 %v8915_v46, %v15457_v57  ;;  %v15459_v44 = vld [vmem:[#allocation17_spill] sm:$0xff]  ;;  %v9439_v5 = vmul.f32 %v8923_v49, %v15461_v61  ;;  %v15463_v2 = vld [vmem:[#allocation219_spill] sm:$0xff] }
 0x22b   : > { %15450 = vst [vmem:[#allocation273_spill] sm:$0xff] %v9414_v29  ;;  %15452 = vst [vmem:[#allocation199_spill] sm:$0xff] %v9418_v30  ;;  %v9435_v15 = vmul.f32 %v8919_v48, %v15459_v44  ;;  %v9443_v53 = vmul.f32 %v8927_v60, %v15463_v2  ;;  %v15465_v35 = vld [vmem:[#allocation225_spill] sm:$0xff]  ;;  %v15467_v58 = vld [vmem:[#allocation18_spill] sm:$0xff] }
 0x22c   : > { %15454 = vst [vmem:[#allocation275_spill] sm:$0xff] %v9422_v55  ;;  %15456 = vst [vmem:[#allocation208_spill] sm:$0xff] %v9426_v39  ;;  %v9447_v59 = vmul.f32 %v8931_v14, %v15465_v35  ;;  %v9451_v46 = vmul.f32 %v8935_v4, %v15467_v58  ;;  %v15469_v57 = vld [vmem:[#allocation226_spill] sm:$0xff]  ;;  %v15470_v48 = vld [vmem:[#allocation171_spill] sm:$0xff] }
 0x22d   : > { %15458 = vst [vmem:[#allocation236_spill] sm:$0xff] %v9431_v7  ;;  %15460 = vst [vmem:[#allocation216_spill] sm:$0xff] %v9435_v15  ;;  %v9455_v44 = vmul.f32 %v15470_v48, %v15469_v57  ;;  %v15472_v15 = vld [vmem:[#allocation227_spill] sm:$0xff]  ;;  %v15473_v7 = vld [vmem:[#allocation49_spill] sm:$0xff] }
 0x22e   : > { %15462 = vst [vmem:[#allocation237_spill] sm:$0xff] %v9439_v5  ;;  %15464 = vst [vmem:[#allocation224_spill] sm:$0xff] %v9443_v53  ;;  %v9459_v49 = vmul.f32 %v15473_v7, %v15472_v15  ;;  %v15475_v61 = vld [vmem:[#allocation233_spill] sm:$0xff]  ;;  %v15476_v5 = vld [vmem:[#allocation50_spill] sm:$0xff] }
 0x22f   : > { %15466 = vst [vmem:[#allocation238_spill] sm:$0xff] %v9447_v59  ;;  %15468 = vst [vmem:[#allocation232_spill] sm:$0xff] %v9451_v46  ;;  %v9463_v60 = vmul.f32 %v15476_v5, %v15475_v61  ;;  %v15478_v2 = vld [vmem:[#allocation19_spill] sm:$0xff]  ;;  %v15479_v53 = vld [vmem:[#allocation177_spill] sm:$0xff] }
 0x230   : > { %15471 = vst [vmem:[#allocation277_spill] sm:$0xff] %v9455_v44  ;;  %15474 = vst [vmem:[#allocation240_spill] sm:$0xff] %v9459_v49  ;;  %v9467_v14 = vmul.f32 %v15479_v53, %v15478_v2  ;;  %v15481_v35 = vld [vmem:[#allocation234_spill] sm:$0xff]  ;;  %v15482_v59 = vld [vmem:[#allocation55_spill] sm:$0xff] }
 0x231   : > { %15477 = vst [vmem:[#allocation278_spill] sm:$0xff] %v9463_v60  ;;  %v9471_v4 = vmul.f32 %v15482_v59, %v15481_v35  ;;  %v15484_v58 = vld [vmem:[#allocation235_spill] sm:$0xff]  ;;  %v15485_v46 = vld [vmem:[#allocation56_spill] sm:$0xff]  ;;  %v15487_v48 = vld [vmem:[#allocation242_spill] sm:$0xff] }
 0x232   : > { %15480 = vst [vmem:[#allocation241_spill] sm:$0xff] %v9467_v14  ;;  %v9475_v57 = vmul.f32 %v15485_v46, %v15484_v58  ;;  %v15488_v44 = vld [vmem:[#allocation179_spill] sm:$0xff]  ;;  %v15490_v15 = vld [vmem:[#allocation20_spill] sm:$0xff]  ;;  %v15491_v49 = vld [vmem:[#allocation57_spill] sm:$0xff] }
 0x233   : > { %15483 = vst [vmem:[#allocation279_spill] sm:$0xff] %v9471_v4  ;;  %v9479_v7 = vmul.f32 %v15488_v44, %v15487_v48  ;;  %v9483_v5 = vmul.f32 %v15491_v49, %v15490_v15  ;;  %v15493_v61 = vld [vmem:[#allocation243_spill] sm:$0xff]  ;;  %v15494_v60 = vld [vmem:[#allocation58_spill] sm:$0xff]  ;;  %v15496_v2 = vld [vmem:[#allocation244_spill] sm:$0xff]  ;;  %v5077_v44 = vmov 0.0  }
 0x234   : > { %15486 = vst [vmem:[#allocation254_spill] sm:$0xff] %v9475_v57  ;;  %v9487_v53 = vmul.f32 %v15494_v60, %v15493_v61  ;;  %v15497_v14 = vld [vmem:[#allocation186_spill] sm:$0xff]  ;;  %v15499_v35 = vld [vmem:[#allocation249_spill] sm:$0xff]  ;;  %v15500_v4 = vld [vmem:[#allocation63_spill] sm:$0xff] }
 0x235   : > { %15489 = vst [vmem:[#allocation280_spill] sm:$0xff] %v9479_v7  ;;  %15492 = vst [vmem:[#allocation258_spill] sm:$0xff] %v9483_v5  ;;  %v9491_v59 = vmul.f32 %v15497_v14, %v15496_v2  ;;  %v9495_v46 = vmul.f32 %v15500_v4, %v15499_v35  ;;  %v15502_v4 = vld [vmem:[#allocation64_spill] sm:$0xff] (!%p4442_p6)  ;;  %v15504_v61 = vld [vmem:[#allocation65_spill] sm:$0xff] (!%p4442_p6) }
 0x236   : > { %15495 = vst [vmem:[#allocation282_spill] sm:$0xff] %v9487_v53  ;;  %378 = vst [vmem:[%s9499_s19] sm:$0xff] %v5077_v44  ;;  %v15503_v48 = vld [vmem:[#allocation188_spill] sm:$0xff] (!%p4442_p6)  ;;  %v15506_v5 = vld [vmem:[#allocation71_spill] sm:$0xff] (!%p4442_p6) }
 0x237   : > { %15498 = vst [vmem:[#allocation262_spill] sm:$0xff] %v9491_v59  ;;  %15501 = vst [vmem:[#allocation284_spill] sm:$0xff] %v9495_v46  ;;  %v15505_v59 = vld [vmem:[#allocation195_spill] sm:$0xff] (!%p4442_p6)  ;;  %v15507_v57 = vld [vmem:[#allocation196_spill] sm:$0xff] (!%p4442_p6) }
 0x238   : > { %379 = vst [vmem:[%s9499_s19 + $0x8] sm:$0xff] %v5077_v44  ;;  %380 = vst [vmem:[%s9499_s19 + $0x10] sm:$0xff] %v5077_v44 }
 0x239   : > { %381 = vst [vmem:[%s9499_s19 + $0x18] sm:$0xff] %v5077_v44  ;;  %382 = vst [vmem:[%s9499_s19 + $0x20] sm:$0xff] %v5077_v44 }
 0x23a   : > { %383 = vst [vmem:[%s9499_s19 + $0x28] sm:$0xff] %v5077_v44  ;;  %384 = vst [vmem:[%s9499_s19 + $0x30] sm:$0xff] %v5077_v44 }
 0x23b   : > { %385 = vst [vmem:[%s9499_s19 + $0x38] sm:$0xff] %v5077_v44  ;;  %386 = vst [vmem:[%s9499_s19 + $0x40] sm:$0xff] %v5077_v44 }
 0x23c   : > { %387 = vst [vmem:[%s9499_s19 + $0x48] sm:$0xff] %v5077_v44  ;;  %388 = vst [vmem:[%s9499_s19 + $0x50] sm:$0xff] %v5077_v44 }
 0x23d   : > { %389 = vst [vmem:[%s9499_s19 + $0x58] sm:$0xff] %v5077_v44  ;;  %390 = vst [vmem:[%s9499_s19 + $0x60] sm:$0xff] %v5077_v44  ;;  %v2050_v49 = vld [vmem:[%s9499_s19] sm:$0xff] (!%p4442_p6) }
 0x23e   : > { %391 = vst [vmem:[%s9499_s19 + $0x68] sm:$0xff] %v5077_v44  ;;  %392 = vst [vmem:[%s9499_s19 + $0x70] sm:$0xff] %v5077_v44  ;;  %v2178_v58 = vadd.f32 (!%p4442_p6), %v2050_v49, %v15502_v4 }
 0x23f   : > { %393 = vst [vmem:[%s9499_s19 + $0x78] sm:$0xff] %v5077_v44  ;;  %394 = vst [vmem:[%s9499_s19 + $0x80] sm:$0xff] %v5077_v44  ;;  %v2051_v60 = vld [vmem:[%s9499_s19 + $0x8] sm:$0xff] (!%p4442_p6)  ;;  %v2052_v14 = vld [vmem:[%s9499_s19 + $0x10] sm:$0xff] (!%p4442_p6) }
 0x240   : > { %395 = vst [vmem:[%s9499_s19 + $0x88] sm:$0xff] %v5077_v44  ;;  %396 = vst [vmem:[%s9499_s19 + $0x90] sm:$0xff] %v5077_v44  ;;  %v2179_v15 = vadd.f32 (!%p4442_p6), %v2051_v60, %v15503_v48  ;;  %v2180_v2 = vadd.f32 (!%p4442_p6), %v2052_v14, %v15504_v61  ;;  %v2053_v35 = vld [vmem:[%s9499_s19 + $0x18] sm:$0xff] (!%p4442_p6)  ;;  %v15508_v14 = vld [vmem:[#allocation73_spill] sm:$0xff] (!%p4442_p6) }
 0x241   : > { %397 = vst [vmem:[%s9499_s19 + $0x98] sm:$0xff] %v5077_v44  ;;  %398 = vst [vmem:[%s9499_s19 + $0xa0] sm:$0xff] %v5077_v44  ;;  %v2055_v46 = vld [vmem:[%s9499_s19 + $0x28] sm:$0xff] (!%p4442_p6)  ;;  %v2181_v53 = vadd.f32 (!%p4442_p6), %v2053_v35, %v15505_v59  ;;  %v2056_v49 = vld [vmem:[%s9499_s19 + $0x30] sm:$0xff] (!%p4442_p6) }
 0x242   : > { %399 = vst [vmem:[%s9499_s19 + $0xa8] sm:$0xff] %v5077_v44  ;;  %400 = vst [vmem:[%s9499_s19 + $0xb0] sm:$0xff] %v5077_v44  ;;  %v2183_v39 = vadd.f32 (!%p4442_p6), %v2055_v46, %v15507_v57  ;;  %v2057_v4 = vld [vmem:[%s9499_s19 + $0x38] sm:$0xff] (!%p4442_p6)  ;;  %v2058_v60 = vld [vmem:[%s9499_s19 + $0x40] sm:$0xff] (!%p4442_p6)  ;;  %v2184_v48 = vadd.f32 (!%p4442_p6), %v2056_v49, %v15508_v14 }
 0x243   : > { %401 = vst [vmem:[%s9499_s19 + $0xb8] sm:$0xff] %v5077_v44  ;;  %402 = vst [vmem:[%s9499_s19 + $0xc0] sm:$0xff] %v5077_v44  ;;  %v15509_v61 = vld [vmem:[#allocation198_spill] sm:$0xff] (!%p4442_p6) }
 0x244   : > { %403 = vst [vmem:[%s9499_s19 + $0xc8] sm:$0xff] %v5077_v44  ;;  %404 = vst [vmem:[%s9499_s19 + $0xd0] sm:$0xff] %v5077_v44  ;;  %v2185_v59 = vadd.f32 (!%p4442_p6), %v2057_v4, %v15509_v61  ;;  %v15510_v35 = vld [vmem:[#allocation74_spill] sm:$0xff] (!%p4442_p6)  ;;  %v2061_v46 = vld [vmem:[%s9499_s19 + $0x58] sm:$0xff] (!%p4442_p6) }
 0x245   : > { %405 = vst [vmem:[%s9499_s19 + $0xd8] sm:$0xff] %v5077_v44  ;;  %406 = vst [vmem:[%s9499_s19 + $0xe0] sm:$0xff] %v5077_v44  ;;  %v2060_v57 = vld [vmem:[%s9499_s19 + $0x50] sm:$0xff] (!%p4442_p6)  ;;  %v2062_v61 = vld [vmem:[%s9499_s19 + $0x60] sm:$0xff] (!%p4442_p6) }
 0x246   : > { %407 = vst [vmem:[%s9499_s19 + $0xe8] sm:$0xff] %v5077_v44  ;;  %408 = vst [vmem:[%s9499_s19 + $0xf0] sm:$0xff] %v5077_v44  ;;  %v15513_v14 = vld [vmem:[#allocation206_spill] sm:$0xff] (!%p4442_p6) }
 0x247   : > { %409 = vst [vmem:[%s9499_s19 + $0xf8] sm:$0xff] %v5077_v44  ;;  %410 = vst [vmem:[%s9499_s19 + $0x100] sm:$0xff] %v5077_v44  ;;  %v2189_v4 = vadd.f32 (!%p4442_p6), %v2061_v46, %v15513_v14  ;;  %v2066_v46 = vld [vmem:[%s9499_s19 + $0x80] sm:$0xff] (!%p4442_p6)  ;;  %v2067_v14 = vld [vmem:[%s9499_s19 + $0x88] sm:$0xff] (!%p4442_p6) }
 0x248   : > { %411 = vst [vmem:[%s9499_s19 + $0x108] sm:$0xff] %v5077_v44  ;;  %412 = vst [vmem:[%s9499_s19 + $0x110] sm:$0xff] %v5077_v44 }
 0x249   : > { %413 = vst [vmem:[%s9499_s19 + $0x118] sm:$0xff] %v5077_v44  ;;  %414 = vst [vmem:[%s9499_s19 + $0x120] sm:$0xff] %v5077_v44 }
 0x24a   : > { %415 = vst [vmem:[%s9499_s19 + $0x128] sm:$0xff] %v5077_v44  ;;  %416 = vst [vmem:[%s9499_s19 + $0x130] sm:$0xff] %v5077_v44 }
 0x24b   : > { %417 = vst [vmem:[%s9499_s19 + $0x138] sm:$0xff] %v5077_v44  ;;  %418 = vst [vmem:[%s9499_s19 + $0x140] sm:$0xff] %v5077_v44 }
 0x24c   : > { %419 = vst [vmem:[%s9499_s19 + $0x148] sm:$0xff] %v5077_v44  ;;  %420 = vst [vmem:[%s9499_s19 + $0x150] sm:$0xff] %v5077_v44 }
 0x24d   : > { %421 = vst [vmem:[%s9499_s19 + $0x158] sm:$0xff] %v5077_v44  ;;  %422 = vst [vmem:[%s9499_s19 + $0x160] sm:$0xff] %v5077_v44 }
 0x24e   : > { %423 = vst [vmem:[%s9499_s19 + $0x168] sm:$0xff] %v5077_v44  ;;  %424 = vst [vmem:[%s9499_s19 + $0x170] sm:$0xff] %v5077_v44 }
 0x24f   : > { %425 = vst [vmem:[%s9499_s19 + $0x178] sm:$0xff] %v5077_v44  ;;  %426 = vst [vmem:[%s9499_s19 + $0x180] sm:$0xff] %v5077_v44 }
 0x250   : > { %427 = vst [vmem:[%s9499_s19 + $0x188] sm:$0xff] %v5077_v44  ;;  %428 = vst [vmem:[%s9499_s19 + $0x190] sm:$0xff] %v5077_v44 }
 0x251   : > { %429 = vst [vmem:[%s9499_s19 + $0x198] sm:$0xff] %v5077_v44  ;;  %430 = vst [vmem:[%s9499_s19 + $0x1a0] sm:$0xff] %v5077_v44 }
 0x252   : > { %431 = vst [vmem:[%s9499_s19 + $0x1a8] sm:$0xff] %v5077_v44  ;;  %432 = vst [vmem:[%s9499_s19 + $0x1b0] sm:$0xff] %v5077_v44 }
 0x253   : > { %433 = vst [vmem:[%s9499_s19 + $0x1b8] sm:$0xff] %v5077_v44  ;;  %434 = vst [vmem:[%s9499_s19 + $0x1c0] sm:$0xff] %v5077_v44 }
 0x254   : > { %435 = vst [vmem:[%s9499_s19 + $0x1c8] sm:$0xff] %v5077_v44  ;;  %436 = vst [vmem:[%s9499_s19 + $0x1d0] sm:$0xff] %v5077_v44 }
 0x255   : > { %437 = vst [vmem:[%s9499_s19 + $0x1d8] sm:$0xff] %v5077_v44  ;;  %438 = vst [vmem:[%s9499_s19 + $0x1e0] sm:$0xff] %v5077_v44 }
 0x256   : > { %439 = vst [vmem:[%s9499_s19 + $0x1e8] sm:$0xff] %v5077_v44  ;;  %440 = vst [vmem:[%s9499_s19 + $0x1f0] sm:$0xff] %v5077_v44 }
 0x257   : > { %441 = vst [vmem:[%s9499_s19 + $0x1f8] sm:$0xff] %v5077_v44  ;;  %442 = vst [vmem:[%s9499_s19 + $0x200] sm:$0xff] %v5077_v44 }
 0x258   : > { %443 = vst [vmem:[%s9499_s19 + $0x208] sm:$0xff] %v5077_v44  ;;  %444 = vst [vmem:[%s9499_s19 + $0x210] sm:$0xff] %v5077_v44 }
 0x259   : > { %445 = vst [vmem:[%s9499_s19 + $0x218] sm:$0xff] %v5077_v44  ;;  %446 = vst [vmem:[%s9499_s19 + $0x220] sm:$0xff] %v5077_v44 }
 0x25a   : > { %447 = vst [vmem:[%s9499_s19 + $0x228] sm:$0xff] %v5077_v44  ;;  %448 = vst [vmem:[%s9499_s19 + $0x230] sm:$0xff] %v5077_v44 }
 0x25b   : > { %449 = vst [vmem:[%s9499_s19 + $0x238] sm:$0xff] %v5077_v44  ;;  %450 = vst [vmem:[%s9499_s19 + $0x240] sm:$0xff] %v5077_v44 }
 0x25c   : > { %451 = vst [vmem:[%s9499_s19 + $0x248] sm:$0xff] %v5077_v44  ;;  %452 = vst [vmem:[%s9499_s19 + $0x250] sm:$0xff] %v5077_v44 }
 0x25d   : > { %453 = vst [vmem:[%s9499_s19 + $0x258] sm:$0xff] %v5077_v44  ;;  %454 = vst [vmem:[%s9499_s19 + $0x260] sm:$0xff] %v5077_v44 }
 0x25e   : > { %455 = vst [vmem:[%s9499_s19 + $0x268] sm:$0xff] %v5077_v44  ;;  %456 = vst [vmem:[%s9499_s19 + $0x270] sm:$0xff] %v5077_v44 }
 0x25f   : > { %457 = vst [vmem:[%s9499_s19 + $0x278] sm:$0xff] %v5077_v44  ;;  %458 = vst [vmem:[%s9499_s19 + $0x280] sm:$0xff] %v5077_v44 }
 0x260   : > { %459 = vst [vmem:[%s9499_s19 + $0x288] sm:$0xff] %v5077_v44  ;;  %460 = vst [vmem:[%s9499_s19 + $0x290] sm:$0xff] %v5077_v44 }
 0x261   : > { %461 = vst [vmem:[%s9499_s19 + $0x298] sm:$0xff] %v5077_v44  ;;  %462 = vst [vmem:[%s9499_s19 + $0x2a0] sm:$0xff] %v5077_v44 }
 0x262   : > { %463 = vst [vmem:[%s9499_s19 + $0x2a8] sm:$0xff] %v5077_v44  ;;  %464 = vst [vmem:[%s9499_s19 + $0x2b0] sm:$0xff] %v5077_v44 }
 0x263   : > { %465 = vst [vmem:[%s9499_s19 + $0x2b8] sm:$0xff] %v5077_v44  ;;  %466 = vst [vmem:[%s9499_s19 + $0x2c0] sm:$0xff] %v5077_v44 }
 0x264   : > { %467 = vst [vmem:[%s9499_s19 + $0x2c8] sm:$0xff] %v5077_v44  ;;  %468 = vst [vmem:[%s9499_s19 + $0x2d0] sm:$0xff] %v5077_v44 }
 0x265   : > { %469 = vst [vmem:[%s9499_s19 + $0x2d8] sm:$0xff] %v5077_v44  ;;  %470 = vst [vmem:[%s9499_s19 + $0x2e0] sm:$0xff] %v5077_v44 }
 0x266   : > { %471 = vst [vmem:[%s9499_s19 + $0x2e8] sm:$0xff] %v5077_v44  ;;  %472 = vst [vmem:[%s9499_s19 + $0x2f0] sm:$0xff] %v5077_v44 }
 0x267   : > { %473 = vst [vmem:[%s9499_s19 + $0x2f8] sm:$0xff] %v5077_v44  ;;  %474 = vst [vmem:[%s9499_s19 + $0x300] sm:$0xff] %v5077_v44 }
 0x268   : > { %475 = vst [vmem:[%s9499_s19 + $0x308] sm:$0xff] %v5077_v44  ;;  %476 = vst [vmem:[%s9499_s19 + $0x310] sm:$0xff] %v5077_v44 }
 0x269   : > { %477 = vst [vmem:[%s9499_s19 + $0x318] sm:$0xff] %v5077_v44  ;;  %478 = vst [vmem:[%s9499_s19 + $0x320] sm:$0xff] %v5077_v44 }
 0x26a   : > { %479 = vst [vmem:[%s9499_s19 + $0x328] sm:$0xff] %v5077_v44  ;;  %480 = vst [vmem:[%s9499_s19 + $0x330] sm:$0xff] %v5077_v44 }
 0x26b   : > { %481 = vst [vmem:[%s9499_s19 + $0x338] sm:$0xff] %v5077_v44  ;;  %482 = vst [vmem:[%s9499_s19 + $0x340] sm:$0xff] %v5077_v44 }
 0x26c   : > { %483 = vst [vmem:[%s9499_s19 + $0x348] sm:$0xff] %v5077_v44  ;;  %484 = vst [vmem:[%s9499_s19 + $0x350] sm:$0xff] %v5077_v44 }
 0x26d   : > { %485 = vst [vmem:[%s9499_s19 + $0x358] sm:$0xff] %v5077_v44  ;;  %486 = vst [vmem:[%s9499_s19 + $0x360] sm:$0xff] %v5077_v44 }
 0x26e   : > { %487 = vst [vmem:[%s9499_s19 + $0x368] sm:$0xff] %v5077_v44  ;;  %488 = vst [vmem:[%s9499_s19 + $0x370] sm:$0xff] %v5077_v44 }
 0x26f   : > { %489 = vst [vmem:[%s9499_s19 + $0x378] sm:$0xff] %v5077_v44  ;;  %490 = vst [vmem:[%s9499_s19 + $0x380] sm:$0xff] %v5077_v44 }
 0x270   : > { %491 = vst [vmem:[%s9499_s19 + $0x388] sm:$0xff] %v5077_v44  ;;  %492 = vst [vmem:[%s9499_s19 + $0x390] sm:$0xff] %v5077_v44 }
 0x271   : > { %493 = vst [vmem:[%s9499_s19 + $0x398] sm:$0xff] %v5077_v44  ;;  %494 = vst [vmem:[%s9499_s19 + $0x3a0] sm:$0xff] %v5077_v44 }
 0x272   : > { %495 = vst [vmem:[%s9499_s19 + $0x3a8] sm:$0xff] %v5077_v44  ;;  %496 = vst [vmem:[%s9499_s19 + $0x3b0] sm:$0xff] %v5077_v44 }
 0x273   : > { %497 = vst [vmem:[%s9499_s19 + $0x3b8] sm:$0xff] %v5077_v44  ;;  %498 = vst [vmem:[%s9499_s19 + $0x3c0] sm:$0xff] %v5077_v44 }
 0x274   : > { %499 = vst [vmem:[%s9499_s19 + $0x3c8] sm:$0xff] %v5077_v44  ;;  %500 = vst [vmem:[%s9499_s19 + $0x3d0] sm:$0xff] %v5077_v44 }
 0x275   : > { %501 = vst [vmem:[%s9499_s19 + $0x3d8] sm:$0xff] %v5077_v44  ;;  %502 = vst [vmem:[%s9499_s19 + $0x3e0] sm:$0xff] %v5077_v44 }
 0x276   : > { %503 = vst [vmem:[%s9499_s19 + $0x3e8] sm:$0xff] %v5077_v44  ;;  %504 = vst [vmem:[%s9499_s19 + $0x3f0] sm:$0xff] %v5077_v44 }
 0x277   : > { %505 = vst [vmem:[%s9499_s19 + $0x3f8] sm:$0xff] %v5077_v44  ;;  %506 = vst [vmem:[%s9759_s23] sm:$0xff] %v5077_v44 }
 0x278   : > { %507 = vst [vmem:[%s9759_s23 + $0x8] sm:$0xff] %v5077_v44  ;;  %508 = vst [vmem:[%s9759_s23 + $0x10] sm:$0xff] %v5077_v44 }
 0x279   : > { %509 = vst [vmem:[%s9759_s23 + $0x18] sm:$0xff] %v5077_v44  ;;  %510 = vst [vmem:[%s9759_s23 + $0x20] sm:$0xff] %v5077_v44 }
 0x27a   : > { %511 = vst [vmem:[%s9759_s23 + $0x28] sm:$0xff] %v5077_v44  ;;  %512 = vst [vmem:[%s9759_s23 + $0x30] sm:$0xff] %v5077_v44 }
 0x27b   : > { %513 = vst [vmem:[%s9759_s23 + $0x38] sm:$0xff] %v5077_v44  ;;  %514 = vst [vmem:[%s9759_s23 + $0x40] sm:$0xff] %v5077_v44 }
 0x27c   : > { %515 = vst [vmem:[%s9759_s23 + $0x48] sm:$0xff] %v5077_v44  ;;  %516 = vst [vmem:[%s9759_s23 + $0x50] sm:$0xff] %v5077_v44 }
 0x27d   : > { %517 = vst [vmem:[%s9759_s23 + $0x58] sm:$0xff] %v5077_v44  ;;  %518 = vst [vmem:[%s9759_s23 + $0x60] sm:$0xff] %v5077_v44 }
 0x27e   : > { %519 = vst [vmem:[%s9759_s23 + $0x68] sm:$0xff] %v5077_v44  ;;  %520 = vst [vmem:[%s9759_s23 + $0x70] sm:$0xff] %v5077_v44 }
 0x27f   : > { %521 = vst [vmem:[%s9759_s23 + $0x78] sm:$0xff] %v5077_v44  ;;  %522 = vst [vmem:[%s9759_s23 + $0x80] sm:$0xff] %v5077_v44 }
 0x280   : > { %523 = vst [vmem:[%s9759_s23 + $0x88] sm:$0xff] %v5077_v44  ;;  %524 = vst [vmem:[%s9759_s23 + $0x90] sm:$0xff] %v5077_v44 }
 0x281   : > { %525 = vst [vmem:[%s9759_s23 + $0x98] sm:$0xff] %v5077_v44  ;;  %526 = vst [vmem:[%s9759_s23 + $0xa0] sm:$0xff] %v5077_v44 }
 0x282   : > { %527 = vst [vmem:[%s9759_s23 + $0xa8] sm:$0xff] %v5077_v44  ;;  %528 = vst [vmem:[%s9759_s23 + $0xb0] sm:$0xff] %v5077_v44 }
 0x283   : > { %529 = vst [vmem:[%s9759_s23 + $0xb8] sm:$0xff] %v5077_v44  ;;  %530 = vst [vmem:[%s9759_s23 + $0xc0] sm:$0xff] %v5077_v44 }
 0x284   : > { %531 = vst [vmem:[%s9759_s23 + $0xc8] sm:$0xff] %v5077_v44  ;;  %532 = vst [vmem:[%s9759_s23 + $0xd0] sm:$0xff] %v5077_v44 }
 0x285   : > { %533 = vst [vmem:[%s9759_s23 + $0xd8] sm:$0xff] %v5077_v44  ;;  %534 = vst [vmem:[%s9759_s23 + $0xe0] sm:$0xff] %v5077_v44 }
 0x286   : > { %535 = vst [vmem:[%s9759_s23 + $0xe8] sm:$0xff] %v5077_v44  ;;  %536 = vst [vmem:[%s9759_s23 + $0xf0] sm:$0xff] %v5077_v44 }
 0x287   : > { %537 = vst [vmem:[%s9759_s23 + $0xf8] sm:$0xff] %v5077_v44  ;;  %538 = vst [vmem:[%s9759_s23 + $0x100] sm:$0xff] %v5077_v44 }
 0x288   : > { %539 = vst [vmem:[%s9759_s23 + $0x108] sm:$0xff] %v5077_v44  ;;  %540 = vst [vmem:[%s9759_s23 + $0x110] sm:$0xff] %v5077_v44 }
 0x289   : > { %541 = vst [vmem:[%s9759_s23 + $0x118] sm:$0xff] %v5077_v44  ;;  %542 = vst [vmem:[%s9759_s23 + $0x120] sm:$0xff] %v5077_v44 }
 0x28a   : > { %543 = vst [vmem:[%s9759_s23 + $0x128] sm:$0xff] %v5077_v44  ;;  %544 = vst [vmem:[%s9759_s23 + $0x130] sm:$0xff] %v5077_v44 }
 0x28b   : > { %545 = vst [vmem:[%s9759_s23 + $0x138] sm:$0xff] %v5077_v44  ;;  %546 = vst [vmem:[%s9759_s23 + $0x140] sm:$0xff] %v5077_v44 }
 0x28c   : > { %547 = vst [vmem:[%s9759_s23 + $0x148] sm:$0xff] %v5077_v44  ;;  %548 = vst [vmem:[%s9759_s23 + $0x150] sm:$0xff] %v5077_v44 }
 0x28d   : > { %549 = vst [vmem:[%s9759_s23 + $0x158] sm:$0xff] %v5077_v44  ;;  %550 = vst [vmem:[%s9759_s23 + $0x160] sm:$0xff] %v5077_v44 }
 0x28e   : > { %551 = vst [vmem:[%s9759_s23 + $0x168] sm:$0xff] %v5077_v44  ;;  %552 = vst [vmem:[%s9759_s23 + $0x170] sm:$0xff] %v5077_v44 }
 0x28f   : > { %553 = vst [vmem:[%s9759_s23 + $0x178] sm:$0xff] %v5077_v44  ;;  %554 = vst [vmem:[%s9759_s23 + $0x180] sm:$0xff] %v5077_v44 }
 0x290   : > { %555 = vst [vmem:[%s9759_s23 + $0x188] sm:$0xff] %v5077_v44  ;;  %556 = vst [vmem:[%s9759_s23 + $0x190] sm:$0xff] %v5077_v44 }
 0x291   : > { %557 = vst [vmem:[%s9759_s23 + $0x198] sm:$0xff] %v5077_v44  ;;  %558 = vst [vmem:[%s9759_s23 + $0x1a0] sm:$0xff] %v5077_v44 }
 0x292   : > { %559 = vst [vmem:[%s9759_s23 + $0x1a8] sm:$0xff] %v5077_v44  ;;  %560 = vst [vmem:[%s9759_s23 + $0x1b0] sm:$0xff] %v5077_v44 }
 0x293   : > { %561 = vst [vmem:[%s9759_s23 + $0x1b8] sm:$0xff] %v5077_v44  ;;  %562 = vst [vmem:[%s9759_s23 + $0x1c0] sm:$0xff] %v5077_v44 }
 0x294   : > { %563 = vst [vmem:[%s9759_s23 + $0x1c8] sm:$0xff] %v5077_v44  ;;  %564 = vst [vmem:[%s9759_s23 + $0x1d0] sm:$0xff] %v5077_v44 }
 0x295   : > { %565 = vst [vmem:[%s9759_s23 + $0x1d8] sm:$0xff] %v5077_v44  ;;  %566 = vst [vmem:[%s9759_s23 + $0x1e0] sm:$0xff] %v5077_v44 }
 0x296   : > { %567 = vst [vmem:[%s9759_s23 + $0x1e8] sm:$0xff] %v5077_v44  ;;  %568 = vst [vmem:[%s9759_s23 + $0x1f0] sm:$0xff] %v5077_v44 }
 0x297   : > { %569 = vst [vmem:[%s9759_s23 + $0x1f8] sm:$0xff] %v5077_v44  ;;  %570 = vst [vmem:[%s9759_s23 + $0x200] sm:$0xff] %v5077_v44 }
 0x298   : > { %571 = vst [vmem:[%s9759_s23 + $0x208] sm:$0xff] %v5077_v44  ;;  %572 = vst [vmem:[%s9759_s23 + $0x210] sm:$0xff] %v5077_v44 }
 0x299   : > { %573 = vst [vmem:[%s9759_s23 + $0x218] sm:$0xff] %v5077_v44  ;;  %574 = vst [vmem:[%s9759_s23 + $0x220] sm:$0xff] %v5077_v44 }
 0x29a   : > { %575 = vst [vmem:[%s9759_s23 + $0x228] sm:$0xff] %v5077_v44  ;;  %576 = vst [vmem:[%s9759_s23 + $0x230] sm:$0xff] %v5077_v44 }
 0x29b   : > { %577 = vst [vmem:[%s9759_s23 + $0x238] sm:$0xff] %v5077_v44  ;;  %578 = vst [vmem:[%s9759_s23 + $0x240] sm:$0xff] %v5077_v44 }
 0x29c   : > { %579 = vst [vmem:[%s9759_s23 + $0x248] sm:$0xff] %v5077_v44  ;;  %580 = vst [vmem:[%s9759_s23 + $0x250] sm:$0xff] %v5077_v44 }
 0x29d   : > { %581 = vst [vmem:[%s9759_s23 + $0x258] sm:$0xff] %v5077_v44  ;;  %582 = vst [vmem:[%s9759_s23 + $0x260] sm:$0xff] %v5077_v44 }
 0x29e   : > { %583 = vst [vmem:[%s9759_s23 + $0x268] sm:$0xff] %v5077_v44  ;;  %584 = vst [vmem:[%s9759_s23 + $0x270] sm:$0xff] %v5077_v44 }
 0x29f   : > { %585 = vst [vmem:[%s9759_s23 + $0x278] sm:$0xff] %v5077_v44  ;;  %586 = vst [vmem:[%s9759_s23 + $0x280] sm:$0xff] %v5077_v44 }
 0x2a0   : > { %587 = vst [vmem:[%s9759_s23 + $0x288] sm:$0xff] %v5077_v44  ;;  %588 = vst [vmem:[%s9759_s23 + $0x290] sm:$0xff] %v5077_v44 }
 0x2a1   : > { %589 = vst [vmem:[%s9759_s23 + $0x298] sm:$0xff] %v5077_v44  ;;  %590 = vst [vmem:[%s9759_s23 + $0x2a0] sm:$0xff] %v5077_v44 }
 0x2a2   : > { %591 = vst [vmem:[%s9759_s23 + $0x2a8] sm:$0xff] %v5077_v44  ;;  %592 = vst [vmem:[%s9759_s23 + $0x2b0] sm:$0xff] %v5077_v44 }
 0x2a3   : > { %593 = vst [vmem:[%s9759_s23 + $0x2b8] sm:$0xff] %v5077_v44  ;;  %594 = vst [vmem:[%s9759_s23 + $0x2c0] sm:$0xff] %v5077_v44 }
 0x2a4   : > { %595 = vst [vmem:[%s9759_s23 + $0x2c8] sm:$0xff] %v5077_v44  ;;  %596 = vst [vmem:[%s9759_s23 + $0x2d0] sm:$0xff] %v5077_v44 }
 0x2a5   : > { %597 = vst [vmem:[%s9759_s23 + $0x2d8] sm:$0xff] %v5077_v44  ;;  %598 = vst [vmem:[%s9759_s23 + $0x2e0] sm:$0xff] %v5077_v44 }
 0x2a6   : > { %599 = vst [vmem:[%s9759_s23 + $0x2e8] sm:$0xff] %v5077_v44  ;;  %600 = vst [vmem:[%s9759_s23 + $0x2f0] sm:$0xff] %v5077_v44 }
 0x2a7   : > { %601 = vst [vmem:[%s9759_s23 + $0x2f8] sm:$0xff] %v5077_v44  ;;  %602 = vst [vmem:[%s9759_s23 + $0x300] sm:$0xff] %v5077_v44 }
 0x2a8   : > { %603 = vst [vmem:[%s9759_s23 + $0x308] sm:$0xff] %v5077_v44  ;;  %604 = vst [vmem:[%s9759_s23 + $0x310] sm:$0xff] %v5077_v44 }
 0x2a9   : > { %605 = vst [vmem:[%s9759_s23 + $0x318] sm:$0xff] %v5077_v44  ;;  %606 = vst [vmem:[%s9759_s23 + $0x320] sm:$0xff] %v5077_v44 }
 0x2aa   : > { %607 = vst [vmem:[%s9759_s23 + $0x328] sm:$0xff] %v5077_v44  ;;  %608 = vst [vmem:[%s9759_s23 + $0x330] sm:$0xff] %v5077_v44 }
 0x2ab   : > { %609 = vst [vmem:[%s9759_s23 + $0x338] sm:$0xff] %v5077_v44  ;;  %610 = vst [vmem:[%s9759_s23 + $0x340] sm:$0xff] %v5077_v44 }
 0x2ac   : > { %611 = vst [vmem:[%s9759_s23 + $0x348] sm:$0xff] %v5077_v44  ;;  %612 = vst [vmem:[%s9759_s23 + $0x350] sm:$0xff] %v5077_v44 }
 0x2ad   : > { %613 = vst [vmem:[%s9759_s23 + $0x358] sm:$0xff] %v5077_v44  ;;  %614 = vst [vmem:[%s9759_s23 + $0x360] sm:$0xff] %v5077_v44 }
 0x2ae   : > { %615 = vst [vmem:[%s9759_s23 + $0x368] sm:$0xff] %v5077_v44  ;;  %616 = vst [vmem:[%s9759_s23 + $0x370] sm:$0xff] %v5077_v44 }
 0x2af   : > { %617 = vst [vmem:[%s9759_s23 + $0x378] sm:$0xff] %v5077_v44  ;;  %618 = vst [vmem:[%s9759_s23 + $0x380] sm:$0xff] %v5077_v44 }
 0x2b0   : > { %619 = vst [vmem:[%s9759_s23 + $0x388] sm:$0xff] %v5077_v44  ;;  %620 = vst [vmem:[%s9759_s23 + $0x390] sm:$0xff] %v5077_v44 }
 0x2b1   : > { %621 = vst [vmem:[%s9759_s23 + $0x398] sm:$0xff] %v5077_v44  ;;  %622 = vst [vmem:[%s9759_s23 + $0x3a0] sm:$0xff] %v5077_v44  ;;  %2049 = sbr.rel (%p4442_p6) target bundleno = 873 (0x369), region = 48 }
 0x2b2   : > { %623 = vst [vmem:[%s9759_s23 + $0x3a8] sm:$0xff] %v5077_v44  ;;  %624 = vst [vmem:[%s9759_s23 + $0x3b0] sm:$0xff] %v5077_v44 }
 0x2b3   : > { %625 = vst [vmem:[%s9759_s23 + $0x3b8] sm:$0xff] %v5077_v44  ;;  %626 = vst [vmem:[%s9759_s23 + $0x3c0] sm:$0xff] %v5077_v44 }
 0x2b4   : > { %627 = vst [vmem:[%s9759_s23 + $0x3c8] sm:$0xff] %v5077_v44  ;;  %628 = vst [vmem:[%s9759_s23 + $0x3d0] sm:$0xff] %v5077_v44 }
 0x2b5   : > { %629 = vst [vmem:[%s9759_s23 + $0x3d8] sm:$0xff] %v5077_v44  ;;  %630 = vst [vmem:[%s9759_s23 + $0x3e0] sm:$0xff] %v5077_v44 }
 0x2b6   : > { %631 = vst [vmem:[%s9759_s23 + $0x3e8] sm:$0xff] %v5077_v44  ;;  %632 = vst [vmem:[%s9759_s23 + $0x3f0] sm:$0xff] %v5077_v44 }
 0x2b7   : > { %633 = vst [vmem:[%s9759_s23 + $0x3f8] sm:$0xff] %v5077_v44  ;;  %v2054_v44 = vld [vmem:[%s9499_s19 + $0x20] sm:$0xff] (!%p4442_p6)  ;;  %2306 = vst [vmem:[%s9499_s19] sm:$0xff] (!%p4442_p6), %v2178_v58  ;;  %v15511_v58 = vld [vmem:[#allocation205_spill] sm:$0xff] (!%p4442_p6) }
 0x2b8   : > { %v2182_v7 = vadd.f32 %v2054_v44, %v15506_v5  ;;  %2307 = vst [vmem:[%s9499_s19 + $0x8] sm:$0xff] %v2179_v15  ;;  %2308 = vst [vmem:[%s9499_s19 + $0x10] sm:$0xff] %v2180_v2  ;;  %v2186_v5 = vadd.f32 %v2058_v60, %v15510_v35  ;;  %v2059_v44 = vld [vmem:[%s9499_s19 + $0x48] sm:$0xff]  ;;  %v15512_v2 = vld [vmem:[#allocation80_spill] sm:$0xff] }
 0x2b9   : > { %2309 = vst [vmem:[%s9499_s19 + $0x18] sm:$0xff] %v2181_v53  ;;  %2311 = vst [vmem:[%s9499_s19 + $0x28] sm:$0xff] %v2183_v39  ;;  %v2187_v15 = vadd.f32 %v2059_v44, %v15511_v58  ;;  %v2188_v49 = vadd.f32 %v2060_v57, %v15512_v2  ;;  %v2063_v60 = vld [vmem:[%s9499_s19 + $0x68] sm:$0xff]  ;;  %v2064_v35 = vld [vmem:[%s9499_s19 + $0x70] sm:$0xff] }
 0x2ba   : > { %2310 = vst [vmem:[%s9499_s19 + $0x20] sm:$0xff] %v2182_v7  ;;  %2312 = vst [vmem:[%s9499_s19 + $0x30] sm:$0xff] %v2184_v48  ;;  %v15514_v7 = vld [vmem:[#allocation207_spill] sm:$0xff]  ;;  %v15515_v53 = vld [vmem:[#allocation82_spill] sm:$0xff] }
 0x2bb   : > { %2313 = vst [vmem:[%s9499_s19 + $0x38] sm:$0xff] %v2185_v59  ;;  %2314 = vst [vmem:[%s9499_s19 + $0x40] sm:$0xff] %v2186_v5  ;;  %v2190_v39 = vadd.f32 %v2062_v61, %v15514_v7  ;;  %v2191_v44 = vadd.f32 %v2063_v60, %v15515_v53  ;;  %v15516_v58 = vld [vmem:[#allocation212_spill] sm:$0xff]  ;;  %v2065_v2 = vld [vmem:[%s9499_s19 + $0x78] sm:$0xff] }
 0x2bc   : > { %v2192_v57 = vadd.f32 %v2064_v35, %v15516_v58  ;;  %2315 = vst [vmem:[%s9499_s19 + $0x48] sm:$0xff] %v2187_v15  ;;  %2316 = vst [vmem:[%s9499_s19 + $0x50] sm:$0xff] %v2188_v49  ;;  %v15517_v48 = vld [vmem:[#allocation87_spill] sm:$0xff]  ;;  %v15518_v5 = vld [vmem:[#allocation213_spill] sm:$0xff] }
 0x2bd   : > { %2317 = vst [vmem:[%s9499_s19 + $0x58] sm:$0xff] %v2189_v4  ;;  %v2193_v59 = vadd.f32 %v2065_v2, %v15517_v48  ;;  %v2194_v61 = vadd.f32 %v2066_v46, %v15518_v5  ;;  %v15519_v7 = vld [vmem:[#allocation88_spill] sm:$0xff]  ;;  %v2068_v53 = vld [vmem:[%s9499_s19 + $0x90] sm:$0xff]  ;;  %v2069_v35 = vld [vmem:[%s9499_s19 + $0x98] sm:$0xff] }
 0x2be   : > { %v2195_v60 = vadd.f32 %v2067_v14, %v15519_v7  ;;  %v2070_v58 = vld [vmem:[%s9499_s19 + $0xa0] sm:$0xff]  ;;  %2318 = vst [vmem:[%s9499_s19 + $0x60] sm:$0xff] %v2190_v39  ;;  %2319 = vst [vmem:[%s9499_s19 + $0x68] sm:$0xff] %v2191_v44  ;;  %v15520_v15 = vld [vmem:[#allocation214_spill] sm:$0xff] }
 0x2bf   : > { %2320 = vst [vmem:[%s9499_s19 + $0x70] sm:$0xff] %v2192_v57  ;;  %v2196_v49 = vadd.f32 %v2068_v53, %v15520_v15  ;;  %v15521_v4 = vld [vmem:[#allocation89_spill] sm:$0xff]  ;;  %v15522_v48 = vld [vmem:[#allocation215_spill] sm:$0xff]  ;;  %v2072_v14 = vld [vmem:[%s9499_s19 + $0xb0] sm:$0xff] }
 0x2c0   : > { %v2197_v2 = vadd.f32 %v2069_v35, %v15521_v4  ;;  %v2198_v46 = vadd.f32 %v2070_v58, %v15522_v48  ;;  %v2071_v5 = vld [vmem:[%s9499_s19 + $0xa8] sm:$0xff]  ;;  %v2073_v7 = vld [vmem:[%s9499_s19 + $0xb8] sm:$0xff]  ;;  %2321 = vst [vmem:[%s9499_s19 + $0x78] sm:$0xff] %v2193_v59  ;;  %2322 = vst [vmem:[%s9499_s19 + $0x80] sm:$0xff] %v2194_v61 }
 0x2c1   : > { %2323 = vst [vmem:[%s9499_s19 + $0x88] sm:$0xff] %v2195_v60  ;;  %v15523_v39 = vld [vmem:[#allocation220_spill] sm:$0xff]  ;;  %v15524_v57 = vld [vmem:[#allocation95_spill] sm:$0xff]  ;;  %v15525_v15 = vld [vmem:[#allocation221_spill] sm:$0xff] }
 0x2c2   : > { %v2199_v44 = vadd.f32 %v2071_v5, %v15523_v39  ;;  %v2200_v53 = vadd.f32 %v2072_v14, %v15524_v57  ;;  %v2201_v35 = vadd.f32 %v2073_v7, %v15525_v15  ;;  %v2074_v4 = vld [vmem:[%s9499_s19 + $0xc0] sm:$0xff]  ;;  %v2075_v58 = vld [vmem:[%s9499_s19 + $0xc8] sm:$0xff]  ;;  %v2076_v48 = vld [vmem:[%s9499_s19 + $0xd0] sm:$0xff]  ;;  %2324 = vst [vmem:[%s9499_s19 + $0x90] sm:$0xff] %v2196_v49 }
 0x2c3   : > { %2325 = vst [vmem:[%s9499_s19 + $0x98] sm:$0xff] %v2197_v2  ;;  %2326 = vst [vmem:[%s9499_s19 + $0xa0] sm:$0xff] %v2198_v46  ;;  %v15526_v59 = vld [vmem:[#allocation96_spill] sm:$0xff]  ;;  %v15527_v60 = vld [vmem:[#allocation222_spill] sm:$0xff] }
 0x2c4   : > { %v2202_v61 = vadd.f32 %v2074_v4, %v15526_v59  ;;  %v2203_v5 = vadd.f32 %v2075_v58, %v15527_v60  ;;  %v15528_v39 = vld [vmem:[#allocation97_spill] sm:$0xff]  ;;  %v2077_v57 = vld [vmem:[%s9499_s19 + $0xd8] sm:$0xff]  ;;  %v2078_v7 = vld [vmem:[%s9499_s19 + $0xe0] sm:$0xff]  ;;  %2327 = vst [vmem:[%s9499_s19 + $0xa8] sm:$0xff] %v2199_v44 }
 0x2c5   : > { %v2204_v14 = vadd.f32 %v2076_v48, %v15528_v39  ;;  %v2079_v15 = vld [vmem:[%s9499_s19 + $0xe8] sm:$0xff]  ;;  %2328 = vst [vmem:[%s9499_s19 + $0xb0] sm:$0xff] %v2200_v53  ;;  %2329 = vst [vmem:[%s9499_s19 + $0xb8] sm:$0xff] %v2201_v35  ;;  %v15529_v49 = vld [vmem:[#allocation223_spill] sm:$0xff] }
 0x2c6   : > { %v2205_v2 = vadd.f32 %v2077_v57, %v15529_v49  ;;  %v15530_v46 = vld [vmem:[#allocation98_spill] sm:$0xff]  ;;  %v15531_v59 = vld [vmem:[#allocation228_spill] sm:$0xff]  ;;  %v2081_v48 = vld [vmem:[%s9499_s19 + $0xf8] sm:$0xff]  ;;  %2330 = vst [vmem:[%s9499_s19 + $0xc0] sm:$0xff] %v2202_v61 }
 0x2c7   : > { %v2206_v4 = vadd.f32 %v2078_v7, %v15530_v46  ;;  %v2207_v58 = vadd.f32 %v2079_v15, %v15531_v59  ;;  %v2080_v60 = vld [vmem:[%s9499_s19 + $0xf0] sm:$0xff]  ;;  %v2082_v39 = vld [vmem:[%s9499_s19 + $0x100] sm:$0xff]  ;;  %2331 = vst [vmem:[%s9499_s19 + $0xc8] sm:$0xff] %v2203_v5  ;;  %2332 = vst [vmem:[%s9499_s19 + $0xd0] sm:$0xff] %v2204_v14 }
 0x2c8   : > { %v15532_v44 = vld [vmem:[#allocation103_spill] sm:$0xff]  ;;  %v15533_v35 = vld [vmem:[#allocation229_spill] sm:$0xff]  ;;  %v15534_v49 = vld [vmem:[#allocation104_spill] sm:$0xff]  ;;  %2333 = vst [vmem:[%s9499_s19 + $0xd8] sm:$0xff] %v2205_v2 }
 0x2c9   : > { %v2208_v53 = vadd.f32 %v2080_v60, %v15532_v44  ;;  %v2209_v57 = vadd.f32 %v2081_v48, %v15533_v35  ;;  %v2210_v7 = vadd.f32 %v2082_v39, %v15534_v49  ;;  %v2083_v46 = vld [vmem:[%s9499_s19 + $0x108] sm:$0xff]  ;;  %v2084_v15 = vld [vmem:[%s9499_s19 + $0x110] sm:$0xff]  ;;  %v2085_v59 = vld [vmem:[%s9499_s19 + $0x118] sm:$0xff]  ;;  %2334 = vst [vmem:[%s9499_s19 + $0xe0] sm:$0xff] %v2206_v4 }
 0x2ca   : > { %2335 = vst [vmem:[%s9499_s19 + $0xe8] sm:$0xff] %v2207_v58  ;;  %v15535_v61 = vld [vmem:[#allocation105_spill] sm:$0xff]  ;;  %v2212_v14 = vadd.f32 %v2084_v15, %v9119_v47  ;;  %v15536_v60 = vld [vmem:[#allocation231_spill] sm:$0xff]  ;;  %v2086_v44 = vld [vmem:[%s9499_s19 + $0x120] sm:$0xff] }
 0x2cb   : > { %v2211_v5 = vadd.f32 %v2083_v46, %v15535_v61  ;;  %v2213_v48 = vadd.f32 %v2085_v59, %v15536_v60  ;;  %v2087_v39 = vld [vmem:[%s9499_s19 + $0x128] sm:$0xff]  ;;  %v2088_v35 = vld [vmem:[%s9499_s19 + $0x130] sm:$0xff]  ;;  %2336 = vst [vmem:[%s9499_s19 + $0xf0] sm:$0xff] %v2208_v53  ;;  %2337 = vst [vmem:[%s9499_s19 + $0xf8] sm:$0xff] %v2209_v57  ;;  %v2214_v2 = vadd.f32 %v2086_v44, %v9127_v36 }
 0x2cc   : > { %2338 = vst [vmem:[%s9499_s19 + $0x100] sm:$0xff] %v2210_v7  ;;  %v2215_v4 = vadd.f32 %v2087_v39, %v9131_v27  ;;  %v15537_v58 = vld [vmem:[#allocation106_spill] sm:$0xff]  ;;  %v2089_v46 = vld [vmem:[%s9499_s19 + $0x138] sm:$0xff]  ;;  %v2090_v15 = vld [vmem:[%s9499_s19 + $0x140] sm:$0xff] }
 0x2cd   : > { %v2216_v49 = vadd.f32 %v2088_v35, %v15537_v58  ;;  %v2091_v59 = vld [vmem:[%s9499_s19 + $0x148] sm:$0xff]  ;;  %2339 = vst [vmem:[%s9499_s19 + $0x108] sm:$0xff] %v2211_v5  ;;  %2340 = vst [vmem:[%s9499_s19 + $0x110] sm:$0xff] %v2212_v14  ;;  %v15538_v53 = vld [vmem:[#allocation118_spill] sm:$0xff] }
 0x2ce   : > { %2341 = vst [vmem:[%s9499_s19 + $0x118] sm:$0xff] %v2213_v48  ;;  %v2217_v57 = vadd.f32 %v2089_v46, %v15538_v53  ;;  %v15539_v7 = vld [vmem:[#allocation245_spill] sm:$0xff]  ;;  %v15540_v60 = vld [vmem:[#allocation119_spill] sm:$0xff]  ;;  %v2092_v39 = vld [vmem:[%s9499_s19 + $0x150] sm:$0xff] }
 0x2cf   : > { %v2218_v61 = vadd.f32 %v2090_v15, %v15539_v7  ;;  %v2219_v44 = vadd.f32 %v2091_v59, %v15540_v60  ;;  %v2093_v35 = vld [vmem:[%s9499_s19 + $0x158] sm:$0xff]  ;;  %v2094_v58 = vld [vmem:[%s9499_s19 + $0x160] sm:$0xff]  ;;  %2342 = vst [vmem:[%s9499_s19 + $0x120] sm:$0xff] %v2214_v2  ;;  %2343 = vst [vmem:[%s9499_s19 + $0x128] sm:$0xff] %v2215_v4 }
 0x2d0   : > { %2344 = vst [vmem:[%s9499_s19 + $0x130] sm:$0xff] %v2216_v49  ;;  %v15541_v5 = vld [vmem:[#allocation120_spill] sm:$0xff]  ;;  %v15542_v48 = vld [vmem:[#allocation247_spill] sm:$0xff]  ;;  %v15543_v53 = vld [vmem:[#allocation125_spill] sm:$0xff] }
 0x2d1   : > { %v2220_v14 = vadd.f32 %v2092_v39, %v15541_v5  ;;  %v2221_v46 = vadd.f32 %v2093_v35, %v15542_v48  ;;  %v2222_v15 = vadd.f32 %v2094_v58, %v15543_v53  ;;  %v2095_v7 = vld [vmem:[%s9499_s19 + $0x168] sm:$0xff]  ;;  %v2096_v59 = vld [vmem:[%s9499_s19 + $0x170] sm:$0xff]  ;;  %v2097_v60 = vld [vmem:[%s9499_s19 + $0x178] sm:$0xff]  ;;  %2345 = vst [vmem:[%s9499_s19 + $0x138] sm:$0xff] %v2217_v57 }
 0x2d2   : > { %2346 = vst [vmem:[%s9499_s19 + $0x140] sm:$0xff] %v2218_v61  ;;  %2347 = vst [vmem:[%s9499_s19 + $0x148] sm:$0xff] %v2219_v44  ;;  %v15544_v2 = vld [vmem:[#allocation126_spill] sm:$0xff]  ;;  %v15546_v5 = vld [vmem:[#allocation127_spill] sm:$0xff] }
 0x2d3   : > { %v2223_v4 = vadd.f32 %v2095_v7, %v15544_v2  ;;  %v15545_v49 = vld [vmem:[#allocation250_spill] sm:$0xff]  ;;  %v2225_v35 = vadd.f32 %v2097_v60, %v15546_v5  ;;  %v2098_v48 = vld [vmem:[%s9499_s19 + $0x180] sm:$0xff]  ;;  %v2099_v58 = vld [vmem:[%s9499_s19 + $0x188] sm:$0xff]  ;;  %2348 = vst [vmem:[%s9499_s19 + $0x150] sm:$0xff] %v2220_v14 }
 0x2d4   : > { %v2224_v39 = vadd.f32 %v2096_v59, %v15545_v49  ;;  %v2100_v53 = vld [vmem:[%s9499_s19 + $0x190] sm:$0xff]  ;;  %2349 = vst [vmem:[%s9499_s19 + $0x158] sm:$0xff] %v2221_v46  ;;  %2350 = vst [vmem:[%s9499_s19 + $0x160] sm:$0xff] %v2222_v15  ;;  %v15547_v57 = vld [vmem:[#allocation132_spill] sm:$0xff] }
 0x2d5   : > { %v2226_v61 = vadd.f32 %v2098_v48, %v15547_v57  ;;  %v15548_v44 = vld [vmem:[#allocation252_spill] sm:$0xff]  ;;  %v15549_v2 = vld [vmem:[#allocation133_spill] sm:$0xff]  ;;  %v2101_v49 = vld [vmem:[%s9499_s19 + $0x198] sm:$0xff]  ;;  %2351 = vst [vmem:[%s9499_s19 + $0x168] sm:$0xff] %v2223_v4 }
 0x2d6   : > { %v2227_v7 = vadd.f32 %v2099_v58, %v15548_v44  ;;  %v2228_v59 = vadd.f32 %v2100_v53, %v15549_v2  ;;  %v2102_v60 = vld [vmem:[%s9499_s19 + $0x1a0] sm:$0xff]  ;;  %v2103_v5 = vld [vmem:[%s9499_s19 + $0x1a8] sm:$0xff]  ;;  %2352 = vst [vmem:[%s9499_s19 + $0x170] sm:$0xff] %v2224_v39  ;;  %2353 = vst [vmem:[%s9499_s19 + $0x178] sm:$0xff] %v2225_v35 }
 0x2d7   : > { %v15550_v14 = vld [vmem:[#allocation134_spill] sm:$0xff]  ;;  %v15551_v15 = vld [vmem:[#allocation255_spill] sm:$0xff]  ;;  %v2106_v2 = vld [vmem:[%s9499_s19 + $0x1c0] sm:$0xff]  ;;  %2354 = vst [vmem:[%s9499_s19 + $0x180] sm:$0xff] %v2226_v61 }
 0x2d8   : > { %v2229_v46 = vadd.f32 %v2101_v49, %v15550_v14  ;;  %v2230_v48 = vadd.f32 %v2102_v60, %v15551_v15  ;;  %v15552_v57 = vld [vmem:[#allocation139_spill] sm:$0xff]  ;;  %v2104_v44 = vld [vmem:[%s9499_s19 + $0x1b0] sm:$0xff]  ;;  %2355 = vst [vmem:[%s9499_s19 + $0x188] sm:$0xff] %v2227_v7  ;;  %2356 = vst [vmem:[%s9499_s19 + $0x190] sm:$0xff] %v2228_v59 }
 0x2d9   : > { %v2231_v58 = vadd.f32 %v2103_v5, %v15552_v57  ;;  %v2105_v53 = vld [vmem:[%s9499_s19 + $0x1b8] sm:$0xff]  ;;  %v15553_v4 = vld [vmem:[#allocation140_spill] sm:$0xff]  ;;  %v15554_v35 = vld [vmem:[#allocation257_spill] sm:$0xff] }
 0x2da   : > { %v2232_v39 = vadd.f32 %v2104_v44, %v15553_v4  ;;  %v2233_v49 = vadd.f32 %v2105_v53, %v15554_v35  ;;  %v15555_v14 = vld [vmem:[#allocation145_spill] sm:$0xff]  ;;  %v2108_v5 = vld [vmem:[%s9499_s19 + $0x1d0] sm:$0xff]  ;;  %v2109_v57 = vld [vmem:[%s9499_s19 + $0x1d8] sm:$0xff]  ;;  %2357 = vst [vmem:[%s9499_s19 + $0x198] sm:$0xff] %v2229_v46 }
 0x2db   : > { %v2234_v60 = vadd.f32 %v2106_v2, %v15555_v14  ;;  %v2107_v15 = vld [vmem:[%s9499_s19 + $0x1c8] sm:$0xff]  ;;  %2358 = vst [vmem:[%s9499_s19 + $0x1a0] sm:$0xff] %v2230_v48  ;;  %2359 = vst [vmem:[%s9499_s19 + $0x1a8] sm:$0xff] %v2231_v58  ;;  %v15556_v61 = vld [vmem:[#allocation259_spill] sm:$0xff] }
 0x2dc   : > { %v2235_v7 = vadd.f32 %v2107_v15, %v15556_v61  ;;  %v15557_v59 = vld [vmem:[#allocation260_spill] sm:$0xff]  ;;  %v15558_v4 = vld [vmem:[#allocation150_spill] sm:$0xff]  ;;  %v2111_v2 = vld [vmem:[%s9499_s19 + $0x1e8] sm:$0xff]  ;;  %2360 = vst [vmem:[%s9499_s19 + $0x1b0] sm:$0xff] %v2232_v39 }
 0x2dd   : > { %v2236_v44 = vadd.f32 %v2108_v5, %v15557_v59  ;;  %v2237_v53 = vadd.f32 %v2109_v57, %v15558_v4  ;;  %v2110_v35 = vld [vmem:[%s9499_s19 + $0x1e0] sm:$0xff]  ;;  %v2112_v14 = vld [vmem:[%s9499_s19 + $0x1f0] sm:$0xff]  ;;  %2361 = vst [vmem:[%s9499_s19 + $0x1b8] sm:$0xff] %v2233_v49  ;;  %2362 = vst [vmem:[%s9499_s19 + $0x1c0] sm:$0xff] %v2234_v60 }
 0x2de   : > { %v15559_v46 = vld [vmem:[#allocation261_spill] sm:$0xff]  ;;  %v15560_v58 = vld [vmem:[#allocation151_spill] sm:$0xff]  ;;  %v2114_v57 = vld [vmem:[%s9499_s19 + $0x200] sm:$0xff]  ;;  %2363 = vst [vmem:[%s9499_s19 + $0x1c8] sm:$0xff] %v2235_v7 }
 0x2df   : > { %v2238_v48 = vadd.f32 %v2110_v35, %v15559_v46  ;;  %v2239_v15 = vadd.f32 %v2111_v2, %v15560_v58  ;;  %v15561_v61 = vld [vmem:[#allocation263_spill] sm:$0xff]  ;;  %v2115_v4 = vld [vmem:[%s9499_s19 + $0x208] sm:$0xff]  ;;  %2364 = vst [vmem:[%s9499_s19 + $0x1d0] sm:$0xff] %v2236_v44  ;;  %2365 = vst [vmem:[%s9499_s19 + $0x1d8] sm:$0xff] %v2237_v53 }
 0x2e0   : > { %v2240_v5 = vadd.f32 %v2112_v14, %v15561_v61  ;;  %v2113_v59 = vld [vmem:[%s9499_s19 + $0x1f8] sm:$0xff]  ;;  %v15562_v39 = vld [vmem:[#allocation264_spill] sm:$0xff]  ;;  %v15564_v46 = vld [vmem:[#allocation266_spill] sm:$0xff] }
 0x2e1   : > { %v2241_v49 = vadd.f32 %v2113_v59, %v15562_v39  ;;  %v15563_v60 = vld [vmem:[#allocation156_spill] sm:$0xff]  ;;  %v2243_v2 = vadd.f32 %v2115_v4, %v15564_v46  ;;  %v2116_v58 = vld [vmem:[%s9499_s19 + $0x210] sm:$0xff]  ;;  %v2117_v14 = vld [vmem:[%s9499_s19 + $0x218] sm:$0xff]  ;;  %2366 = vst [vmem:[%s9499_s19 + $0x1e0] sm:$0xff] %v2238_v48 }
 0x2e2   : > { %v2242_v35 = vadd.f32 %v2114_v57, %v15563_v60  ;;  %v2118_v61 = vld [vmem:[%s9499_s19 + $0x220] sm:$0xff]  ;;  %2367 = vst [vmem:[%s9499_s19 + $0x1e8] sm:$0xff] %v2239_v15  ;;  %2368 = vst [vmem:[%s9499_s19 + $0x1f0] sm:$0xff] %v2240_v5  ;;  %v2244_v7 = vadd.f32 %v2116_v58, %v9247_v42  ;;  %v2245_v44 = vadd.f32 %v2117_v14, %v9251_v22  ;;  %v2119_v57 = vld [vmem:[%s9499_s19 + $0x228] sm:$0xff] }
 0x2e3   : > { %v15565_v53 = vld [vmem:[#allocation164_spill] sm:$0xff]  ;;  %v2120_v4 = vld [vmem:[%s9499_s19 + $0x230] sm:$0xff]  ;;  %v2121_v39 = vld [vmem:[%s9499_s19 + $0x238] sm:$0xff]  ;;  %2369 = vst [vmem:[%s9499_s19 + $0x1f8] sm:$0xff] %v2241_v49  ;;  %v2247_v48 = vadd.f32 %v2119_v57, %v9259_v62 }
 0x2e4   : > { %v2246_v59 = vadd.f32 %v2118_v61, %v15565_v53  ;;  %2370 = vst [vmem:[%s9499_s19 + $0x200] sm:$0xff] %v2242_v35  ;;  %2371 = vst [vmem:[%s9499_s19 + $0x208] sm:$0xff] %v2243_v2  ;;  %v2248_v15 = vadd.f32 %v2120_v4, %v9263_v17  ;;  %v2249_v5 = vadd.f32 %v2121_v39, %v9267_v3  ;;  %v2122_v60 = vld [vmem:[%s9499_s19 + $0x240] sm:$0xff]  ;;  %v2123_v46 = vld [vmem:[%s9499_s19 + $0x248] sm:$0xff] }
 0x2e5   : > { %v2124_v58 = vld [vmem:[%s9499_s19 + $0x250] sm:$0xff]  ;;  %2372 = vst [vmem:[%s9499_s19 + $0x210] sm:$0xff] %v2244_v7  ;;  %2373 = vst [vmem:[%s9499_s19 + $0x218] sm:$0xff] %v2245_v44  ;;  %v2250_v49 = vadd.f32 %v2122_v60, %v9271_v41  ;;  %v2251_v35 = vadd.f32 %v2123_v46, %v9275_v33  ;;  %v2125_v14 = vld [vmem:[%s9499_s19 + $0x258] sm:$0xff] }
 0x2e6   : > { %2374 = vst [vmem:[%s9499_s19 + $0x220] sm:$0xff] %v2246_v59  ;;  %v2252_v2 = vadd.f32 %v2124_v58, %v9279_v11  ;;  %v2126_v61 = vld [vmem:[%s9499_s19 + $0x260] sm:$0xff]  ;;  %v2127_v53 = vld [vmem:[%s9499_s19 + $0x268] sm:$0xff]  ;;  %2375 = vst [vmem:[%s9499_s19 + $0x228] sm:$0xff] %v2247_v48  ;;  %v2253_v7 = vadd.f32 %v2125_v14, %v9283_v34 }
 0x2e7   : > { %2376 = vst [vmem:[%s9499_s19 + $0x230] sm:$0xff] %v2248_v15  ;;  %2377 = vst [vmem:[%s9499_s19 + $0x238] sm:$0xff] %v2249_v5  ;;  %v2254_v44 = vadd.f32 %v2126_v61, %v9287_v63  ;;  %v2255_v59 = vadd.f32 %v2127_v53, %v9291_v54  ;;  %v2128_v57 = vld [vmem:[%s9499_s19 + $0x270] sm:$0xff]  ;;  %v2129_v4 = vld [vmem:[%s9499_s19 + $0x278] sm:$0xff] }
 0x2e8   : > { %v2130_v39 = vld [vmem:[%s9499_s19 + $0x280] sm:$0xff]  ;;  %2378 = vst [vmem:[%s9499_s19 + $0x240] sm:$0xff] %v2250_v49  ;;  %2379 = vst [vmem:[%s9499_s19 + $0x248] sm:$0xff] %v2251_v35  ;;  %v2256_v48 = vadd.f32 %v2128_v57, %v9295_v1  ;;  %v2257_v15 = vadd.f32 %v2129_v4, %v9299_v6  ;;  %v2131_v60 = vld [vmem:[%s9499_s19 + $0x288] sm:$0xff] }
 0x2e9   : > { %2380 = vst [vmem:[%s9499_s19 + $0x250] sm:$0xff] %v2252_v2  ;;  %v2258_v5 = vadd.f32 %v2130_v39, %v9303_v43  ;;  %v2132_v46 = vld [vmem:[%s9499_s19 + $0x290] sm:$0xff]  ;;  %v2133_v58 = vld [vmem:[%s9499_s19 + $0x298] sm:$0xff]  ;;  %2381 = vst [vmem:[%s9499_s19 + $0x258] sm:$0xff] %v2253_v7  ;;  %v2259_v49 = vadd.f32 %v2131_v60, %v9307_v38 }
 0x2ea   : > { %2382 = vst [vmem:[%s9499_s19 + $0x260] sm:$0xff] %v2254_v44  ;;  %2383 = vst [vmem:[%s9499_s19 + $0x268] sm:$0xff] %v2255_v59  ;;  %v2260_v35 = vadd.f32 %v2132_v46, %v9311_v25  ;;  %v2261_v2 = vadd.f32 %v2133_v58, %v9315_v23  ;;  %v2134_v14 = vld [vmem:[%s9499_s19 + $0x2a0] sm:$0xff]  ;;  %v2135_v61 = vld [vmem:[%s9499_s19 + $0x2a8] sm:$0xff] }
 0x2eb   : > { %v2136_v53 = vld [vmem:[%s9499_s19 + $0x2b0] sm:$0xff]  ;;  %2384 = vst [vmem:[%s9499_s19 + $0x270] sm:$0xff] %v2256_v48  ;;  %2385 = vst [vmem:[%s9499_s19 + $0x278] sm:$0xff] %v2257_v15  ;;  %v2262_v7 = vadd.f32 %v2134_v14, %v9319_v9  ;;  %v2263_v44 = vadd.f32 %v2135_v61, %v9323_v10  ;;  %v2137_v57 = vld [vmem:[%s9499_s19 + $0x2b8] sm:$0xff] }
 0x2ec   : > { %2386 = vst [vmem:[%s9499_s19 + $0x280] sm:$0xff] %v2258_v5  ;;  %v2264_v59 = vadd.f32 %v2136_v53, %v9327_v51  ;;  %v2138_v4 = vld [vmem:[%s9499_s19 + $0x2c0] sm:$0xff]  ;;  %v2139_v39 = vld [vmem:[%s9499_s19 + $0x2c8] sm:$0xff]  ;;  %2387 = vst [vmem:[%s9499_s19 + $0x288] sm:$0xff] %v2259_v49  ;;  %v2265_v48 = vadd.f32 %v2137_v57, %v9331_v21 }
 0x2ed   : > { %2388 = vst [vmem:[%s9499_s19 + $0x290] sm:$0xff] %v2260_v35  ;;  %2389 = vst [vmem:[%s9499_s19 + $0x298] sm:$0xff] %v2261_v2  ;;  %v2266_v15 = vadd.f32 %v2138_v4, %v9335_v52  ;;  %v2267_v5 = vadd.f32 %v2139_v39, %v9339_v24  ;;  %v2140_v60 = vld [vmem:[%s9499_s19 + $0x2d0] sm:$0xff]  ;;  %v2141_v46 = vld [vmem:[%s9499_s19 + $0x2d8] sm:$0xff] }
 0x2ee   : > { %v2142_v58 = vld [vmem:[%s9499_s19 + $0x2e0] sm:$0xff]  ;;  %2390 = vst [vmem:[%s9499_s19 + $0x2a0] sm:$0xff] %v2262_v7  ;;  %2391 = vst [vmem:[%s9499_s19 + $0x2a8] sm:$0xff] %v2263_v44  ;;  %v2268_v49 = vadd.f32 %v2140_v60, %v9343_v13  ;;  %v2269_v35 = vadd.f32 %v2141_v46, %v9347_v45  ;;  %v2143_v14 = vld [vmem:[%s9499_s19 + $0x2e8] sm:$0xff] }
 0x2ef   : > { %2392 = vst [vmem:[%s9499_s19 + $0x2b0] sm:$0xff] %v2264_v59  ;;  %v2270_v2 = vadd.f32 %v2142_v58, %v9351_v32  ;;  %v2144_v61 = vld [vmem:[%s9499_s19 + $0x2f0] sm:$0xff]  ;;  %v2145_v53 = vld [vmem:[%s9499_s19 + $0x2f8] sm:$0xff]  ;;  %2393 = vst [vmem:[%s9499_s19 + $0x2b8] sm:$0xff] %v2265_v48  ;;  %v2271_v7 = vadd.f32 %v2143_v14, %v9355_v16 }
 0x2f0   : > { %2394 = vst [vmem:[%s9499_s19 + $0x2c0] sm:$0xff] %v2266_v15  ;;  %2395 = vst [vmem:[%s9499_s19 + $0x2c8] sm:$0xff] %v2267_v5  ;;  %v2272_v44 = vadd.f32 %v2144_v61, %v9359_v8  ;;  %v2273_v59 = vadd.f32 %v2145_v53, %v9363_v19  ;;  %v2146_v57 = vld [vmem:[%s9499_s19 + $0x300] sm:$0xff]  ;;  %v2147_v4 = vld [vmem:[%s9499_s19 + $0x308] sm:$0xff] }
 0x2f1   : > { %v2148_v39 = vld [vmem:[%s9499_s19 + $0x310] sm:$0xff]  ;;  %2396 = vst [vmem:[%s9499_s19 + $0x2d0] sm:$0xff] %v2268_v49  ;;  %2397 = vst [vmem:[%s9499_s19 + $0x2d8] sm:$0xff] %v2269_v35  ;;  %v2274_v48 = vadd.f32 %v2146_v57, %v9367_v37  ;;  %v2275_v15 = vadd.f32 %v2147_v4, %v9371_v56  ;;  %v2149_v60 = vld [vmem:[%s9499_s19 + $0x318] sm:$0xff] }
 0x2f2   : > { %2398 = vst [vmem:[%s9499_s19 + $0x2e0] sm:$0xff] %v2270_v2  ;;  %v2276_v5 = vadd.f32 %v2148_v39, %v9375_v12  ;;  %v2150_v46 = vld [vmem:[%s9499_s19 + $0x320] sm:$0xff]  ;;  %v2151_v58 = vld [vmem:[%s9499_s19 + $0x328] sm:$0xff]  ;;  %2399 = vst [vmem:[%s9499_s19 + $0x2e8] sm:$0xff] %v2271_v7  ;;  %v2277_v49 = vadd.f32 %v2149_v60, %v9382_v31 }
 0x2f3   : > { %2400 = vst [vmem:[%s9499_s19 + $0x2f0] sm:$0xff] %v2272_v44  ;;  %2401 = vst [vmem:[%s9499_s19 + $0x2f8] sm:$0xff] %v2273_v59  ;;  %v2278_v35 = vadd.f32 %v2150_v46, %v9386_v26  ;;  %v2279_v2 = vadd.f32 %v2151_v58, %v9390_v18  ;;  %v2152_v14 = vld [vmem:[%s9499_s19 + $0x330] sm:$0xff]  ;;  %v2153_v61 = vld [vmem:[%s9499_s19 + $0x338] sm:$0xff] }
 0x2f4   : > { %v2154_v53 = vld [vmem:[%s9499_s19 + $0x340] sm:$0xff]  ;;  %2402 = vst [vmem:[%s9499_s19 + $0x300] sm:$0xff] %v2274_v48  ;;  %2403 = vst [vmem:[%s9499_s19 + $0x308] sm:$0xff] %v2275_v15  ;;  %v2280_v7 = vadd.f32 %v2152_v14, %v9394_v40  ;;  %v2281_v44 = vadd.f32 %v2153_v61, %v9398_v28  ;;  %v2155_v57 = vld [vmem:[%s9499_s19 + $0x348] sm:$0xff] }
 0x2f5   : > { %2404 = vst [vmem:[%s9499_s19 + $0x310] sm:$0xff] %v2276_v5  ;;  %v2282_v59 = vadd.f32 %v2154_v53, %v9402_v50  ;;  %v2156_v4 = vld [vmem:[%s9499_s19 + $0x350] sm:$0xff]  ;;  %v2157_v39 = vld [vmem:[%s9499_s19 + $0x358] sm:$0xff]  ;;  %2405 = vst [vmem:[%s9499_s19 + $0x318] sm:$0xff] %v2277_v49  ;;  %v2283_v48 = vadd.f32 %v2155_v57, %v9406_v20 }
 0x2f6   : > { %2406 = vst [vmem:[%s9499_s19 + $0x320] sm:$0xff] %v2278_v35  ;;  %2407 = vst [vmem:[%s9499_s19 + $0x328] sm:$0xff] %v2279_v2  ;;  %v2284_v15 = vadd.f32 %v2156_v4, %v9410_v0  ;;  %v2285_v5 = vadd.f32 %v2157_v39, %v9414_v29  ;;  %v2158_v60 = vld [vmem:[%s9499_s19 + $0x360] sm:$0xff]  ;;  %v2159_v46 = vld [vmem:[%s9499_s19 + $0x368] sm:$0xff] }
 0x2f7   : > { %v2160_v58 = vld [vmem:[%s9499_s19 + $0x370] sm:$0xff]  ;;  %2408 = vst [vmem:[%s9499_s19 + $0x330] sm:$0xff] %v2280_v7  ;;  %2409 = vst [vmem:[%s9499_s19 + $0x338] sm:$0xff] %v2281_v44  ;;  %v2286_v49 = vadd.f32 %v2158_v60, %v9418_v30  ;;  %v2287_v35 = vadd.f32 %v2159_v46, %v9422_v55  ;;  %v15566_v2 = vld [vmem:[#allocation208_spill] sm:$0xff] }
 0x2f8   : > { %2410 = vst [vmem:[%s9499_s19 + $0x340] sm:$0xff] %v2282_v59  ;;  %v2288_v14 = vadd.f32 %v2160_v58, %v15566_v2  ;;  %v2161_v61 = vld [vmem:[%s9499_s19 + $0x378] sm:$0xff]  ;;  %v2162_v53 = vld [vmem:[%s9499_s19 + $0x380] sm:$0xff]  ;;  %v2163_v57 = vld [vmem:[%s9499_s19 + $0x388] sm:$0xff] }
 0x2f9   : > { %2411 = vst [vmem:[%s9499_s19 + $0x348] sm:$0xff] %v2283_v48  ;;  %2412 = vst [vmem:[%s9499_s19 + $0x350] sm:$0xff] %v2284_v15  ;;  %v15567_v7 = vld [vmem:[#allocation236_spill] sm:$0xff]  ;;  %v15569_v39 = vld [vmem:[#allocation237_spill] sm:$0xff] }
 0x2fa   : > { %2413 = vst [vmem:[%s9499_s19 + $0x358] sm:$0xff] %v2285_v5  ;;  %v2289_v44 = vadd.f32 %v2161_v61, %v15567_v7  ;;  %v15568_v59 = vld [vmem:[#allocation216_spill] sm:$0xff]  ;;  %v2291_v60 = vadd.f32 %v2163_v57, %v15569_v39  ;;  %v2164_v46 = vld [vmem:[%s9499_s19 + $0x390] sm:$0xff]  ;;  %v2165_v58 = vld [vmem:[%s9499_s19 + $0x398] sm:$0xff] }
 0x2fb   : > { %v2290_v4 = vadd.f32 %v2162_v53, %v15568_v59  ;;  %v2166_v2 = vld [vmem:[%s9499_s19 + $0x3a0] sm:$0xff]  ;;  %2414 = vst [vmem:[%s9499_s19 + $0x360] sm:$0xff] %v2286_v49  ;;  %2415 = vst [vmem:[%s9499_s19 + $0x368] sm:$0xff] %v2287_v35  ;;  %v15571_v5 = vld [vmem:[#allocation238_spill] sm:$0xff] }
 0x2fc   : > { %2416 = vst [vmem:[%s9499_s19 + $0x370] sm:$0xff] %v2288_v14  ;;  %v15570_v48 = vld [vmem:[#allocation224_spill] sm:$0xff]  ;;  %v2293_v61 = vadd.f32 %v2165_v58, %v15571_v5  ;;  %v2167_v59 = vld [vmem:[%s9499_s19 + $0x3a8] sm:$0xff]  ;;  %v2168_v57 = vld [vmem:[%s9499_s19 + $0x3b0] sm:$0xff] }
 0x2fd   : > { %v2292_v15 = vadd.f32 %v2164_v46, %v15570_v48  ;;  %v15572_v7 = vld [vmem:[#allocation232_spill] sm:$0xff]  ;;  %v2169_v39 = vld [vmem:[%s9499_s19 + $0x3b8] sm:$0xff]  ;;  %2417 = vst [vmem:[%s9499_s19 + $0x378] sm:$0xff] %v2289_v44  ;;  %2418 = vst [vmem:[%s9499_s19 + $0x380] sm:$0xff] %v2290_v4 }
 0x2fe   : > { %v2294_v53 = vadd.f32 %v2166_v2, %v15572_v7  ;;  %2419 = vst [vmem:[%s9499_s19 + $0x388] sm:$0xff] %v2291_v60  ;;  %v15573_v49 = vld [vmem:[#allocation277_spill] sm:$0xff]  ;;  %v15574_v14 = vld [vmem:[#allocation240_spill] sm:$0xff]  ;;  %v15575_v48 = vld [vmem:[#allocation278_spill] sm:$0xff] }
 0x2ff   : > { %v2295_v35 = vadd.f32 %v2167_v59, %v15573_v49  ;;  %v2296_v46 = vadd.f32 %v2168_v57, %v15574_v14  ;;  %v2297_v58 = vadd.f32 %v2169_v39, %v15575_v48  ;;  %v2170_v5 = vld [vmem:[%s9499_s19 + $0x3c0] sm:$0xff]  ;;  %v2171_v2 = vld [vmem:[%s9499_s19 + $0x3c8] sm:$0xff]  ;;  %v2172_v7 = vld [vmem:[%s9499_s19 + $0x3d0] sm:$0xff]  ;;  %2420 = vst [vmem:[%s9499_s19 + $0x390] sm:$0xff] %v2292_v15 }
 0x300   : > { %2421 = vst [vmem:[%s9499_s19 + $0x398] sm:$0xff] %v2293_v61  ;;  %2422 = vst [vmem:[%s9499_s19 + $0x3a0] sm:$0xff] %v2294_v53  ;;  %v15576_v44 = vld [vmem:[#allocation241_spill] sm:$0xff]  ;;  %v15577_v60 = vld [vmem:[#allocation279_spill] sm:$0xff] }
 0x301   : > { %v2298_v4 = vadd.f32 %v2170_v5, %v15576_v44  ;;  %v2299_v59 = vadd.f32 %v2171_v2, %v15577_v60  ;;  %v15578_v49 = vld [vmem:[#allocation254_spill] sm:$0xff]  ;;  %v2173_v14 = vld [vmem:[%s9499_s19 + $0x3d8] sm:$0xff]  ;;  %v2174_v39 = vld [vmem:[%s9499_s19 + $0x3e0] sm:$0xff]  ;;  %2423 = vst [vmem:[%s9499_s19 + $0x3a8] sm:$0xff] %v2295_v35 }
 0x302   : > { %v2300_v57 = vadd.f32 %v2172_v7, %v15578_v49  ;;  %v2175_v48 = vld [vmem:[%s9499_s19 + $0x3e8] sm:$0xff]  ;;  %2424 = vst [vmem:[%s9499_s19 + $0x3b0] sm:$0xff] %v2296_v46  ;;  %2425 = vst [vmem:[%s9499_s19 + $0x3b8] sm:$0xff] %v2297_v58  ;;  %v15579_v15 = vld [vmem:[#allocation280_spill] sm:$0xff] }
 0x303   : > { %v2301_v61 = vadd.f32 %v2173_v14, %v15579_v15  ;;  %v15580_v53 = vld [vmem:[#allocation258_spill] sm:$0xff]  ;;  %v2177_v7 = vld [vmem:[%s9499_s19 + $0x3f8] sm:$0xff]  ;;  %v2434_v49 = vld [vmem:[%s9759_s23] sm:$0xff]  ;;  %2426 = vst [vmem:[%s9499_s19 + $0x3c0] sm:$0xff] %v2298_v4 }
 0x304   : > { %v2302_v5 = vadd.f32 %v2174_v39, %v15580_v53  ;;  %v15581_v44 = vld [vmem:[#allocation282_spill] sm:$0xff]  ;;  %2427 = vst [vmem:[%s9499_s19 + $0x3c8] sm:$0xff] %v2299_v59  ;;  %2428 = vst [vmem:[%s9499_s19 + $0x3d0] sm:$0xff] %v2300_v57  ;;  %v15583_v58 = vld [vmem:[#allocation284_spill] sm:$0xff] }
 0x305   : > { %v2303_v2 = vadd.f32 %v2175_v48, %v15581_v44  ;;  %v2176_v60 = vld [vmem:[%s9499_s19 + $0x3f0] sm:$0xff]  ;;  %v2305_v14 = vadd.f32 %v2177_v7, %v15583_v58  ;;  %v15584_v15 = vld [vmem:[#allocation21_spill] sm:$0xff]  ;;  %v2437_v44 = vld [vmem:[%s9759_s23 + $0x18] sm:$0xff]  ;;  %2429 = vst [vmem:[%s9499_s19 + $0x3d8] sm:$0xff] %v2301_v61 }
 0x306   : > { %v15582_v35 = vld [vmem:[#allocation262_spill] sm:$0xff]  ;;  %v2562_v39 = vadd.f32 %v2434_v49, %v15584_v15  ;;  %v2435_v53 = vld [vmem:[%s9759_s23 + $0x8] sm:$0xff]  ;;  %2430 = vst [vmem:[%s9499_s19 + $0x3e0] sm:$0xff] %v2302_v5  ;;  %v15586_v57 = vld [vmem:[#allocation23_spill] sm:$0xff] }
 0x307   : > { %v2304_v46 = vadd.f32 %v2176_v60, %v15582_v35  ;;  %v2436_v48 = vld [vmem:[%s9759_s23 + $0x10] sm:$0xff]  ;;  %2431 = vst [vmem:[%s9499_s19 + $0x3e8] sm:$0xff] %v2303_v2  ;;  %v15587_v35 = vld [vmem:[#allocation24_spill] sm:$0xff]  ;;  %v2439_v49 = vld [vmem:[%s9759_s23 + $0x28] sm:$0xff] }
 0x308   : > { %v15585_v4 = vld [vmem:[#allocation22_spill] sm:$0xff]  ;;  %v2564_v60 = vadd.f32 %v2436_v48, %v15586_v57  ;;  %v2565_v7 = vadd.f32 %v2437_v44, %v15587_v35  ;;  %v2438_v58 = vld [vmem:[%s9759_s23 + $0x20] sm:$0xff]  ;;  %2433 = vst [vmem:[%s9499_s19 + $0x3f8] sm:$0xff] %v2305_v14  ;;  %2690 = vst [vmem:[%s9759_s23] sm:$0xff] %v2562_v39 }
 0x309   : > { %v2563_v59 = vadd.f32 %v2435_v53, %v15585_v4  ;;  %v2440_v15 = vld [vmem:[%s9759_s23 + $0x30] sm:$0xff]  ;;  %2432 = vst [vmem:[%s9499_s19 + $0x3f0] sm:$0xff] %v2304_v46  ;;  %v15588_v61 = vld [vmem:[#allocation25_spill] sm:$0xff]  ;;  %v15590_v4 = vld [vmem:[#allocation27_spill] sm:$0xff] }
 0x30a   : > { %v2566_v5 = vadd.f32 %v2438_v58, %v15588_v61  ;;  %v15589_v2 = vld [vmem:[#allocation26_spill] sm:$0xff]  ;;  %v2568_v48 = vadd.f32 %v2440_v15, %v15590_v4  ;;  %v2441_v57 = vld [vmem:[%s9759_s23 + $0x38] sm:$0xff]  ;;  %v2442_v44 = vld [vmem:[%s9759_s23 + $0x40] sm:$0xff]  ;;  %2692 = vst [vmem:[%s9759_s23 + $0x10] sm:$0xff] %v2564_v60 }
 0x30b   : > { %v2567_v53 = vadd.f32 %v2439_v49, %v15589_v2  ;;  %v2443_v35 = vld [vmem:[%s9759_s23 + $0x48] sm:$0xff]  ;;  %2691 = vst [vmem:[%s9759_s23 + $0x8] sm:$0xff] %v2563_v59  ;;  %2693 = vst [vmem:[%s9759_s23 + $0x18] sm:$0xff] %v2565_v7  ;;  %v15591_v46 = vld [vmem:[#allocation28_spill] sm:$0xff] }
 0x30c   : > { %v2569_v14 = vadd.f32 %v2441_v57, %v15591_v46  ;;  %v15592_v39 = vld [vmem:[#allocation29_spill] sm:$0xff]  ;;  %v15593_v61 = vld [vmem:[#allocation30_spill] sm:$0xff]  ;;  %v2445_v15 = vld [vmem:[%s9759_s23 + $0x58] sm:$0xff]  ;;  %2694 = vst [vmem:[%s9759_s23 + $0x20] sm:$0xff] %v2566_v5 }
 0x30d   : > { %v2570_v58 = vadd.f32 %v2442_v44, %v15592_v39  ;;  %v2571_v49 = vadd.f32 %v2443_v35, %v15593_v61  ;;  %v2444_v2 = vld [vmem:[%s9759_s23 + $0x50] sm:$0xff]  ;;  %v2446_v4 = vld [vmem:[%s9759_s23 + $0x60] sm:$0xff]  ;;  %2695 = vst [vmem:[%s9759_s23 + $0x28] sm:$0xff] %v2567_v53  ;;  %2696 = vst [vmem:[%s9759_s23 + $0x30] sm:$0xff] %v2568_v48 }
 0x30e   : > { %v15594_v59 = vld [vmem:[#allocation31_spill] sm:$0xff]  ;;  %v15595_v7 = vld [vmem:[#allocation32_spill] sm:$0xff]  ;;  %v15596_v46 = vld [vmem:[#allocation33_spill] sm:$0xff]  ;;  %2697 = vst [vmem:[%s9759_s23 + $0x38] sm:$0xff] %v2569_v14 }
 0x30f   : > { %v2572_v60 = vadd.f32 %v2444_v2, %v15594_v59  ;;  %v2573_v57 = vadd.f32 %v2445_v15, %v15595_v7  ;;  %v2574_v44 = vadd.f32 %v2446_v4, %v15596_v46  ;;  %v2447_v39 = vld [vmem:[%s9759_s23 + $0x68] sm:$0xff]  ;;  %v2448_v35 = vld [vmem:[%s9759_s23 + $0x70] sm:$0xff]  ;;  %v2449_v61 = vld [vmem:[%s9759_s23 + $0x78] sm:$0xff]  ;;  %2698 = vst [vmem:[%s9759_s23 + $0x40] sm:$0xff] %v2570_v58 }
 0x310   : > { %2699 = vst [vmem:[%s9759_s23 + $0x48] sm:$0xff] %v2571_v49  ;;  %v15597_v5 = vld [vmem:[#allocation34_spill] sm:$0xff]  ;;  %v15598_v48 = vld [vmem:[#allocation35_spill] sm:$0xff]  ;;  %v15599_v59 = vld [vmem:[#allocation36_spill] sm:$0xff] }
 0x311   : > { %v2575_v53 = vadd.f32 %v2447_v39, %v15597_v5  ;;  %v2576_v2 = vadd.f32 %v2448_v35, %v15598_v48  ;;  %v2577_v15 = vadd.f32 %v2449_v61, %v15599_v59  ;;  %v2450_v7 = vld [vmem:[%s9759_s23 + $0x80] sm:$0xff]  ;;  %v2451_v4 = vld [vmem:[%s9759_s23 + $0x88] sm:$0xff]  ;;  %v2452_v46 = vld [vmem:[%s9759_s23 + $0x90] sm:$0xff]  ;;  %2700 = vst [vmem:[%s9759_s23 + $0x50] sm:$0xff] %v2572_v60 }
 0x312   : > { %2701 = vst [vmem:[%s9759_s23 + $0x58] sm:$0xff] %v2573_v57  ;;  %2702 = vst [vmem:[%s9759_s23 + $0x60] sm:$0xff] %v2574_v44  ;;  %v15600_v14 = vld [vmem:[#allocation37_spill] sm:$0xff]  ;;  %v15601_v49 = vld [vmem:[#allocation38_spill] sm:$0xff] }
 0x313   : > { %v2578_v58 = vadd.f32 %v2450_v7, %v15600_v14  ;;  %v2579_v39 = vadd.f32 %v2451_v4, %v15601_v49  ;;  %v15602_v5 = vld [vmem:[#allocation39_spill] sm:$0xff]  ;;  %v2454_v61 = vld [vmem:[%s9759_s23 + $0xa0] sm:$0xff]  ;;  %v2455_v59 = vld [vmem:[%s9759_s23 + $0xa8] sm:$0xff]  ;;  %2703 = vst [vmem:[%s9759_s23 + $0x68] sm:$0xff] %v2575_v53 }
 0x314   : > { %v2580_v35 = vadd.f32 %v2452_v46, %v15602_v5  ;;  %v2453_v48 = vld [vmem:[%s9759_s23 + $0x98] sm:$0xff]  ;;  %2704 = vst [vmem:[%s9759_s23 + $0x70] sm:$0xff] %v2576_v2  ;;  %2705 = vst [vmem:[%s9759_s23 + $0x78] sm:$0xff] %v2577_v15  ;;  %v15604_v44 = vld [vmem:[#allocation44_spill] sm:$0xff] }
 0x315   : > { %v15603_v60 = vld [vmem:[#allocation43_spill] sm:$0xff]  ;;  %v2582_v7 = vadd.f32 %v2454_v61, %v15604_v44  ;;  %v15605_v14 = vld [vmem:[#allocation45_spill] sm:$0xff]  ;;  %v2456_v49 = vld [vmem:[%s9759_s23 + $0xb0] sm:$0xff]  ;;  %2706 = vst [vmem:[%s9759_s23 + $0x80] sm:$0xff] %v2578_v58 }
 0x316   : > { %v2581_v57 = vadd.f32 %v2453_v48, %v15603_v60  ;;  %v2583_v4 = vadd.f32 %v2455_v59, %v15605_v14  ;;  %v2457_v46 = vld [vmem:[%s9759_s23 + $0xb8] sm:$0xff]  ;;  %v2458_v5 = vld [vmem:[%s9759_s23 + $0xc0] sm:$0xff]  ;;  %2707 = vst [vmem:[%s9759_s23 + $0x88] sm:$0xff] %v2579_v39  ;;  %2708 = vst [vmem:[%s9759_s23 + $0x90] sm:$0xff] %v2580_v35 }
 0x317   : > { %v15606_v53 = vld [vmem:[#allocation46_spill] sm:$0xff]  ;;  %v15607_v15 = vld [vmem:[#allocation51_spill] sm:$0xff]  ;;  %v15608_v60 = vld [vmem:[#allocation52_spill] sm:$0xff]  ;;  %2710 = vst [vmem:[%s9759_s23 + $0xa0] sm:$0xff] %v2582_v7 }
 0x318   : > { %v2584_v2 = vadd.f32 %v2456_v49, %v15606_v53  ;;  %v2585_v48 = vadd.f32 %v2457_v46, %v15607_v15  ;;  %v2586_v61 = vadd.f32 %v2458_v5, %v15608_v60  ;;  %v2459_v44 = vld [vmem:[%s9759_s23 + $0xc8] sm:$0xff]  ;;  %v2460_v59 = vld [vmem:[%s9759_s23 + $0xd0] sm:$0xff]  ;;  %v2461_v14 = vld [vmem:[%s9759_s23 + $0xd8] sm:$0xff]  ;;  %2709 = vst [vmem:[%s9759_s23 + $0x98] sm:$0xff] %v2581_v57 }
 0x319   : > { %2711 = vst [vmem:[%s9759_s23 + $0xa8] sm:$0xff] %v2583_v4  ;;  %v15609_v58 = vld [vmem:[#allocation53_spill] sm:$0xff]  ;;  %v15610_v35 = vld [vmem:[#allocation54_spill] sm:$0xff]  ;;  %v15611_v53 = vld [vmem:[#allocation59_spill] sm:$0xff] }
 0x31a   : > { %v2587_v39 = vadd.f32 %v2459_v44, %v15609_v58  ;;  %v2588_v49 = vadd.f32 %v2460_v59, %v15610_v35  ;;  %v2589_v46 = vadd.f32 %v2461_v14, %v15611_v53  ;;  %v2462_v15 = vld [vmem:[%s9759_s23 + $0xe0] sm:$0xff]  ;;  %v2463_v5 = vld [vmem:[%s9759_s23 + $0xe8] sm:$0xff]  ;;  %v2464_v60 = vld [vmem:[%s9759_s23 + $0xf0] sm:$0xff]  ;;  %2712 = vst [vmem:[%s9759_s23 + $0xb0] sm:$0xff] %v2584_v2 }
 0x31b   : > { %2713 = vst [vmem:[%s9759_s23 + $0xb8] sm:$0xff] %v2585_v48  ;;  %2714 = vst [vmem:[%s9759_s23 + $0xc0] sm:$0xff] %v2586_v61  ;;  %v15612_v57 = vld [vmem:[#allocation60_spill] sm:$0xff]  ;;  %v15613_v4 = vld [vmem:[#allocation61_spill] sm:$0xff] }
 0x31c   : > { %v2590_v7 = vadd.f32 %v2462_v15, %v15612_v57  ;;  %v2591_v44 = vadd.f32 %v2463_v5, %v15613_v4  ;;  %v15614_v58 = vld [vmem:[#allocation62_spill] sm:$0xff]  ;;  %v2465_v35 = vld [vmem:[%s9759_s23 + $0xf8] sm:$0xff]  ;;  %v2466_v14 = vld [vmem:[%s9759_s23 + $0x100] sm:$0xff]  ;;  %2715 = vst [vmem:[%s9759_s23 + $0xc8] sm:$0xff] %v2587_v39 }
 0x31d   : > { %v2592_v59 = vadd.f32 %v2464_v60, %v15614_v58  ;;  %v2467_v53 = vld [vmem:[%s9759_s23 + $0x108] sm:$0xff]  ;;  %2716 = vst [vmem:[%s9759_s23 + $0xd0] sm:$0xff] %v2588_v49  ;;  %2717 = vst [vmem:[%s9759_s23 + $0xd8] sm:$0xff] %v2589_v46  ;;  %v15615_v2 = vld [vmem:[#allocation67_spill] sm:$0xff] }
 0x31e   : > { %v2593_v48 = vadd.f32 %v2465_v35, %v15615_v2  ;;  %v15616_v61 = vld [vmem:[#allocation68_spill] sm:$0xff]  ;;  %v15617_v57 = vld [vmem:[#allocation69_spill] sm:$0xff]  ;;  %v2468_v4 = vld [vmem:[%s9759_s23 + $0x110] sm:$0xff]  ;;  %2718 = vst [vmem:[%s9759_s23 + $0xe0] sm:$0xff] %v2590_v7 }
 0x31f   : > { %v2594_v15 = vadd.f32 %v2466_v14, %v15616_v61  ;;  %v2595_v5 = vadd.f32 %v2467_v53, %v15617_v57  ;;  %v2469_v60 = vld [vmem:[%s9759_s23 + $0x118] sm:$0xff]  ;;  %v2470_v58 = vld [vmem:[%s9759_s23 + $0x120] sm:$0xff]  ;;  %2719 = vst [vmem:[%s9759_s23 + $0xe8] sm:$0xff] %v2591_v44  ;;  %2720 = vst [vmem:[%s9759_s23 + $0xf0] sm:$0xff] %v2592_v59 }
 0x320   : > { %v15618_v39 = vld [vmem:[#allocation70_spill] sm:$0xff]  ;;  %v15619_v46 = vld [vmem:[#allocation75_spill] sm:$0xff]  ;;  %v15620_v2 = vld [vmem:[#allocation76_spill] sm:$0xff]  ;;  %2721 = vst [vmem:[%s9759_s23 + $0xf8] sm:$0xff] %v2593_v48 }
 0x321   : > { %v2596_v49 = vadd.f32 %v2468_v4, %v15618_v39  ;;  %v2597_v35 = vadd.f32 %v2469_v60, %v15619_v46  ;;  %v2598_v14 = vadd.f32 %v2470_v58, %v15620_v2  ;;  %v2471_v61 = vld [vmem:[%s9759_s23 + $0x128] sm:$0xff]  ;;  %v2472_v53 = vld [vmem:[%s9759_s23 + $0x130] sm:$0xff]  ;;  %v2473_v57 = vld [vmem:[%s9759_s23 + $0x138] sm:$0xff]  ;;  %2722 = vst [vmem:[%s9759_s23 + $0x100] sm:$0xff] %v2594_v15 }
 0x322   : > { %2723 = vst [vmem:[%s9759_s23 + $0x108] sm:$0xff] %v2595_v5  ;;  %v15621_v7 = vld [vmem:[#allocation77_spill] sm:$0xff]  ;;  %v15622_v59 = vld [vmem:[#allocation78_spill] sm:$0xff]  ;;  %v15623_v39 = vld [vmem:[#allocation83_spill] sm:$0xff] }
 0x323   : > { %v2599_v44 = vadd.f32 %v2471_v61, %v15621_v7  ;;  %v2600_v4 = vadd.f32 %v2472_v53, %v15622_v59  ;;  %v2601_v60 = vadd.f32 %v2473_v57, %v15623_v39  ;;  %v2474_v46 = vld [vmem:[%s9759_s23 + $0x140] sm:$0xff]  ;;  %v2475_v58 = vld [vmem:[%s9759_s23 + $0x148] sm:$0xff]  ;;  %v2476_v2 = vld [vmem:[%s9759_s23 + $0x150] sm:$0xff]  ;;  %2724 = vst [vmem:[%s9759_s23 + $0x110] sm:$0xff] %v2596_v49 }
 0x324   : > { %2725 = vst [vmem:[%s9759_s23 + $0x118] sm:$0xff] %v2597_v35  ;;  %2726 = vst [vmem:[%s9759_s23 + $0x120] sm:$0xff] %v2598_v14  ;;  %v15624_v48 = vld [vmem:[#allocation84_spill] sm:$0xff]  ;;  %v15625_v5 = vld [vmem:[#allocation85_spill] sm:$0xff] }
 0x325   : > { %v2602_v15 = vadd.f32 %v2474_v46, %v15624_v48  ;;  %v2603_v61 = vadd.f32 %v2475_v58, %v15625_v5  ;;  %v15626_v7 = vld [vmem:[#allocation86_spill] sm:$0xff]  ;;  %v2477_v59 = vld [vmem:[%s9759_s23 + $0x158] sm:$0xff]  ;;  %v2478_v57 = vld [vmem:[%s9759_s23 + $0x160] sm:$0xff]  ;;  %2727 = vst [vmem:[%s9759_s23 + $0x128] sm:$0xff] %v2599_v44 }
 0x326   : > { %v2604_v53 = vadd.f32 %v2476_v2, %v15626_v7  ;;  %v2479_v39 = vld [vmem:[%s9759_s23 + $0x168] sm:$0xff]  ;;  %2728 = vst [vmem:[%s9759_s23 + $0x130] sm:$0xff] %v2600_v4  ;;  %2729 = vst [vmem:[%s9759_s23 + $0x138] sm:$0xff] %v2601_v60  ;;  %v15627_v49 = vld [vmem:[#allocation91_spill] sm:$0xff] }
 0x327   : > { %v2605_v35 = vadd.f32 %v2477_v59, %v15627_v49  ;;  %v15628_v14 = vld [vmem:[#allocation92_spill] sm:$0xff]  ;;  %v15629_v48 = vld [vmem:[#allocation93_spill] sm:$0xff]  ;;  %v2480_v5 = vld [vmem:[%s9759_s23 + $0x170] sm:$0xff]  ;;  %2730 = vst [vmem:[%s9759_s23 + $0x140] sm:$0xff] %v2602_v15 }
 0x328   : > { %v2606_v46 = vadd.f32 %v2478_v57, %v15628_v14  ;;  %v2607_v58 = vadd.f32 %v2479_v39, %v15629_v48  ;;  %v2481_v2 = vld [vmem:[%s9759_s23 + $0x178] sm:$0xff]  ;;  %v2482_v7 = vld [vmem:[%s9759_s23 + $0x180] sm:$0xff]  ;;  %2731 = vst [vmem:[%s9759_s23 + $0x148] sm:$0xff] %v2603_v61  ;;  %2732 = vst [vmem:[%s9759_s23 + $0x150] sm:$0xff] %v2604_v53 }
 0x329   : > { %v15630_v44 = vld [vmem:[#allocation94_spill] sm:$0xff]  ;;  %v15631_v60 = vld [vmem:[#allocation99_spill] sm:$0xff]  ;;  %v15632_v49 = vld [vmem:[#allocation100_spill] sm:$0xff]  ;;  %2733 = vst [vmem:[%s9759_s23 + $0x158] sm:$0xff] %v2605_v35 }
 0x32a   : > { %v2608_v4 = vadd.f32 %v2480_v5, %v15630_v44  ;;  %v2609_v59 = vadd.f32 %v2481_v2, %v15631_v60  ;;  %v2610_v57 = vadd.f32 %v2482_v7, %v15632_v49  ;;  %v2483_v14 = vld [vmem:[%s9759_s23 + $0x188] sm:$0xff]  ;;  %v2484_v39 = vld [vmem:[%s9759_s23 + $0x190] sm:$0xff]  ;;  %v2485_v48 = vld [vmem:[%s9759_s23 + $0x198] sm:$0xff]  ;;  %2734 = vst [vmem:[%s9759_s23 + $0x160] sm:$0xff] %v2606_v46 }
 0x32b   : > { %2735 = vst [vmem:[%s9759_s23 + $0x168] sm:$0xff] %v2607_v58  ;;  %v15633_v15 = vld [vmem:[#allocation101_spill] sm:$0xff]  ;;  %v15634_v53 = vld [vmem:[#allocation102_spill] sm:$0xff]  ;;  %v15635_v44 = vld [vmem:[#allocation107_spill] sm:$0xff] }
 0x32c   : > { %v2611_v61 = vadd.f32 %v2483_v14, %v15633_v15  ;;  %v2612_v5 = vadd.f32 %v2484_v39, %v15634_v53  ;;  %v2613_v2 = vadd.f32 %v2485_v48, %v15635_v44  ;;  %v2486_v60 = vld [vmem:[%s9759_s23 + $0x1a0] sm:$0xff]  ;;  %v2487_v7 = vld [vmem:[%s9759_s23 + $0x1a8] sm:$0xff]  ;;  %v2488_v49 = vld [vmem:[%s9759_s23 + $0x1b0] sm:$0xff]  ;;  %2736 = vst [vmem:[%s9759_s23 + $0x170] sm:$0xff] %v2608_v4 }
 0x32d   : > { %2737 = vst [vmem:[%s9759_s23 + $0x178] sm:$0xff] %v2609_v59  ;;  %2738 = vst [vmem:[%s9759_s23 + $0x180] sm:$0xff] %v2610_v57  ;;  %v15636_v35 = vld [vmem:[#allocation108_spill] sm:$0xff]  ;;  %v15637_v58 = vld [vmem:[#allocation109_spill] sm:$0xff] }
 0x32e   : > { %v2614_v46 = vadd.f32 %v2486_v60, %v15636_v35  ;;  %v2615_v14 = vadd.f32 %v2487_v7, %v15637_v58  ;;  %v15638_v15 = vld [vmem:[#allocation110_spill] sm:$0xff]  ;;  %v2489_v53 = vld [vmem:[%s9759_s23 + $0x1b8] sm:$0xff]  ;;  %v2490_v48 = vld [vmem:[%s9759_s23 + $0x1c0] sm:$0xff]  ;;  %2739 = vst [vmem:[%s9759_s23 + $0x188] sm:$0xff] %v2611_v61 }
 0x32f   : > { %v2616_v39 = vadd.f32 %v2488_v49, %v15638_v15  ;;  %v2491_v44 = vld [vmem:[%s9759_s23 + $0x1c8] sm:$0xff]  ;;  %2740 = vst [vmem:[%s9759_s23 + $0x190] sm:$0xff] %v2612_v5  ;;  %2741 = vst [vmem:[%s9759_s23 + $0x198] sm:$0xff] %v2613_v2  ;;  %v15639_v4 = vld [vmem:[#allocation114_spill] sm:$0xff] }
 0x330   : > { %v2617_v59 = vadd.f32 %v2489_v53, %v15639_v4  ;;  %v15640_v57 = vld [vmem:[#allocation115_spill] sm:$0xff]  ;;  %v15641_v35 = vld [vmem:[#allocation116_spill] sm:$0xff]  ;;  %v2492_v58 = vld [vmem:[%s9759_s23 + $0x1d0] sm:$0xff]  ;;  %2742 = vst [vmem:[%s9759_s23 + $0x1a0] sm:$0xff] %v2614_v46 }
 0x331   : > { %v2618_v60 = vadd.f32 %v2490_v48, %v15640_v57  ;;  %v2619_v7 = vadd.f32 %v2491_v44, %v15641_v35  ;;  %v2493_v49 = vld [vmem:[%s9759_s23 + $0x1d8] sm:$0xff]  ;;  %v2494_v15 = vld [vmem:[%s9759_s23 + $0x1e0] sm:$0xff]  ;;  %2743 = vst [vmem:[%s9759_s23 + $0x1a8] sm:$0xff] %v2615_v14  ;;  %2744 = vst [vmem:[%s9759_s23 + $0x1b0] sm:$0xff] %v2616_v39 }
 0x332   : > { %v15642_v61 = vld [vmem:[#allocation117_spill] sm:$0xff]  ;;  %v15644_v4 = vld [vmem:[#allocation122_spill] sm:$0xff]  ;;  %v2497_v35 = vld [vmem:[%s9759_s23 + $0x1f8] sm:$0xff]  ;;  %2745 = vst [vmem:[%s9759_s23 + $0x1b8] sm:$0xff] %v2617_v59 }
 0x333   : > { %v2620_v5 = vadd.f32 %v2492_v58, %v15642_v61  ;;  %v15643_v2 = vld [vmem:[#allocation121_spill] sm:$0xff]  ;;  %v2622_v48 = vadd.f32 %v2494_v15, %v15644_v4  ;;  %v2496_v44 = vld [vmem:[%s9759_s23 + $0x1f0] sm:$0xff]  ;;  %2746 = vst [vmem:[%s9759_s23 + $0x1c0] sm:$0xff] %v2618_v60  ;;  %2747 = vst [vmem:[%s9759_s23 + $0x1c8] sm:$0xff] %v2619_v7 }
 0x334   : > { %v2621_v53 = vadd.f32 %v2493_v49, %v15643_v2  ;;  %v2495_v57 = vld [vmem:[%s9759_s23 + $0x1e8] sm:$0xff]  ;;  %v15645_v46 = vld [vmem:[#allocation123_spill] sm:$0xff]  ;;  %v15646_v39 = vld [vmem:[#allocation124_spill] sm:$0xff] }
 0x335   : > { %v2623_v14 = vadd.f32 %v2495_v57, %v15645_v46  ;;  %v2624_v58 = vadd.f32 %v2496_v44, %v15646_v39  ;;  %v15647_v61 = vld [vmem:[#allocation128_spill] sm:$0xff]  ;;  %v2499_v15 = vld [vmem:[%s9759_s23 + $0x208] sm:$0xff]  ;;  %v2500_v4 = vld [vmem:[%s9759_s23 + $0x210] sm:$0xff]  ;;  %2748 = vst [vmem:[%s9759_s23 + $0x1d0] sm:$0xff] %v2620_v5 }
 0x336   : > { %v2625_v49 = vadd.f32 %v2497_v35, %v15647_v61  ;;  %v2498_v2 = vld [vmem:[%s9759_s23 + $0x200] sm:$0xff]  ;;  %2749 = vst [vmem:[%s9759_s23 + $0x1d8] sm:$0xff] %v2621_v53  ;;  %2750 = vst [vmem:[%s9759_s23 + $0x1e0] sm:$0xff] %v2622_v48  ;;  %v15648_v59 = vld [vmem:[#allocation129_spill] sm:$0xff] }
 0x337   : > { %v2626_v60 = vadd.f32 %v2498_v2, %v15648_v59  ;;  %v15649_v7 = vld [vmem:[#allocation130_spill] sm:$0xff]  ;;  %v15650_v46 = vld [vmem:[#allocation131_spill] sm:$0xff]  ;;  %v2502_v35 = vld [vmem:[%s9759_s23 + $0x220] sm:$0xff]  ;;  %2751 = vst [vmem:[%s9759_s23 + $0x1e8] sm:$0xff] %v2623_v14 }
 0x338   : > { %v2627_v57 = vadd.f32 %v2499_v15, %v15649_v7  ;;  %v2628_v44 = vadd.f32 %v2500_v4, %v15650_v46  ;;  %v2501_v39 = vld [vmem:[%s9759_s23 + $0x218] sm:$0xff]  ;;  %v2503_v61 = vld [vmem:[%s9759_s23 + $0x228] sm:$0xff]  ;;  %2752 = vst [vmem:[%s9759_s23 + $0x1f0] sm:$0xff] %v2624_v58  ;;  %2753 = vst [vmem:[%s9759_s23 + $0x1f8] sm:$0xff] %v2625_v49 }
 0x339   : > { %v15651_v5 = vld [vmem:[#allocation135_spill] sm:$0xff]  ;;  %v15652_v48 = vld [vmem:[#allocation136_spill] sm:$0xff]  ;;  %v15653_v59 = vld [vmem:[#allocation137_spill] sm:$0xff]  ;;  %2754 = vst [vmem:[%s9759_s23 + $0x200] sm:$0xff] %v2626_v60 }
 0x33a   : > { %v2629_v53 = vadd.f32 %v2501_v39, %v15651_v5  ;;  %v2630_v2 = vadd.f32 %v2502_v35, %v15652_v48  ;;  %v2631_v15 = vadd.f32 %v2503_v61, %v15653_v59  ;;  %v2504_v7 = vld [vmem:[%s9759_s23 + $0x230] sm:$0xff]  ;;  %v2505_v4 = vld [vmem:[%s9759_s23 + $0x238] sm:$0xff]  ;;  %v2506_v46 = vld [vmem:[%s9759_s23 + $0x240] sm:$0xff]  ;;  %2755 = vst [vmem:[%s9759_s23 + $0x208] sm:$0xff] %v2627_v57 }
 0x33b   : > { %2756 = vst [vmem:[%s9759_s23 + $0x210] sm:$0xff] %v2628_v44  ;;  %v15654_v14 = vld [vmem:[#allocation138_spill] sm:$0xff]  ;;  %v15655_v49 = vld [vmem:[#allocation141_spill] sm:$0xff]  ;;  %v2509_v59 = vld [vmem:[%s9759_s23 + $0x258] sm:$0xff] }
 0x33c   : > { %v2632_v58 = vadd.f32 %v2504_v7, %v15654_v14  ;;  %v2633_v39 = vadd.f32 %v2505_v4, %v15655_v49  ;;  %v15656_v5 = vld [vmem:[#allocation142_spill] sm:$0xff]  ;;  %v2507_v48 = vld [vmem:[%s9759_s23 + $0x248] sm:$0xff]  ;;  %2757 = vst [vmem:[%s9759_s23 + $0x218] sm:$0xff] %v2629_v53  ;;  %2758 = vst [vmem:[%s9759_s23 + $0x220] sm:$0xff] %v2630_v2 }
 0x33d   : > { %v2634_v35 = vadd.f32 %v2506_v46, %v15656_v5  ;;  %v2508_v61 = vld [vmem:[%s9759_s23 + $0x250] sm:$0xff]  ;;  %2759 = vst [vmem:[%s9759_s23 + $0x228] sm:$0xff] %v2631_v15  ;;  %v15657_v60 = vld [vmem:[#allocation143_spill] sm:$0xff]  ;;  %v15658_v44 = vld [vmem:[#allocation144_spill] sm:$0xff] }
 0x33e   : > { %v2635_v57 = vadd.f32 %v2507_v48, %v15657_v60  ;;  %v2636_v7 = vadd.f32 %v2508_v61, %v15658_v44  ;;  %v15659_v14 = vld [vmem:[#allocation146_spill] sm:$0xff]  ;;  %v2510_v49 = vld [vmem:[%s9759_s23 + $0x260] sm:$0xff]  ;;  %v2511_v46 = vld [vmem:[%s9759_s23 + $0x268] sm:$0xff]  ;;  %2760 = vst [vmem:[%s9759_s23 + $0x230] sm:$0xff] %v2632_v58 }
 0x33f   : > { %v2637_v4 = vadd.f32 %v2509_v59, %v15659_v14  ;;  %v2512_v5 = vld [vmem:[%s9759_s23 + $0x270] sm:$0xff]  ;;  %2761 = vst [vmem:[%s9759_s23 + $0x238] sm:$0xff] %v2633_v39  ;;  %2762 = vst [vmem:[%s9759_s23 + $0x240] sm:$0xff] %v2634_v35  ;;  %v15660_v53 = vld [vmem:[#allocation147_spill] sm:$0xff] }
 0x340   : > { %v2638_v2 = vadd.f32 %v2510_v49, %v15660_v53  ;;  %v15661_v15 = vld [vmem:[#allocation148_spill] sm:$0xff]  ;;  %v15662_v60 = vld [vmem:[#allocation149_spill] sm:$0xff]  ;;  %v2513_v44 = vld [vmem:[%s9759_s23 + $0x278] sm:$0xff]  ;;  %2763 = vst [vmem:[%s9759_s23 + $0x248] sm:$0xff] %v2635_v57 }
 0x341   : > { %v2639_v48 = vadd.f32 %v2511_v46, %v15661_v15  ;;  %v2640_v61 = vadd.f32 %v2512_v5, %v15662_v60  ;;  %v2514_v59 = vld [vmem:[%s9759_s23 + $0x280] sm:$0xff]  ;;  %v2515_v14 = vld [vmem:[%s9759_s23 + $0x288] sm:$0xff]  ;;  %2764 = vst [vmem:[%s9759_s23 + $0x250] sm:$0xff] %v2636_v7  ;;  %2765 = vst [vmem:[%s9759_s23 + $0x258] sm:$0xff] %v2637_v4 }
 0x342   : > { %v15663_v58 = vld [vmem:[#allocation152_spill] sm:$0xff]  ;;  %v15664_v35 = vld [vmem:[#allocation153_spill] sm:$0xff]  ;;  %v15665_v53 = vld [vmem:[#allocation154_spill] sm:$0xff]  ;;  %2766 = vst [vmem:[%s9759_s23 + $0x260] sm:$0xff] %v2638_v2 }
 0x343   : > { %v2641_v39 = vadd.f32 %v2513_v44, %v15663_v58  ;;  %v2642_v49 = vadd.f32 %v2514_v59, %v15664_v35  ;;  %v2643_v46 = vadd.f32 %v2515_v14, %v15665_v53  ;;  %v2516_v15 = vld [vmem:[%s9759_s23 + $0x290] sm:$0xff]  ;;  %v2517_v5 = vld [vmem:[%s9759_s23 + $0x298] sm:$0xff]  ;;  %v2518_v60 = vld [vmem:[%s9759_s23 + $0x2a0] sm:$0xff]  ;;  %2767 = vst [vmem:[%s9759_s23 + $0x268] sm:$0xff] %v2639_v48 }
 0x344   : > { %2768 = vst [vmem:[%s9759_s23 + $0x270] sm:$0xff] %v2640_v61  ;;  %v15666_v57 = vld [vmem:[#allocation155_spill] sm:$0xff]  ;;  %v15667_v4 = vld [vmem:[#allocation157_spill] sm:$0xff]  ;;  %v15668_v58 = vld [vmem:[#allocation158_spill] sm:$0xff] }
 0x345   : > { %v2644_v7 = vadd.f32 %v2516_v15, %v15666_v57  ;;  %v2645_v44 = vadd.f32 %v2517_v5, %v15667_v4  ;;  %v2646_v59 = vadd.f32 %v2518_v60, %v15668_v58  ;;  %v2519_v35 = vld [vmem:[%s9759_s23 + $0x2a8] sm:$0xff]  ;;  %v2520_v14 = vld [vmem:[%s9759_s23 + $0x2b0] sm:$0xff]  ;;  %v2521_v53 = vld [vmem:[%s9759_s23 + $0x2b8] sm:$0xff]  ;;  %2769 = vst [vmem:[%s9759_s23 + $0x278] sm:$0xff] %v2641_v39 }
 0x346   : > { %2770 = vst [vmem:[%s9759_s23 + $0x280] sm:$0xff] %v2642_v49  ;;  %2771 = vst [vmem:[%s9759_s23 + $0x288] sm:$0xff] %v2643_v46  ;;  %v15669_v2 = vld [vmem:[#allocation159_spill] sm:$0xff]  ;;  %v15670_v61 = vld [vmem:[#allocation160_spill] sm:$0xff] }
 0x347   : > { %v2647_v48 = vadd.f32 %v2519_v35, %v15669_v2  ;;  %v2648_v15 = vadd.f32 %v2520_v14, %v15670_v61  ;;  %v15671_v57 = vld [vmem:[#allocation165_spill] sm:$0xff]  ;;  %v2522_v4 = vld [vmem:[%s9759_s23 + $0x2c0] sm:$0xff]  ;;  %v2524_v58 = vld [vmem:[%s9759_s23 + $0x2d0] sm:$0xff]  ;;  %2772 = vst [vmem:[%s9759_s23 + $0x290] sm:$0xff] %v2644_v7 }
 0x348   : > { %v2649_v5 = vadd.f32 %v2521_v53, %v15671_v57  ;;  %v2523_v60 = vld [vmem:[%s9759_s23 + $0x2c8] sm:$0xff]  ;;  %2773 = vst [vmem:[%s9759_s23 + $0x298] sm:$0xff] %v2645_v44  ;;  %2774 = vst [vmem:[%s9759_s23 + $0x2a0] sm:$0xff] %v2646_v59  ;;  %v15672_v39 = vld [vmem:[#allocation166_spill] sm:$0xff] }
 0x349   : > { %v2650_v49 = vadd.f32 %v2522_v4, %v15672_v39  ;;  %v15673_v46 = vld [vmem:[#allocation167_spill] sm:$0xff]  ;;  %v15674_v2 = vld [vmem:[#allocation168_spill] sm:$0xff]  ;;  %v2527_v57 = vld [vmem:[%s9759_s23 + $0x2e8] sm:$0xff]  ;;  %2775 = vst [vmem:[%s9759_s23 + $0x2a8] sm:$0xff] %v2647_v48 }
 0x34a   : > { %v2651_v35 = vadd.f32 %v2523_v60, %v15673_v46  ;;  %v2652_v14 = vadd.f32 %v2524_v58, %v15674_v2  ;;  %v2525_v61 = vld [vmem:[%s9759_s23 + $0x2d8] sm:$0xff]  ;;  %v2526_v53 = vld [vmem:[%s9759_s23 + $0x2e0] sm:$0xff]  ;;  %2776 = vst [vmem:[%s9759_s23 + $0x2b0] sm:$0xff] %v2648_v15  ;;  %2777 = vst [vmem:[%s9759_s23 + $0x2b8] sm:$0xff] %v2649_v5 }
 0x34b   : > { %v15675_v7 = vld [vmem:[#allocation173_spill] sm:$0xff]  ;;  %v15676_v59 = vld [vmem:[#allocation174_spill] sm:$0xff]  ;;  %v15677_v39 = vld [vmem:[#allocation175_spill] sm:$0xff]  ;;  %2778 = vst [vmem:[%s9759_s23 + $0x2c0] sm:$0xff] %v2650_v49 }
 0x34c   : > { %v2653_v44 = vadd.f32 %v2525_v61, %v15675_v7  ;;  %v2654_v4 = vadd.f32 %v2526_v53, %v15676_v59  ;;  %v2655_v60 = vadd.f32 %v2527_v57, %v15677_v39  ;;  %v2528_v46 = vld [vmem:[%s9759_s23 + $0x2f0] sm:$0xff]  ;;  %v2529_v58 = vld [vmem:[%s9759_s23 + $0x2f8] sm:$0xff]  ;;  %v2530_v2 = vld [vmem:[%s9759_s23 + $0x300] sm:$0xff]  ;;  %2779 = vst [vmem:[%s9759_s23 + $0x2c8] sm:$0xff] %v2651_v35 }
 0x34d   : > { %2780 = vst [vmem:[%s9759_s23 + $0x2d0] sm:$0xff] %v2652_v14  ;;  %v15678_v48 = vld [vmem:[#allocation176_spill] sm:$0xff]  ;;  %v15679_v5 = vld [vmem:[#allocation182_spill] sm:$0xff]  ;;  %v15680_v7 = vld [vmem:[#allocation183_spill] sm:$0xff] }
 0x34e   : > { %v2656_v15 = vadd.f32 %v2528_v46, %v15678_v48  ;;  %v2657_v61 = vadd.f32 %v2529_v58, %v15679_v5  ;;  %v2658_v53 = vadd.f32 %v2530_v2, %v15680_v7  ;;  %v2531_v59 = vld [vmem:[%s9759_s23 + $0x308] sm:$0xff]  ;;  %v2532_v57 = vld [vmem:[%s9759_s23 + $0x310] sm:$0xff]  ;;  %v2533_v39 = vld [vmem:[%s9759_s23 + $0x318] sm:$0xff]  ;;  %2781 = vst [vmem:[%s9759_s23 + $0x2d8] sm:$0xff] %v2653_v44 }
 0x34f   : > { %2782 = vst [vmem:[%s9759_s23 + $0x2e0] sm:$0xff] %v2654_v4  ;;  %2783 = vst [vmem:[%s9759_s23 + $0x2e8] sm:$0xff] %v2655_v60  ;;  %v15681_v49 = vld [vmem:[#allocation184_spill] sm:$0xff]  ;;  %v15682_v14 = vld [vmem:[#allocation185_spill] sm:$0xff] }
 0x350   : > { %v2659_v35 = vadd.f32 %v2531_v59, %v15681_v49  ;;  %v2660_v46 = vadd.f32 %v2532_v57, %v15682_v14  ;;  %v15683_v48 = vld [vmem:[#allocation191_spill] sm:$0xff]  ;;  %v2534_v5 = vld [vmem:[%s9759_s23 + $0x320] sm:$0xff]  ;;  %v2535_v2 = vld [vmem:[%s9759_s23 + $0x328] sm:$0xff]  ;;  %2784 = vst [vmem:[%s9759_s23 + $0x2f0] sm:$0xff] %v2656_v15 }
 0x351   : > { %v2661_v58 = vadd.f32 %v2533_v39, %v15683_v48  ;;  %v2536_v7 = vld [vmem:[%s9759_s23 + $0x330] sm:$0xff]  ;;  %2785 = vst [vmem:[%s9759_s23 + $0x2f8] sm:$0xff] %v2657_v61  ;;  %2786 = vst [vmem:[%s9759_s23 + $0x300] sm:$0xff] %v2658_v53  ;;  %v15684_v44 = vld [vmem:[#allocation192_spill] sm:$0xff] }
 0x352   : > { %v2662_v4 = vadd.f32 %v2534_v5, %v15684_v44  ;;  %v15685_v60 = vld [vmem:[#allocation193_spill] sm:$0xff]  ;;  %v15686_v49 = vld [vmem:[#allocation194_spill] sm:$0xff]  ;;  %v2537_v14 = vld [vmem:[%s9759_s23 + $0x338] sm:$0xff]  ;;  %2787 = vst [vmem:[%s9759_s23 + $0x308] sm:$0xff] %v2659_v35 }
 0x353   : > { %v2663_v59 = vadd.f32 %v2535_v2, %v15685_v60  ;;  %v2664_v57 = vadd.f32 %v2536_v7, %v15686_v49  ;;  %v2538_v39 = vld [vmem:[%s9759_s23 + $0x340] sm:$0xff]  ;;  %v2539_v48 = vld [vmem:[%s9759_s23 + $0x348] sm:$0xff]  ;;  %2788 = vst [vmem:[%s9759_s23 + $0x310] sm:$0xff] %v2660_v46  ;;  %2789 = vst [vmem:[%s9759_s23 + $0x318] sm:$0xff] %v2661_v58 }
 0x354   : > { %v15687_v15 = vld [vmem:[#allocation200_spill] sm:$0xff]  ;;  %v15688_v53 = vld [vmem:[#allocation201_spill] sm:$0xff]  ;;  %v15689_v44 = vld [vmem:[#allocation202_spill] sm:$0xff]  ;;  %2790 = vst [vmem:[%s9759_s23 + $0x320] sm:$0xff] %v2662_v4 }
 0x355   : > { %v2665_v61 = vadd.f32 %v2537_v14, %v15687_v15  ;;  %v2666_v5 = vadd.f32 %v2538_v39, %v15688_v53  ;;  %v2667_v2 = vadd.f32 %v2539_v48, %v15689_v44  ;;  %v2540_v60 = vld [vmem:[%s9759_s23 + $0x350] sm:$0xff]  ;;  %v2541_v7 = vld [vmem:[%s9759_s23 + $0x358] sm:$0xff]  ;;  %v2542_v49 = vld [vmem:[%s9759_s23 + $0x360] sm:$0xff]  ;;  %2791 = vst [vmem:[%s9759_s23 + $0x328] sm:$0xff] %v2663_v59 }
 0x356   : > { %2792 = vst [vmem:[%s9759_s23 + $0x330] sm:$0xff] %v2664_v57  ;;  %v15690_v35 = vld [vmem:[#allocation203_spill] sm:$0xff]  ;;  %v15691_v58 = vld [vmem:[#allocation209_spill] sm:$0xff]  ;;  %v15692_v15 = vld [vmem:[#allocation16_spill] sm:$0xff] }
 0x357   : > { %v2668_v46 = vadd.f32 %v2540_v60, %v15690_v35  ;;  %v2669_v14 = vadd.f32 %v2541_v7, %v15691_v58  ;;  %v2670_v39 = vadd.f32 %v2542_v49, %v15692_v15  ;;  %v2543_v53 = vld [vmem:[%s9759_s23 + $0x368] sm:$0xff]  ;;  %v2544_v48 = vld [vmem:[%s9759_s23 + $0x370] sm:$0xff]  ;;  %v2545_v44 = vld [vmem:[%s9759_s23 + $0x378] sm:$0xff]  ;;  %2793 = vst [vmem:[%s9759_s23 + $0x338] sm:$0xff] %v2665_v61 }
 0x358   : > { %2794 = vst [vmem:[%s9759_s23 + $0x340] sm:$0xff] %v2666_v5  ;;  %2795 = vst [vmem:[%s9759_s23 + $0x348] sm:$0xff] %v2667_v2  ;;  %v15693_v4 = vld [vmem:[#allocation210_spill] sm:$0xff]  ;;  %v15694_v57 = vld [vmem:[#allocation211_spill] sm:$0xff] }
 0x359   : > { %v2671_v59 = vadd.f32 %v2543_v53, %v15693_v4  ;;  %v2672_v60 = vadd.f32 %v2544_v48, %v15694_v57  ;;  %v15695_v35 = vld [vmem:[#allocation217_spill] sm:$0xff]  ;;  %v2546_v58 = vld [vmem:[%s9759_s23 + $0x380] sm:$0xff]  ;;  %v2548_v15 = vld [vmem:[%s9759_s23 + $0x390] sm:$0xff]  ;;  %2796 = vst [vmem:[%s9759_s23 + $0x350] sm:$0xff] %v2668_v46 }
 0x35a   : > { %v2673_v7 = vadd.f32 %v2545_v44, %v15695_v35  ;;  %v2547_v49 = vld [vmem:[%s9759_s23 + $0x388] sm:$0xff]  ;;  %2797 = vst [vmem:[%s9759_s23 + $0x358] sm:$0xff] %v2669_v14  ;;  %2798 = vst [vmem:[%s9759_s23 + $0x360] sm:$0xff] %v2670_v39  ;;  %v15697_v2 = vld [vmem:[#allocation218_spill] sm:$0xff] }
 0x35b   : > { %v15696_v61 = vld [vmem:[#allocation17_spill] sm:$0xff]  ;;  %v2675_v53 = vadd.f32 %v2547_v49, %v15697_v2  ;;  %v15698_v4 = vld [vmem:[#allocation219_spill] sm:$0xff]  ;;  %v2550_v44 = vld [vmem:[%s9759_s23 + $0x3a0] sm:$0xff]  ;;  %2799 = vst [vmem:[%s9759_s23 + $0x368] sm:$0xff] %v2671_v59 }
 0x35c   : > { %v2674_v5 = vadd.f32 %v2546_v58, %v15696_v61  ;;  %v2676_v48 = vadd.f32 %v2548_v15, %v15698_v4  ;;  %v2549_v57 = vld [vmem:[%s9759_s23 + $0x398] sm:$0xff]  ;;  %v2551_v35 = vld [vmem:[%s9759_s23 + $0x3a8] sm:$0xff]  ;;  %2800 = vst [vmem:[%s9759_s23 + $0x370] sm:$0xff] %v2672_v60  ;;  %2801 = vst [vmem:[%s9759_s23 + $0x378] sm:$0xff] %v2673_v7 }
 0x35d   : > { %v15699_v46 = vld [vmem:[#allocation225_spill] sm:$0xff]  ;;  %v15700_v39 = vld [vmem:[#allocation18_spill] sm:$0xff]  ;;  %v2553_v15 = vld [vmem:[%s9759_s23 + $0x3b8] sm:$0xff]  ;;  %2803 = vst [vmem:[%s9759_s23 + $0x388] sm:$0xff] %v2675_v53 }
 0x35e   : > { %v2677_v14 = vadd.f32 %v2549_v57, %v15699_v46  ;;  %v2678_v58 = vadd.f32 %v2550_v44, %v15700_v39  ;;  %v15701_v61 = vld [vmem:[#allocation226_spill] sm:$0xff]  ;;  %v2554_v4 = vld [vmem:[%s9759_s23 + $0x3c0] sm:$0xff]  ;;  %2802 = vst [vmem:[%s9759_s23 + $0x380] sm:$0xff] %v2674_v5  ;;  %2804 = vst [vmem:[%s9759_s23 + $0x390] sm:$0xff] %v2676_v48 }
 0x35f   : > { %v2679_v49 = vadd.f32 %v2551_v35, %v15701_v61  ;;  %v2552_v2 = vld [vmem:[%s9759_s23 + $0x3b0] sm:$0xff]  ;;  %v15702_v59 = vld [vmem:[#allocation227_spill] sm:$0xff]  ;;  %v15703_v7 = vld [vmem:[#allocation233_spill] sm:$0xff] }
 0x360   : > { %v2680_v60 = vadd.f32 %v2552_v2, %v15702_v59  ;;  %v2681_v57 = vadd.f32 %v2553_v15, %v15703_v7  ;;  %v15704_v46 = vld [vmem:[#allocation19_spill] sm:$0xff]  ;;  %v2555_v39 = vld [vmem:[%s9759_s23 + $0x3c8] sm:$0xff]  ;;  %v2556_v35 = vld [vmem:[%s9759_s23 + $0x3d0] sm:$0xff]  ;;  %2805 = vst [vmem:[%s9759_s23 + $0x398] sm:$0xff] %v2677_v14 }
 0x361   : > { %v2682_v44 = vadd.f32 %v2554_v4, %v15704_v46  ;;  %v2557_v61 = vld [vmem:[%s9759_s23 + $0x3d8] sm:$0xff]  ;;  %2806 = vst [vmem:[%s9759_s23 + $0x3a0] sm:$0xff] %v2678_v58  ;;  %2807 = vst [vmem:[%s9759_s23 + $0x3a8] sm:$0xff] %v2679_v49  ;;  %v15705_v5 = vld [vmem:[#allocation234_spill] sm:$0xff] }
 0x362   : > { %v2683_v53 = vadd.f32 %v2555_v39, %v15705_v5  ;;  %v15706_v48 = vld [vmem:[#allocation235_spill] sm:$0xff]  ;;  %v15707_v59 = vld [vmem:[#allocation242_spill] sm:$0xff]  ;;  %v2558_v7 = vld [vmem:[%s9759_s23 + $0x3e0] sm:$0xff]  ;;  %2808 = vst [vmem:[%s9759_s23 + $0x3b0] sm:$0xff] %v2680_v60 }
 0x363   : > { %v2684_v2 = vadd.f32 %v2556_v35, %v15706_v48  ;;  %v2685_v15 = vadd.f32 %v2557_v61, %v15707_v59  ;;  %v2559_v4 = vld [vmem:[%s9759_s23 + $0x3e8] sm:$0xff]  ;;  %v2560_v46 = vld [vmem:[%s9759_s23 + $0x3f0] sm:$0xff]  ;;  %2809 = vst [vmem:[%s9759_s23 + $0x3b8] sm:$0xff] %v2681_v57  ;;  %2810 = vst [vmem:[%s9759_s23 + $0x3c0] sm:$0xff] %v2682_v44 }
 0x364   : > { %v15708_v14 = vld [vmem:[#allocation20_spill] sm:$0xff]  ;;  %v15709_v49 = vld [vmem:[#allocation243_spill] sm:$0xff]  ;;  %2811 = vst [vmem:[%s9759_s23 + $0x3c8] sm:$0xff] %v2683_v53  ;;  %v15711_v35 = vld [vmem:[#allocation249_spill] sm:$0xff] }
 0x365   : > { %v2686_v58 = vadd.f32 %v2558_v7, %v15708_v14  ;;  %v2687_v55 = vadd.f32 %v2559_v4, %v15709_v49  ;;  %v15710_v30 = vld [vmem:[#allocation244_spill] sm:$0xff]  ;;  %v2561_v5 = vld [vmem:[%s9759_s23 + $0x3f8] sm:$0xff]  ;;  %2812 = vst [vmem:[%s9759_s23 + $0x3d0] sm:$0xff] %v2684_v2  ;;  %2813 = vst [vmem:[%s9759_s23 + $0x3d8] sm:$0xff] %v2685_v15 }
 0x366   : > { %v2688_v39 = vadd.f32 %v2560_v46, %v15710_v30  ;;  %v2689_v61 = vadd.f32 %v2561_v5, %v15711_v35 }
 0x367   : > { %2814 = vst [vmem:[%s9759_s23 + $0x3e0] sm:$0xff] %v2686_v58  ;;  %2815 = vst [vmem:[%s9759_s23 + $0x3e8] sm:$0xff] %v2687_v55 }
 0x368   : > { %2816 = vst [vmem:[%s9759_s23 + $0x3f0] sm:$0xff] %v2688_v39  ;;  %2817 = vst [vmem:[%s9759_s23 + $0x3f8] sm:$0xff] %v2689_v61 }
 0x369 PF: > { %p4443_p5 = scmp.le.s32.totalorder %s6636_s15, %s6587_s6 }
 0x36b   : > { %2821 = sbr.rel (%p4443_p5) target bundleno = 1170 (0x492), region = 52 }
 0x372   : > { %v2822_v60 = vlaneseq  ;;  %v10791_v30 = vstv %s4441_s14  ;;  %v10796_v44 = vstv %s6587_s6  ;;  %v3209_v59 = vld [vmem:[%s9499_s19] sm:$0xff]  ;;  %v3210_v35 = vld [vmem:[%s9499_s19 + $0x8] sm:$0xff]  ;;  %v15722_v20 = vld [vmem:[#allocation71_spill] sm:$0xff] }
 0x373   : > { %v15715_v39 = vld [vmem:[#allocation64_spill] sm:$0xff]  ;;  %v3211_v61 = vld [vmem:[%s9499_s19 + $0x10] sm:$0xff] }
 0x374   : > { %v10793_v57 = vshrl.u32 %v2822_v60, 7  ;;  %v3212_v60 = vld [vmem:[%s9499_s19 + $0x18] sm:$0xff]  ;;  %v3215_v50 = vld [vmem:[%s9499_s19 + $0x30] sm:$0xff] }
 0x376   : > { %v10800_v55 = vadd.s32 %v10791_v30, %v10793_v57  ;;  %v2824_v53 = vadd.s32 8, %v10793_v57  ;;  %v2825_v48 = vadd.s32 16, %v10793_v57  ;;  %v2826_v2 = vadd.s32 24, %v10793_v57 }
 0x377   : > { %v2827_v15 = vadd.s32 32, %v10793_v57  ;;  %v2828_v7 = vadd.s32 40, %v10793_v57  ;;  %v2829_v4 = vadd.s32 48, %v10793_v57  ;;  %v2830_v46 = vadd.s32 56, %v10793_v57 }
 0x378   : > { %15712 = vst [vmem:[#allocation285_spill] sm:$0xff] %v10800_v55  ;;  %vm3081_vm7 = vcmp.lt.s32.totalorder %v10800_v55, %v10796_v44  ;;  %v10813_v14 = vadd.s32 %v10791_v30, %v2824_v53  ;;  %v10816_v58 = vadd.s32 %v10791_v30, %v2825_v48  ;;  %v10819_v49 = vadd.s32 %v10791_v30, %v2826_v2 }
 0x379   : > { %v3337_v5 = vsel %vm3081_vm7, %v15715_v39, 0.0  ;;  %v10829_v29 = vadd.s32 %v10791_v30, %v2827_v15  ;;  %v10832_v53 = vadd.s32 %v10791_v30, %v2828_v7  ;;  %v10835_v48 = vadd.s32 %v10791_v30, %v2829_v4  ;;  %v3213_v15 = vld [vmem:[%s9499_s19 + $0x20] sm:$0xff]  ;;  %v15720_v4 = vld [vmem:[#allocation65_spill] sm:$0xff] }
 0x37a   : > { %15713 = vst [vmem:[#allocation286_spill] sm:$0xff] %v10813_v14  ;;  %15714 = vst [vmem:[#allocation287_spill] sm:$0xff] %v10816_v58  ;;  %v3465_v2 = vadd.f32 %v3337_v5, %v3209_v59  ;;  %vm3082_vm9 = vcmp.lt.s32.totalorder %v10813_v14, %v10796_v44  ;;  %vm3083_vm10 = vcmp.lt.s32.totalorder %v10816_v58, %v10796_v44  ;;  %v15719_v39 = vld [vmem:[#allocation188_spill] sm:$0xff]  ;;  %v15721_v5 = vld [vmem:[#allocation195_spill] sm:$0xff] }
 0x37b   : > { %15716 = vst [vmem:[#allocation288_spill] sm:$0xff] %v10829_v29  ;;  %15717 = vst [vmem:[#allocation289_spill] sm:$0xff] %v10832_v53  ;;  %vm3084_vm2 = vcmp.lt.s32.totalorder %v10819_v49, %v10796_v44  ;;  %v3338_v7 = vsel %vm3082_vm9, %v15719_v39, 0.0  ;;  %v3339_v59 = vsel %vm3083_vm10, %v15720_v4, 0.0  ;;  %vm3085_vm13 = vcmp.lt.s32.totalorder %v10829_v29, %v10796_v44  ;;  %v3214_v58 = vld [vmem:[%s9499_s19 + $0x28] sm:$0xff] }
 0x37c   : > { %15718 = vst [vmem:[#allocation290_spill] sm:$0xff] %v10835_v48  ;;  %v3340_v55 = vsel %vm3084_vm2, %v15721_v5, 0.0  ;;  %3593 = vst [vmem:[%s9499_s19] sm:$0xff] %v3465_v2  ;;  %v3466_v14 = vadd.f32 %v3338_v7, %v3210_v35  ;;  %v3467_v0 = vadd.f32 %v3339_v59, %v3211_v61  ;;  %v3341_v4 = vsel %vm3085_vm13, %v15722_v20, 0.0  ;;  %v15725_v35 = vld [vmem:[#allocation73_spill] sm:$0xff]  ;;  %v15726_v59 = vld [vmem:[#allocation198_spill] sm:$0xff] }
 0x37d   : > { %v3468_v39 = vadd.f32 %v3340_v55, %v3212_v60  ;;  %v3469_v28 = vadd.f32 %v3341_v4, %v3213_v15  ;;  %vm3086_vm12 = vcmp.lt.s32.totalorder %v10832_v53, %v10796_v44  ;;  %vm3087_vm1 = vcmp.lt.s32.totalorder %v10835_v48, %v10796_v44  ;;  %v15724_v55 = vld [vmem:[#allocation196_spill] sm:$0xff]  ;;  %v3216_v60 = vld [vmem:[%s9499_s19 + $0x38] sm:$0xff]  ;;  %v3239_v53 = vld [vmem:[%s9499_s19 + $0xf0] sm:$0xff] }
 0x37e   : > { %v10870_v2 = vadd.s32 %v10791_v30, %v2830_v46  ;;  %3594 = vst [vmem:[%s9499_s19 + $0x8] sm:$0xff] %v3466_v14  ;;  %3595 = vst [vmem:[%s9499_s19 + $0x10] sm:$0xff] %v3467_v0  ;;  %v3342_v20 = vsel %vm3086_vm12, %v15724_v55, 0.0  ;;  %v3343_v61 = vsel %vm3087_vm1, %v15725_v35, 0.0  ;;  %v2831_v46 = vadd.s32 64, %v10793_v57  ;;  %v3218_v55 = vld [vmem:[%s9499_s19 + $0x48] sm:$0xff] }
 0x37f   : > { %3596 = vst [vmem:[%s9499_s19 + $0x18] sm:$0xff] %v3468_v39  ;;  %v2832_v0 = vadd.s32 72, %v10793_v57  ;;  %3597 = vst [vmem:[%s9499_s19 + $0x20] sm:$0xff] %v3469_v28  ;;  %v3470_v14 = vadd.f32 %v3342_v20, %v3214_v58  ;;  %v3471_v15 = vadd.f32 %v3343_v61, %v3215_v50  ;;  %v2833_v7 = vadd.s32 80, %v10793_v57  ;;  %v3217_v58 = vld [vmem:[%s9499_s19 + $0x40] sm:$0xff] }
 0x380   : > { %15723 = vst [vmem:[#allocation291_spill] sm:$0xff] %v10870_v2  ;;  %vm3088_vm3 = vcmp.lt.s32.totalorder %v10870_v2, %v10796_v44  ;;  %v10895_v39 = vadd.s32 %v10791_v30, %v2831_v46  ;;  %v2834_v28 = vadd.s32 88, %v10793_v57  ;;  %v2835_v35 = vadd.s32 96, %v10793_v57  ;;  %v3219_v46 = vld [vmem:[%s9499_s19 + $0x50] sm:$0xff]  ;;  %v15734_v48 = vld [vmem:[#allocation80_spill] sm:$0xff] }
 0x381   : > { %v3344_v5 = vsel %vm3088_vm3, %v15726_v59, 0.0  ;;  %v10898_v4 = vadd.s32 %v10791_v30, %v2832_v0  ;;  %3598 = vst [vmem:[%s9499_s19 + $0x28] sm:$0xff] %v3470_v14  ;;  %3599 = vst [vmem:[%s9499_s19 + $0x30] sm:$0xff] %v3471_v15  ;;  %v10906_v20 = vadd.s32 %v10791_v30, %v2833_v7  ;;  %v2836_v61 = vadd.s32 104, %v10793_v57  ;;  %v15731_v14 = vld [vmem:[#allocation74_spill] sm:$0xff]  ;;  %v15732_v7 = vld [vmem:[#allocation205_spill] sm:$0xff] }
 0x382   : > { %15727 = vst [vmem:[#allocation292_spill] sm:$0xff] %v10895_v39  ;;  %v3472_v50 = vadd.f32 %v3344_v5, %v3216_v60  ;;  %vm3089_vm0 = vcmp.lt.s32.totalorder %v10895_v39, %v10796_v44  ;;  %v10916_v0 = vadd.s32 %v10791_v30, %v2834_v28  ;;  %v2837_v60 = vadd.s32 112, %v10793_v57  ;;  %v3220_v5 = vld [vmem:[%s9499_s19 + $0x58] sm:$0xff]  ;;  %v15735_v39 = vld [vmem:[#allocation206_spill] sm:$0xff] }
 0x383   : > { %15728 = vst [vmem:[#allocation293_spill] sm:$0xff] %v10898_v4  ;;  %15729 = vst [vmem:[#allocation294_spill] sm:$0xff] %v10906_v20  ;;  %vm3090_vm15 = vcmp.lt.s32.totalorder %v10898_v4, %v10796_v44  ;;  %v3345_v15 = vsel %vm3089_vm0, %v15731_v14, 0.0  ;;  %vm3091_vm4 = vcmp.lt.s32.totalorder %v10906_v20, %v10796_v44  ;;  %v10932_v28 = vadd.s32 %v10791_v30, %v2835_v35  ;;  %v15748_v20 = vld [vmem:[#allocation214_spill] sm:$0xff] }
 0x384   : > { %15730 = vst [vmem:[#allocation295_spill] sm:$0xff] %v10916_v0  ;;  %3600 = vst [vmem:[%s9499_s19 + $0x38] sm:$0xff] %v3472_v50  ;;  %v3346_v59 = vsel %vm3090_vm15, %v15732_v7, 0.0  ;;  %v3473_v50 = vadd.f32 %v3345_v15, %v3217_v58  ;;  %v3347_v14 = vsel %vm3091_vm4, %v15734_v48, 0.0  ;;  %vm3092_vm8 = vcmp.lt.s32.totalorder %v10916_v0, %v10796_v44  ;;  %v3221_v7 = vld [vmem:[%s9499_s19 + $0x60] sm:$0xff]  ;;  %v3222_v15 = vld [vmem:[%s9499_s19 + $0x68] sm:$0xff] }
 0x385   : > { %15733 = vst [vmem:[#allocation296_spill] sm:$0xff] %v10932_v28  ;;  %v3474_v2 = vadd.f32 %v3346_v59, %v3218_v55  ;;  %v3475_v4 = vadd.f32 %v3347_v14, %v3219_v46  ;;  %v3348_v35 = vsel %vm3092_vm8, %v15735_v39, 0.0  ;;  %vm13583_vm5 = vcmp.lt.s32.totalorder %v10932_v28, %v10796_v44  ;;  %v15737_v55 = vld [vmem:[#allocation207_spill] sm:$0xff]  ;;  %v3226_v28 = vld [vmem:[%s9499_s19 + $0x88] sm:$0xff] }
 0x386   : > { %v10948_v58 = vadd.s32 %v10791_v30, %v2836_v61  ;;  %3601 = vst [vmem:[%s9499_s19 + $0x40] sm:$0xff] %v3473_v50  ;;  %v3476_v48 = vadd.f32 %v3348_v35, %v3220_v5  ;;  %v3349_v46 = vsel %vm13583_vm5, %v15737_v55, 0.0  ;;  %v10958_v59 = vadd.s32 %v10791_v30, %v2837_v60  ;;  %v15739_v50 = vld [vmem:[#allocation82_spill] sm:$0xff]  ;;  %v15741_v55 = vld [vmem:[#allocation212_spill] sm:$0xff] }
 0x387   : > { %3602 = vst [vmem:[%s9499_s19 + $0x48] sm:$0xff] %v3474_v2  ;;  %v2838_v39 = vadd.s32 120, %v10793_v57  ;;  %3603 = vst [vmem:[%s9499_s19 + $0x50] sm:$0xff] %v3475_v4  ;;  %v3477_v14 = vadd.f32 %v3349_v46, %v3221_v7  ;;  %v3223_v2 = vld [vmem:[%s9499_s19 + $0x70] sm:$0xff]  ;;  %v2839_v61 = vadd.s32 128, %v10793_v57  ;;  %v2840_v5 = vadd.s32 136, %v10793_v57 }
 0x388   : > { %15736 = vst [vmem:[#allocation297_spill] sm:$0xff] %v10948_v58  ;;  %15738 = vst [vmem:[#allocation298_spill] sm:$0xff] %v10958_v59  ;;  %vm13569_vm14 = vcmp.lt.s32.totalorder %v10948_v58, %v10796_v44  ;;  %vm13568_vm6 = vcmp.lt.s32.totalorder %v10958_v59, %v10796_v44  ;;  %v2841_v7 = vadd.s32 144, %v10793_v57  ;;  %v3224_v46 = vld [vmem:[%s9499_s19 + $0x78] sm:$0xff] }
 0x389   : > { %3604 = vst [vmem:[%s9499_s19 + $0x58] sm:$0xff] %v3476_v48  ;;  %v3350_v60 = vsel %vm13569_vm14, %v15739_v50, 0.0  ;;  %v10975_v4 = vadd.s32 %v10791_v30, %v2838_v39  ;;  %3605 = vst [vmem:[%s9499_s19 + $0x60] sm:$0xff] %v3477_v14  ;;  %v3351_v48 = vsel %vm13568_vm6, %v15741_v55, 0.0  ;;  %v10985_v50 = vadd.s32 %v10791_v30, %v2839_v61  ;;  %v3225_v14 = vld [vmem:[%s9499_s19 + $0x80] sm:$0xff]  ;;  %v15745_v55 = vld [vmem:[#allocation87_spill] sm:$0xff] }
 0x38a   : > { %v3478_v35 = vadd.f32 %v3350_v60, %v3222_v15  ;;  %v10988_v58 = vadd.s32 %v10791_v30, %v2840_v5  ;;  %v3479_v39 = vadd.f32 %v3351_v48, %v3223_v2  ;;  %v10995_v15 = vadd.s32 %v10791_v30, %v2841_v7  ;;  %v3227_v2 = vld [vmem:[%s9499_s19 + $0x90] sm:$0xff] }
 0x38b   : > { %15740 = vst [vmem:[#allocation299_spill] sm:$0xff] %v10975_v4  ;;  %15742 = vst [vmem:[#allocation300_spill] sm:$0xff] %v10985_v50  ;;  %vm13571_vm11 = vcmp.lt.s32.totalorder %v10975_v4, %v10796_v44  ;;  %v2842_v60 = vadd.s32 152, %v10793_v57  ;;  %vm13581_vm6 = vcmp.lt.s32.totalorder %v10985_v50, %v10796_v44  ;;  %v2843_v5 = vadd.s32 160, %v10793_v57 }
 0x38c   : > { %15743 = vst [vmem:[#allocation301_spill] sm:$0xff] %v10988_v58  ;;  %15744 = vst [vmem:[#allocation302_spill] sm:$0xff] %v10995_v15  ;;  %v3352_v61 = vsel %vm13571_vm11, %v15745_v55, 0.0  ;;  %vm13577_vm14 = vcmp.lt.s32.totalorder %v10988_v58, %v10796_v44  ;;  %v15747_v55 = vld [vmem:[#allocation88_spill] sm:$0xff]  ;;  %vm13576_vm11 = vcmp.lt.s32.totalorder %v10995_v15, %v10796_v44 }
 0x38d   : > { %3606 = vst [vmem:[%s9499_s19 + $0x68] sm:$0xff] %v3478_v35  ;;  %3607 = vst [vmem:[%s9499_s19 + $0x70] sm:$0xff] %v3479_v39  ;;  %v3480_v7 = vadd.f32 %v3352_v61, %v3224_v46  ;;  %v15746_v35 = vld [vmem:[#allocation213_spill] sm:$0xff]  ;;  %v3354_v4 = vsel %vm13577_vm14, %v15747_v55, 0.0  ;;  %v3355_v46 = vsel %vm13576_vm11, %v15748_v20, 0.0  ;;  %v11025_v39 = vadd.s32 %v10791_v30, %v2842_v60  ;;  %v3229_v20 = vld [vmem:[%s9499_s19 + $0xa0] sm:$0xff] }
 0x38e   : > { %v3353_v48 = vsel %vm13581_vm6, %v15746_v35, 0.0  ;;  %v3482_v0 = vadd.f32 %v3354_v4, %v3226_v28  ;;  %v3483_v61 = vadd.f32 %v3355_v46, %v3227_v2  ;;  %v3228_v35 = vld [vmem:[%s9499_s19 + $0x98] sm:$0xff]  ;;  %v11030_v58 = vadd.s32 %v10791_v30, %v2843_v5  ;;  %v15751_v2 = vld [vmem:[#allocation89_spill] sm:$0xff] }
 0x38f   : > { %v3481_v59 = vadd.f32 %v3353_v48, %v3225_v14  ;;  %15749 = vst [vmem:[#allocation303_spill] sm:$0xff] %v11025_v39  ;;  %3608 = vst [vmem:[%s9499_s19 + $0x78] sm:$0xff] %v3480_v7  ;;  %v2844_v55 = vadd.s32 168, %v10793_v57  ;;  %v2845_v28 = vadd.s32 176, %v10793_v57  ;;  %vm13580_vm11 = vcmp.lt.s32.totalorder %v11025_v39, %v10796_v44  ;;  %v15754_v48 = vld [vmem:[#allocation215_spill] sm:$0xff]  ;;  %v3231_v39 = vld [vmem:[%s9499_s19 + $0xb0] sm:$0xff] }
 0x390   : > { %15750 = vst [vmem:[#allocation304_spill] sm:$0xff] %v11030_v58  ;;  %3610 = vst [vmem:[%s9499_s19 + $0x88] sm:$0xff] %v3482_v0  ;;  %v2846_v4 = vadd.s32 184, %v10793_v57  ;;  %v2847_v14 = vadd.s32 192, %v10793_v57  ;;  %v2848_v60 = vadd.s32 200, %v10793_v57  ;;  %v3356_v5 = vsel %vm13580_vm11, %v15751_v2, 0.0 }
 0x391   : > { %3609 = vst [vmem:[%s9499_s19 + $0x80] sm:$0xff] %v3481_v59  ;;  %3611 = vst [vmem:[%s9499_s19 + $0x90] sm:$0xff] %v3483_v61  ;;  %vm13582_vm14 = vcmp.lt.s32.totalorder %v11030_v58, %v10796_v44  ;;  %v11050_v0 = vadd.s32 %v10791_v30, %v2844_v55  ;;  %v11053_v59 = vadd.s32 %v10791_v30, %v2845_v28  ;;  %v3230_v61 = vld [vmem:[%s9499_s19 + $0xa8] sm:$0xff]  ;;  %v3233_v28 = vld [vmem:[%s9499_s19 + $0xc0] sm:$0xff] }
 0x392   : > { %v3484_v7 = vadd.f32 %v3356_v5, %v3228_v35  ;;  %v3357_v46 = vsel %vm13582_vm14, %v15754_v48, 0.0  ;;  %v11062_v2 = vadd.s32 %v10791_v30, %v2846_v4  ;;  %v11065_v15 = vadd.s32 %v10791_v30, %v2847_v14  ;;  %v3232_v35 = vld [vmem:[%s9499_s19 + $0xb8] sm:$0xff]  ;;  %v15758_v4 = vld [vmem:[#allocation220_spill] sm:$0xff] }
 0x393   : > { %15752 = vst [vmem:[#allocation305_spill] sm:$0xff] %v11050_v0  ;;  %15753 = vst [vmem:[#allocation306_spill] sm:$0xff] %v11053_v59  ;;  %v3485_v55 = vadd.f32 %v3357_v46, %v3229_v20  ;;  %vm13592_vm11 = vcmp.lt.s32.totalorder %v11050_v0, %v10796_v44  ;;  %vm13588_vm6 = vcmp.lt.s32.totalorder %v11053_v59, %v10796_v44  ;;  %v15759_v14 = vld [vmem:[#allocation95_spill] sm:$0xff]  ;;  %v15760_v46 = vld [vmem:[#allocation221_spill] sm:$0xff] }
 0x394   : > { %15755 = vst [vmem:[#allocation307_spill] sm:$0xff] %v11062_v2  ;;  %15756 = vst [vmem:[#allocation308_spill] sm:$0xff] %v11065_v15  ;;  %v11074_v5 = vadd.s32 %v10791_v30, %v2848_v60  ;;  %v3358_v20 = vsel %vm13592_vm11, %v15758_v4, 0.0  ;;  %v3359_v48 = vsel %vm13588_vm6, %v15759_v14, 0.0  ;;  %vm13591_vm14 = vcmp.lt.s32.totalorder %v11062_v2, %v10796_v44  ;;  %v15761_v0 = vld [vmem:[#allocation96_spill] sm:$0xff]  ;;  %v3234_v59 = vld [vmem:[%s9499_s19 + $0xc8] sm:$0xff] }
 0x395   : > { %3612 = vst [vmem:[%s9499_s19 + $0x98] sm:$0xff] %v3484_v7  ;;  %vm13590_vm5 = vcmp.lt.s32.totalorder %v11065_v15, %v10796_v44  ;;  %3613 = vst [vmem:[%s9499_s19 + $0xa0] sm:$0xff] %v3485_v55  ;;  %v3486_v60 = vadd.f32 %v3358_v20, %v3230_v61  ;;  %v3487_v7 = vadd.f32 %v3359_v48, %v3231_v39  ;;  %v3360_v4 = vsel %vm13591_vm14, %v15760_v46, 0.0  ;;  %v15762_v39 = vld [vmem:[#allocation222_spill] sm:$0xff] }
 0x396   : > { %15757 = vst [vmem:[#allocation309_spill] sm:$0xff] %v11074_v5  ;;  %v3361_v14 = vsel %vm13590_vm5, %v15761_v0, 0.0  ;;  %v3488_v58 = vadd.f32 %v3360_v4, %v3232_v35  ;;  %vm13589_vm6 = vcmp.lt.s32.totalorder %v11074_v5, %v10796_v44  ;;  %v2849_v61 = vadd.s32 208, %v10793_v57  ;;  %v3235_v46 = vld [vmem:[%s9499_s19 + $0xd0] sm:$0xff] }
 0x397   : > { %v3489_v50 = vadd.f32 %v3361_v14, %v3233_v28  ;;  %3614 = vst [vmem:[%s9499_s19 + $0xa8] sm:$0xff] %v3486_v60  ;;  %3615 = vst [vmem:[%s9499_s19 + $0xb0] sm:$0xff] %v3487_v7  ;;  %v3362_v55 = vsel %vm13589_vm6, %v15762_v39, 0.0  ;;  %v2850_v20 = vadd.s32 216, %v10793_v57  ;;  %v2851_v0 = vadd.s32 224, %v10793_v57  ;;  %v15768_v15 = vld [vmem:[#allocation98_spill] sm:$0xff] }
 0x398   : > { %v2852_v35 = vadd.s32 232, %v10793_v57  ;;  %3616 = vst [vmem:[%s9499_s19 + $0xb8] sm:$0xff] %v3488_v58  ;;  %v3490_v28 = vadd.f32 %v3362_v55, %v3234_v59  ;;  %v11114_v48 = vadd.s32 %v10791_v30, %v2849_v61  ;;  %v2853_v60 = vadd.s32 240, %v10793_v57  ;;  %v3237_v59 = vld [vmem:[%s9499_s19 + $0xe0] sm:$0xff]  ;;  %v3238_v61 = vld [vmem:[%s9499_s19 + $0xe8] sm:$0xff] }
 0x399   : > { %3617 = vst [vmem:[%s9499_s19 + $0xc0] sm:$0xff] %v3489_v50  ;;  %v2854_v7 = vadd.s32 248, %v10793_v57  ;;  %v11120_v4 = vadd.s32 %v10791_v30, %v2850_v20  ;;  %v11123_v14 = vadd.s32 %v10791_v30, %v2851_v0  ;;  %v2855_v58 = vadd.s32 256, %v10793_v57  ;;  %v3236_v50 = vld [vmem:[%s9499_s19 + $0xd8] sm:$0xff] }
 0x39a   : > { %15763 = vst [vmem:[#allocation310_spill] sm:$0xff] %v11114_v48  ;;  %v11126_v39 = vadd.s32 %v10791_v30, %v2852_v35  ;;  %3618 = vst [vmem:[%s9499_s19 + $0xc8] sm:$0xff] %v3490_v28  ;;  %vm13668_vm6 = vcmp.lt.s32.totalorder %v11114_v48, %v10796_v44  ;;  %v11136_v55 = vadd.s32 %v10791_v30, %v2853_v60  ;;  %v2856_v0 = vadd.s32 264, %v10793_v57  ;;  %v15766_v35 = vld [vmem:[#allocation97_spill] sm:$0xff]  ;;  %v15769_v48 = vld [vmem:[#allocation228_spill] sm:$0xff] }
 0x39b   : > { %15764 = vst [vmem:[#allocation311_spill] sm:$0xff] %v11120_v4  ;;  %v11139_v20 = vadd.s32 %v10791_v30, %v2854_v7  ;;  %v3363_v28 = vsel %vm13668_vm6, %v15766_v35, 0.0  ;;  %vm13599_vm5 = vcmp.lt.s32.totalorder %v11120_v4, %v10796_v44  ;;  %vm13601_vm14 = vcmp.lt.s32.totalorder %v11123_v14, %v10796_v44  ;;  %v15767_v7 = vld [vmem:[#allocation223_spill] sm:$0xff] }
 0x39c   : > { %vm13603_vm11 = vcmp.lt.s32.totalorder %v11126_v39, %v10796_v44  ;;  %v3491_v60 = vadd.f32 %v3363_v28, %v3235_v46  ;;  %v3364_v5 = vsel %vm13599_vm5, %v15767_v7, 0.0  ;;  %v3365_v35 = vsel %vm13601_vm14, %v15768_v15, 0.0  ;;  %v3240_v7 = vld [vmem:[%s9499_s19 + $0xf8] sm:$0xff] }
 0x39d   : > { %15765 = vst [vmem:[#allocation312_spill] sm:$0xff] %v11139_v20  ;;  %v3366_v2 = vsel %vm13603_vm11, %v15769_v48, 0.0  ;;  %v3492_v46 = vadd.f32 %v3364_v5, %v3236_v50  ;;  %v3493_v28 = vadd.f32 %v3365_v35, %v3237_v59  ;;  %vm13602_vm5 = vcmp.lt.s32.totalorder %v11136_v55, %v10796_v44  ;;  %v15770_v4 = vld [vmem:[#allocation103_spill] sm:$0xff]  ;;  %v15772_v50 = vld [vmem:[#allocation229_spill] sm:$0xff]  ;;  %v3241_v59 = vld [vmem:[%s9499_s19 + $0x100] sm:$0xff] }
 0x39e   : > { %v3494_v29 = vadd.f32 %v3366_v2, %v3238_v61  ;;  %3619 = vst [vmem:[%s9499_s19 + $0xd0] sm:$0xff] %v3491_v60  ;;  %v3367_v15 = vsel %vm13602_vm5, %v15770_v4, 0.0  ;;  %vm13608_vm14 = vcmp.lt.s32.totalorder %v11139_v20, %v10796_v44  ;;  %v11176_v48 = vadd.s32 %v10791_v30, %v2855_v58  ;;  %v3242_v61 = vld [vmem:[%s9499_s19 + $0x108] sm:$0xff]  ;;  %v3244_v20 = vld [vmem:[%s9499_s19 + $0x118] sm:$0xff] }
 0x39f   : > { %v11179_v5 = vadd.s32 %v10791_v30, %v2856_v0  ;;  %3620 = vst [vmem:[%s9499_s19 + $0xd8] sm:$0xff] %v3492_v46  ;;  %3621 = vst [vmem:[%s9499_s19 + $0xe0] sm:$0xff] %v3493_v28  ;;  %v3495_v2 = vadd.f32 %v3367_v15, %v3239_v53  ;;  %v3368_v4 = vsel %vm13608_vm14, %v15772_v50, 0.0  ;;  %v2857_v58 = vadd.s32 272, %v10793_v57  ;;  %v15773_v53 = vld [vmem:[#allocation104_spill] sm:$0xff]  ;;  %v15774_v46 = vld [vmem:[#allocation105_spill] sm:$0xff] }
 0x3a0   : > { %3622 = vst [vmem:[%s9499_s19 + $0xe8] sm:$0xff] %v3494_v29  ;;  %v2858_v60 = vadd.s32 280, %v10793_v57  ;;  %v3496_v0 = vadd.f32 %v3368_v4, %v3240_v7  ;;  %vm13607_vm5 = vcmp.lt.s32.totalorder %v11176_v48, %v10796_v44  ;;  %v2859_v29 = vadd.s32 288, %v10793_v57  ;;  %v3243_v4 = vld [vmem:[%s9499_s19 + $0x110] sm:$0xff] }
 0x3a1   : > { %15771 = vst [vmem:[#allocation313_spill] sm:$0xff] %v11179_v5  ;;  %vm13606_vm11 = vcmp.lt.s32.totalorder %v11179_v5, %v10796_v44  ;;  %3623 = vst [vmem:[%s9499_s19 + $0xf0] sm:$0xff] %v3495_v2  ;;  %v3369_v35 = vsel %vm13607_vm5, %v15773_v53, 0.0  ;;  %v11207_v7 = vadd.s32 %v10791_v30, %v2857_v58  ;;  %v2860_v5 = vadd.s32 296, %v10793_v57  ;;  %v3245_v58 = vld [vmem:[%s9499_s19 + $0x120] sm:$0xff] }
 0x3a2   : > { %v3370_v28 = vsel %vm13606_vm11, %v15774_v46, 0.0  ;;  %v11210_v15 = vadd.s32 %v10791_v30, %v2858_v60  ;;  %3624 = vst [vmem:[%s9499_s19 + $0xf8] sm:$0xff] %v3496_v0  ;;  %v3497_v2 = vadd.f32 %v3369_v35, %v3241_v59  ;;  %v11216_v53 = vadd.s32 %v10791_v30, %v2859_v29  ;;  %v15777_v0 = vld [vmem:[#allocation231_spill] sm:$0xff] }
 0x3a3   : > { %v3498_v50 = vadd.f32 %v3370_v28, %v3242_v61  ;;  %vm13616_vm11 = vcmp.lt.s32.totalorder %v11207_v7, %v10796_v44  ;;  %v2861_v60 = vadd.s32 304, %v10793_v57  ;;  %v2862_v59 = vadd.s32 312, %v10793_v57 }
 0x3a4   : > { %15775 = vst [vmem:[#allocation314_spill] sm:$0xff] %v11210_v15  ;;  %15776 = vst [vmem:[#allocation315_spill] sm:$0xff] %v11216_v53  ;;  %vm13609_vm5 = vcmp.lt.s32.totalorder %v11210_v15, %v10796_v44  ;;  %v3371_v61 = vsel %vm13616_vm11, %v9119_v47, 0.0  ;;  %vm13611_vm14 = vcmp.lt.s32.totalorder %v11216_v53, %v10796_v44  ;;  %v11239_v35 = vadd.s32 %v10791_v30, %v2860_v5  ;;  %v3247_v15 = vld [vmem:[%s9499_s19 + $0x130] sm:$0xff]  ;;  %v3252_v53 = vld [vmem:[%s9499_s19 + $0x158] sm:$0xff] }
 0x3a5   : > { %3625 = vst [vmem:[%s9499_s19 + $0x100] sm:$0xff] %v3497_v2  ;;  %3626 = vst [vmem:[%s9499_s19 + $0x108] sm:$0xff] %v3498_v50  ;;  %v3372_v29 = vsel %vm13609_vm5, %v15777_v0, 0.0  ;;  %v3499_v46 = vadd.f32 %v3371_v61, %v3243_v4  ;;  %v3373_v47 = vsel %vm13611_vm14, %v9127_v36, 0.0  ;;  %v3246_v2 = vld [vmem:[%s9499_s19 + $0x128] sm:$0xff]  ;;  %v11247_v50 = vadd.s32 %v10791_v30, %v2861_v60  ;;  %v3248_v4 = vld [vmem:[%s9499_s19 + $0x138] sm:$0xff] }
 0x3a6   : > { %15778 = vst [vmem:[#allocation316_spill] sm:$0xff] %v11239_v35  ;;  %v3500_v28 = vadd.f32 %v3372_v29, %v3244_v20  ;;  %v3501_v0 = vadd.f32 %v3373_v47, %v3245_v58  ;;  %vm13612_vm5 = vcmp.lt.s32.totalorder %v11239_v35, %v10796_v44  ;;  %v11253_v5 = vadd.s32 %v10791_v30, %v2862_v59  ;;  %v15781_v61 = vld [vmem:[#allocation106_spill] sm:$0xff] }
 0x3a7   : > { %15779 = vst [vmem:[#allocation317_spill] sm:$0xff] %v11247_v50  ;;  %v2863_v20 = vadd.s32 320, %v10793_v57  ;;  %3627 = vst [vmem:[%s9499_s19 + $0x110] sm:$0xff] %v3499_v46  ;;  %v3374_v36 = vsel %vm13612_vm5, %v9131_v27, 0.0  ;;  %vm13613_vm14 = vcmp.lt.s32.totalorder %v11247_v50, %v10796_v44  ;;  %v2864_v58 = vadd.s32 328, %v10793_v57 }
 0x3a8   : > { %15780 = vst [vmem:[#allocation318_spill] sm:$0xff] %v11253_v5  ;;  %3628 = vst [vmem:[%s9499_s19 + $0x118] sm:$0xff] %v3500_v28  ;;  %v2865_v60 = vadd.s32 336, %v10793_v57  ;;  %v3502_v59 = vadd.f32 %v3374_v36, %v3246_v2  ;;  %v3375_v29 = vsel %vm13613_vm14, %v15781_v61, 0.0  ;;  %vm13615_vm5 = vcmp.lt.s32.totalorder %v11253_v5, %v10796_v44  ;;  %v15783_v28 = vld [vmem:[#allocation118_spill] sm:$0xff]  ;;  %v3249_v2 = vld [vmem:[%s9499_s19 + $0x140] sm:$0xff] }
 0x3a9   : > { %3629 = vst [vmem:[%s9499_s19 + $0x120] sm:$0xff] %v3501_v0  ;;  %v11275_v27 = vadd.s32 %v10791_v30, %v2863_v20  ;;  %v3503_v46 = vadd.f32 %v3375_v29, %v3247_v15  ;;  %v3376_v47 = vsel %vm13615_vm5, %v15783_v28, 0.0  ;;  %v11283_v0 = vadd.s32 %v10791_v30, %v2864_v58  ;;  %v3250_v20 = vld [vmem:[%s9499_s19 + $0x148] sm:$0xff]  ;;  %v3251_v15 = vld [vmem:[%s9499_s19 + $0x150] sm:$0xff] }
 0x3aa   : > { %v11286_v36 = vadd.s32 %v10791_v30, %v2865_v60  ;;  %3630 = vst [vmem:[%s9499_s19 + $0x128] sm:$0xff] %v3502_v59  ;;  %v3504_v61 = vadd.f32 %v3376_v47, %v3248_v4  ;;  %v2866_v29 = vadd.s32 344, %v10793_v57  ;;  %v2867_v28 = vadd.s32 352, %v10793_v57  ;;  %v15786_v5 = vld [vmem:[#allocation245_spill] sm:$0xff]  ;;  %v15787_v59 = vld [vmem:[#allocation119_spill] sm:$0xff]  ;;  %v15788_v47 = vld [vmem:[#allocation120_spill] sm:$0xff] }
 0x3ab   : > { %15782 = vst [vmem:[#allocation319_spill] sm:$0xff] %v11275_v27  ;;  %15784 = vst [vmem:[#allocation320_spill] sm:$0xff] %v11283_v0  ;;  %vm13623_vm14 = vcmp.lt.s32.totalorder %v11275_v27, %v10796_v44  ;;  %vm13621_vm5 = vcmp.lt.s32.totalorder %v11283_v0, %v10796_v44  ;;  %v2868_v4 = vadd.s32 360, %v10793_v57  ;;  %v3255_v0 = vld [vmem:[%s9499_s19 + $0x170] sm:$0xff] }
 0x3ac   : > { %15785 = vst [vmem:[#allocation321_spill] sm:$0xff] %v11286_v36  ;;  %3631 = vst [vmem:[%s9499_s19 + $0x130] sm:$0xff] %v3503_v46  ;;  %v3377_v58 = vsel %vm13623_vm14, %v15786_v5, 0.0  ;;  %vm13622_vm11 = vcmp.lt.s32.totalorder %v11286_v36, %v10796_v44  ;;  %v3378_v46 = vsel %vm13621_vm5, %v15787_v59, 0.0  ;;  %v11315_v27 = vadd.s32 %v10791_v30, %v2866_v29  ;;  %v3254_v59 = vld [vmem:[%s9499_s19 + $0x168] sm:$0xff] }
 0x3ad   : > { %3632 = vst [vmem:[%s9499_s19 + $0x138] sm:$0xff] %v3504_v61  ;;  %v3505_v60 = vadd.f32 %v3377_v58, %v3249_v2  ;;  %v3379_v5 = vsel %vm13622_vm11, %v15788_v47, 0.0  ;;  %v3506_v50 = vadd.f32 %v3378_v46, %v3250_v20  ;;  %v11319_v2 = vadd.s32 %v10791_v30, %v2867_v28  ;;  %v3253_v58 = vld [vmem:[%s9499_s19 + $0x160] sm:$0xff]  ;;  %v15793_v46 = vld [vmem:[#allocation125_spill] sm:$0xff] }
 0x3ae   : > { %15789 = vst [vmem:[#allocation322_spill] sm:$0xff] %v11315_v27  ;;  %v3507_v35 = vadd.f32 %v3379_v5, %v3251_v15  ;;  %v11322_v61 = vadd.s32 %v10791_v30, %v2868_v4  ;;  %vm13630_vm5 = vcmp.lt.s32.totalorder %v11315_v27, %v10796_v44  ;;  %v2869_v47 = vadd.s32 368, %v10793_v57  ;;  %v15792_v15 = vld [vmem:[#allocation247_spill] sm:$0xff] }
 0x3af   : > { %15790 = vst [vmem:[#allocation323_spill] sm:$0xff] %v11319_v2  ;;  %3633 = vst [vmem:[%s9499_s19 + $0x140] sm:$0xff] %v3505_v60  ;;  %v2870_v29 = vadd.s32 376, %v10793_v57  ;;  %v2871_v20 = vadd.s32 384, %v10793_v57  ;;  %v3380_v28 = vsel %vm13630_vm5, %v15792_v15, 0.0  ;;  %vm13627_vm11 = vcmp.lt.s32.totalorder %v11319_v2, %v10796_v44  ;;  %v15802_v2 = vld [vmem:[#allocation252_spill] sm:$0xff] }
 0x3b0   : > { %15791 = vst [vmem:[#allocation324_spill] sm:$0xff] %v11322_v61  ;;  %3634 = vst [vmem:[%s9499_s19 + $0x148] sm:$0xff] %v3506_v50  ;;  %vm13629_vm14 = vcmp.lt.s32.totalorder %v11322_v61, %v10796_v44  ;;  %v2872_v4 = vadd.s32 392, %v10793_v57  ;;  %v3508_v60 = vadd.f32 %v3380_v28, %v3252_v53  ;;  %v15794_v50 = vld [vmem:[#allocation126_spill] sm:$0xff]  ;;  %v11352_v15 = vadd.s32 %v10791_v30, %v2869_v47  ;;  %v3257_v61 = vld [vmem:[%s9499_s19 + $0x180] sm:$0xff] }
 0x3b1   : > { %3635 = vst [vmem:[%s9499_s19 + $0x150] sm:$0xff] %v3507_v35  ;;  %v3381_v35 = vsel %vm13627_vm11, %v15793_v46, 0.0  ;;  %v3382_v5 = vsel %vm13629_vm14, %v15794_v50, 0.0  ;;  %v11356_v53 = vadd.s32 %v10791_v30, %v2870_v29  ;;  %v11359_v28 = vadd.s32 %v10791_v30, %v2871_v20  ;;  %v3256_v46 = vld [vmem:[%s9499_s19 + $0x178] sm:$0xff]  ;;  %v15799_v47 = vld [vmem:[#allocation250_spill] sm:$0xff]  ;;  %v3258_v20 = vld [vmem:[%s9499_s19 + $0x188] sm:$0xff] }
 0x3b2   : > { %15795 = vst [vmem:[#allocation325_spill] sm:$0xff] %v11352_v15  ;;  %v3509_v27 = vadd.f32 %v3381_v35, %v3253_v58  ;;  %v3510_v36 = vadd.f32 %v3382_v5, %v3254_v59  ;;  %3636 = vst [vmem:[%s9499_s19 + $0x158] sm:$0xff] %v3508_v60  ;;  %vm13631_vm11 = vcmp.lt.s32.totalorder %v11352_v15, %v10796_v44  ;;  %v2873_v58 = vadd.s32 400, %v10793_v57  ;;  %v15801_v35 = vld [vmem:[#allocation132_spill] sm:$0xff] }
 0x3b3   : > { %15796 = vst [vmem:[#allocation326_spill] sm:$0xff] %v11356_v53  ;;  %15797 = vst [vmem:[#allocation327_spill] sm:$0xff] %v11359_v28  ;;  %v11367_v50 = vadd.s32 %v10791_v30, %v2872_v4  ;;  %v2874_v59 = vadd.s32 408, %v10793_v57  ;;  %v3383_v29 = vsel %vm13631_vm11, %v15799_v47, 0.0  ;;  %vm13638_vm14 = vcmp.lt.s32.totalorder %v11356_v53, %v10796_v44 }
 0x3b4   : > { %3637 = vst [vmem:[%s9499_s19 + $0x160] sm:$0xff] %v3509_v27  ;;  %3638 = vst [vmem:[%s9499_s19 + $0x168] sm:$0xff] %v3510_v36  ;;  %vm13637_vm5 = vcmp.lt.s32.totalorder %v11359_v28, %v10796_v44  ;;  %v2875_v4 = vadd.s32 416, %v10793_v57  ;;  %v3511_v60 = vadd.f32 %v3383_v29, %v3255_v0  ;;  %v15800_v27 = vld [vmem:[#allocation127_spill] sm:$0xff]  ;;  %v11398_v29 = vadd.s32 %v10791_v30, %v2873_v58  ;;  %v3259_v28 = vld [vmem:[%s9499_s19 + $0x190] sm:$0xff] }
 0x3b5   : > { %15798 = vst [vmem:[#allocation328_spill] sm:$0xff] %v11367_v50  ;;  %v3384_v36 = vsel %vm13638_vm14, %v15800_v27, 0.0  ;;  %v3385_v5 = vsel %vm13637_vm5, %v15801_v35, 0.0  ;;  %vm13636_vm11 = vcmp.lt.s32.totalorder %v11367_v50, %v10796_v44  ;;  %v11403_v35 = vadd.s32 %v10791_v30, %v2874_v59 }
 0x3b6   : > { %v3512_v47 = vadd.f32 %v3384_v36, %v3256_v46  ;;  %v3513_v15 = vadd.f32 %v3385_v5, %v3257_v61  ;;  %v3386_v0 = vsel %vm13636_vm11, %v15802_v2, 0.0  ;;  %15803 = vst [vmem:[#allocation329_spill] sm:$0xff] %v11398_v29  ;;  %3639 = vst [vmem:[%s9499_s19 + $0x170] sm:$0xff] %v3511_v60  ;;  %v11406_v53 = vadd.s32 %v10791_v30, %v2875_v4  ;;  %v3260_v2 = vld [vmem:[%s9499_s19 + $0x198] sm:$0xff]  ;;  %v3261_v46 = vld [vmem:[%s9499_s19 + $0x1a0] sm:$0xff] }
 0x3b7   : > { %v3514_v27 = vadd.f32 %v3386_v0, %v3258_v20  ;;  %15804 = vst [vmem:[#allocation330_spill] sm:$0xff] %v11403_v35  ;;  %v2876_v61 = vadd.s32 424, %v10793_v57  ;;  %vm13641_vm11 = vcmp.lt.s32.totalorder %v11398_v29, %v10796_v44  ;;  %v2877_v58 = vadd.s32 432, %v10793_v57  ;;  %v15806_v4 = vld [vmem:[#allocation133_spill] sm:$0xff]  ;;  %v15808_v5 = vld [vmem:[#allocation134_spill] sm:$0xff]  ;;  %v15809_v0 = vld [vmem:[#allocation255_spill] sm:$0xff] }
 0x3b8   : > { %15805 = vst [vmem:[#allocation331_spill] sm:$0xff] %v11406_v53  ;;  %3640 = vst [vmem:[%s9499_s19 + $0x178] sm:$0xff] %v3512_v47  ;;  %v2878_v20 = vadd.s32 440, %v10793_v57  ;;  %v2879_v59 = vadd.s32 448, %v10793_v57  ;;  %v3387_v60 = vsel %vm13641_vm11, %v15806_v4, 0.0  ;;  %vm13645_vm5 = vcmp.lt.s32.totalorder %v11403_v35, %v10796_v44  ;;  %v3262_v4 = vld [vmem:[%s9499_s19 + $0x1a8] sm:$0xff] }
 0x3b9   : > { %3641 = vst [vmem:[%s9499_s19 + $0x180] sm:$0xff] %v3513_v15  ;;  %3642 = vst [vmem:[%s9499_s19 + $0x188] sm:$0xff] %v3514_v27  ;;  %vm13642_vm14 = vcmp.lt.s32.totalorder %v11406_v53, %v10796_v44  ;;  %v11428_v15 = vadd.s32 %v10791_v30, %v2876_v61  ;;  %v3515_v36 = vadd.f32 %v3387_v60, %v3259_v28  ;;  %v3388_v47 = vsel %vm13645_vm5, %v15808_v5, 0.0  ;;  %v3263_v28 = vld [vmem:[%s9499_s19 + $0x1b0] sm:$0xff]  ;;  %v15812_v5 = vld [vmem:[#allocation139_spill] sm:$0xff] }
 0x3ba   : > { %v3389_v27 = vsel %vm13642_vm14, %v15809_v0, 0.0  ;;  %v11440_v29 = vadd.s32 %v10791_v30, %v2877_v58  ;;  %v3516_v50 = vadd.f32 %v3388_v47, %v3260_v2  ;;  %v11446_v60 = vadd.s32 %v10791_v30, %v2878_v20  ;;  %v3264_v2 = vld [vmem:[%s9499_s19 + $0x1b8] sm:$0xff] }
 0x3bb   : > { %15807 = vst [vmem:[#allocation332_spill] sm:$0xff] %v11428_v15  ;;  %v3517_v61 = vadd.f32 %v3389_v27, %v3261_v46  ;;  %vm13643_vm11 = vcmp.lt.s32.totalorder %v11428_v15, %v10796_v44  ;;  %3643 = vst [vmem:[%s9499_s19 + $0x190] sm:$0xff] %v3515_v36  ;;  %v11457_v46 = vadd.s32 %v10791_v30, %v2879_v59  ;;  %v2880_v58 = vadd.s32 456, %v10793_v57  ;;  %v15814_v36 = vld [vmem:[#allocation140_spill] sm:$0xff]  ;;  %v15815_v15 = vld [vmem:[#allocation257_spill] sm:$0xff] }
 0x3bc   : > { %15810 = vst [vmem:[#allocation333_spill] sm:$0xff] %v11440_v29  ;;  %15811 = vst [vmem:[#allocation334_spill] sm:$0xff] %v11446_v60  ;;  %v3390_v0 = vsel %vm13643_vm11, %v15812_v5, 0.0  ;;  %vm13654_vm14 = vcmp.lt.s32.totalorder %v11440_v29, %v10796_v44  ;;  %vm13647_vm11 = vcmp.lt.s32.totalorder %v11446_v60, %v10796_v44  ;;  %v3265_v27 = vld [vmem:[%s9499_s19 + $0x1c0] sm:$0xff]  ;;  %v2881_v59 = vadd.s32 464, %v10793_v57  ;;  %v3270_v29 = vld [vmem:[%s9499_s19 + $0x1e8] sm:$0xff] }
 0x3bd   : > { %15813 = vst [vmem:[#allocation335_spill] sm:$0xff] %v11457_v46  ;;  %3644 = vst [vmem:[%s9499_s19 + $0x198] sm:$0xff] %v3516_v50  ;;  %v3518_v20 = vadd.f32 %v3390_v0, %v3262_v4  ;;  %v3391_v47 = vsel %vm13654_vm14, %v15814_v36, 0.0  ;;  %v3392_v50 = vsel %vm13647_vm11, %v15815_v15, 0.0  ;;  %vm13648_vm5 = vcmp.lt.s32.totalorder %v11457_v46, %v10796_v44  ;;  %v15817_v0 = vld [vmem:[#allocation145_spill] sm:$0xff]  ;;  %v15827_v35 = vld [vmem:[#allocation263_spill] sm:$0xff] }
 0x3be   : > { %3645 = vst [vmem:[%s9499_s19 + $0x1a0] sm:$0xff] %v3517_v61  ;;  %v3519_v5 = vadd.f32 %v3391_v47, %v3263_v28  ;;  %v11477_v4 = vadd.s32 %v10791_v30, %v2880_v58  ;;  %v3520_v61 = vadd.f32 %v3392_v50, %v3264_v2  ;;  %v3393_v28 = vsel %vm13648_vm5, %v15817_v0, 0.0  ;;  %v3266_v36 = vld [vmem:[%s9499_s19 + $0x1c8] sm:$0xff]  ;;  %v3267_v58 = vld [vmem:[%s9499_s19 + $0x1d0] sm:$0xff]  ;;  %v15819_v50 = vld [vmem:[#allocation259_spill] sm:$0xff] }
 0x3bf   : > { %3646 = vst [vmem:[%s9499_s19 + $0x1a8] sm:$0xff] %v3518_v20  ;;  %v11486_v47 = vadd.s32 %v10791_v30, %v2881_v59  ;;  %v2882_v15 = vadd.s32 472, %v10793_v57  ;;  %v3521_v60 = vadd.f32 %v3393_v28, %v3265_v27  ;;  %v2883_v2 = vadd.s32 480, %v10793_v57  ;;  %v15821_v28 = vld [vmem:[#allocation260_spill] sm:$0xff] }
 0x3c0   : > { %15816 = vst [vmem:[#allocation336_spill] sm:$0xff] %v11477_v4  ;;  %3647 = vst [vmem:[%s9499_s19 + $0x1b0] sm:$0xff] %v3519_v5  ;;  %vm13651_vm11 = vcmp.lt.s32.totalorder %v11477_v4, %v10796_v44  ;;  %v2884_v20 = vadd.s32 488, %v10793_v57  ;;  %v2885_v5 = vadd.s32 496, %v10793_v57  ;;  %v3268_v4 = vld [vmem:[%s9499_s19 + $0x1d8] sm:$0xff] }
 0x3c1   : > { %15818 = vst [vmem:[#allocation337_spill] sm:$0xff] %v11486_v47  ;;  %3648 = vst [vmem:[%s9499_s19 + $0x1b8] sm:$0xff] %v3520_v61  ;;  %v3394_v59 = vsel %vm13651_vm11, %v15819_v50, 0.0  ;;  %vm13653_vm5 = vcmp.lt.s32.totalorder %v11486_v47, %v10796_v44  ;;  %v11503_v27 = vadd.s32 %v10791_v30, %v2882_v15  ;;  %v11513_v50 = vadd.s32 %v10791_v30, %v2883_v2 }
 0x3c2   : > { %3649 = vst [vmem:[%s9499_s19 + $0x1c0] sm:$0xff] %v3521_v60  ;;  %v3522_v0 = vadd.f32 %v3394_v59, %v3266_v36  ;;  %v3395_v61 = vsel %vm13653_vm5, %v15821_v28, 0.0  ;;  %v11516_v46 = vadd.s32 %v10791_v30, %v2884_v20  ;;  %v3269_v60 = vld [vmem:[%s9499_s19 + $0x1e0] sm:$0xff]  ;;  %v11523_v36 = vadd.s32 %v10791_v30, %v2885_v5  ;;  %v15824_v28 = vld [vmem:[#allocation150_spill] sm:$0xff] }
 0x3c3   : > { %15820 = vst [vmem:[#allocation338_spill] sm:$0xff] %v11503_v27  ;;  %v3523_v15 = vadd.f32 %v3395_v61, %v3267_v58  ;;  %vm13656_vm11 = vcmp.lt.s32.totalorder %v11503_v27, %v10796_v44  ;;  %v2886_v59 = vadd.s32 504, %v10793_v57  ;;  %vm13666_vm5 = vcmp.lt.s32.totalorder %v11513_v50, %v10796_v44  ;;  %v3271_v58 = vld [vmem:[%s9499_s19 + $0x1f0] sm:$0xff] }
 0x3c4   : > { %15822 = vst [vmem:[#allocation339_spill] sm:$0xff] %v11516_v46  ;;  %15823 = vst [vmem:[#allocation340_spill] sm:$0xff] %v11523_v36  ;;  %v3396_v2 = vsel %vm13656_vm11, %v15824_v28, 0.0  ;;  %vm13662_vm14 = vcmp.lt.s32.totalorder %v11516_v46, %v10796_v44  ;;  %v2887_v20 = vadd.s32 512, %v10793_v57  ;;  %v15826_v28 = vld [vmem:[#allocation151_spill] sm:$0xff]  ;;  %vm13661_vm11 = vcmp.lt.s32.totalorder %v11523_v36, %v10796_v44 }
 0x3c5   : > { %3650 = vst [vmem:[%s9499_s19 + $0x1c8] sm:$0xff] %v3522_v0  ;;  %3651 = vst [vmem:[%s9499_s19 + $0x1d0] sm:$0xff] %v3523_v15  ;;  %v3524_v5 = vadd.f32 %v3396_v2, %v3268_v4  ;;  %v15825_v0 = vld [vmem:[#allocation261_spill] sm:$0xff]  ;;  %v3398_v27 = vsel %vm13662_vm14, %v15826_v28, 0.0  ;;  %v3399_v4 = vsel %vm13661_vm11, %v15827_v35, 0.0  ;;  %v11553_v15 = vadd.s32 %v10791_v30, %v2886_v59  ;;  %v3273_v35 = vld [vmem:[%s9499_s19 + $0x200] sm:$0xff] }
 0x3c6   : > { %v3397_v61 = vsel %vm13666_vm5, %v15825_v0, 0.0  ;;  %v3526_v53 = vadd.f32 %v3398_v27, %v3270_v29  ;;  %v3527_v2 = vadd.f32 %v3399_v4, %v3271_v58  ;;  %v3272_v0 = vld [vmem:[%s9499_s19 + $0x1f8] sm:$0xff]  ;;  %v11558_v46 = vadd.s32 %v10791_v30, %v2887_v20  ;;  %v15829_v58 = vld [vmem:[#allocation264_spill] sm:$0xff] }
 0x3c7   : > { %v3525_v47 = vadd.f32 %v3397_v61, %v3269_v60  ;;  %15828 = vst [vmem:[#allocation341_spill] sm:$0xff] %v11553_v15  ;;  %3652 = vst [vmem:[%s9499_s19 + $0x1d8] sm:$0xff] %v3524_v5  ;;  %v2888_v28 = vadd.s32 520, %v10793_v57  ;;  %v2889_v29 = vadd.s32 528, %v10793_v57  ;;  %vm13665_vm11 = vcmp.lt.s32.totalorder %v11553_v15, %v10796_v44  ;;  %v15832_v61 = vld [vmem:[#allocation156_spill] sm:$0xff]  ;;  %v3275_v15 = vld [vmem:[%s9499_s19 + $0x210] sm:$0xff] }
 0x3c8   : > { %3654 = vst [vmem:[%s9499_s19 + $0x1e8] sm:$0xff] %v3526_v53  ;;  %v2890_v27 = vadd.s32 536, %v10793_v57  ;;  %v2891_v60 = vadd.s32 544, %v10793_v57  ;;  %v2892_v59 = vadd.s32 552, %v10793_v57  ;;  %3655 = vst [vmem:[%s9499_s19 + $0x1f0] sm:$0xff] %v3527_v2  ;;  %v3400_v20 = vsel %vm13665_vm11, %v15829_v58, 0.0 }
 0x3c9   : > { %3653 = vst [vmem:[%s9499_s19 + $0x1e0] sm:$0xff] %v3525_v47  ;;  %vm13667_vm14 = vcmp.lt.s32.totalorder %v11558_v46, %v10796_v44  ;;  %v11578_v53 = vadd.s32 %v10791_v30, %v2888_v28  ;;  %v11581_v47 = vadd.s32 %v10791_v30, %v2889_v29  ;;  %v3528_v5 = vadd.f32 %v3400_v20, %v3272_v0  ;;  %v3274_v2 = vld [vmem:[%s9499_s19 + $0x208] sm:$0xff]  ;;  %v3276_v0 = vld [vmem:[%s9499_s19 + $0x218] sm:$0xff]  ;;  %v3277_v29 = vld [vmem:[%s9499_s19 + $0x220] sm:$0xff] }
 0x3ca   : > { %v3401_v4 = vsel %vm13667_vm14, %v15832_v61, 0.0  ;;  %v11590_v58 = vadd.s32 %v10791_v30, %v2890_v27  ;;  %v11593_v36 = vadd.s32 %v10791_v30, %v2891_v60  ;;  %v11602_v20 = vadd.s32 %v10791_v30, %v2892_v59  ;;  %v15833_v27 = vld [vmem:[#allocation266_spill] sm:$0xff] }
 0x3cb   : > { %15830 = vst [vmem:[#allocation342_spill] sm:$0xff] %v11578_v53  ;;  %15831 = vst [vmem:[#allocation343_spill] sm:$0xff] %v11581_v47  ;;  %v3529_v28 = vadd.f32 %v3401_v4, %v3273_v35  ;;  %vm13675_vm11 = vcmp.lt.s32.totalorder %v11578_v53, %v10796_v44  ;;  %vm13671_vm5 = vcmp.lt.s32.totalorder %v11581_v47, %v10796_v44  ;;  %v15834_v4 = vld [vmem:[#allocation164_spill] sm:$0xff] }
 0x3cc   : > { %3656 = vst [vmem:[%s9499_s19 + $0x1f8] sm:$0xff] %v3528_v5  ;;  %v3402_v35 = vsel %vm13675_vm11, %v15833_v27, 0.0  ;;  %v3403_v60 = vsel %vm13671_vm5, %v9247_v42, 0.0  ;;  %vm13674_vm14 = vcmp.lt.s32.totalorder %v11590_v58, %v10796_v44  ;;  %vm13673_vm6 = vcmp.lt.s32.totalorder %v11593_v36, %v10796_v44  ;;  %v3278_v27 = vld [vmem:[%s9499_s19 + $0x228] sm:$0xff] }
 0x3cd   : > { %3657 = vst [vmem:[%s9499_s19 + $0x200] sm:$0xff] %v3529_v28  ;;  %v3530_v59 = vadd.f32 %v3402_v35, %v3274_v2  ;;  %v3531_v5 = vadd.f32 %v3403_v60, %v3275_v15  ;;  %v3404_v61 = vsel %vm13674_vm14, %v9251_v22, 0.0  ;;  %v3405_v42 = vsel %vm13673_vm6, %v15834_v4, 0.0 }
 0x3ce   : > { %v3532_v47 = vadd.f32 %v3404_v61, %v3276_v0  ;;  %v3533_v53 = vadd.f32 %v3405_v42, %v3277_v29  ;;  %vm13672_vm5 = vcmp.lt.s32.totalorder %v11602_v20, %v10796_v44  ;;  %v2893_v2 = vadd.s32 560, %v10793_v57  ;;  %v3281_v42 = vld [vmem:[%s9499_s19 + $0x240] sm:$0xff] }
 0x3cf   : > { %3658 = vst [vmem:[%s9499_s19 + $0x208] sm:$0xff] %v3530_v59  ;;  %3659 = vst [vmem:[%s9499_s19 + $0x210] sm:$0xff] %v3531_v5  ;;  %v3406_v22 = vsel %vm13672_vm5, %v9259_v62, 0.0  ;;  %v2894_v15 = vadd.s32 568, %v10793_v57  ;;  %v2895_v28 = vadd.s32 576, %v10793_v57  ;;  %v2896_v0 = vadd.s32 584, %v10793_v57 }
 0x3d0   : > { %3660 = vst [vmem:[%s9499_s19 + $0x218] sm:$0xff] %v3532_v47  ;;  %3661 = vst [vmem:[%s9499_s19 + $0x220] sm:$0xff] %v3533_v53  ;;  %v3534_v29 = vadd.f32 %v3406_v22, %v3278_v27  ;;  %v11642_v35 = vadd.s32 %v10791_v30, %v2893_v2  ;;  %v2897_v60 = vadd.s32 592, %v10793_v57  ;;  %v2898_v59 = vadd.s32 600, %v10793_v57  ;;  %v3279_v62 = vld [vmem:[%s9499_s19 + $0x230] sm:$0xff]  ;;  %v3280_v47 = vld [vmem:[%s9499_s19 + $0x238] sm:$0xff] }
 0x3d1   : > { %v11648_v5 = vadd.s32 %v10791_v30, %v2894_v15  ;;  %v11651_v61 = vadd.s32 %v10791_v30, %v2895_v28  ;;  %v11654_v4 = vadd.s32 %v10791_v30, %v2896_v0  ;;  %v2899_v53 = vadd.s32 608, %v10793_v57  ;;  %v3282_v27 = vld [vmem:[%s9499_s19 + $0x248] sm:$0xff] }
 0x3d2   : > { %15835 = vst [vmem:[#allocation344_spill] sm:$0xff] %v11642_v35  ;;  %3662 = vst [vmem:[%s9499_s19 + $0x228] sm:$0xff] %v3534_v29  ;;  %vm13720_vm5 = vcmp.lt.s32.totalorder %v11642_v35, %v10796_v44  ;;  %v11664_v2 = vadd.s32 %v10791_v30, %v2897_v60  ;;  %v11667_v22 = vadd.s32 %v10791_v30, %v2898_v59  ;;  %v2900_v15 = vadd.s32 616, %v10793_v57  ;;  %v3283_v59 = vld [vmem:[%s9499_s19 + $0x250] sm:$0xff] }
 0x3d3   : > { %v3407_v28 = vsel %vm13720_vm5, %v9263_v17, 0.0  ;;  %vm13677_vm6 = vcmp.lt.s32.totalorder %v11648_v5, %v10796_v44  ;;  %vm13678_vm14 = vcmp.lt.s32.totalorder %v11651_v61, %v10796_v44  ;;  %vm13680_vm11 = vcmp.lt.s32.totalorder %v11654_v4, %v10796_v44 }
 0x3d4   : > { %v3535_v0 = vadd.f32 %v3407_v28, %v3279_v62  ;;  %v3408_v29 = vsel %vm13677_vm6, %v9267_v3, 0.0  ;;  %v3409_v17 = vsel %vm13678_vm14, %v9271_v41, 0.0  ;;  %v3410_v60 = vsel %vm13680_vm11, %v9275_v33, 0.0  ;;  %v3284_v3 = vld [vmem:[%s9499_s19 + $0x258] sm:$0xff] }
 0x3d5   : > { %v3536_v62 = vadd.f32 %v3408_v29, %v3280_v47  ;;  %v3537_v28 = vadd.f32 %v3409_v17, %v3281_v42  ;;  %v3538_v35 = vadd.f32 %v3410_v60, %v3282_v27  ;;  %vm13679_vm6 = vcmp.lt.s32.totalorder %v11664_v2, %v10796_v44  ;;  %v3285_v27 = vld [vmem:[%s9499_s19 + $0x260] sm:$0xff] }
 0x3d6   : > { %3663 = vst [vmem:[%s9499_s19 + $0x230] sm:$0xff] %v3535_v0  ;;  %v3411_v41 = vsel %vm13679_vm6, %v9279_v11, 0.0  ;;  %vm13683_vm14 = vcmp.lt.s32.totalorder %v11667_v22, %v10796_v44  ;;  %v11704_v33 = vadd.s32 %v10791_v30, %v2899_v53  ;;  %v11707_v47 = vadd.s32 %v10791_v30, %v2900_v15  ;;  %v3286_v0 = vld [vmem:[%s9499_s19 + $0x268] sm:$0xff] }
 0x3d7   : > { %3664 = vst [vmem:[%s9499_s19 + $0x238] sm:$0xff] %v3536_v62  ;;  %3665 = vst [vmem:[%s9499_s19 + $0x240] sm:$0xff] %v3537_v28  ;;  %v3539_v42 = vadd.f32 %v3411_v41, %v3283_v59  ;;  %v3412_v11 = vsel %vm13683_vm14, %v9283_v34, 0.0  ;;  %v2901_v53 = vadd.s32 624, %v10793_v57  ;;  %v2902_v29 = vadd.s32 632, %v10793_v57  ;;  %v3288_v41 = vld [vmem:[%s9499_s19 + $0x278] sm:$0xff] }
 0x3d8   : > { %3666 = vst [vmem:[%s9499_s19 + $0x248] sm:$0xff] %v3538_v35  ;;  %v3540_v15 = vadd.f32 %v3412_v11, %v3284_v3  ;;  %vm13682_vm6 = vcmp.lt.s32.totalorder %v11704_v33, %v10796_v44  ;;  %vm13681_vm11 = vcmp.lt.s32.totalorder %v11707_v47, %v10796_v44  ;;  %v2903_v35 = vadd.s32 640, %v10793_v57  ;;  %v3287_v3 = vld [vmem:[%s9499_s19 + $0x270] sm:$0xff] }
 0x3d9   : > { %3667 = vst [vmem:[%s9499_s19 + $0x250] sm:$0xff] %v3539_v42  ;;  %v3413_v34 = vsel %vm13682_vm6, %v9287_v63, 0.0  ;;  %v3414_v17 = vsel %vm13681_vm11, %v9291_v54, 0.0  ;;  %v11735_v60 = vadd.s32 %v10791_v30, %v2901_v53  ;;  %v11738_v59 = vadd.s32 %v10791_v30, %v2902_v29  ;;  %v3289_v54 = vld [vmem:[%s9499_s19 + $0x280] sm:$0xff] }
 0x3da   : > { %3668 = vst [vmem:[%s9499_s19 + $0x258] sm:$0xff] %v3540_v15  ;;  %v3541_v62 = vadd.f32 %v3413_v34, %v3285_v27  ;;  %v3542_v28 = vadd.f32 %v3414_v17, %v3286_v0  ;;  %v11744_v63 = vadd.s32 %v10791_v30, %v2903_v35  ;;  %v2904_v42 = vadd.s32 648, %v10793_v57  ;;  %v3290_v34 = vld [vmem:[%s9499_s19 + $0x288] sm:$0xff] }
 0x3db   : > { %vm13689_vm11 = vcmp.lt.s32.totalorder %v11735_v60, %v10796_v44  ;;  %vm13684_vm6 = vcmp.lt.s32.totalorder %v11738_v59, %v10796_v44  ;;  %v2905_v11 = vadd.s32 656, %v10793_v57  ;;  %v2906_v27 = vadd.s32 664, %v10793_v57 }
 0x3dc   : > { %3669 = vst [vmem:[%s9499_s19 + $0x260] sm:$0xff] %v3541_v62  ;;  %3670 = vst [vmem:[%s9499_s19 + $0x268] sm:$0xff] %v3542_v28  ;;  %v3415_v0 = vsel %vm13689_vm11, %v9295_v1, 0.0  ;;  %v3416_v53 = vsel %vm13684_vm6, %v9299_v6, 0.0  ;;  %vm13685_vm14 = vcmp.lt.s32.totalorder %v11744_v63, %v10796_v44  ;;  %v11767_v29 = vadd.s32 %v10791_v30, %v2904_v42  ;;  %v3291_v62 = vld [vmem:[%s9499_s19 + $0x290] sm:$0xff] }
 0x3dd   : > { %v3543_v15 = vadd.f32 %v3415_v0, %v3287_v3  ;;  %v3544_v35 = vadd.f32 %v3416_v53, %v3288_v41  ;;  %v3417_v1 = vsel %vm13685_vm14, %v9303_v43, 0.0  ;;  %v11775_v17 = vadd.s32 %v10791_v30, %v2905_v11  ;;  %v3292_v41 = vld [vmem:[%s9499_s19 + $0x298] sm:$0xff] }
 0x3de   : > { %v3545_v6 = vadd.f32 %v3417_v1, %v3289_v54  ;;  %vm13686_vm6 = vcmp.lt.s32.totalorder %v11767_v29, %v10796_v44  ;;  %v11781_v28 = vadd.s32 %v10791_v30, %v2906_v27  ;;  %v2907_v3 = vadd.s32 672, %v10793_v57 }
 0x3df   : > { %3671 = vst [vmem:[%s9499_s19 + $0x270] sm:$0xff] %v3543_v15  ;;  %3672 = vst [vmem:[%s9499_s19 + $0x278] sm:$0xff] %v3544_v35  ;;  %v3418_v43 = vsel %vm13686_vm6, %v9307_v38, 0.0  ;;  %vm13687_vm14 = vcmp.lt.s32.totalorder %v11775_v17, %v10796_v44  ;;  %v2908_v42 = vadd.s32 680, %v10793_v57  ;;  %v2909_v54 = vadd.s32 688, %v10793_v57  ;;  %v3293_v15 = vld [vmem:[%s9499_s19 + $0x2a0] sm:$0xff] }
 0x3e0   : > { %3673 = vst [vmem:[%s9499_s19 + $0x280] sm:$0xff] %v3545_v6  ;;  %v3546_v11 = vadd.f32 %v3418_v43, %v3290_v34  ;;  %v3419_v27 = vsel %vm13687_vm14, %v9311_v25, 0.0  ;;  %vm13688_vm6 = vcmp.lt.s32.totalorder %v11781_v28, %v10796_v44  ;;  %v11803_v38 = vadd.s32 %v10791_v30, %v2907_v3  ;;  %v3294_v34 = vld [vmem:[%s9499_s19 + $0x2a8] sm:$0xff]  ;;  %v3295_v6 = vld [vmem:[%s9499_s19 + $0x2b0] sm:$0xff] }
 0x3e1   : > { %v3547_v0 = vadd.f32 %v3419_v27, %v3291_v62  ;;  %v3420_v53 = vsel %vm13688_vm6, %v9315_v23, 0.0  ;;  %v11811_v35 = vadd.s32 %v10791_v30, %v2908_v42  ;;  %v11814_v1 = vadd.s32 %v10791_v30, %v2909_v54 }
 0x3e2   : > { %3674 = vst [vmem:[%s9499_s19 + $0x288] sm:$0xff] %v3546_v11  ;;  %v3548_v25 = vadd.f32 %v3420_v53, %v3292_v41  ;;  %vm13692_vm14 = vcmp.lt.s32.totalorder %v11803_v38, %v10796_v44  ;;  %v2910_v62 = vadd.s32 696, %v10793_v57  ;;  %v2911_v23 = vadd.s32 704, %v10793_v57 }
 0x3e3   : > { %3675 = vst [vmem:[%s9499_s19 + $0x290] sm:$0xff] %v3547_v0  ;;  %v3421_v3 = vsel %vm13692_vm14, %v9319_v9, 0.0  ;;  %vm13690_vm6 = vcmp.lt.s32.totalorder %v11811_v35, %v10796_v44  ;;  %vm13691_vm11 = vcmp.lt.s32.totalorder %v11814_v1, %v10796_v44  ;;  %v2912_v43 = vadd.s32 712, %v10793_v57  ;;  %v3296_v0 = vld [vmem:[%s9499_s19 + $0x2b8] sm:$0xff] }
 0x3e4   : > { %3676 = vst [vmem:[%s9499_s19 + $0x298] sm:$0xff] %v3548_v25  ;;  %v3549_v41 = vadd.f32 %v3421_v3, %v3293_v15  ;;  %v3422_v42 = vsel %vm13690_vm6, %v9323_v10, 0.0  ;;  %v3423_v9 = vsel %vm13691_vm11, %v9327_v51, 0.0  ;;  %v11843_v54 = vadd.s32 %v10791_v30, %v2910_v62  ;;  %v3297_v10 = vld [vmem:[%s9499_s19 + $0x2c0] sm:$0xff]  ;;  %v3298_v25 = vld [vmem:[%s9499_s19 + $0x2c8] sm:$0xff] }
 0x3e5   : > { %v3550_v11 = vadd.f32 %v3422_v42, %v3294_v34  ;;  %v3551_v27 = vadd.f32 %v3423_v9, %v3295_v6  ;;  %v11847_v53 = vadd.s32 %v10791_v30, %v2911_v23  ;;  %v11850_v15 = vadd.s32 %v10791_v30, %v2912_v43 }
 0x3e6   : > { %3677 = vst [vmem:[%s9499_s19 + $0x2a0] sm:$0xff] %v3549_v41  ;;  %vm13695_vm6 = vcmp.lt.s32.totalorder %v11843_v54, %v10796_v44  ;;  %v2913_v51 = vadd.s32 720, %v10793_v57  ;;  %v2914_v62 = vadd.s32 728, %v10793_v57  ;;  %v2915_v34 = vadd.s32 736, %v10793_v57 }
 0x3e7   : > { %3678 = vst [vmem:[%s9499_s19 + $0x2a8] sm:$0xff] %v3550_v11  ;;  %3679 = vst [vmem:[%s9499_s19 + $0x2b0] sm:$0xff] %v3551_v27  ;;  %v3424_v6 = vsel %vm13695_vm6, %v9331_v21, 0.0  ;;  %vm13693_vm11 = vcmp.lt.s32.totalorder %v11847_v53, %v10796_v44  ;;  %vm13694_vm14 = vcmp.lt.s32.totalorder %v11850_v15, %v10796_v44  ;;  %v2916_v23 = vadd.s32 744, %v10793_v57  ;;  %v3299_v11 = vld [vmem:[%s9499_s19 + $0x2d0] sm:$0xff] }
 0x3e8   : > { %v3552_v3 = vadd.f32 %v3424_v6, %v3296_v0  ;;  %v3425_v43 = vsel %vm13693_vm11, %v9335_v52, 0.0  ;;  %v3426_v21 = vsel %vm13694_vm14, %v9339_v24, 0.0  ;;  %v11880_v41 = vadd.s32 %v10791_v30, %v2913_v51  ;;  %v3300_v52 = vld [vmem:[%s9499_s19 + $0x2d8] sm:$0xff]  ;;  %v3301_v6 = vld [vmem:[%s9499_s19 + $0x2e0] sm:$0xff] }
 0x3e9   : > { %v3553_v42 = vadd.f32 %v3425_v43, %v3297_v10  ;;  %v3554_v9 = vadd.f32 %v3426_v21, %v3298_v25  ;;  %v11884_v27 = vadd.s32 %v10791_v30, %v2914_v62  ;;  %v11887_v0 = vadd.s32 %v10791_v30, %v2915_v34  ;;  %v3302_v62 = vld [vmem:[%s9499_s19 + $0x2e8] sm:$0xff] }
 0x3ea   : > { %3680 = vst [vmem:[%s9499_s19 + $0x2b8] sm:$0xff] %v3552_v3  ;;  %vm13696_vm11 = vcmp.lt.s32.totalorder %v11880_v41, %v10796_v44  ;;  %v11895_v24 = vadd.s32 %v10791_v30, %v2916_v23  ;;  %v2917_v10 = vadd.s32 752, %v10793_v57  ;;  %v2918_v25 = vadd.s32 760, %v10793_v57 }
 0x3eb   : > { %3681 = vst [vmem:[%s9499_s19 + $0x2c0] sm:$0xff] %v3553_v42  ;;  %3682 = vst [vmem:[%s9499_s19 + $0x2c8] sm:$0xff] %v3554_v9  ;;  %v3427_v51 = vsel %vm13696_vm11, %v9343_v13, 0.0  ;;  %vm13699_vm14 = vcmp.lt.s32.totalorder %v11884_v27, %v10796_v44  ;;  %vm13698_vm6 = vcmp.lt.s32.totalorder %v11887_v0, %v10796_v44  ;;  %v2919_v34 = vadd.s32 768, %v10793_v57 }
 0x3ec   : > { %v3555_v23 = vadd.f32 %v3427_v51, %v3299_v11  ;;  %v3428_v3 = vsel %vm13699_vm14, %v9347_v45, 0.0  ;;  %v3429_v13 = vsel %vm13698_vm6, %v9351_v32, 0.0  ;;  %vm13697_vm11 = vcmp.lt.s32.totalorder %v11895_v24, %v10796_v44  ;;  %v3303_v11 = vld [vmem:[%s9499_s19 + $0x2f0] sm:$0xff] }
 0x3ed   : > { %v3556_v43 = vadd.f32 %v3428_v3, %v3300_v52  ;;  %v3557_v21 = vadd.f32 %v3429_v13, %v3301_v6  ;;  %v3430_v42 = vsel %vm13697_vm11, %v9355_v16, 0.0  ;;  %v11926_v45 = vadd.s32 %v10791_v30, %v2917_v10  ;;  %v3304_v16 = vld [vmem:[%s9499_s19 + $0x2f8] sm:$0xff]  ;;  %v3305_v6 = vld [vmem:[%s9499_s19 + $0x300] sm:$0xff] }
 0x3ee   : > { %3683 = vst [vmem:[%s9499_s19 + $0x2d0] sm:$0xff] %v3555_v23  ;;  %v3558_v9 = vadd.f32 %v3430_v42, %v3302_v62  ;;  %v11931_v32 = vadd.s32 %v10791_v30, %v2918_v25  ;;  %v11934_v51 = vadd.s32 %v10791_v30, %v2919_v34  ;;  %v2920_v52 = vadd.s32 776, %v10793_v57 }
 0x3ef   : > { %3684 = vst [vmem:[%s9499_s19 + $0x2d8] sm:$0xff] %v3556_v43  ;;  %3685 = vst [vmem:[%s9499_s19 + $0x2e0] sm:$0xff] %v3557_v21  ;;  %vm13700_vm11 = vcmp.lt.s32.totalorder %v11926_v45, %v10796_v44  ;;  %v2921_v10 = vadd.s32 784, %v10793_v57  ;;  %v2922_v62 = vadd.s32 792, %v10793_v57  ;;  %v2923_v25 = vadd.s32 800, %v10793_v57  ;;  %v3306_v43 = vld [vmem:[%s9499_s19 + $0x308] sm:$0xff] }
 0x3f0   : > { %3686 = vst [vmem:[%s9499_s19 + $0x2e8] sm:$0xff] %v3558_v9  ;;  %v3431_v34 = vsel %vm13700_vm11, %v9359_v8, 0.0  ;;  %vm13703_vm6 = vcmp.lt.s32.totalorder %v11931_v32, %v10796_v44  ;;  %vm13701_vm14 = vcmp.lt.s32.totalorder %v11934_v51, %v10796_v44  ;;  %v11956_v23 = vadd.s32 %v10791_v30, %v2920_v52 }
 0x3f1   : > { %v3559_v3 = vadd.f32 %v3431_v34, %v3303_v11  ;;  %v3432_v13 = vsel %vm13703_vm6, %v9363_v19, 0.0  ;;  %v3433_v8 = vsel %vm13701_vm14, %v9367_v37, 0.0  ;;  %v11968_v21 = vadd.s32 %v10791_v30, %v2921_v10  ;;  %v3307_v11 = vld [vmem:[%s9499_s19 + $0x310] sm:$0xff]  ;;  %v3308_v37 = vld [vmem:[%s9499_s19 + $0x318] sm:$0xff] }
 0x3f2   : > { %v3560_v42 = vadd.f32 %v3432_v13, %v3304_v16  ;;  %v3561_v9 = vadd.f32 %v3433_v8, %v3305_v6  ;;  %vm13702_vm11 = vcmp.lt.s32.totalorder %v11956_v23, %v10796_v44  ;;  %v11974_v52 = vadd.s32 %v10791_v30, %v2922_v62  ;;  %v3309_v62 = vld [vmem:[%s9499_s19 + $0x320] sm:$0xff] }
 0x3f3   : > { %3687 = vst [vmem:[%s9499_s19 + $0x2f0] sm:$0xff] %v3559_v3  ;;  %v3434_v19 = vsel %vm13702_vm11, %v9371_v56, 0.0  ;;  %vm13708_vm14 = vcmp.lt.s32.totalorder %v11968_v21, %v10796_v44  ;;  %v11985_v16 = vadd.s32 %v10791_v30, %v2923_v25  ;;  %v2924_v6 = vadd.s32 808, %v10793_v57 }
 0x3f4   : > { %3688 = vst [vmem:[%s9499_s19 + $0x2f8] sm:$0xff] %v3560_v42  ;;  %3689 = vst [vmem:[%s9499_s19 + $0x300] sm:$0xff] %v3561_v9  ;;  %v3562_v10 = vadd.f32 %v3434_v19, %v3306_v43  ;;  %v3435_v56 = vsel %vm13708_vm14, %v9375_v12, 0.0  ;;  %vm13704_vm11 = vcmp.lt.s32.totalorder %v11974_v52, %v10796_v44  ;;  %v2925_v25 = vadd.s32 816, %v10793_v57  ;;  %v3310_v43 = vld [vmem:[%s9499_s19 + $0x328] sm:$0xff] }
 0x3f5   : > { %15836 = vst [vmem:[#allocation345_spill] sm:$0xff] %v11985_v16  ;;  %v3563_v34 = vadd.f32 %v3435_v56, %v3307_v11  ;;  %v3436_v3 = vsel %vm13704_vm11, %v9382_v31, 0.0  ;;  %vm13705_vm6 = vcmp.lt.s32.totalorder %v11985_v16, %v10796_v44  ;;  %v12005_v13 = vadd.s32 %v10791_v30, %v2924_v6  ;;  %v3311_v11 = vld [vmem:[%s9499_s19 + $0x330] sm:$0xff] }
 0x3f6   : > { %3690 = vst [vmem:[%s9499_s19 + $0x308] sm:$0xff] %v3562_v10  ;;  %v3564_v12 = vadd.f32 %v3436_v3, %v3308_v37  ;;  %v3437_v8 = vsel %vm13705_vm6, %v9386_v26, 0.0  ;;  %v12014_v42 = vadd.s32 %v10791_v30, %v2925_v25  ;;  %v2926_v31 = vadd.s32 824, %v10793_v57  ;;  %v3312_v25 = vld [vmem:[%s9499_s19 + $0x338] sm:$0xff] }
 0x3f7   : > { %15837 = vst [vmem:[#allocation346_spill] sm:$0xff] %v12005_v13  ;;  %3691 = vst [vmem:[%s9499_s19 + $0x310] sm:$0xff] %v3563_v34  ;;  %v3565_v9 = vadd.f32 %v3437_v8, %v3309_v62  ;;  %vm13706_vm11 = vcmp.lt.s32.totalorder %v12005_v13, %v10796_v44  ;;  %v2927_v19 = vadd.s32 832, %v10793_v57  ;;  %v2928_v37 = vadd.s32 840, %v10793_v57  ;;  %v3314_v8 = vld [vmem:[%s9499_s19 + $0x348] sm:$0xff]  ;;  %v3327_v13 = vld [vmem:[%s9499_s19 + $0x3b0] sm:$0xff] }
 0x3f8   : > { %15838 = vst [vmem:[#allocation347_spill] sm:$0xff] %v12014_v42  ;;  %3692 = vst [vmem:[%s9499_s19 + $0x318] sm:$0xff] %v3564_v12  ;;  %v3438_v26 = vsel %vm13706_vm11, %v9390_v18, 0.0  ;;  %vm13707_vm6 = vcmp.lt.s32.totalorder %v12014_v42, %v10796_v44  ;;  %v12031_v6 = vadd.s32 %v10791_v30, %v2926_v31  ;;  %v2929_v10 = vadd.s32 848, %v10793_v57  ;;  %v3313_v12 = vld [vmem:[%s9499_s19 + $0x340] sm:$0xff]  ;;  %v15846_v42 = vld [vmem:[#allocation190_spill] sm:$0xff] }
 0x3f9   : > { %3693 = vst [vmem:[%s9499_s19 + $0x320] sm:$0xff] %v3565_v9  ;;  %v3566_v56 = vadd.f32 %v3438_v26, %v3310_v43  ;;  %v3439_v62 = vsel %vm13707_vm6, %v9394_v40, 0.0  ;;  %v12041_v18 = vadd.s32 %v10791_v30, %v2927_v19  ;;  %v12044_v34 = vadd.s32 %v10791_v30, %v2928_v37  ;;  %v15843_v40 = vld [vmem:[#allocation268_spill] sm:$0xff]  ;;  %v15844_v26 = vld [vmem:[#allocation181_spill] sm:$0xff] }
 0x3fa   : > { %15839 = vst [vmem:[#allocation348_spill] sm:$0xff] %v12031_v6  ;;  %v3567_v3 = vadd.f32 %v3439_v62, %v3311_v11  ;;  %vm13709_vm11 = vcmp.lt.s32.totalorder %v12031_v6, %v10796_v44  ;;  %v12051_v43 = vadd.s32 %v10791_v30, %v2929_v10  ;;  %v2930_v31 = vadd.s32 856, %v10793_v57  ;;  %v3315_v11 = vld [vmem:[%s9499_s19 + $0x350] sm:$0xff] }
 0x3fb   : > { %15840 = vst [vmem:[#allocation349_spill] sm:$0xff] %v12041_v18  ;;  %15841 = vst [vmem:[#allocation350_spill] sm:$0xff] %v12044_v34  ;;  %v3440_v9 = vsel %vm13709_vm11, %v15843_v40, 0.0  ;;  %vm13718_vm6 = vcmp.lt.s32.totalorder %v12041_v18, %v10796_v44  ;;  %vm13714_vm14 = vcmp.lt.s32.totalorder %v12044_v34, %v10796_v44  ;;  %v2931_v19 = vadd.s32 864, %v10793_v57 }
 0x3fc   : > { %15842 = vst [vmem:[#allocation351_spill] sm:$0xff] %v12051_v43  ;;  %3694 = vst [vmem:[%s9499_s19 + $0x328] sm:$0xff] %v3566_v56  ;;  %v3568_v37 = vadd.f32 %v3440_v9, %v3312_v25  ;;  %v3441_v10 = vsel %vm13718_vm6, %v15844_v26, 0.0  ;;  %v15845_v56 = vld [vmem:[#allocation271_spill] sm:$0xff]  ;;  %vm13713_vm11 = vcmp.lt.s32.totalorder %v12051_v43, %v10796_v44 }
 0x3fd   : > { %3695 = vst [vmem:[%s9499_s19 + $0x330] sm:$0xff] %v3567_v3  ;;  %v3442_v62 = vsel %vm13714_vm14, %v15845_v56, 0.0  ;;  %v3569_v40 = vadd.f32 %v3441_v10, %v3313_v12  ;;  %v3443_v25 = vsel %vm13713_vm11, %v15846_v42, 0.0  ;;  %v12081_v3 = vadd.s32 %v10791_v30, %v2930_v31  ;;  %v3316_v26 = vld [vmem:[%s9499_s19 + $0x358] sm:$0xff]  ;;  %v3317_v42 = vld [vmem:[%s9499_s19 + $0x360] sm:$0xff] }
 0x3fe   : > { %v3570_v6 = vadd.f32 %v3442_v62, %v3314_v8  ;;  %3696 = vst [vmem:[%s9499_s19 + $0x338] sm:$0xff] %v3568_v37  ;;  %v3571_v9 = vadd.f32 %v3443_v25, %v3315_v11  ;;  %v12086_v34 = vadd.s32 %v10791_v30, %v2931_v19  ;;  %v2932_v56 = vadd.s32 872, %v10793_v57  ;;  %v15849_v19 = vld [vmem:[#allocation273_spill] sm:$0xff] }
 0x3ff   : > { %15847 = vst [vmem:[#allocation352_spill] sm:$0xff] %v12081_v3  ;;  %v2933_v12 = vadd.s32 880, %v10793_v57  ;;  %3697 = vst [vmem:[%s9499_s19 + $0x340] sm:$0xff] %v3569_v40  ;;  %vm13717_vm11 = vcmp.lt.s32.totalorder %v12081_v3, %v10796_v44  ;;  %v2934_v8 = vadd.s32 888, %v10793_v57  ;;  %v2935_v31 = vadd.s32 896, %v10793_v57  ;;  %v15852_v40 = vld [vmem:[#allocation199_spill] sm:$0xff] }
 0x400   : > { %15848 = vst [vmem:[#allocation353_spill] sm:$0xff] %v12086_v34  ;;  %3698 = vst [vmem:[%s9499_s19 + $0x348] sm:$0xff] %v3570_v6  ;;  %v2936_v11 = vadd.s32 904, %v10793_v57  ;;  %v3444_v37 = vsel %vm13717_vm11, %v15849_v19, 0.0  ;;  %vm13719_vm14 = vcmp.lt.s32.totalorder %v12086_v34, %v10796_v44  ;;  %v12106_v6 = vadd.s32 %v10791_v30, %v2932_v56  ;;  %v3319_v3 = vld [vmem:[%s9499_s19 + $0x370] sm:$0xff] }
 0x401   : > { %3699 = vst [vmem:[%s9499_s19 + $0x350] sm:$0xff] %v3571_v9  ;;  %v12109_v10 = vadd.s32 %v10791_v30, %v2933_v12  ;;  %v3572_v62 = vadd.f32 %v3444_v37, %v3316_v26  ;;  %v3445_v25 = vsel %vm13719_vm14, %v15852_v40, 0.0  ;;  %v3318_v9 = vld [vmem:[%s9499_s19 + $0x368] sm:$0xff]  ;;  %v12118_v19 = vadd.s32 %v10791_v30, %v2934_v8  ;;  %v3320_v26 = vld [vmem:[%s9499_s19 + $0x378] sm:$0xff]  ;;  %v3321_v12 = vld [vmem:[%s9499_s19 + $0x380] sm:$0xff] }
 0x402   : > { %15850 = vst [vmem:[#allocation354_spill] sm:$0xff] %v12106_v6  ;;  %v12121_v43 = vadd.s32 %v10791_v30, %v2935_v31  ;;  %v3573_v56 = vadd.f32 %v3445_v25, %v3317_v42  ;;  %vm13729_vm11 = vcmp.lt.s32.totalorder %v12106_v6, %v10796_v44  ;;  %v12130_v37 = vadd.s32 %v10791_v30, %v2936_v11  ;;  %v15856_v8 = vld [vmem:[#allocation275_spill] sm:$0xff]  ;;  %v15857_v31 = vld [vmem:[#allocation208_spill] sm:$0xff] }
 0x403   : > { %15851 = vst [vmem:[#allocation355_spill] sm:$0xff] %v12109_v10  ;;  %15853 = vst [vmem:[#allocation356_spill] sm:$0xff] %v12118_v19  ;;  %vm13725_vm6 = vcmp.lt.s32.totalorder %v12109_v10, %v10796_v44  ;;  %v3446_v42 = vsel %vm13729_vm11, %v15856_v8, 0.0  ;;  %vm13728_vm14 = vcmp.lt.s32.totalorder %v12118_v19, %v10796_v44  ;;  %v15858_v25 = vld [vmem:[#allocation236_spill] sm:$0xff]  ;;  %v3322_v10 = vld [vmem:[%s9499_s19 + $0x388] sm:$0xff] }
 0x404   : > { %15854 = vst [vmem:[#allocation357_spill] sm:$0xff] %v12121_v43  ;;  %15855 = vst [vmem:[#allocation358_spill] sm:$0xff] %v12130_v37  ;;  %v3447_v40 = vsel %vm13725_vm6, %v15857_v31, 0.0  ;;  %vm13727_vm5 = vcmp.lt.s32.totalorder %v12121_v43, %v10796_v44  ;;  %v3574_v11 = vadd.f32 %v3446_v42, %v3318_v9  ;;  %v3448_v8 = vsel %vm13728_vm14, %v15858_v25, 0.0  ;;  %v15859_v6 = vld [vmem:[#allocation216_spill] sm:$0xff]  ;;  %v3323_v25 = vld [vmem:[%s9499_s19 + $0x390] sm:$0xff] }
 0x405   : > { %3700 = vst [vmem:[%s9499_s19 + $0x358] sm:$0xff] %v3572_v62  ;;  %3701 = vst [vmem:[%s9499_s19 + $0x360] sm:$0xff] %v3573_v56  ;;  %v3575_v62 = vadd.f32 %v3447_v40, %v3319_v3  ;;  %v3449_v31 = vsel %vm13727_vm5, %v15859_v6, 0.0  ;;  %v3576_v34 = vadd.f32 %v3448_v8, %v3320_v26  ;;  %vm13726_vm6 = vcmp.lt.s32.totalorder %v12130_v37, %v10796_v44  ;;  %v15860_v3 = vld [vmem:[#allocation237_spill] sm:$0xff]  ;;  %v15869_v43 = vld [vmem:[#allocation232_spill] sm:$0xff] }
 0x406   : > { %v3577_v18 = vadd.f32 %v3449_v31, %v3321_v12  ;;  %v2937_v9 = vadd.s32 912, %v10793_v57  ;;  %3702 = vst [vmem:[%s9499_s19 + $0x368] sm:$0xff] %v3574_v11  ;;  %v3450_v56 = vsel %vm13726_vm6, %v15860_v3, 0.0  ;;  %v2938_v42 = vadd.s32 920, %v10793_v57 }
 0x407   : > { %3703 = vst [vmem:[%s9499_s19 + $0x370] sm:$0xff] %v3575_v62  ;;  %v2939_v6 = vadd.s32 928, %v10793_v57  ;;  %v2940_v26 = vadd.s32 936, %v10793_v57  ;;  %3704 = vst [vmem:[%s9499_s19 + $0x378] sm:$0xff] %v3576_v34  ;;  %v3578_v12 = vadd.f32 %v3450_v56, %v3322_v10  ;;  %v2941_v11 = vadd.s32 944, %v10793_v57  ;;  %v3324_v34 = vld [vmem:[%s9499_s19 + $0x398] sm:$0xff] }
 0x408   : > { %3705 = vst [vmem:[%s9499_s19 + $0x380] sm:$0xff] %v3577_v18  ;;  %v12170_v40 = vadd.s32 %v10791_v30, %v2937_v9  ;;  %v2942_v62 = vadd.s32 952, %v10793_v57  ;;  %v12176_v8 = vadd.s32 %v10791_v30, %v2938_v42  ;;  %v2943_v18 = vadd.s32 960, %v10793_v57  ;;  %v3325_v10 = vld [vmem:[%s9499_s19 + $0x3a0] sm:$0xff]  ;;  %v3326_v9 = vld [vmem:[%s9499_s19 + $0x3a8] sm:$0xff] }
 0x409   : > { %v12179_v31 = vadd.s32 %v10791_v30, %v2939_v6  ;;  %v12182_v3 = vadd.s32 %v10791_v30, %v2940_v26  ;;  %3706 = vst [vmem:[%s9499_s19 + $0x388] sm:$0xff] %v3578_v12  ;;  %v12192_v56 = vadd.s32 %v10791_v30, %v2941_v11  ;;  %v2944_v6 = vadd.s32 968, %v10793_v57  ;;  %v15867_v26 = vld [vmem:[#allocation224_spill] sm:$0xff] }
 0x40a   : > { %15861 = vst [vmem:[#allocation359_spill] sm:$0xff] %v12170_v40  ;;  %15862 = vst [vmem:[#allocation360_spill] sm:$0xff] %v12176_v8  ;;  %vm3195_vm6 = vcmp.lt.s32.totalorder %v12170_v40, %v10796_v44  ;;  %v12195_v42 = vadd.s32 %v10791_v30, %v2942_v62  ;;  %vm13736_vm5 = vcmp.lt.s32.totalorder %v12176_v8, %v10796_v44  ;;  %v15868_v62 = vld [vmem:[#allocation238_spill] sm:$0xff]  ;;  %v15870_v40 = vld [vmem:[#allocation277_spill] sm:$0xff] }
 0x40b   : > { %15863 = vst [vmem:[#allocation361_spill] sm:$0xff] %v12179_v31  ;;  %15864 = vst [vmem:[#allocation362_spill] sm:$0xff] %v12182_v3  ;;  %v3451_v12 = vsel %vm3195_vm6, %v15867_v26, 0.0  ;;  %vm13738_vm14 = vcmp.lt.s32.totalorder %v12179_v31, %v10796_v44  ;;  %vm13740_vm11 = vcmp.lt.s32.totalorder %v12182_v3, %v10796_v44  ;;  %v3452_v37 = vsel %vm13736_vm5, %v15868_v62, 0.0  ;;  %v3328_v62 = vld [vmem:[%s9499_s19 + $0x3b8] sm:$0xff]  ;;  %v15871_v8 = vld [vmem:[#allocation240_spill] sm:$0xff] }
 0x40c   : > { %15865 = vst [vmem:[#allocation363_spill] sm:$0xff] %v12192_v56  ;;  %15866 = vst [vmem:[#allocation364_spill] sm:$0xff] %v12195_v42  ;;  %v3579_v11 = vadd.f32 %v3451_v12, %v3323_v25  ;;  %v3453_v26 = vsel %vm13738_vm14, %v15869_v43, 0.0  ;;  %v3454_v19 = vsel %vm13740_vm11, %v15870_v40, 0.0  ;;  %v3580_v25 = vadd.f32 %v3452_v37, %v3324_v34  ;;  %v15874_v34 = vld [vmem:[#allocation278_spill] sm:$0xff] }
 0x40d   : > { %v3581_v12 = vadd.f32 %v3453_v26, %v3325_v10  ;;  %v3582_v16 = vadd.f32 %v3454_v19, %v3326_v9  ;;  %vm13739_vm5 = vcmp.lt.s32.totalorder %v12192_v56, %v10796_v44  ;;  %vm13745_vm14 = vcmp.lt.s32.totalorder %v12195_v42, %v10796_v44  ;;  %v3329_v10 = vld [vmem:[%s9499_s19 + $0x3c0] sm:$0xff]  ;;  %v3330_v9 = vld [vmem:[%s9499_s19 + $0x3c8] sm:$0xff]  ;;  %v15898_v56 = vld [vmem:[#allocation26_spill] sm:$0xff] }
 0x40e   : > { %3707 = vst [vmem:[%s9499_s19 + $0x390] sm:$0xff] %v3579_v11  ;;  %v3455_v43 = vsel %vm13739_vm5, %v15871_v8, 0.0  ;;  %v12232_v40 = vadd.s32 %v10791_v30, %v2943_v18  ;;  %v12235_v37 = vadd.s32 %v10791_v30, %v2944_v6  ;;  %3708 = vst [vmem:[%s9499_s19 + $0x398] sm:$0xff] %v3580_v25  ;;  %v3456_v8 = vsel %vm13745_vm14, %v15874_v34, 0.0  ;;  %v15876_v25 = vld [vmem:[#allocation279_spill] sm:$0xff] }
 0x40f   : > { %3709 = vst [vmem:[%s9499_s19 + $0x3a0] sm:$0xff] %v3581_v12  ;;  %3710 = vst [vmem:[%s9499_s19 + $0x3a8] sm:$0xff] %v3582_v16  ;;  %v3583_v19 = vadd.f32 %v3455_v43, %v3327_v13  ;;  %v2945_v18 = vadd.s32 976, %v10793_v57  ;;  %v2946_v11 = vadd.s32 984, %v10793_v57  ;;  %v3584_v6 = vadd.f32 %v3456_v8, %v3328_v62  ;;  %v15875_v13 = vld [vmem:[#allocation241_spill] sm:$0xff]  ;;  %v3331_v8 = vld [vmem:[%s9499_s19 + $0x3d0] sm:$0xff] }
 0x410   : > { %15872 = vst [vmem:[#allocation365_spill] sm:$0xff] %v12232_v40  ;;  %15873 = vst [vmem:[#allocation366_spill] sm:$0xff] %v12235_v37  ;;  %vm13744_vm5 = vcmp.lt.s32.totalorder %v12232_v40, %v10796_v44  ;;  %vm13743_vm11 = vcmp.lt.s32.totalorder %v12235_v37, %v10796_v44  ;;  %v2947_v16 = vadd.s32 992, %v10793_v57  ;;  %v3332_v40 = vld [vmem:[%s9499_s19 + $0x3d8] sm:$0xff]  ;;  %v2948_v37 = vadd.s32 1000, %v10793_v57 }
 0x411   : > { %3711 = vst [vmem:[%s9499_s19 + $0x3b0] sm:$0xff] %v3583_v19  ;;  %v3457_v26 = vsel %vm13744_vm5, %v15875_v13, 0.0  ;;  %v3458_v12 = vsel %vm13743_vm11, %v15876_v25, 0.0  ;;  %v12263_v62 = vadd.s32 %v10791_v30, %v2945_v18  ;;  %v12266_v43 = vadd.s32 %v10791_v30, %v2946_v11  ;;  %3712 = vst [vmem:[%s9499_s19 + $0x3b8] sm:$0xff] %v3584_v6  ;;  %v3333_v18 = vld [vmem:[%s9499_s19 + $0x3e0] sm:$0xff]  ;;  %v15880_v11 = vld [vmem:[#allocation254_spill] sm:$0xff] }
 0x412   : > { %v3585_v19 = vadd.f32 %v3457_v26, %v3329_v10  ;;  %v3586_v34 = vadd.f32 %v3458_v12, %v3330_v9  ;;  %v12272_v13 = vadd.s32 %v10791_v30, %v2947_v16  ;;  %v2949_v10 = vadd.s32 1008, %v10793_v57  ;;  %v15881_v16 = vld [vmem:[#allocation280_spill] sm:$0xff] }
 0x413   : > { %15877 = vst [vmem:[#allocation367_spill] sm:$0xff] %v12263_v62  ;;  %15878 = vst [vmem:[#allocation368_spill] sm:$0xff] %v12266_v43  ;;  %vm3203_vm11 = vcmp.lt.s32.totalorder %v12263_v62, %v10796_v44  ;;  %vm13749_vm5 = vcmp.lt.s32.totalorder %v12266_v43, %v10796_v44  ;;  %v2950_v9 = vadd.s32 1016, %v10793_v57  ;;  %v12295_v57 = vadd.s32 %v10791_v30, %v2948_v37  ;;  %v3721_v25 = vld [vmem:[%s9759_s23] sm:$0xff]  ;;  %v3334_v43 = vld [vmem:[%s9499_s19 + $0x3e8] sm:$0xff] }
 0x414   : > { %15879 = vst [vmem:[#allocation369_spill] sm:$0xff] %v12272_v13  ;;  %3713 = vst [vmem:[%s9499_s19 + $0x3c0] sm:$0xff] %v3585_v19  ;;  %v3459_v6 = vsel %vm3203_vm11, %v15880_v11, 0.0  ;;  %v3460_v26 = vsel %vm13749_vm5, %v15881_v16, 0.0  ;;  %vm13750_vm14 = vcmp.lt.s32.totalorder %v12272_v13, %v10796_v44  ;;  %v12304_v16 = vadd.s32 %v10791_v30, %v2949_v10  ;;  %v3722_v62 = vld [vmem:[%s9759_s23 + $0x8] sm:$0xff]  ;;  %v3335_v37 = vld [vmem:[%s9499_s19 + $0x3f0] sm:$0xff] }
 0x415   : > { %3714 = vst [vmem:[%s9499_s19 + $0x3c8] sm:$0xff] %v3586_v34  ;;  %15882 = vst [vmem:[#allocation370_spill] sm:$0xff] %v12295_v57  ;;  %v3587_v12 = vadd.f32 %v3459_v6, %v3331_v8  ;;  %v3588_v19 = vadd.f32 %v3460_v26, %v3332_v40  ;;  %v15883_v34 = vld [vmem:[#allocation258_spill] sm:$0xff]  ;;  %vm3206_vm5 = vcmp.lt.s32.totalorder %v12295_v57, %v10796_v44  ;;  %v15886_v8 = vld [vmem:[#allocation21_spill] sm:$0xff] }
 0x416   : > { %v3461_v11 = vsel %vm13750_vm14, %v15883_v34, 0.0  ;;  %15884 = vst [vmem:[#allocation371_spill] sm:$0xff] %v12304_v16  ;;  %v12311_v40 = vadd.s32 %v10791_v30, %v2950_v9  ;;  %v3849_v26 = vsel %vm3081_vm7, %v15886_v8, 0.0  ;;  %v15888_v10 = vld [vmem:[#allocation282_spill] sm:$0xff]  ;;  %vm3207_vm14 = vcmp.lt.s32.totalorder %v12304_v16, %v10796_v44  ;;  %v3336_v34 = vld [vmem:[%s9499_s19 + $0x3f8] sm:$0xff] }
 0x417   : > { %v3589_v42 = vadd.f32 %v3461_v11, %v3333_v18  ;;  %3715 = vst [vmem:[%s9499_s19 + $0x3d0] sm:$0xff] %v3587_v12  ;;  %3716 = vst [vmem:[%s9499_s19 + $0x3d8] sm:$0xff] %v3588_v19  ;;  %v3462_v18 = vsel %vm3206_vm5, %v15888_v10, 0.0  ;;  %v3977_v30 = vadd.f32 %v3849_v26, %v3721_v25  ;;  %v15889_v9 = vld [vmem:[#allocation22_spill] sm:$0xff]  ;;  %v3724_v19 = vld [vmem:[%s9759_s23 + $0x18] sm:$0xff] }
 0x418   : > { %15885 = vst [vmem:[#allocation372_spill] sm:$0xff] %v12311_v40  ;;  %v3850_v8 = vsel %vm3082_vm9, %v15889_v9, 0.0  ;;  %v3723_v12 = vld [vmem:[%s9759_s23 + $0x10] sm:$0xff]  ;;  %v3590_v6 = vadd.f32 %v3462_v18, %v3334_v43  ;;  %vm3208_vm7 = vcmp.lt.s32.totalorder %v12311_v40, %v10796_v44  ;;  %v3725_v26 = vld [vmem:[%s9759_s23 + $0x20] sm:$0xff]  ;;  %v15893_v43 = vld [vmem:[#allocation23_spill] sm:$0xff] }
 0x419   : > { %3717 = vst [vmem:[%s9499_s19 + $0x3e0] sm:$0xff] %v3589_v42  ;;  %v15891_v10 = vld [vmem:[#allocation262_spill] sm:$0xff]  ;;  %v3978_v25 = vadd.f32 %v3850_v8, %v3722_v62  ;;  %v15892_v11 = vld [vmem:[#allocation284_spill] sm:$0xff]  ;;  %4105 = vst [vmem:[%s9759_s23] sm:$0xff] %v3977_v30  ;;  %v3851_v16 = vsel %vm3083_vm10, %v15893_v43, 0.0 }
 0x41a   : > { %v3463_v57 = vsel %vm3207_vm14, %v15891_v10, 0.0  ;;  %v3464_v42 = vsel %vm3208_vm7, %v15892_v11, 0.0  ;;  %v15895_v10 = vld [vmem:[#allocation24_spill] sm:$0xff]  ;;  %v3726_v8 = vld [vmem:[%s9759_s23 + $0x28] sm:$0xff]  ;;  %3718 = vst [vmem:[%s9499_s19 + $0x3e8] sm:$0xff] %v3590_v6  ;;  %v3979_v11 = vadd.f32 %v3851_v16, %v3723_v12  ;;  %v3854_v6 = vsel %vm3086_vm12, %v15898_v56, 0.0 }
 0x41b   : > { %v3591_v9 = vadd.f32 %v3463_v57, %v3335_v37  ;;  %v3852_v62 = vsel %vm3084_vm2, %v15895_v10, 0.0  ;;  %v3727_v57 = vld [vmem:[%s9759_s23 + $0x30] sm:$0xff]  ;;  %v3728_v37 = vld [vmem:[%s9759_s23 + $0x38] sm:$0xff]  ;;  %v3592_v30 = vadd.f32 %v3464_v42, %v3336_v34  ;;  %4106 = vst [vmem:[%s9759_s23 + $0x8] sm:$0xff] %v3978_v25  ;;  %v15896_v43 = vld [vmem:[#allocation25_spill] sm:$0xff]  ;;  %v3982_v3 = vadd.f32 %v3854_v6, %v3726_v8 }
 0x41c   : > { %v3980_v18 = vadd.f32 %v3852_v62, %v3724_v19  ;;  %v3853_v49 = vsel %vm3085_vm13, %v15896_v43, 0.0  ;;  %v3729_v10 = vld [vmem:[%s9759_s23 + $0x40] sm:$0xff]  ;;  %v15900_v34 = vld [vmem:[#allocation27_spill] sm:$0xff]  ;;  %v3730_v25 = vld [vmem:[%s9759_s23 + $0x48] sm:$0xff]  ;;  %4107 = vst [vmem:[%s9759_s23 + $0x10] sm:$0xff] %v3979_v11 }
 0x41d   : > { %3719 = vst [vmem:[%s9499_s19 + $0x3f0] sm:$0xff] %v3591_v9  ;;  %v3981_v13 = vadd.f32 %v3853_v49, %v3725_v26  ;;  %v3855_v16 = vsel %vm3087_vm1, %v15900_v34, 0.0  ;;  %v15902_v12 = vld [vmem:[#allocation28_spill] sm:$0xff]  ;;  %v3731_v9 = vld [vmem:[%s9759_s23 + $0x50] sm:$0xff]  ;;  %v3732_v26 = vld [vmem:[%s9759_s23 + $0x58] sm:$0xff] }
 0x41e   : > { %v3856_v40 = vsel %vm3088_vm3, %v15902_v12, 0.0  ;;  %3720 = vst [vmem:[%s9499_s19 + $0x3f8] sm:$0xff] %v3592_v30  ;;  %4108 = vst [vmem:[%s9759_s23 + $0x18] sm:$0xff] %v3980_v18  ;;  %v3983_v56 = vadd.f32 %v3855_v16, %v3727_v57  ;;  %v15904_v43 = vld [vmem:[#allocation29_spill] sm:$0xff]  ;;  %v3733_v42 = vld [vmem:[%s9759_s23 + $0x60] sm:$0xff] }
 0x41f   : > { %v3984_v62 = vadd.f32 %v3856_v40, %v3728_v37  ;;  %v3857_v34 = vsel %vm3089_vm0, %v15904_v43, 0.0  ;;  %4109 = vst [vmem:[%s9759_s23 + $0x20] sm:$0xff] %v3981_v13  ;;  %v15906_v19 = vld [vmem:[#allocation30_spill] sm:$0xff]  ;;  %v15908_v18 = vld [vmem:[#allocation31_spill] sm:$0xff]  ;;  %v15910_v57 = vld [vmem:[#allocation32_spill] sm:$0xff] }
 0x420   : > { %v3985_v12 = vadd.f32 %v3857_v34, %v3729_v10  ;;  %v3858_v11 = vsel %vm3090_vm15, %v15906_v19, 0.0  ;;  %v3859_v8 = vsel %vm3091_vm4, %v15908_v18, 0.0  ;;  %v3860_v6 = vsel %vm3092_vm8, %v15910_v57, 0.0  ;;  %v3734_v16 = vld [vmem:[%s9759_s23 + $0x68] sm:$0xff]  ;;  %v3735_v13 = vld [vmem:[%s9759_s23 + $0x70] sm:$0xff]  ;;  %v3736_v10 = vld [vmem:[%s9759_s23 + $0x78] sm:$0xff] }
 0x421   : > { %4110 = vst [vmem:[%s9759_s23 + $0x28] sm:$0xff] %v3982_v3  ;;  %4111 = vst [vmem:[%s9759_s23 + $0x30] sm:$0xff] %v3983_v56  ;;  %v3986_v40 = vadd.f32 %v3858_v11, %v3730_v25  ;;  %v3987_v31 = vadd.f32 %v3859_v8, %v3731_v9  ;;  %v3988_v43 = vadd.f32 %v3860_v6, %v3732_v26  ;;  %v15912_v49 = vld [vmem:[#allocation33_spill] sm:$0xff]  ;;  %v15913_v34 = vld [vmem:[#allocation296_spill] sm:$0xff] }
 0x422   : > { %4112 = vst [vmem:[%s9759_s23 + $0x38] sm:$0xff] %v3984_v62  ;;  %vm15914_vm9 = vcmp.lt.s32.totalorder %v15913_v34, %v10796_v44  ;;  %v3737_v30 = vld [vmem:[%s9759_s23 + $0x80] sm:$0xff]  ;;  %4113 = vst [vmem:[%s9759_s23 + $0x40] sm:$0xff] %v3985_v12  ;;  %v15915_v57 = vld [vmem:[#allocation34_spill] sm:$0xff] }
 0x423   : > { %v3861_v19 = vsel %vm15914_vm9, %v15912_v49, 0.0  ;;  %v15916_v3 = vld [vmem:[#allocation297_spill] sm:$0xff]  ;;  %v15918_v62 = vld [vmem:[#allocation35_spill] sm:$0xff]  ;;  %v15919_v37 = vld [vmem:[#allocation298_spill] sm:$0xff]  ;;  %4114 = vst [vmem:[%s9759_s23 + $0x48] sm:$0xff] %v3986_v40 }
 0x424   : > { %v3989_v18 = vadd.f32 %v3861_v19, %v3733_v42  ;;  %vm15917_vm10 = vcmp.lt.s32.totalorder %v15916_v3, %v10796_v44  ;;  %vm15920_vm2 = vcmp.lt.s32.totalorder %v15919_v37, %v10796_v44  ;;  %v15921_v9 = vld [vmem:[#allocation36_spill] sm:$0xff]  ;;  %v15922_v26 = vld [vmem:[#allocation299_spill] sm:$0xff]  ;;  %v3738_v8 = vld [vmem:[%s9759_s23 + $0x88] sm:$0xff]  ;;  %4115 = vst [vmem:[%s9759_s23 + $0x50] sm:$0xff] %v3987_v31 }
 0x425   : > { %v3862_v56 = vsel %vm15917_vm10, %v15915_v57, 0.0  ;;  %v3863_v25 = vsel %vm15920_vm2, %v15918_v62, 0.0  ;;  %vm15923_vm13 = vcmp.lt.s32.totalorder %v15922_v26, %v10796_v44  ;;  %v3739_v12 = vld [vmem:[%s9759_s23 + $0x90] sm:$0xff]  ;;  %v3740_v42 = vld [vmem:[%s9759_s23 + $0x98] sm:$0xff]  ;;  %4116 = vst [vmem:[%s9759_s23 + $0x58] sm:$0xff] %v3988_v43  ;;  %v15924_v19 = vld [vmem:[#allocation37_spill] sm:$0xff] }
 0x426   : > { %v3864_v11 = vsel %vm15923_vm13, %v15921_v9, 0.0  ;;  %v3990_v6 = vadd.f32 %v3862_v56, %v3734_v16  ;;  %v3991_v49 = vadd.f32 %v3863_v25, %v3735_v13  ;;  %v15925_v57 = vld [vmem:[#allocation300_spill] sm:$0xff]  ;;  %4117 = vst [vmem:[%s9759_s23 + $0x60] sm:$0xff] %v3989_v18  ;;  %v15927_v9 = vld [vmem:[#allocation38_spill] sm:$0xff]  ;;  %v15928_v40 = vld [vmem:[#allocation301_spill] sm:$0xff] }
 0x427   : > { %v3992_v34 = vadd.f32 %v3864_v11, %v3736_v10  ;;  %vm15926_vm12 = vcmp.lt.s32.totalorder %v15925_v57, %v10796_v44  ;;  %v3741_v62 = vld [vmem:[%s9759_s23 + $0xa0] sm:$0xff]  ;;  %vm15929_vm1 = vcmp.lt.s32.totalorder %v15928_v40, %v10796_v44  ;;  %v15930_v43 = vld [vmem:[#allocation39_spill] sm:$0xff]  ;;  %v15931_v26 = vld [vmem:[#allocation302_spill] sm:$0xff] }
 0x428   : > { %v3865_v3 = vsel %vm15926_vm12, %v15924_v19, 0.0  ;;  %v3866_v31 = vsel %vm15929_vm1, %v15927_v9, 0.0  ;;  %vm15932_vm3 = vcmp.lt.s32.totalorder %v15931_v26, %v10796_v44  ;;  %v15933_v13 = vld [vmem:[#allocation43_spill] sm:$0xff]  ;;  %v3742_v25 = vld [vmem:[%s9759_s23 + $0xa8] sm:$0xff]  ;;  %v3743_v18 = vld [vmem:[%s9759_s23 + $0xb0] sm:$0xff]  ;;  %4118 = vst [vmem:[%s9759_s23 + $0x68] sm:$0xff] %v3990_v6  ;;  %vm15961_vm1 = vcmp.lt.s32.totalorder %v11123_v14, %v10796_v44 }
 0x429   : > { %v3993_v37 = vadd.f32 %v3865_v3, %v3737_v30  ;;  %v3867_v16 = vsel %vm15932_vm3, %v15930_v43, 0.0  ;;  %v15934_v10 = vld [vmem:[#allocation303_spill] sm:$0xff]  ;;  %4119 = vst [vmem:[%s9759_s23 + $0x70] sm:$0xff] %v3991_v49  ;;  %4120 = vst [vmem:[%s9759_s23 + $0x78] sm:$0xff] %v3992_v34  ;;  %v3994_v11 = vadd.f32 %v3866_v31, %v3738_v8  ;;  %v15936_v3 = vld [vmem:[#allocation44_spill] sm:$0xff]  ;;  %vm15963_vm3 = vcmp.lt.s32.totalorder %v11126_v39, %v10796_v44 }
 0x42a   : > { %vm15935_vm0 = vcmp.lt.s32.totalorder %v15934_v10, %v10796_v44  ;;  %v3744_v30 = vld [vmem:[%s9759_s23 + $0xb8] sm:$0xff]  ;;  %v3995_v19 = vadd.f32 %v3867_v16, %v3739_v12  ;;  %v15937_v9 = vld [vmem:[#allocation304_spill] sm:$0xff]  ;;  %v15940_v6 = vld [vmem:[#allocation305_spill] sm:$0xff] }
 0x42b   : > { %v3868_v56 = vsel %vm15935_vm0, %v15933_v13, 0.0  ;;  %vm15938_vm15 = vcmp.lt.s32.totalorder %v15937_v9, %v10796_v44  ;;  %v3745_v43 = vld [vmem:[%s9759_s23 + $0xc0] sm:$0xff]  ;;  %4121 = vst [vmem:[%s9759_s23 + $0x80] sm:$0xff] %v3993_v37  ;;  %v15939_v13 = vld [vmem:[#allocation45_spill] sm:$0xff]  ;;  %vm15941_vm4 = vcmp.lt.s32.totalorder %v15940_v6, %v10796_v44  ;;  %v15942_v34 = vld [vmem:[#allocation46_spill] sm:$0xff]  ;;  %vm15965_vm0 = vcmp.lt.s32.totalorder %v11136_v55, %v10796_v44 }
 0x42c   : > { %v3996_v57 = vadd.f32 %v3868_v56, %v3740_v42  ;;  %v3869_v40 = vsel %vm15938_vm15, %v15936_v3, 0.0  ;;  %v3870_v49 = vsel %vm15941_vm4, %v15939_v13, 0.0  ;;  %v15943_v10 = vld [vmem:[#allocation306_spill] sm:$0xff]  ;;  %v15945_v12 = vld [vmem:[#allocation51_spill] sm:$0xff]  ;;  %v3746_v16 = vld [vmem:[%s9759_s23 + $0xc8] sm:$0xff]  ;;  %4122 = vst [vmem:[%s9759_s23 + $0x88] sm:$0xff] %v3994_v11  ;;  %vm15970_vm4 = vcmp.lt.s32.totalorder %v11176_v48, %v10796_v44 }
 0x42d   : > { %v3997_v26 = vadd.f32 %v3869_v40, %v3741_v62  ;;  %vm15944_vm8 = vcmp.lt.s32.totalorder %v15943_v10, %v10796_v44  ;;  %v15946_v42 = vld [vmem:[#allocation307_spill] sm:$0xff]  ;;  %v3747_v37 = vld [vmem:[%s9759_s23 + $0xd0] sm:$0xff]  ;;  %4123 = vst [vmem:[%s9759_s23 + $0x90] sm:$0xff] %v3995_v19  ;;  %v3998_v56 = vadd.f32 %v3870_v49, %v3742_v25  ;;  %v15948_v40 = vld [vmem:[#allocation52_spill] sm:$0xff] }
 0x42e   : > { %v3871_v8 = vsel %vm15944_vm8, %v15942_v34, 0.0  ;;  %vm15947_vm9 = vcmp.lt.s32.totalorder %v15946_v42, %v10796_v44  ;;  %v3748_v62 = vld [vmem:[%s9759_s23 + $0xd8] sm:$0xff]  ;;  %4124 = vst [vmem:[%s9759_s23 + $0x98] sm:$0xff] %v3996_v57  ;;  %v15949_v13 = vld [vmem:[#allocation308_spill] sm:$0xff]  ;;  %v15952_v11 = vld [vmem:[#allocation309_spill] sm:$0xff] }
 0x42f   : > { %v3872_v31 = vsel %vm15947_vm9, %v15945_v12, 0.0  ;;  %v3999_v3 = vadd.f32 %v3871_v8, %v3743_v18  ;;  %vm15950_vm10 = vcmp.lt.s32.totalorder %v15949_v13, %v10796_v44  ;;  %v3749_v34 = vld [vmem:[%s9759_s23 + $0xe0] sm:$0xff]  ;;  %4125 = vst [vmem:[%s9759_s23 + $0xa0] sm:$0xff] %v3997_v26  ;;  %v15951_v12 = vld [vmem:[#allocation53_spill] sm:$0xff]  ;;  %vm15953_vm2 = vcmp.lt.s32.totalorder %v15952_v11, %v10796_v44  ;;  %v15954_v57 = vld [vmem:[#allocation54_spill] sm:$0xff] }
 0x430   : > { %v4000_v9 = vadd.f32 %v3872_v31, %v3744_v30  ;;  %v3873_v6 = vsel %vm15950_vm10, %v15948_v40, 0.0  ;;  %v3874_v19 = vsel %vm15953_vm2, %v15951_v12, 0.0  ;;  %v15955_v42 = vld [vmem:[#allocation310_spill] sm:$0xff]  ;;  %v15957_v18 = vld [vmem:[#allocation59_spill] sm:$0xff]  ;;  %v3750_v8 = vld [vmem:[%s9759_s23 + $0xe8] sm:$0xff]  ;;  %4126 = vst [vmem:[%s9759_s23 + $0xa8] sm:$0xff] %v3998_v56  ;;  %vm15975_vm9 = vcmp.lt.s32.totalorder %v11207_v7, %v10796_v44 }
 0x431   : > { %v4001_v10 = vadd.f32 %v3873_v6, %v3745_v43  ;;  %vm15956_vm13 = vcmp.lt.s32.totalorder %v15955_v42, %v10796_v44  ;;  %v15958_v30 = vld [vmem:[#allocation311_spill] sm:$0xff]  ;;  %v3751_v26 = vld [vmem:[%s9759_s23 + $0xf0] sm:$0xff]  ;;  %4127 = vst [vmem:[%s9759_s23 + $0xb0] sm:$0xff] %v3999_v3  ;;  %v4002_v31 = vadd.f32 %v3874_v19, %v3746_v16  ;;  %v15960_v6 = vld [vmem:[#allocation60_spill] sm:$0xff] }
 0x432   : > { %v3875_v25 = vsel %vm15956_vm13, %v15954_v57, 0.0  ;;  %vm15959_vm12 = vcmp.lt.s32.totalorder %v15958_v30, %v10796_v44  ;;  %v3752_v43 = vld [vmem:[%s9759_s23 + $0xf8] sm:$0xff]  ;;  %4128 = vst [vmem:[%s9759_s23 + $0xb8] sm:$0xff] %v4000_v9  ;;  %v3877_v12 = vsel %vm15961_vm1, %v15960_v6, 0.0  ;;  %v3753_v11 = vld [vmem:[%s9759_s23 + $0x100] sm:$0xff]  ;;  %v15962_v42 = vld [vmem:[#allocation61_spill] sm:$0xff] }
 0x433   : > { %v3876_v49 = vsel %vm15959_vm12, %v15957_v18, 0.0  ;;  %v4003_v40 = vadd.f32 %v3875_v25, %v3747_v37  ;;  %4129 = vst [vmem:[%s9759_s23 + $0xc0] sm:$0xff] %v4001_v10  ;;  %v4005_v57 = vadd.f32 %v3877_v12, %v3749_v34  ;;  %v3878_v56 = vsel %vm15963_vm3, %v15962_v42, 0.0  ;;  %v15964_v3 = vld [vmem:[#allocation62_spill] sm:$0xff]  ;;  %v15966_v37 = vld [vmem:[#allocation67_spill] sm:$0xff]  ;;  %v3754_v9 = vld [vmem:[%s9759_s23 + $0x108] sm:$0xff] }
 0x434   : > { %v4004_v13 = vadd.f32 %v3876_v49, %v3748_v62  ;;  %v3879_v16 = vsel %vm15965_vm0, %v15964_v3, 0.0  ;;  %v15967_v62 = vld [vmem:[#allocation312_spill] sm:$0xff]  ;;  %v3755_v10 = vld [vmem:[%s9759_s23 + $0x110] sm:$0xff]  ;;  %v3756_v34 = vld [vmem:[%s9759_s23 + $0x118] sm:$0xff]  ;;  %4130 = vst [vmem:[%s9759_s23 + $0xc8] sm:$0xff] %v4002_v31  ;;  %v4006_v39 = vadd.f32 %v3878_v56, %v3750_v8 }
 0x435   : > { %vm15968_vm15 = vcmp.lt.s32.totalorder %v15967_v62, %v10796_v44  ;;  %4131 = vst [vmem:[%s9759_s23 + $0xd0] sm:$0xff] %v4003_v40  ;;  %v4007_v55 = vadd.f32 %v3879_v16, %v3751_v26  ;;  %v15969_v25 = vld [vmem:[#allocation68_spill] sm:$0xff]  ;;  %4133 = vst [vmem:[%s9759_s23 + $0xe0] sm:$0xff] %v4005_v57  ;;  %v15971_v6 = vld [vmem:[#allocation69_spill] sm:$0xff] }
 0x436   : > { %v3880_v14 = vsel %vm15968_vm15, %v15966_v37, 0.0  ;;  %4132 = vst [vmem:[%s9759_s23 + $0xd8] sm:$0xff] %v4004_v13  ;;  %v3881_v18 = vsel %vm15970_vm4, %v15969_v25, 0.0  ;;  %v3757_v30 = vld [vmem:[%s9759_s23 + $0x120] sm:$0xff]  ;;  %v15972_v31 = vld [vmem:[#allocation313_spill] sm:$0xff]  ;;  %v15974_v13 = vld [vmem:[#allocation70_spill] sm:$0xff] }
 0x437   : > { %v4008_v19 = vadd.f32 %v3880_v14, %v3752_v43  ;;  %v4009_v49 = vadd.f32 %v3881_v18, %v3753_v11  ;;  %vm15973_vm8 = vcmp.lt.s32.totalorder %v15972_v31, %v10796_v44  ;;  %v3883_v8 = vsel %vm15975_vm9, %v15974_v13, 0.0  ;;  %v15976_v26 = vld [vmem:[#allocation75_spill] sm:$0xff]  ;;  %v15977_v43 = vld [vmem:[#allocation314_spill] sm:$0xff]  ;;  %v3758_v12 = vld [vmem:[%s9759_s23 + $0x128] sm:$0xff]  ;;  %4134 = vst [vmem:[%s9759_s23 + $0xe8] sm:$0xff] %v4006_v39 }
 0x438   : > { %v3882_v40 = vsel %vm15973_vm8, %v15971_v6, 0.0  ;;  %vm15978_vm10 = vcmp.lt.s32.totalorder %v15977_v43, %v10796_v44  ;;  %v3759_v57 = vld [vmem:[%s9759_s23 + $0x130] sm:$0xff]  ;;  %v3760_v11 = vld [vmem:[%s9759_s23 + $0x138] sm:$0xff]  ;;  %4135 = vst [vmem:[%s9759_s23 + $0xf0] sm:$0xff] %v4007_v55  ;;  %v4011_v7 = vadd.f32 %v3883_v8, %v3755_v10  ;;  %v15979_v3 = vld [vmem:[#allocation76_spill] sm:$0xff] }
 0x439   : > { %v3884_v48 = vsel %vm15978_vm10, %v15976_v26, 0.0  ;;  %4136 = vst [vmem:[%s9759_s23 + $0xf8] sm:$0xff] %v4008_v19  ;;  %v4010_v42 = vadd.f32 %v3882_v40, %v3754_v9  ;;  %v15980_v16 = vld [vmem:[#allocation315_spill] sm:$0xff]  ;;  %v3761_v62 = vld [vmem:[%s9759_s23 + $0x140] sm:$0xff]  ;;  %4137 = vst [vmem:[%s9759_s23 + $0x100] sm:$0xff] %v4009_v49 }
 0x43a   : > { %v4012_v56 = vadd.f32 %v3884_v48, %v3756_v34  ;;  %vm15981_vm2 = vcmp.lt.s32.totalorder %v15980_v16, %v10796_v44  ;;  %v15982_v25 = vld [vmem:[#allocation77_spill] sm:$0xff]  ;;  %v15983_v39 = vld [vmem:[#allocation316_spill] sm:$0xff]  ;;  %v15985_v19 = vld [vmem:[#allocation78_spill] sm:$0xff]  ;;  %4139 = vst [vmem:[%s9759_s23 + $0x110] sm:$0xff] %v4011_v7 }
 0x43b   : > { %v3885_v37 = vsel %vm15981_vm2, %v15979_v3, 0.0  ;;  %vm15984_vm13 = vcmp.lt.s32.totalorder %v15983_v39, %v10796_v44  ;;  %v15986_v18 = vld [vmem:[#allocation317_spill] sm:$0xff]  ;;  %v15988_v10 = vld [vmem:[#allocation83_spill] sm:$0xff]  ;;  %v15989_v34 = vld [vmem:[#allocation318_spill] sm:$0xff]  ;;  %4138 = vst [vmem:[%s9759_s23 + $0x108] sm:$0xff] %v4010_v42 }
 0x43c   : > { %v4013_v14 = vadd.f32 %v3885_v37, %v3757_v30  ;;  %v3886_v55 = vsel %vm15984_vm13, %v15982_v25, 0.0  ;;  %vm15987_vm12 = vcmp.lt.s32.totalorder %v15986_v18, %v10796_v44  ;;  %vm15990_vm1 = vcmp.lt.s32.totalorder %v15989_v34, %v10796_v44  ;;  %v3762_v31 = vld [vmem:[%s9759_s23 + $0x148] sm:$0xff]  ;;  %v3763_v49 = vld [vmem:[%s9759_s23 + $0x150] sm:$0xff]  ;;  %v3764_v30 = vld [vmem:[%s9759_s23 + $0x158] sm:$0xff]  ;;  %4140 = vst [vmem:[%s9759_s23 + $0x118] sm:$0xff] %v4012_v56 }
 0x43d   : > { %v3887_v9 = vsel %vm15987_vm12, %v15985_v19, 0.0  ;;  %v3888_v6 = vsel %vm15990_vm1, %v15988_v10, 0.0  ;;  %v4014_v40 = vadd.f32 %v3886_v55, %v3758_v12  ;;  %v15991_v26 = vld [vmem:[#allocation84_spill] sm:$0xff]  ;;  %v15992_v43 = vld [vmem:[#allocation319_spill] sm:$0xff]  ;;  %v15994_v37 = vld [vmem:[#allocation85_spill] sm:$0xff] }
 0x43e   : > { %v4015_v13 = vadd.f32 %v3887_v9, %v3759_v57  ;;  %v4016_v8 = vadd.f32 %v3888_v6, %v3760_v11  ;;  %vm15993_vm3 = vcmp.lt.s32.totalorder %v15992_v43, %v10796_v44  ;;  %v3765_v3 = vld [vmem:[%s9759_s23 + $0x160] sm:$0xff]  ;;  %4141 = vst [vmem:[%s9759_s23 + $0x120] sm:$0xff] %v4013_v14  ;;  %v15997_v56 = vld [vmem:[#allocation86_spill] sm:$0xff]  ;;  %v15998_v25 = vld [vmem:[#allocation321_spill] sm:$0xff] }
 0x43f   : > { %v3889_v48 = vsel %vm15993_vm3, %v15991_v26, 0.0  ;;  %v15995_v42 = vld [vmem:[#allocation320_spill] sm:$0xff]  ;;  %vm15999_vm15 = vcmp.lt.s32.totalorder %v15998_v25, %v10796_v44  ;;  %v16000_v57 = vld [vmem:[#allocation91_spill] sm:$0xff]  ;;  %v16001_v11 = vld [vmem:[#allocation322_spill] sm:$0xff]  ;;  %4142 = vst [vmem:[%s9759_s23 + $0x128] sm:$0xff] %v4014_v40 }
 0x440   : > { %v4017_v16 = vadd.f32 %v3889_v48, %v3761_v62  ;;  %vm15996_vm0 = vcmp.lt.s32.totalorder %v15995_v42, %v10796_v44  ;;  %v3891_v12 = vsel %vm15999_vm15, %v15997_v56, 0.0  ;;  %vm16002_vm4 = vcmp.lt.s32.totalorder %v16001_v11, %v10796_v44  ;;  %v3766_v55 = vld [vmem:[%s9759_s23 + $0x168] sm:$0xff]  ;;  %v3767_v14 = vld [vmem:[%s9759_s23 + $0x170] sm:$0xff]  ;;  %v3768_v62 = vld [vmem:[%s9759_s23 + $0x178] sm:$0xff]  ;;  %4143 = vst [vmem:[%s9759_s23 + $0x130] sm:$0xff] %v4015_v13 }
 0x441   : > { %v3890_v7 = vsel %vm15996_vm0, %v15994_v37, 0.0  ;;  %v3892_v39 = vsel %vm16002_vm4, %v16000_v57, 0.0  ;;  %4144 = vst [vmem:[%s9759_s23 + $0x138] sm:$0xff] %v4016_v8  ;;  %v4019_v18 = vadd.f32 %v3891_v12, %v3763_v49  ;;  %v16003_v10 = vld [vmem:[#allocation92_spill] sm:$0xff]  ;;  %v16004_v34 = vld [vmem:[#allocation323_spill] sm:$0xff]  ;;  %v16006_v48 = vld [vmem:[#allocation93_spill] sm:$0xff] }
 0x442   : > { %v4018_v19 = vadd.f32 %v3890_v7, %v3762_v31  ;;  %v4020_v9 = vadd.f32 %v3892_v39, %v3764_v30  ;;  %vm16005_vm8 = vcmp.lt.s32.totalorder %v16004_v34, %v10796_v44  ;;  %v3769_v26 = vld [vmem:[%s9759_s23 + $0x180] sm:$0xff]  ;;  %4145 = vst [vmem:[%s9759_s23 + $0x140] sm:$0xff] %v4017_v16  ;;  %v16009_v8 = vld [vmem:[#allocation94_spill] sm:$0xff]  ;;  %v16010_v37 = vld [vmem:[#allocation325_spill] sm:$0xff] }
 0x443   : > { %v3893_v6 = vsel %vm16005_vm8, %v16003_v10, 0.0  ;;  %v16007_v40 = vld [vmem:[#allocation324_spill] sm:$0xff]  ;;  %vm16011_vm10 = vcmp.lt.s32.totalorder %v16010_v37, %v10796_v44  ;;  %v16012_v49 = vld [vmem:[#allocation99_spill] sm:$0xff]  ;;  %v16013_v30 = vld [vmem:[#allocation326_spill] sm:$0xff]  ;;  %4147 = vst [vmem:[%s9759_s23 + $0x150] sm:$0xff] %v4019_v18 }
 0x444   : > { %v4021_v43 = vadd.f32 %v3893_v6, %v3765_v3  ;;  %vm16008_vm9 = vcmp.lt.s32.totalorder %v16007_v40, %v10796_v44  ;;  %v3895_v31 = vsel %vm16011_vm10, %v16009_v8, 0.0  ;;  %vm16014_vm2 = vcmp.lt.s32.totalorder %v16013_v30, %v10796_v44  ;;  %v3770_v7 = vld [vmem:[%s9759_s23 + $0x188] sm:$0xff]  ;;  %v3771_v16 = vld [vmem:[%s9759_s23 + $0x190] sm:$0xff]  ;;  %v3772_v3 = vld [vmem:[%s9759_s23 + $0x198] sm:$0xff]  ;;  %4146 = vst [vmem:[%s9759_s23 + $0x148] sm:$0xff] %v4018_v19 }
 0x445   : > { %v3894_v13 = vsel %vm16008_vm9, %v16006_v48, 0.0  ;;  %v3896_v42 = vsel %vm16014_vm2, %v16012_v49, 0.0  ;;  %4148 = vst [vmem:[%s9759_s23 + $0x158] sm:$0xff] %v4020_v9  ;;  %v4023_v25 = vadd.f32 %v3895_v31, %v3767_v14  ;;  %v16015_v57 = vld [vmem:[#allocation100_spill] sm:$0xff]  ;;  %v16016_v11 = vld [vmem:[#allocation327_spill] sm:$0xff]  ;;  %v16018_v6 = vld [vmem:[#allocation101_spill] sm:$0xff] }
 0x446   : > { %v4022_v56 = vadd.f32 %v3894_v13, %v3766_v55  ;;  %v4024_v12 = vadd.f32 %v3896_v42, %v3768_v62  ;;  %vm16017_vm13 = vcmp.lt.s32.totalorder %v16016_v11, %v10796_v44  ;;  %v3773_v10 = vld [vmem:[%s9759_s23 + $0x1a0] sm:$0xff]  ;;  %4149 = vst [vmem:[%s9759_s23 + $0x160] sm:$0xff] %v4021_v43  ;;  %v16021_v9 = vld [vmem:[#allocation102_spill] sm:$0xff]  ;;  %v16022_v48 = vld [vmem:[#allocation329_spill] sm:$0xff] }
 0x447   : > { %v3897_v39 = vsel %vm16017_vm13, %v16015_v57, 0.0  ;;  %v16019_v19 = vld [vmem:[#allocation328_spill] sm:$0xff]  ;;  %vm16023_vm1 = vcmp.lt.s32.totalorder %v16022_v48, %v10796_v44  ;;  %v16024_v14 = vld [vmem:[#allocation107_spill] sm:$0xff]  ;;  %v16025_v62 = vld [vmem:[#allocation330_spill] sm:$0xff]  ;;  %4151 = vst [vmem:[%s9759_s23 + $0x170] sm:$0xff] %v4023_v25 }
 0x448   : > { %v4025_v34 = vadd.f32 %v3897_v39, %v3769_v26  ;;  %vm16020_vm12 = vcmp.lt.s32.totalorder %v16019_v19, %v10796_v44  ;;  %v3899_v55 = vsel %vm16023_vm1, %v16021_v9, 0.0  ;;  %vm16026_vm3 = vcmp.lt.s32.totalorder %v16025_v62, %v10796_v44  ;;  %v3774_v13 = vld [vmem:[%s9759_s23 + $0x1a8] sm:$0xff]  ;;  %v3775_v43 = vld [vmem:[%s9759_s23 + $0x1b0] sm:$0xff]  ;;  %v3776_v26 = vld [vmem:[%s9759_s23 + $0x1b8] sm:$0xff]  ;;  %4150 = vst [vmem:[%s9759_s23 + $0x168] sm:$0xff] %v4022_v56 }
 0x449   : > { %v3898_v18 = vsel %vm16020_vm12, %v16018_v6, 0.0  ;;  %v3900_v40 = vsel %vm16026_vm3, %v16024_v14, 0.0  ;;  %4152 = vst [vmem:[%s9759_s23 + $0x178] sm:$0xff] %v4024_v12  ;;  %v4027_v37 = vadd.f32 %v3899_v55, %v3771_v16  ;;  %v16027_v49 = vld [vmem:[#allocation108_spill] sm:$0xff]  ;;  %v16028_v30 = vld [vmem:[#allocation331_spill] sm:$0xff]  ;;  %v16030_v39 = vld [vmem:[#allocation109_spill] sm:$0xff]  ;;  %vm16052_vm12 = vcmp.lt.s32.totalorder %v11513_v50, %v10796_v44 }
 0x44a   : > { %v4026_v8 = vadd.f32 %v3898_v18, %v3770_v7  ;;  %v4028_v31 = vadd.f32 %v3900_v40, %v3772_v3  ;;  %vm16029_vm0 = vcmp.lt.s32.totalorder %v16028_v30, %v10796_v44  ;;  %v3777_v57 = vld [vmem:[%s9759_s23 + $0x1c0] sm:$0xff]  ;;  %4153 = vst [vmem:[%s9759_s23 + $0x180] sm:$0xff] %v4025_v34  ;;  %v16033_v12 = vld [vmem:[#allocation110_spill] sm:$0xff]  ;;  %v16034_v6 = vld [vmem:[#allocation333_spill] sm:$0xff] }
 0x44b   : > { %v3901_v42 = vsel %vm16029_vm0, %v16027_v49, 0.0  ;;  %v16031_v56 = vld [vmem:[#allocation332_spill] sm:$0xff]  ;;  %vm16035_vm4 = vcmp.lt.s32.totalorder %v16034_v6, %v10796_v44  ;;  %v16036_v16 = vld [vmem:[#allocation114_spill] sm:$0xff]  ;;  %v3778_v18 = vld [vmem:[%s9759_s23 + $0x1c8] sm:$0xff]  ;;  %4155 = vst [vmem:[%s9759_s23 + $0x190] sm:$0xff] %v4027_v37 }
 0x44c   : > { %v4029_v11 = vadd.f32 %v3901_v42, %v3773_v10  ;;  %vm16032_vm15 = vcmp.lt.s32.totalorder %v16031_v56, %v10796_v44  ;;  %v3903_v7 = vsel %vm16035_vm4, %v16033_v12, 0.0  ;;  %v16037_v3 = vld [vmem:[#allocation334_spill] sm:$0xff]  ;;  %v3780_v10 = vld [vmem:[%s9759_s23 + $0x1d8] sm:$0xff]  ;;  %4154 = vst [vmem:[%s9759_s23 + $0x188] sm:$0xff] %v4026_v8  ;;  %4156 = vst [vmem:[%s9759_s23 + $0x198] sm:$0xff] %v4028_v31 }
 0x44d   : > { %v3902_v25 = vsel %vm16032_vm15, %v16030_v39, 0.0  ;;  %vm16038_vm8 = vcmp.lt.s32.totalorder %v16037_v3, %v10796_v44  ;;  %v3779_v34 = vld [vmem:[%s9759_s23 + $0x1d0] sm:$0xff]  ;;  %v4031_v48 = vadd.f32 %v3903_v7, %v3775_v43  ;;  %v16039_v14 = vld [vmem:[#allocation115_spill] sm:$0xff]  ;;  %v3781_v49 = vld [vmem:[%s9759_s23 + $0x1e0] sm:$0xff]  ;;  %vm16063_vm15 = vcmp.lt.s32.totalorder %v11558_v46, %v10796_v44 }
 0x44e   : > { %v3904_v19 = vsel %vm16038_vm8, %v16036_v16, 0.0  ;;  %v4030_v9 = vadd.f32 %v3902_v25, %v3774_v13  ;;  %v16040_v62 = vld [vmem:[#allocation335_spill] sm:$0xff]  ;;  %4157 = vst [vmem:[%s9759_s23 + $0x1a0] sm:$0xff] %v4029_v11  ;;  %v16042_v42 = vld [vmem:[#allocation116_spill] sm:$0xff]  ;;  %v16045_v31 = vld [vmem:[#allocation117_spill] sm:$0xff] }
 0x44f   : > { %v4032_v55 = vadd.f32 %v3904_v19, %v3776_v26  ;;  %vm16041_vm9 = vcmp.lt.s32.totalorder %v16040_v62, %v10796_v44  ;;  %v16043_v8 = vld [vmem:[#allocation336_spill] sm:$0xff]  ;;  %v16046_v39 = vld [vmem:[#allocation337_spill] sm:$0xff]  ;;  %v16049_v26 = vld [vmem:[#allocation338_spill] sm:$0xff]  ;;  %4159 = vst [vmem:[%s9759_s23 + $0x1b0] sm:$0xff] %v4031_v48 }
 0x450   : > { %v3905_v40 = vsel %vm16041_vm9, %v16039_v14, 0.0  ;;  %vm16044_vm10 = vcmp.lt.s32.totalorder %v16043_v8, %v10796_v44  ;;  %vm16047_vm2 = vcmp.lt.s32.totalorder %v16046_v39, %v10796_v44  ;;  %v16048_v43 = vld [vmem:[#allocation121_spill] sm:$0xff]  ;;  %vm16050_vm13 = vcmp.lt.s32.totalorder %v16049_v26, %v10796_v44  ;;  %v3783_v11 = vld [vmem:[%s9759_s23 + $0x1f0] sm:$0xff]  ;;  %4158 = vst [vmem:[%s9759_s23 + $0x1a8] sm:$0xff] %v4030_v9  ;;  %v3785_v19 = vld [vmem:[%s9759_s23 + $0x200] sm:$0xff] }
 0x451   : > { %v4033_v30 = vadd.f32 %v3905_v40, %v3777_v57  ;;  %v3906_v37 = vsel %vm16044_vm10, %v16042_v42, 0.0  ;;  %v3907_v13 = vsel %vm16047_vm2, %v16045_v31, 0.0  ;;  %v3908_v56 = vsel %vm16050_vm13, %v16048_v43, 0.0  ;;  %v3782_v25 = vld [vmem:[%s9759_s23 + $0x1e8] sm:$0xff]  ;;  %v3784_v57 = vld [vmem:[%s9759_s23 + $0x1f8] sm:$0xff]  ;;  %4160 = vst [vmem:[%s9759_s23 + $0x1b8] sm:$0xff] %v4032_v55 }
 0x452   : > { %v4034_v12 = vadd.f32 %v3906_v37, %v3778_v18  ;;  %v4035_v6 = vadd.f32 %v3907_v13, %v3779_v34  ;;  %v4036_v7 = vadd.f32 %v3908_v56, %v3780_v10  ;;  %v16051_v16 = vld [vmem:[#allocation122_spill] sm:$0xff]  ;;  %v16053_v62 = vld [vmem:[#allocation123_spill] sm:$0xff]  ;;  %v16056_v55 = vld [vmem:[#allocation124_spill] sm:$0xff]  ;;  %vm16071_vm9 = vcmp.lt.s32.totalorder %v11590_v58, %v10796_v44 }
 0x453   : > { %v3909_v3 = vsel %vm16052_vm12, %v16051_v16, 0.0  ;;  %4161 = vst [vmem:[%s9759_s23 + $0x1c0] sm:$0xff] %v4033_v30  ;;  %v16054_v9 = vld [vmem:[#allocation339_spill] sm:$0xff]  ;;  %v16057_v40 = vld [vmem:[#allocation340_spill] sm:$0xff]  ;;  %v16060_v10 = vld [vmem:[#allocation341_spill] sm:$0xff]  ;;  %vm16073_vm10 = vcmp.lt.s32.totalorder %v11593_v36, %v10796_v44  ;;  %vm16075_vm2 = vcmp.lt.s32.totalorder %v11602_v20, %v10796_v44  ;;  %vm16080_vm12 = vcmp.lt.s32.totalorder %v11648_v5, %v10796_v44 }
 0x454   : > { %v4037_v14 = vadd.f32 %v3909_v3, %v3781_v49  ;;  %vm16055_vm1 = vcmp.lt.s32.totalorder %v16054_v9, %v10796_v44  ;;  %vm16058_vm3 = vcmp.lt.s32.totalorder %v16057_v40, %v10796_v44  ;;  %v16059_v34 = vld [vmem:[#allocation128_spill] sm:$0xff]  ;;  %vm16061_vm0 = vcmp.lt.s32.totalorder %v16060_v10, %v10796_v44  ;;  %v3786_v42 = vld [vmem:[%s9759_s23 + $0x208] sm:$0xff]  ;;  %v3787_v30 = vld [vmem:[%s9759_s23 + $0x210] sm:$0xff]  ;;  %4162 = vst [vmem:[%s9759_s23 + $0x1c8] sm:$0xff] %v4034_v12 }
 0x455   : > { %v3910_v48 = vsel %vm16055_vm1, %v16053_v62, 0.0  ;;  %v3911_v18 = vsel %vm16058_vm3, %v16056_v55, 0.0  ;;  %v3912_v50 = vsel %vm16061_vm0, %v16059_v34, 0.0  ;;  %v3788_v49 = vld [vmem:[%s9759_s23 + $0x218] sm:$0xff]  ;;  %4163 = vst [vmem:[%s9759_s23 + $0x1d0] sm:$0xff] %v4035_v6  ;;  %4164 = vst [vmem:[%s9759_s23 + $0x1d8] sm:$0xff] %v4036_v7  ;;  %vm16082_vm1 = vcmp.lt.s32.totalorder %v11651_v61, %v10796_v44 }
 0x456   : > { %v4038_v8 = vadd.f32 %v3910_v48, %v3782_v25  ;;  %v4039_v37 = vadd.f32 %v3911_v18, %v3783_v11  ;;  %v4040_v31 = vadd.f32 %v3912_v50, %v3784_v57  ;;  %v16062_v39 = vld [vmem:[#allocation129_spill] sm:$0xff]  ;;  %v3789_v43 = vld [vmem:[%s9759_s23 + $0x220] sm:$0xff]  ;;  %4165 = vst [vmem:[%s9759_s23 + $0x1e0] sm:$0xff] %v4037_v14  ;;  %v16064_v56 = vld [vmem:[#allocation130_spill] sm:$0xff]  ;;  %vm16084_vm3 = vcmp.lt.s32.totalorder %v11654_v4, %v10796_v44 }
 0x457   : > { %v3913_v13 = vsel %vm16063_vm15, %v16062_v39, 0.0  ;;  %v16065_v12 = vld [vmem:[#allocation342_spill] sm:$0xff]  ;;  %v16067_v7 = vld [vmem:[#allocation131_spill] sm:$0xff]  ;;  %v3790_v57 = vld [vmem:[%s9759_s23 + $0x228] sm:$0xff]  ;;  %vm16086_vm0 = vcmp.lt.s32.totalorder %v11664_v2, %v10796_v44  ;;  %vm16088_vm15 = vcmp.lt.s32.totalorder %v11667_v22, %v10796_v44 }
 0x458   : > { %v4041_v26 = vadd.f32 %v3913_v13, %v3785_v19  ;;  %vm16066_vm4 = vcmp.lt.s32.totalorder %v16065_v12, %v10796_v44  ;;  %v16068_v16 = vld [vmem:[#allocation343_spill] sm:$0xff]  ;;  %v3791_v3 = vld [vmem:[%s9759_s23 + $0x230] sm:$0xff]  ;;  %4166 = vst [vmem:[%s9759_s23 + $0x1e8] sm:$0xff] %v4038_v8  ;;  %4167 = vst [vmem:[%s9759_s23 + $0x1f0] sm:$0xff] %v4039_v37 }
 0x459   : > { %v3914_v6 = vsel %vm16066_vm4, %v16064_v56, 0.0  ;;  %vm16069_vm8 = vcmp.lt.s32.totalorder %v16068_v16, %v10796_v44  ;;  %v16070_v11 = vld [vmem:[#allocation135_spill] sm:$0xff]  ;;  %4168 = vst [vmem:[%s9759_s23 + $0x1f8] sm:$0xff] %v4040_v31  ;;  %v16072_v48 = vld [vmem:[#allocation136_spill] sm:$0xff]  ;;  %v16074_v18 = vld [vmem:[#allocation137_spill] sm:$0xff]  ;;  %vm16090_vm4 = vcmp.lt.s32.totalorder %v11704_v33, %v10796_v44 }
 0x45a   : > { %v3915_v25 = vsel %vm16069_vm8, %v16067_v7, 0.0  ;;  %v3916_v46 = vsel %vm16071_vm9, %v16070_v11, 0.0  ;;  %v3792_v19 = vld [vmem:[%s9759_s23 + $0x238] sm:$0xff]  ;;  %v4042_v14 = vadd.f32 %v3914_v6, %v3786_v42  ;;  %v3917_v58 = vsel %vm16073_vm10, %v16072_v48, 0.0  ;;  %v3793_v55 = vld [vmem:[%s9759_s23 + $0x240] sm:$0xff]  ;;  %4169 = vst [vmem:[%s9759_s23 + $0x200] sm:$0xff] %v4041_v26 }
 0x45b   : > { %v4043_v62 = vadd.f32 %v3915_v25, %v3787_v30  ;;  %v4044_v9 = vadd.f32 %v3916_v46, %v3788_v49  ;;  %v4045_v40 = vadd.f32 %v3917_v58, %v3789_v43  ;;  %v3918_v34 = vsel %vm16075_vm2, %v16074_v18, 0.0  ;;  %v16076_v10 = vld [vmem:[#allocation138_spill] sm:$0xff]  ;;  %v16077_v50 = vld [vmem:[#allocation344_spill] sm:$0xff]  ;;  %v16079_v30 = vld [vmem:[#allocation141_spill] sm:$0xff] }
 0x45c   : > { %vm16078_vm13 = vcmp.lt.s32.totalorder %v16077_v50, %v10796_v44  ;;  %v3920_v36 = vsel %vm16080_vm12, %v16079_v30, 0.0  ;;  %v3794_v49 = vld [vmem:[%s9759_s23 + $0x248] sm:$0xff]  ;;  %v3795_v8 = vld [vmem:[%s9759_s23 + $0x250] sm:$0xff]  ;;  %v3796_v37 = vld [vmem:[%s9759_s23 + $0x258] sm:$0xff]  ;;  %4170 = vst [vmem:[%s9759_s23 + $0x208] sm:$0xff] %v4042_v14  ;;  %v4046_v20 = vadd.f32 %v3918_v34, %v3790_v57  ;;  %vm16092_vm8 = vcmp.lt.s32.totalorder %v11707_v47, %v10796_v44 }
 0x45d   : > { %v3919_v42 = vsel %vm16078_vm13, %v16076_v10, 0.0  ;;  %4171 = vst [vmem:[%s9759_s23 + $0x210] sm:$0xff] %v4043_v62  ;;  %4172 = vst [vmem:[%s9759_s23 + $0x218] sm:$0xff] %v4044_v9  ;;  %v4048_v39 = vadd.f32 %v3920_v36, %v3792_v19  ;;  %v16081_v13 = vld [vmem:[#allocation142_spill] sm:$0xff]  ;;  %v3797_v43 = vld [vmem:[%s9759_s23 + $0x260] sm:$0xff]  ;;  %vm16094_vm9 = vcmp.lt.s32.totalorder %v11735_v60, %v10796_v44  ;;  %vm16096_vm10 = vcmp.lt.s32.totalorder %v11738_v59, %v10796_v44 }
 0x45e   : > { %v4047_v31 = vadd.f32 %v3919_v42, %v3791_v3  ;;  %v3921_v5 = vsel %vm16082_vm1, %v16081_v13, 0.0  ;;  %4173 = vst [vmem:[%s9759_s23 + $0x220] sm:$0xff] %v4045_v40  ;;  %v16083_v56 = vld [vmem:[#allocation143_spill] sm:$0xff]  ;;  %v16085_v6 = vld [vmem:[#allocation144_spill] sm:$0xff]  ;;  %v16087_v16 = vld [vmem:[#allocation146_spill] sm:$0xff]  ;;  %vm16098_vm2 = vcmp.lt.s32.totalorder %v11744_v63, %v10796_v44  ;;  %vm16100_vm13 = vcmp.lt.s32.totalorder %v11767_v29, %v10796_v44 }
 0x45f   : > { %v4049_v26 = vadd.f32 %v3921_v5, %v3793_v55  ;;  %v3922_v12 = vsel %vm16084_vm3, %v16083_v56, 0.0  ;;  %v3923_v7 = vsel %vm16086_vm0, %v16085_v6, 0.0  ;;  %v3924_v61 = vsel %vm16088_vm15, %v16087_v16, 0.0  ;;  %v3798_v25 = vld [vmem:[%s9759_s23 + $0x268] sm:$0xff]  ;;  %v3799_v11 = vld [vmem:[%s9759_s23 + $0x270] sm:$0xff]  ;;  %v3800_v46 = vld [vmem:[%s9759_s23 + $0x278] sm:$0xff] }
 0x460   : > { %4174 = vst [vmem:[%s9759_s23 + $0x228] sm:$0xff] %v4046_v20  ;;  %4175 = vst [vmem:[%s9759_s23 + $0x230] sm:$0xff] %v4047_v31  ;;  %v4050_v4 = vadd.f32 %v3922_v12, %v3794_v49  ;;  %v4051_v2 = vadd.f32 %v3923_v7, %v3795_v8  ;;  %v4052_v57 = vadd.f32 %v3924_v61, %v3796_v37  ;;  %v16089_v3 = vld [vmem:[#allocation147_spill] sm:$0xff]  ;;  %v3801_v19 = vld [vmem:[%s9759_s23 + $0x280] sm:$0xff] }
 0x461   : > { %4176 = vst [vmem:[%s9759_s23 + $0x238] sm:$0xff] %v4048_v39  ;;  %v3925_v22 = vsel %vm16090_vm4, %v16089_v3, 0.0  ;;  %4177 = vst [vmem:[%s9759_s23 + $0x240] sm:$0xff] %v4049_v26  ;;  %v16091_v62 = vld [vmem:[#allocation148_spill] sm:$0xff]  ;;  %v16093_v48 = vld [vmem:[#allocation149_spill] sm:$0xff]  ;;  %vm16102_vm12 = vcmp.lt.s32.totalorder %v11775_v17, %v10796_v44  ;;  %vm16104_vm1 = vcmp.lt.s32.totalorder %v11781_v28, %v10796_v44  ;;  %vm16106_vm3 = vcmp.lt.s32.totalorder %v11803_v38, %v10796_v44 }
 0x462   : > { %v4053_v14 = vadd.f32 %v3925_v22, %v3797_v43  ;;  %v3926_v9 = vsel %vm16092_vm8, %v16091_v62, 0.0  ;;  %v3927_v58 = vsel %vm16094_vm9, %v16093_v48, 0.0  ;;  %v16095_v55 = vld [vmem:[#allocation152_spill] sm:$0xff]  ;;  %v3802_v40 = vld [vmem:[%s9759_s23 + $0x288] sm:$0xff]  ;;  %v3803_v18 = vld [vmem:[%s9759_s23 + $0x290] sm:$0xff]  ;;  %4178 = vst [vmem:[%s9759_s23 + $0x248] sm:$0xff] %v4050_v4  ;;  %vm16108_vm0 = vcmp.lt.s32.totalorder %v11811_v35, %v10796_v44 }
 0x463   : > { %v3928_v33 = vsel %vm16096_vm10, %v16095_v55, 0.0  ;;  %v3804_v34 = vld [vmem:[%s9759_s23 + $0x298] sm:$0xff]  ;;  %4179 = vst [vmem:[%s9759_s23 + $0x250] sm:$0xff] %v4051_v2  ;;  %4180 = vst [vmem:[%s9759_s23 + $0x258] sm:$0xff] %v4052_v57  ;;  %v4054_v47 = vadd.f32 %v3926_v9, %v3798_v25  ;;  %v4055_v60 = vadd.f32 %v3927_v58, %v3799_v11  ;;  %v16097_v50 = vld [vmem:[#allocation153_spill] sm:$0xff]  ;;  %vm16110_vm15 = vcmp.lt.s32.totalorder %v11814_v1, %v10796_v44 }
 0x464   : > { %v4056_v10 = vadd.f32 %v3928_v33, %v3800_v46  ;;  %v3929_v59 = vsel %vm16098_vm2, %v16097_v50, 0.0  ;;  %v3805_v42 = vld [vmem:[%s9759_s23 + $0x2a0] sm:$0xff]  ;;  %4181 = vst [vmem:[%s9759_s23 + $0x260] sm:$0xff] %v4053_v14  ;;  %v16099_v36 = vld [vmem:[#allocation154_spill] sm:$0xff]  ;;  %v16101_v8 = vld [vmem:[#allocation155_spill] sm:$0xff]  ;;  %vm16112_vm4 = vcmp.lt.s32.totalorder %v11843_v54, %v10796_v44  ;;  %vm16114_vm8 = vcmp.lt.s32.totalorder %v11847_v53, %v10796_v44 }
 0x465   : > { %v4057_v30 = vadd.f32 %v3929_v59, %v3801_v19  ;;  %v3930_v49 = vsel %vm16100_vm13, %v16099_v36, 0.0  ;;  %v3931_v37 = vsel %vm16102_vm12, %v16101_v8, 0.0  ;;  %v16103_v20 = vld [vmem:[#allocation157_spill] sm:$0xff]  ;;  %v3807_v39 = vld [vmem:[%s9759_s23 + $0x2b0] sm:$0xff]  ;;  %v3808_v13 = vld [vmem:[%s9759_s23 + $0x2b8] sm:$0xff]  ;;  %4182 = vst [vmem:[%s9759_s23 + $0x268] sm:$0xff] %v4054_v47  ;;  %vm16116_vm9 = vcmp.lt.s32.totalorder %v11850_v15, %v10796_v44 }
 0x466   : > { %v3932_v63 = vsel %vm16104_vm1, %v16103_v20, 0.0  ;;  %v3806_v31 = vld [vmem:[%s9759_s23 + $0x2a8] sm:$0xff]  ;;  %4183 = vst [vmem:[%s9759_s23 + $0x270] sm:$0xff] %v4055_v60  ;;  %4184 = vst [vmem:[%s9759_s23 + $0x278] sm:$0xff] %v4056_v10  ;;  %v4058_v29 = vadd.f32 %v3930_v49, %v3802_v40  ;;  %v4059_v17 = vadd.f32 %v3931_v37, %v3803_v18  ;;  %v16105_v43 = vld [vmem:[#allocation158_spill] sm:$0xff]  ;;  %vm16118_vm10 = vcmp.lt.s32.totalorder %v11880_v41, %v10796_v44 }
 0x467   : > { %v4060_v5 = vadd.f32 %v3932_v63, %v3804_v34  ;;  %v3933_v28 = vsel %vm16106_vm3, %v16105_v43, 0.0  ;;  %v3809_v26 = vld [vmem:[%s9759_s23 + $0x2c0] sm:$0xff]  ;;  %4185 = vst [vmem:[%s9759_s23 + $0x280] sm:$0xff] %v4057_v30  ;;  %v16107_v12 = vld [vmem:[#allocation159_spill] sm:$0xff]  ;;  %v16111_v61 = vld [vmem:[#allocation165_spill] sm:$0xff]  ;;  %vm16120_vm2 = vcmp.lt.s32.totalorder %v11884_v27, %v10796_v44  ;;  %vm16122_vm13 = vcmp.lt.s32.totalorder %v11887_v0, %v10796_v44 }
 0x468   : > { %v4061_v56 = vadd.f32 %v3933_v28, %v3805_v42  ;;  %v3934_v6 = vsel %vm16108_vm0, %v16107_v12, 0.0  ;;  %v16109_v7 = vld [vmem:[#allocation160_spill] sm:$0xff]  ;;  %v3936_v38 = vsel %vm16112_vm4, %v16111_v61, 0.0  ;;  %v3810_v25 = vld [vmem:[%s9759_s23 + $0x2c8] sm:$0xff]  ;;  %v3811_v11 = vld [vmem:[%s9759_s23 + $0x2d0] sm:$0xff]  ;;  %4186 = vst [vmem:[%s9759_s23 + $0x288] sm:$0xff] %v4058_v29  ;;  %vm16124_vm12 = vcmp.lt.s32.totalorder %v11895_v24, %v10796_v44 }
 0x469   : > { %v3935_v16 = vsel %vm16110_vm15, %v16109_v7, 0.0  ;;  %v3812_v46 = vld [vmem:[%s9759_s23 + $0x2d8] sm:$0xff]  ;;  %4187 = vst [vmem:[%s9759_s23 + $0x290] sm:$0xff] %v4059_v17  ;;  %4188 = vst [vmem:[%s9759_s23 + $0x298] sm:$0xff] %v4060_v5  ;;  %v4062_v35 = vadd.f32 %v3934_v6, %v3806_v31  ;;  %v4064_v4 = vadd.f32 %v3936_v38, %v3808_v13  ;;  %v16113_v2 = vld [vmem:[#allocation166_spill] sm:$0xff]  ;;  %vm16126_vm1 = vcmp.lt.s32.totalorder %v11926_v45, %v10796_v44 }
 0x46a   : > { %v4063_v1 = vadd.f32 %v3935_v16, %v3807_v39  ;;  %v3937_v54 = vsel %vm16114_vm8, %v16113_v2, 0.0  ;;  %v3813_v57 = vld [vmem:[%s9759_s23 + $0x2e0] sm:$0xff]  ;;  %4189 = vst [vmem:[%s9759_s23 + $0x2a0] sm:$0xff] %v4061_v56  ;;  %v16115_v22 = vld [vmem:[#allocation167_spill] sm:$0xff]  ;;  %v16119_v9 = vld [vmem:[#allocation173_spill] sm:$0xff]  ;;  %vm16128_vm3 = vcmp.lt.s32.totalorder %v11931_v32, %v10796_v44  ;;  %vm16130_vm0 = vcmp.lt.s32.totalorder %v11934_v51, %v10796_v44 }
 0x46b   : > { %v4065_v3 = vadd.f32 %v3937_v54, %v3809_v26  ;;  %v3938_v19 = vsel %vm16116_vm9, %v16115_v22, 0.0  ;;  %v16117_v14 = vld [vmem:[#allocation168_spill] sm:$0xff]  ;;  %v3940_v53 = vsel %vm16120_vm2, %v16119_v9, 0.0  ;;  %v3814_v48 = vld [vmem:[%s9759_s23 + $0x2e8] sm:$0xff]  ;;  %v3815_v58 = vld [vmem:[%s9759_s23 + $0x2f0] sm:$0xff]  ;;  %4190 = vst [vmem:[%s9759_s23 + $0x2a8] sm:$0xff] %v4062_v35  ;;  %vm16132_vm15 = vcmp.lt.s32.totalorder %v11956_v23, %v10796_v44 }
 0x46c   : > { %v3939_v62 = vsel %vm16118_vm10, %v16117_v14, 0.0  ;;  %v3816_v55 = vld [vmem:[%s9759_s23 + $0x2f8] sm:$0xff]  ;;  %4191 = vst [vmem:[%s9759_s23 + $0x2b0] sm:$0xff] %v4063_v1  ;;  %4192 = vst [vmem:[%s9759_s23 + $0x2b8] sm:$0xff] %v4064_v4  ;;  %v4066_v15 = vadd.f32 %v3938_v19, %v3810_v25  ;;  %v4068_v33 = vadd.f32 %v3940_v53, %v3812_v46  ;;  %v16121_v40 = vld [vmem:[#allocation174_spill] sm:$0xff]  ;;  %vm16134_vm4 = vcmp.lt.s32.totalorder %v11968_v21, %v10796_v44 }
 0x46d   : > { %v4067_v41 = vadd.f32 %v3939_v62, %v3811_v11  ;;  %v3941_v27 = vsel %vm16122_vm13, %v16121_v40, 0.0  ;;  %v3817_v18 = vld [vmem:[%s9759_s23 + $0x300] sm:$0xff]  ;;  %4193 = vst [vmem:[%s9759_s23 + $0x2c0] sm:$0xff] %v4065_v3  ;;  %v16123_v47 = vld [vmem:[#allocation175_spill] sm:$0xff]  ;;  %v16127_v59 = vld [vmem:[#allocation182_spill] sm:$0xff]  ;;  %vm16136_vm8 = vcmp.lt.s32.totalorder %v11974_v52, %v10796_v44 }
 0x46e   : > { %v4069_v34 = vadd.f32 %v3941_v27, %v3813_v57  ;;  %v3942_v60 = vsel %vm16124_vm12, %v16123_v47, 0.0  ;;  %v16125_v10 = vld [vmem:[#allocation176_spill] sm:$0xff]  ;;  %v3944_v0 = vsel %vm16128_vm3, %v16127_v59, 0.0  ;;  %v3818_v42 = vld [vmem:[%s9759_s23 + $0x308] sm:$0xff]  ;;  %v3819_v30 = vld [vmem:[%s9759_s23 + $0x310] sm:$0xff]  ;;  %4194 = vst [vmem:[%s9759_s23 + $0x2c8] sm:$0xff] %v4066_v15 }
 0x46f   : > { %v3943_v50 = vsel %vm16126_vm1, %v16125_v10, 0.0  ;;  %v3820_v36 = vld [vmem:[%s9759_s23 + $0x318] sm:$0xff]  ;;  %4195 = vst [vmem:[%s9759_s23 + $0x2d0] sm:$0xff] %v4067_v41  ;;  %4196 = vst [vmem:[%s9759_s23 + $0x2d8] sm:$0xff] %v4068_v33  ;;  %v4070_v24 = vadd.f32 %v3942_v60, %v3814_v48  ;;  %v4072_v49 = vadd.f32 %v3944_v0, %v3816_v55  ;;  %v3821_v37 = vld [vmem:[%s9759_s23 + $0x320] sm:$0xff] }
 0x470   : > { %v4071_v45 = vadd.f32 %v3943_v50, %v3815_v58  ;;  %v16129_v8 = vld [vmem:[#allocation183_spill] sm:$0xff]  ;;  %4197 = vst [vmem:[%s9759_s23 + $0x2e0] sm:$0xff] %v4069_v34  ;;  %v16131_v63 = vld [vmem:[#allocation184_spill] sm:$0xff]  ;;  %v16133_v39 = vld [vmem:[#allocation185_spill] sm:$0xff] }
 0x471   : > { %v3945_v32 = vsel %vm16130_vm0, %v16129_v8, 0.0  ;;  %v3946_v31 = vsel %vm16132_vm15, %v16131_v63, 0.0  ;;  %v3947_v13 = vsel %vm16134_vm4, %v16133_v39, 0.0  ;;  %v16135_v29 = vld [vmem:[#allocation191_spill] sm:$0xff]  ;;  %v3822_v17 = vld [vmem:[%s9759_s23 + $0x328] sm:$0xff]  ;;  %v3823_v5 = vld [vmem:[%s9759_s23 + $0x330] sm:$0xff] }
 0x472   : > { %v4073_v20 = vadd.f32 %v3945_v32, %v3817_v18  ;;  %v3948_v51 = vsel %vm16136_vm8, %v16135_v29, 0.0  ;;  %v3824_v43 = vld [vmem:[%s9759_s23 + $0x338] sm:$0xff]  ;;  %4198 = vst [vmem:[%s9759_s23 + $0x2e8] sm:$0xff] %v4070_v24  ;;  %4199 = vst [vmem:[%s9759_s23 + $0x2f0] sm:$0xff] %v4071_v45  ;;  %v4074_v23 = vadd.f32 %v3946_v31, %v3818_v42  ;;  %v4075_v21 = vadd.f32 %v3947_v13, %v3819_v30  ;;  %v16137_v26 = vld [vmem:[#allocation192_spill] sm:$0xff] }
 0x473   : > { %4200 = vst [vmem:[%s9759_s23 + $0x2f8] sm:$0xff] %v4072_v49  ;;  %v4076_v28 = vadd.f32 %v3948_v51, %v3820_v36  ;;  %v16138_v56 = vld [vmem:[#allocation345_spill] sm:$0xff]  ;;  %v3825_v12 = vld [vmem:[%s9759_s23 + $0x340] sm:$0xff]  ;;  %v16141_v16 = vld [vmem:[#allocation346_spill] sm:$0xff] }
 0x474   : > { %vm16139_vm9 = vcmp.lt.s32.totalorder %v16138_v56, %v10796_v44  ;;  %4201 = vst [vmem:[%s9759_s23 + $0x300] sm:$0xff] %v4073_v20  ;;  %v16140_v7 = vld [vmem:[#allocation193_spill] sm:$0xff]  ;;  %vm16142_vm10 = vcmp.lt.s32.totalorder %v16141_v16, %v10796_v44  ;;  %v16143_v38 = vld [vmem:[#allocation194_spill] sm:$0xff]  ;;  %v16144_v25 = vld [vmem:[#allocation347_spill] sm:$0xff] }
 0x475   : > { %v3949_v52 = vsel %vm16139_vm9, %v16137_v26, 0.0  ;;  %v3950_v61 = vsel %vm16142_vm10, %v16140_v7, 0.0  ;;  %vm16145_vm2 = vcmp.lt.s32.totalorder %v16144_v25, %v10796_v44  ;;  %v16146_v46 = vld [vmem:[#allocation200_spill] sm:$0xff]  ;;  %v3826_v4 = vld [vmem:[%s9759_s23 + $0x348] sm:$0xff]  ;;  %v3827_v2 = vld [vmem:[%s9759_s23 + $0x350] sm:$0xff]  ;;  %4202 = vst [vmem:[%s9759_s23 + $0x308] sm:$0xff] %v4074_v23 }
 0x476   : > { %v4077_v6 = vadd.f32 %v3949_v52, %v3821_v37  ;;  %v3951_v11 = vsel %vm16145_vm2, %v16143_v38, 0.0  ;;  %v16147_v35 = vld [vmem:[#allocation348_spill] sm:$0xff]  ;;  %v3828_v54 = vld [vmem:[%s9759_s23 + $0x358] sm:$0xff]  ;;  %4203 = vst [vmem:[%s9759_s23 + $0x310] sm:$0xff] %v4075_v21  ;;  %4204 = vst [vmem:[%s9759_s23 + $0x318] sm:$0xff] %v4076_v28  ;;  %v4078_v57 = vadd.f32 %v3950_v61, %v3822_v17 }
 0x477   : > { %vm16148_vm13 = vcmp.lt.s32.totalorder %v16147_v35, %v10796_v44  ;;  %v4079_v3 = vadd.f32 %v3951_v11, %v3823_v5  ;;  %v16149_v19 = vld [vmem:[#allocation201_spill] sm:$0xff]  ;;  %v3829_v9 = vld [vmem:[%s9759_s23 + $0x360] sm:$0xff]  ;;  %v16152_v48 = vld [vmem:[#allocation202_spill] sm:$0xff] }
 0x478   : > { %v3952_v1 = vsel %vm16148_vm13, %v16146_v46, 0.0  ;;  %v16150_v14 = vld [vmem:[#allocation349_spill] sm:$0xff]  ;;  %4205 = vst [vmem:[%s9759_s23 + $0x320] sm:$0xff] %v4077_v6  ;;  %v16153_v58 = vld [vmem:[#allocation350_spill] sm:$0xff]  ;;  %v16155_v15 = vld [vmem:[#allocation203_spill] sm:$0xff] }
 0x479   : > { %v4080_v22 = vadd.f32 %v3952_v1, %v3824_v43  ;;  %vm16151_vm12 = vcmp.lt.s32.totalorder %v16150_v14, %v10796_v44  ;;  %vm16154_vm1 = vcmp.lt.s32.totalorder %v16153_v58, %v10796_v44  ;;  %v16156_v41 = vld [vmem:[#allocation351_spill] sm:$0xff]  ;;  %v16158_v40 = vld [vmem:[#allocation209_spill] sm:$0xff]  ;;  %v16159_v27 = vld [vmem:[#allocation352_spill] sm:$0xff]  ;;  %4206 = vst [vmem:[%s9759_s23 + $0x328] sm:$0xff] %v4078_v57 }
 0x47a   : > { %v3953_v62 = vsel %vm16151_vm12, %v16149_v19, 0.0  ;;  %v3954_v55 = vsel %vm16154_vm1, %v16152_v48, 0.0  ;;  %vm16157_vm3 = vcmp.lt.s32.totalorder %v16156_v41, %v10796_v44  ;;  %vm16160_vm0 = vcmp.lt.s32.totalorder %v16159_v27, %v10796_v44  ;;  %v3830_v34 = vld [vmem:[%s9759_s23 + $0x368] sm:$0xff]  ;;  %v3831_v47 = vld [vmem:[%s9759_s23 + $0x370] sm:$0xff]  ;;  %v3832_v60 = vld [vmem:[%s9759_s23 + $0x378] sm:$0xff]  ;;  %4207 = vst [vmem:[%s9759_s23 + $0x330] sm:$0xff] %v4079_v3 }
 0x47b   : > { %v4081_v53 = vadd.f32 %v3953_v62, %v3825_v12  ;;  %v3955_v33 = vsel %vm16157_vm3, %v16155_v15, 0.0  ;;  %v3956_v18 = vsel %vm16160_vm0, %v16158_v40, 0.0  ;;  %4208 = vst [vmem:[%s9759_s23 + $0x338] sm:$0xff] %v4080_v22  ;;  %v4082_v10 = vadd.f32 %v3954_v55, %v3826_v4  ;;  %v16161_v0 = vld [vmem:[#allocation16_spill] sm:$0xff]  ;;  %v16162_v42 = vld [vmem:[#allocation353_spill] sm:$0xff]  ;;  %v16164_v45 = vld [vmem:[#allocation210_spill] sm:$0xff] }
 0x47c   : > { %v4083_v50 = vadd.f32 %v3955_v33, %v3827_v2  ;;  %v4084_v59 = vadd.f32 %v3956_v18, %v3828_v54  ;;  %vm16163_vm15 = vcmp.lt.s32.totalorder %v16162_v42, %v10796_v44  ;;  %v3833_v36 = vld [vmem:[%s9759_s23 + $0x380] sm:$0xff]  ;;  %v16165_v49 = vld [vmem:[#allocation354_spill] sm:$0xff]  ;;  %v16167_v32 = vld [vmem:[#allocation211_spill] sm:$0xff] }
 0x47d   : > { %v3957_v30 = vsel %vm16163_vm15, %v16161_v0, 0.0  ;;  %4209 = vst [vmem:[%s9759_s23 + $0x340] sm:$0xff] %v4081_v53  ;;  %vm16166_vm4 = vcmp.lt.s32.totalorder %v16165_v49, %v10796_v44  ;;  %v16168_v37 = vld [vmem:[#allocation355_spill] sm:$0xff]  ;;  %v16170_v63 = vld [vmem:[#allocation217_spill] sm:$0xff]  ;;  %v16171_v31 = vld [vmem:[#allocation356_spill] sm:$0xff] }
 0x47e   : > { %v4085_v24 = vadd.f32 %v3957_v30, %v3829_v9  ;;  %v3958_v8 = vsel %vm16166_vm4, %v16164_v45, 0.0  ;;  %vm16169_vm8 = vcmp.lt.s32.totalorder %v16168_v37, %v10796_v44  ;;  %vm16172_vm9 = vcmp.lt.s32.totalorder %v16171_v31, %v10796_v44  ;;  %v3834_v13 = vld [vmem:[%s9759_s23 + $0x388] sm:$0xff]  ;;  %v3835_v29 = vld [vmem:[%s9759_s23 + $0x390] sm:$0xff]  ;;  %v3836_v51 = vld [vmem:[%s9759_s23 + $0x398] sm:$0xff]  ;;  %4210 = vst [vmem:[%s9759_s23 + $0x348] sm:$0xff] %v4082_v10 }
 0x47f   : > { %v3959_v20 = vsel %vm16169_vm8, %v16167_v32, 0.0  ;;  %v3960_v39 = vsel %vm16172_vm9, %v16170_v63, 0.0  ;;  %4211 = vst [vmem:[%s9759_s23 + $0x350] sm:$0xff] %v4083_v50  ;;  %4212 = vst [vmem:[%s9759_s23 + $0x358] sm:$0xff] %v4084_v59  ;;  %v4086_v17 = vadd.f32 %v3958_v8, %v3830_v34  ;;  %v16173_v23 = vld [vmem:[#allocation17_spill] sm:$0xff]  ;;  %v3837_v26 = vld [vmem:[%s9759_s23 + $0x3a0] sm:$0xff] }
 0x480   : > { %v4087_v5 = vadd.f32 %v3959_v20, %v3831_v47  ;;  %v4088_v43 = vadd.f32 %v3960_v39, %v3832_v60  ;;  %v16174_v21 = vld [vmem:[#allocation357_spill] sm:$0xff]  ;;  %4213 = vst [vmem:[%s9759_s23 + $0x360] sm:$0xff] %v4085_v24  ;;  %v16176_v52 = vld [vmem:[#allocation218_spill] sm:$0xff]  ;;  %v16179_v7 = vld [vmem:[#allocation219_spill] sm:$0xff] }
 0x481   : > { %vm16175_vm10 = vcmp.lt.s32.totalorder %v16174_v21, %v10796_v44  ;;  %v16177_v12 = vld [vmem:[#allocation358_spill] sm:$0xff]  ;;  %v3963_v61 = vsel %vm3195_vm6, %v16179_v7, 0.0  ;;  %v16181_v38 = vld [vmem:[#allocation225_spill] sm:$0xff]  ;;  %v16182_v25 = vld [vmem:[#allocation360_spill] sm:$0xff]  ;;  %4214 = vst [vmem:[%s9759_s23 + $0x368] sm:$0xff] %v4086_v17 }
 0x482   : > { %v3961_v28 = vsel %vm16175_vm10, %v16173_v23, 0.0  ;;  %vm16178_vm2 = vcmp.lt.s32.totalorder %v16177_v12, %v10796_v44  ;;  %vm16183_vm13 = vcmp.lt.s32.totalorder %v16182_v25, %v10796_v44  ;;  %v3838_v46 = vld [vmem:[%s9759_s23 + $0x3a8] sm:$0xff]  ;;  %v3839_v35 = vld [vmem:[%s9759_s23 + $0x3b0] sm:$0xff]  ;;  %v3840_v1 = vld [vmem:[%s9759_s23 + $0x3b8] sm:$0xff]  ;;  %4215 = vst [vmem:[%s9759_s23 + $0x370] sm:$0xff] %v4087_v5  ;;  %v4091_v2 = vadd.f32 %v3963_v61, %v3835_v29 }
 0x483   : > { %v4089_v56 = vadd.f32 %v3961_v28, %v3833_v36  ;;  %v3962_v6 = vsel %vm16178_vm2, %v16176_v52, 0.0  ;;  %v3964_v11 = vsel %vm16183_vm13, %v16181_v38, 0.0  ;;  %4216 = vst [vmem:[%s9759_s23 + $0x378] sm:$0xff] %v4088_v43  ;;  %v16184_v57 = vld [vmem:[#allocation18_spill] sm:$0xff]  ;;  %v16185_v3 = vld [vmem:[#allocation361_spill] sm:$0xff]  ;;  %v3841_v19 = vld [vmem:[%s9759_s23 + $0x3c0] sm:$0xff] }
 0x484   : > { %v4090_v4 = vadd.f32 %v3962_v6, %v3834_v13  ;;  %v4092_v54 = vadd.f32 %v3964_v11, %v3836_v51  ;;  %vm16186_vm6 = vcmp.lt.s32.totalorder %v16185_v3, %v10796_v44  ;;  %v16187_v62 = vld [vmem:[#allocation226_spill] sm:$0xff]  ;;  %v16190_v48 = vld [vmem:[#allocation227_spill] sm:$0xff]  ;;  %v16193_v15 = vld [vmem:[#allocation233_spill] sm:$0xff]  ;;  %4219 = vst [vmem:[%s9759_s23 + $0x390] sm:$0xff] %v4091_v2 }
 0x485   : > { %v3965_v22 = vsel %vm16186_vm6, %v16184_v57, 0.0  ;;  %4217 = vst [vmem:[%s9759_s23 + $0x380] sm:$0xff] %v4089_v56  ;;  %v16188_v9 = vld [vmem:[#allocation362_spill] sm:$0xff]  ;;  %v16191_v58 = vld [vmem:[#allocation363_spill] sm:$0xff]  ;;  %v16194_v41 = vld [vmem:[#allocation364_spill] sm:$0xff] }
 0x486   : > { %v4093_v14 = vadd.f32 %v3965_v22, %v3837_v26  ;;  %vm16189_vm12 = vcmp.lt.s32.totalorder %v16188_v9, %v10796_v44  ;;  %vm16192_vm1 = vcmp.lt.s32.totalorder %v16191_v58, %v10796_v44  ;;  %vm16195_vm3 = vcmp.lt.s32.totalorder %v16194_v41, %v10796_v44  ;;  %v3842_v40 = vld [vmem:[%s9759_s23 + $0x3c8] sm:$0xff]  ;;  %v3843_v27 = vld [vmem:[%s9759_s23 + $0x3d0] sm:$0xff]  ;;  %v3844_v18 = vld [vmem:[%s9759_s23 + $0x3d8] sm:$0xff]  ;;  %4218 = vst [vmem:[%s9759_s23 + $0x388] sm:$0xff] %v4090_v4 }
 0x487   : > { %v3966_v53 = vsel %vm16189_vm12, %v16187_v62, 0.0  ;;  %v3967_v55 = vsel %vm16192_vm1, %v16190_v48, 0.0  ;;  %v3968_v33 = vsel %vm16195_vm3, %v16193_v15, 0.0  ;;  %4220 = vst [vmem:[%s9759_s23 + $0x398] sm:$0xff] %v4092_v54  ;;  %v16196_v10 = vld [vmem:[#allocation19_spill] sm:$0xff]  ;;  %v16197_v50 = vld [vmem:[#allocation365_spill] sm:$0xff] }
 0x488   : > { %v4094_v34 = vadd.f32 %v3966_v53, %v3838_v46  ;;  %v4095_v47 = vadd.f32 %v3967_v55, %v3839_v35  ;;  %v4096_v60 = vadd.f32 %v3968_v33, %v3840_v1  ;;  %vm16198_vm0 = vcmp.lt.s32.totalorder %v16197_v50, %v10796_v44  ;;  %v3845_v0 = vld [vmem:[%s9759_s23 + $0x3e0] sm:$0xff]  ;;  %4221 = vst [vmem:[%s9759_s23 + $0x3a0] sm:$0xff] %v4093_v14  ;;  %v16199_v30 = vld [vmem:[#allocation234_spill] sm:$0xff]  ;;  %v16202_v45 = vld [vmem:[#allocation235_spill] sm:$0xff] }
 0x489   : > { %v3969_v59 = vsel %vm16198_vm0, %v16196_v10, 0.0  ;;  %v16200_v36 = vld [vmem:[#allocation366_spill] sm:$0xff]  ;;  %v3971_v8 = vsel %vm3203_vm11, %v16202_v45, 0.0  ;;  %v16205_v37 = vld [vmem:[#allocation368_spill] sm:$0xff]  ;;  %v3846_v63 = vld [vmem:[%s9759_s23 + $0x3e8] sm:$0xff] }
 0x48a   : > { %v4097_v42 = vadd.f32 %v3969_v59, %v3841_v19  ;;  %vm16201_vm15 = vcmp.lt.s32.totalorder %v16200_v36, %v10796_v44  ;;  %v16204_v32 = vld [vmem:[#allocation242_spill] sm:$0xff]  ;;  %vm16206_vm4 = vcmp.lt.s32.totalorder %v16205_v37, %v10796_v44  ;;  %v3848_v39 = vld [vmem:[%s9759_s23 + $0x3f8] sm:$0xff]  ;;  %4222 = vst [vmem:[%s9759_s23 + $0x3a8] sm:$0xff] %v4094_v34  ;;  %4223 = vst [vmem:[%s9759_s23 + $0x3b0] sm:$0xff] %v4095_v47 }
 0x48b   : > { %v3970_v24 = vsel %vm16201_vm15, %v16199_v30, 0.0  ;;  %v3972_v20 = vsel %vm16206_vm4, %v16204_v32, 0.0  ;;  %v3847_v31 = vld [vmem:[%s9759_s23 + $0x3f0] sm:$0xff]  ;;  %4224 = vst [vmem:[%s9759_s23 + $0x3b8] sm:$0xff] %v4096_v60  ;;  %v4099_v29 = vadd.f32 %v3971_v8, %v3843_v27  ;;  %v16207_v17 = vld [vmem:[#allocation20_spill] sm:$0xff]  ;;  %v16208_v5 = vld [vmem:[#allocation369_spill] sm:$0xff] }
 0x48c   : > { %v4098_v13 = vadd.f32 %v3970_v24, %v3842_v40  ;;  %v4100_v51 = vadd.f32 %v3972_v20, %v3844_v18  ;;  %vm16209_vm11 = vcmp.lt.s32.totalorder %v16208_v5, %v10796_v44  ;;  %4225 = vst [vmem:[%s9759_s23 + $0x3c0] sm:$0xff] %v4097_v42  ;;  %v16210_v21 = vld [vmem:[#allocation243_spill] sm:$0xff]  ;;  %v16212_v56 = vld [vmem:[#allocation244_spill] sm:$0xff]  ;;  %v16214_v6 = vld [vmem:[#allocation249_spill] sm:$0xff] }
 0x48d   : > { %v3973_v43 = vsel %vm16209_vm11, %v16207_v17, 0.0  ;;  %v3974_v26 = vsel %vm3206_vm5, %v16210_v21, 0.0  ;;  %v3975_v12 = vsel %vm3207_vm14, %v16212_v56, 0.0  ;;  %v3976_v16 = vsel %vm3208_vm7, %v16214_v6, 0.0  ;;  %4227 = vst [vmem:[%s9759_s23 + $0x3d0] sm:$0xff] %v4099_v29 }
 0x48e   : > { %v4101_v23 = vadd.f32 %v3973_v43, %v3845_v0  ;;  %4226 = vst [vmem:[%s9759_s23 + $0x3c8] sm:$0xff] %v4098_v13  ;;  %4228 = vst [vmem:[%s9759_s23 + $0x3d8] sm:$0xff] %v4100_v51  ;;  %v4102_v61 = vadd.f32 %v3974_v26, %v3846_v63  ;;  %v4103_v38 = vadd.f32 %v3975_v12, %v3847_v31 }
 0x48f   : > { %v4104_v25 = vadd.f32 %v3976_v16, %v3848_v39 }
 0x490   : > { %4229 = vst [vmem:[%s9759_s23 + $0x3e0] sm:$0xff] %v4101_v23  ;;  %4230 = vst [vmem:[%s9759_s23 + $0x3e8] sm:$0xff] %v4102_v61 }
 0x491   : > { %4231 = vst [vmem:[%s9759_s23 + $0x3f0] sm:$0xff] %v4103_v38  ;;  %4232 = vst [vmem:[%s9759_s23 + $0x3f8] sm:$0xff] %v4104_v25 }
 0x492 PF: > { %s4454_s16 = sshll.u32 %s5060_s25, 14  ;;  %s4252_s30 = sshll.u32 %s9499_s19, 4  ;;  %s13111_s30 = int_to_ptr.vmem [resolvable:$true] %s4252_s30 }
 0x493   : > { %s13108_s12 = scalar_lea.hbm %s13209_s4, %s4454_s16  ;;  %s4234_s13 = scalar_lea.sflag [#allocation6], %s9378_s17 }
 0x494   : > { %s4925_s7 = scalar_lea.vmem %s13111_s30, 16384  ;;  %s5078_s8 = smov [#allocation9]  }
 0x495   : > { %p4926_p4 = scmp.ne.s32.totalorder %s13111_s30, %s4925_s7  ;;  %s4929_s6 = sshll.u32 %s5078_s8, 4  ;;  %s4930_s6 = int_to_ptr.vmem [resolvable:$false] %s4929_s6 }
 0x496   : > { %s4931_s14 = scalar_lea.vmem %s4930_s6, 32768  ;;  %p4932_p9 = scmp.lt.s32.totalorder %s13111_s30, %s4930_s6 }
 0x497   : > { %p4927_p7 = pnand %p4926_p4, %p5179_p12  ;;  %p4933_p10 = scmp.lt.s32.totalorder %s4931_s14, %s4925_s7 }
 0x499   : > { %p4928_p8 = pneg %p4927_p7  ;;  %p4934_p11 = por %p4933_p10, %p4932_p9 }
 0x49b   : > { %p4935_p0 = pnand %p4934_p11, %p4928_p8 }
 0x49d   : > { %4938 = shalt.err (!%p4935_p0)
}
 0x49e   : > { %s4939_s15 = scalar_lea.hbm %s13108_s12, 16384  ;;  %s4943_s27 = scalar_lea.hbm %s13209_s4, 32768 }
 0x49f   : > { %p4940_p1 = scmp.ne.s32.totalorder %s13108_s12, %s4939_s15  ;;  %p4944_p6 = scmp.lt.u32.totalorder %s13108_s12, %s13209_s4 }
 0x4a0   : > { %p4945_p5 = scmp.lt.u32.totalorder %s4943_s27, %s4939_s15  ;;  %p4947_p7 = scmp.lt.u32.totalorder %s4939_s15, %s13108_s12 }
 0x4a1   : > { %p4941_p2 = pnand %p4940_p1, %p5179_p12 }
 0x4a2   : > { %p4946_p4 = por %p4945_p5, %p4944_p6 }
 0x4a3   : > { %p4942_p3 = pneg %p4941_p2 }
 0x4a4   : > { %p4948_p8 = por %p4947_p7, %p4946_p4 }
 0x4a6   : > { %p4949_p9 = pnand %p4948_p8, %p4942_p3 }
 0x4a8   : > { %4952 = shalt.err (!%p4949_p9)
}
 0x4a9   : > { %s5079_s7 = smov 128   ;;  %s5080_s6 = smov 8  }
 0x4aa   : > { %4777 = dma.vmem_to_hbm [thread:$0]  (%p5179_p12), %s13111_s30, 16384, %s13108_s12, %s4234_s13, %s5079_s7, %s5079_s7, %s5080_s6  }
 0x4ab   : > { %s13145_s18 = scalar_lea.hbm %s13210_s5, %s4454_s16  ;;  %s4268_s19 = sshll.u32 %s9759_s23, 4  ;;  %s13148_s19 = int_to_ptr.vmem [resolvable:$true] %s4268_s19 }
 0x4ac   : > { %s4239_s27 = scalar_lea.sflag [#allocation11], %s9378_s17  ;;  %s4953_s28 = scalar_lea.vmem %s13148_s19, 16384 }
 0x4ad   : > { %p4954_p10 = scmp.ne.s32.totalorder %s13148_s19, %s4953_s28  ;;  %s5081_s8 = smov [#allocation10]  }
 0x4ae   : > { %s4957_s12 = sshll.u32 %s5081_s8, 4  ;;  %s4958_s12 = int_to_ptr.vmem [resolvable:$false] %s4957_s12 }
 0x4af   : > { %p4955_p11 = pnand %p4954_p10, %p5179_p12  ;;  %s4959_s25 = scalar_lea.vmem %s4958_s12, 32768 }
 0x4b0   : > { %p4960_p1 = scmp.lt.s32.totalorder %s13148_s19, %s4958_s12  ;;  %p4961_p2 = scmp.lt.s32.totalorder %s4959_s25, %s4953_s28 }
 0x4b1   : > { %p4956_p0 = pneg %p4955_p11 }
 0x4b2   : > { %p4962_p3 = por %p4961_p2, %p4960_p1 }
 0x4b4   : > { %p4963_p6 = pnand %p4962_p3, %p4956_p0 }
 0x4b6   : > { %4966 = shalt.err (!%p4963_p6)
}
 0x4b7   : > { %s4967_s23 = scalar_lea.hbm %s13145_s18, 16384  ;;  %s4971_s13 = scalar_lea.hbm %s13210_s5, 32768 }
 0x4b8   : > { %p4968_p5 = scmp.ne.s32.totalorder %s13145_s18, %s4967_s23  ;;  %p4972_p8 = scmp.lt.u32.totalorder %s13145_s18, %s13210_s5 }
 0x4b9   : > { %p4973_p9 = scmp.lt.u32.totalorder %s4971_s13, %s4967_s23  ;;  %p4975_p11 = scmp.lt.u32.totalorder %s4967_s23, %s13145_s18 }
 0x4ba   : > { %p4969_p4 = pnand %p4968_p5, %p5179_p12 }
 0x4bb   : > { %p4974_p10 = por %p4973_p9, %p4972_p8 }
 0x4bc   : > { %p4970_p7 = pneg %p4969_p4 }
 0x4bd   : > { %p4976_p0 = por %p4975_p11, %p4974_p10 }
 0x4bf   : > { %p4977_p1 = pnand %p4976_p0, %p4970_p7 }
 0x4c1   : > { %4980 = shalt.err (!%p4977_p1)
}
 0x4c2   : > { %4778 = dma.vmem_to_hbm [thread:$0]  (%p5179_p12), %s13148_s19, 16384, %s13145_s18, %s4239_s27, %s5079_s7, %s5079_s7, %s5080_s6  }
 0x4c3 PF: > { %s4283_s28 = sand.u32 1, %s5040_s20   ;;  %p16216_p2 = scmp.ge.s32.totalorder %s5068_s26, 2 }
 0x4c4   : > { %s4284_s8 = scalar_lea.sflag [#allocation6], %s4283_s28 }
 0x4c5   : > { %p4782_p3 = pnand %p16216_p2, %p5183_p13 }
 0x4c7   : > { %5026 = dma.done.wait (!%p4782_p3), %s4284_s8, 16384  }
 0x4c8   : > { %5028 = vsyncadd (!%p4782_p3), %s4284_s8, 4294950912  ;;  %s4293_s10 = scalar_lea.sflag [#allocation11], %s4283_s28 }
 0x4c9   : > { %5030 = dma.done.wait (!%p4782_p3), %s4293_s10, 16384  }
 0x4ca   : > { %5032 = vsyncadd (!%p4782_p3), %s4293_s10, 4294950912  ;;  %s29_s26 = sadd.s32 1, %s5068_s26   ;;  %s16217_s20 = smov %s5044_s21 }
 0x4cb   : > { %p26_p6 = scmp.ge.s32.totalorder %s29_s26, 4   ;;  %s16218_s21 = smov %s5048_s22 }
 0x4cc   : > { %s16219_s22 = smov %s5173_s9  ;;  %s16220_s23 = smov %s5056_s24 }
 0x4cd   : > { %s13195_s24 = smov 0   ;;  %s16221_s25 = smov %s5064_s0 }
 0x4ce   : > { %s16222_s0 = smov %s16224_s29  ;;  %28 = sbr.rel (!%p26_p6) target bundleno = 13 (0xd), region = 122 }
 0x4d5   :  { %4298 = vsyncpa [#allocation5], 1 }
 0x4d6   :  { %4300 = vsyncpa [#allocation5 + $0x1], 1 }
 0x4d7   :  { %4301 = vsyncpa [#allocation8], 1 }
 0x4d8   :  { %4303 = vsyncpa [#allocation8 + $0x1], 1 }
 0x4d9   :  { %4304 = vsyncpa [#allocation6], 1 }
 0x4da   :  { %4306 = vsyncpa [#allocation6 + $0x1], 1 }
 0x4db   :  { %4307 = vsyncpa [#allocation11], 1 }
 0x4dc   :  { %4309 = vsyncpa [#allocation11 + $0x1], 1 }

</bundles_post_ra>
